<compile_context>
chip_gen: v6e
topology: v6e:2x2x1
jax: 0.10.0
libtpu: 0.0.40
codegen_flags: <defaults>
</compile_context>

<pallas_src>
import jax
import jax.numpy as jnp
from jax.experimental import pallas as pl
from jax.experimental.pallas import tpu as pltpu

LEAK = 0.2          # LeakyReLU(0.2)
BN_EPS = 1e-5       # nn.BatchNorm2d default eps (training-mode batch stats)
BATCH_SIZE = 1      # as in the reference script
LANE = 128          # TPU lane width

_CONV_PARAMS = pltpu.CompilerParams(
    dimension_semantics=("parallel", "parallel"),
    vmem_limit_bytes=32 * 1024 * 1024,
)
_HEAD_PARAMS = pltpu.CompilerParams(
    dimension_semantics=("arbitrary",),          # K-reduction axis
    vmem_limit_bytes=32 * 1024 * 1024,
)


# ----------------------------- Pallas kernels ------------------------------

def _leaky_relu(x):
    return jnp.where(x >= 0.0, x, LEAK * x)


def _tap_accumulate(x0_ref, x1_ref, w_ref):
    """4x4/stride-2 conv for one output row == 4 shifted matmuls, f32 acc.

    x0_ref / x1_ref : (Wo+1, 4*Cin) bf16  -- space-to-depth rows ho and ho+1
    w_ref           : (2, 2, 4*Cin, Cout) bf16 tap matrices
    returns         : (Wo, Cout) f32
    """
    wo = x0_ref.shape[0] - 1
    acc = None
    for dh, x_ref in ((0, x0_ref), (1, x1_ref)):
        for dw in (0, 1):
            lhs = x_ref[dw:dw + wo, :]                       # (Wo, 4*Cin)
            part = jnp.dot(lhs, w_ref[dh, dw],
                           preferred_element_type=jnp.float32)
            acc = part if acc is None else acc + part
    return acc


def _conv_bias_lrelu_kernel(x0_ref, x1_ref, w_ref, b_ref, o_ref):
    # `In` block: conv + bias + LeakyReLU (no BatchNorm).
    acc = _tap_accumulate(x0_ref, x1_ref, w_ref) + b_ref[...]
    o_ref[...] = _leaky_relu(acc).astype(o_ref.dtype)


def _conv_stats_kernel(x0_ref, x1_ref, w_ref, y_ref, s_ref):
    # BN layers: conv only (bias cancels under training-mode BN) + per-tile
    # per-channel sum / sum-of-squares partials for exact batch statistics.
    acc = _tap_accumulate(x0_ref, x1_ref, w_ref)
    y_ref[...] = acc.astype(y_ref.dtype)
    s_ref[0:1, :] = jnp.sum(acc, axis=0, keepdims=True)
    s_ref[1:2, :] = jnp.sum(acc * acc, axis=0, keepdims=True)


def _bn_lrelu_kernel(y_ref, sc_ref, sh_ref, o_ref):
    # Second BN pass: y * scale + shift, fused with LeakyReLU.
    y = y_ref[...].astype(jnp.float32) * sc_ref[...] + sh_ref[...]
    o_ref[...] = _leaky_relu(y).astype(o_ref.dtype)


def _head_kernel(x_ref, w1_ref, b1_ref, w2_ref, b2_ref, o_ref, acc_ref):
    # Linear(F,100) streamed over a K-grid -> Linear(100,batch) -> Sigmoid.
    k = pl.program_id(0)

    @pl.when(k == 0)
    def _():
        acc_ref[...] = jnp.zeros_like(acc_ref)

    acc_ref[...] += jnp.dot(x_ref[...], w1_ref[...],
                            preferred_element_type=jnp.float32)

    @pl.when(k == pl.num_programs(0) - 1)
    def _():
        h = acc_ref[...] + b1_ref[...]
        z = jnp.dot(h, w2_ref[...], preferred_element_type=jnp.float32)
        z = z + b2_ref[...]
        o_ref[...] = 1.0 / (1.0 + jnp.exp(-z))      # exp + div -> EUP slot


# ------------------------------ host wrappers -------------------------------

def _space_to_depth(x_nhwc):
    """pad=1 then 2x2 space-to-depth: (N,H,W,C) -> (N, H/2+1, W/2+1, 4C).

    s2d[n, i, j, (2a+b)*C + c] = x_padded[n, 2i+a, 2j+b, c]
    Pure layout change (no data blow-up); replaces materialized im2col.
    """
    n, h, w, c = x_nhwc.shape
    ho, wo = h // 2, w // 2
    xp = jnp.pad(x_nhwc, ((0, 0), (1, 1), (1, 1), (0, 0)))
    s2d = xp.reshape(n, ho + 1, 2, wo + 1, 2, c)
    s2d = s2d.transpose(0, 1, 3, 2, 4, 5).reshape(n, ho + 1, wo + 1, 4 * c)
    return s2d, ho, wo


def _weights_to_taps(w):
    """Torch (Cout, Cin, 4, 4) -> (2, 2, 4*Cin, Cout) bf16 tap matrices.

    Wtap[dh, dw, (2a+b)*Cin + cin, co] = W[co, cin, 2*dh + a, 2*dw + b]
    """
    cout, cin = w.shape[:2]
    wt = w.reshape(cout, cin, 2, 2, 2, 2)           # (co, cin, dh, a, dw, b)
    wt = wt.transpose(2, 4, 3, 5, 1, 0)             # (dh, dw, a, b, cin, co)
    return wt.reshape(2, 2, 4 * cin, cout).astype(jnp.bfloat16)


def _conv_pallas(x_nhwc_bf16, wtap, bias=None):
    """Stride-2 4x4 conv.  bias path -> activation; else (pre-act, stat partials)."""
    n = x_nhwc_bf16.shape[0]
    s2d, ho, wo = _space_to_depth(x_nhwc_bf16)
    c4 = s2d.shape[-1]
    cout = wtap.shape[-1]
    grid = (n, ho)

    # The same s2d buffer is passed twice: rows ho (dh=0) and ho+1 (dh=1).
    row_spec0 = pl.BlockSpec((None, None, wo + 1, c4), lambda i, j: (i, j, 0, 0))
    row_spec1 = pl.BlockSpec((None, None, wo + 1, c4), lambda i, j: (i, j + 1, 0, 0))
    w_spec = pl.BlockSpec((2, 2, c4, cout), lambda i, j: (0, 0, 0, 0))  # VMEM-resident
    y_spec = pl.BlockSpec((None, None, wo, cout), lambda i, j: (i, j, 0, 0))

    if bias is not None:
        return pl.pallas_call(
            _conv_bias_lrelu_kernel,
            out_shape=jax.ShapeDtypeStruct((n, ho, wo, cout), jnp.bfloat16),
            grid=grid,
            in_specs=[row_spec0, row_spec1, w_spec,
                      pl.BlockSpec((1, cout), lambda i, j: (0, 0))],
            out_specs=y_spec,
            compiler_params=_CONV_PARAMS,
        )(s2d, s2d, wtap, bias.reshape(1, cout).astype(jnp.float32))

    y, part = pl.pallas_call(
        _conv_stats_kernel,
        out_shape=(jax.ShapeDtypeStruct((n, ho, wo, cout), jnp.bfloat16),
                   jax.ShapeDtypeStruct((n, ho, 2, cout), jnp.float32)),
        grid=grid,
        in_specs=[row_spec0, row_spec1, w_spec],
        out_specs=(y_spec,
                   pl.BlockSpec((None, None, 2, cout), lambda i, j: (i, j, 0, 0))),
        compiler_params=_CONV_PARAMS,
    )(s2d, s2d, wtap)
    return y, part


def _bn_lrelu_pallas(y, scale, shift):
    n, ho, wo, cout = y.shape
    spec = pl.BlockSpec((None, None, wo, cout), lambda i, j: (i, j, 0, 0))
    vec = pl.BlockSpec((1, cout), lambda i, j: (0, 0))
    return pl.pallas_call(
        _bn_lrelu_kernel,
        out_shape=jax.ShapeDtypeStruct((n, ho, wo, cout), jnp.bfloat16),
        grid=(n, ho),
        in_specs=[spec, vec, vec],
        out_specs=spec,
        compiler_params=_CONV_PARAMS,
    )(y, scale.reshape(1, cout).astype(jnp.float32),
      shift.reshape(1, cout).astype(jnp.float32))


def _head_pallas(x_flat_bf16, w1, b1, w2, b2):
    f = x_flat_bf16.shape[1]
    n_hidden = w1.shape[1]                 # 100
    n_out = w2.shape[1]                    # batch_size
    # Zero-pad all lane dims to 128 so every matmul/store is lane-dense.
    w1p = jnp.zeros((f, LANE), jnp.bfloat16).at[:, :n_hidden].set(w1.astype(jnp.bfloat16))
    b1p = jnp.zeros((1, LANE), jnp.float32).at[:, :n_hidden].set(b1.astype(jnp.float32))
    w2p = jnp.zeros((LANE, LANE), jnp.float32).at[:n_hidden, :n_out].set(w2.astype(jnp.float32))
    b2p = jnp.zeros((1, LANE), jnp.float32).at[:, :n_out].set(b2.astype(jnp.float32))

    fk = min(512, f)                       # K-tile for streaming w1
    assert f % fk == 0
    out = pl.pallas_call(
        _head_kernel,
        out_shape=jax.ShapeDtypeStruct((1, LANE), jnp.float32),
        grid=(f // fk,),
        in_specs=[pl.BlockSpec((1, fk), lambda k: (0, k)),
                  pl.BlockSpec((fk, LANE), lambda k: (k, 0)),
                  pl.BlockSpec((1, LANE), lambda k: (0, 0)),
                  pl.BlockSpec((LANE, LANE), lambda k: (0, 0)),
                  pl.BlockSpec((1, LANE), lambda k: (0, 0))],
        out_specs=pl.BlockSpec((1, LANE), lambda k: (0, 0)),
        scratch_shapes=[pltpu.VMEM((1, LANE), jnp.float32)],
        compiler_params=_HEAD_PARAMS,
    )(x_flat_bf16, w1p, b1p, w2p, b2p)
    return out[0, :n_out]                  # shape (batch_size,), like PyTorch


# ------------------------------ parameter init ------------------------------

def init_params(key, in_hw):
    """Deterministic synthetic parameters matching the module's shapes."""
    chans = [3, 64, 128, 256, 512]
    params = {"convs": []}
    for li in range(4):
        cin, cout = chans[li], chans[li + 1]
        key, kw, kb, kg, kbt = jax.random.split(key, 5)
        layer = {"w": 0.05 * jax.random.normal(kw, (cout, cin, 4, 4), jnp.float32)}
        if li == 0:
            layer["b"] = 0.05 * jax.random.normal(kb, (cout,), jnp.float32)
        else:
            # Conv bias before training-mode BatchNorm cancels exactly -> omitted.
            layer["gamma"] = 1.0 + 0.05 * jax.random.normal(kg, (cout,), jnp.float32)
            layer["beta"] = 0.05 * jax.random.normal(kbt, (cout,), jnp.float32)
        params["convs"].append(layer)
    ho = in_hw // 16                        # four stride-2 convs
    feat = BATCH_SIZE * ho * ho * 512
    key, k1, k2, k3, k4 = jax.random.split(key, 5)
    # w1 is defined in NHWC flatten order (== a fixed row-permutation of the
    # PyTorch NCHW-flatten weight; parameters are synthetic).
    params["w1"] = 0.02 * jax.random.normal(k1, (feat, 100), jnp.float32)
    params["b1"] = 0.02 * jax.random.normal(k2, (100,), jnp.float32)
    params["w2"] = 0.02 * jax.random.normal(k3, (100, BATCH_SIZE), jnp.float32)
    params["b2"] = 0.02 * jax.random.normal(k4, (BATCH_SIZE,), jnp.float32)
    return params


# ------------------------------ forward pass --------------------------------

def discriminator_forward(params, x_nchw):
    convs = params["convs"]
    x = jnp.transpose(x_nchw, (0, 2, 3, 1)).astype(jnp.bfloat16)   # NHWC once

    # --- `In`: Conv(3->64) + bias + LeakyReLU (Cout zero-padded 64 -> 128) ---
    c0 = convs[0]
    cout0 = c0["w"].shape[0]
    wtap0 = jnp.pad(_weights_to_taps(c0["w"]),
                    ((0, 0), (0, 0), (0, 0), (0, LANE - cout0)))
    bias0 = jnp.pad(c0["b"], (0, LANE - cout0))
    x = _conv_pallas(x, wtap0, bias=bias0)[..., :cout0]            # drop pad lanes

    # --- `main`: 3 x (Conv + BatchNorm(batch stats) + LeakyReLU) ---
    for layer in convs[1:]:
        y, part = _conv_pallas(x, _weights_to_taps(layer["w"]))
        m_total = y.shape[0] * y.shape[1] * y.shape[2]
        sums = jnp.sum(part, axis=(0, 1))                          # exact batch stats
        mean = sums[0] / m_total
        var = jnp.maximum(sums[1] / m_total - mean * mean, 0.0)    # biased var
        scale = layer["gamma"] * jax.lax.rsqrt(var + BN_EPS)
        shift = layer["beta"] - mean * scale
        x = _bn_lrelu_pallas(y, scale, shift)

    # --- `Out`: x.view(-1) -> Linear -> Linear -> Sigmoid ---
    x_flat = x.reshape(1, -1)                                      # NHWC flatten
    return _head_pallas(x_flat, params["w1"], params["b1"],
                        params["w2"], params["b2"])


# --------------------------- pure-JAX reference ------------------------------

def reference_forward(params, x_nchw):
    """f32 XLA reference (same NHWC convention / training-mode BN semantics)."""
    x = jnp.transpose(x_nchw, (0, 2, 3, 1)).astype(jnp.float32)
    for li, layer in enumerate(params["convs"]):
        w_hwio = jnp.transpose(layer["w"], (2, 3, 1, 0))
        y = jax.lax.conv_general_dilated(
            x, w_hwio, window_strides=(2, 2), padding=((1, 1), (1, 1)),
            dimension_numbers=("NHWC", "HWIO", "NHWC"))
        if li == 0:
            y = y + layer["b"]
        else:
            mean = jnp.mean(y, axis=(0, 1, 2))
            var = jnp.var(y, axis=(0, 1, 2))
            y = (y - mean) * jax.lax.rsqrt(var + BN_EPS)
            y = y * layer["gamma"] + layer["beta"]
        x = jnp.where(y >= 0.0, y, LEAK * y)
    h = x.reshape(1, -1) @ params["w1"] + params["b1"]
    z = h @ params["w2"] + params["b2"]
    return jax.nn.sigmoid(z).reshape(-1)


# ----------------------------------- main ------------------------------------

if __name__ == "__main__":
    key = jax.random.PRNGKey(0)
    k_param, k_x = jax.random.split(key)
    IN_HW = 32                                # small spatial (module implies 512)
    x = jax.random.normal(k_x, (BATCH_SIZE, 3, IN_HW, IN_HW), jnp.float32)
    params = init_params(k_param, IN_HW)

    fwd = jax.jit(discriminator_forward)
    out = jax.block_until_ready(fwd(params, x))
    assert out.shape == (BATCH_SIZE,)
    assert bool(jnp.all(jnp.isfinite(out)))
    assert bool(jnp.all((out >= 0.0) & (out <= 1.0)))

    # Numerical check against the f32 XLA reference (bf16 path => loose atol).
    ref = jax.jit(reference_forward)(params, x)
    assert bool(jnp.max(jnp.abs(out.astype(jnp.float32) - ref)) < 3e-2)

    print("KERNEL_OK")
</pallas_src>

<mosaic_0001>
module attributes {stable_mosaic.version = 11 : i64} {
  func.func @_conv_bias_lrelu_kernel(%arg0: i32, %arg1: i32, %arg2: memref<1x1x17x12xbf16, #tpu.memory_space<vmem>>, %arg3: memref<1x1x17x12xbf16, #tpu.memory_space<vmem>>, %arg4: memref<2x2x12x128xbf16, #tpu.memory_space<vmem>>, %arg5: memref<1x128xf32, #tpu.memory_space<vmem>>, %arg6: memref<1x1x16x128xbf16, #tpu.memory_space<vmem>>) attributes {dimension_semantics = [#tpu.dimension_semantics<parallel>, #tpu.dimension_semantics<parallel>], iteration_bounds = array<i64: 1, 16>, scalar_prefetch = 0 : i64, scratch_operands = 0 : i64, tpu.core_type = #tpu.core_type<tc>, window_params = [{transform_indices = @transform_0, window_bounds = array<i64: 1, 1, 17, 12>}, {transform_indices = @transform_1, window_bounds = array<i64: 1, 1, 17, 12>}, {pipeline_mode = #tpu.pipeline_mode<synchronous>, transform_indices = @transform_2, window_bounds = array<i64: 2, 2, 12, 128>}, {pipeline_mode = #tpu.pipeline_mode<synchronous>, transform_indices = @transform_3, window_bounds = array<i64: 1, 128>}, {transform_indices = @transform_4, window_bounds = array<i64: 1, 1, 16, 128>}]} {
    %c0 = arith.constant 0 : index
    %c0_0 = arith.constant 0 : index
    %c0_1 = arith.constant 0 : index
    %c0_2 = arith.constant 0 : index
    %0 = vector.load %arg2[%c0, %c0_0, %c0_1, %c0_2] : memref<1x1x17x12xbf16, #tpu.memory_space<vmem>>, vector<1x1x16x12xbf16>
    %1 = vector.shape_cast %0 : vector<1x1x16x12xbf16> to vector<16x12xbf16>
    %c0_3 = arith.constant 0 : index
    %c0_4 = arith.constant 0 : index
    %c0_5 = arith.constant 0 : index
    %c0_6 = arith.constant 0 : index
    %2 = vector.load %arg4[%c0_3, %c0_4, %c0_5, %c0_6] : memref<2x2x12x128xbf16, #tpu.memory_space<vmem>>, vector<1x1x12x128xbf16>
    %3 = vector.shape_cast %2 : vector<1x1x12x128xbf16> to vector<12x128xbf16>
    %cst = arith.constant dense<0.000000e+00> : vector<16x128xf32>
    %4 = tpu.matmul %1, %3, %cst {dimension_numbers = #tpu.dot_dimension_numbers<[1], [0], [0], [1], [0, 0, 1, 1], [], []>} : vector<16x12xbf16>, vector<12x128xbf16>, vector<16x128xf32> -> vector<16x128xf32>
    %c0_7 = arith.constant 0 : index
    %c0_8 = arith.constant 0 : index
    %c1 = arith.constant 1 : index
    %c0_9 = arith.constant 0 : index
    %5 = vector.load %arg2[%c0_7, %c0_8, %c1, %c0_9] : memref<1x1x17x12xbf16, #tpu.memory_space<vmem>>, vector<1x1x16x12xbf16>
    %6 = vector.shape_cast %5 : vector<1x1x16x12xbf16> to vector<16x12xbf16>
    %c0_10 = arith.constant 0 : index
    %c1_11 = arith.constant 1 : index
    %c0_12 = arith.constant 0 : index
    %c0_13 = arith.constant 0 : index
    %7 = vector.load %arg4[%c0_10, %c1_11, %c0_12, %c0_13] : memref<2x2x12x128xbf16, #tpu.memory_space<vmem>>, vector<1x1x12x128xbf16>
    %8 = vector.shape_cast %7 : vector<1x1x12x128xbf16> to vector<12x128xbf16>
    %cst_14 = arith.constant dense<0.000000e+00> : vector<16x128xf32>
    %9 = tpu.matmul %6, %8, %cst_14 {dimension_numbers = #tpu.dot_dimension_numbers<[1], [0], [0], [1], [0, 0, 1, 1], [], []>} : vector<16x12xbf16>, vector<12x128xbf16>, vector<16x128xf32> -> vector<16x128xf32>
    %10 = arith.addf %4, %9 : vector<16x128xf32>
    %c0_15 = arith.constant 0 : index
    %c0_16 = arith.constant 0 : index
    %c0_17 = arith.constant 0 : index
    %c0_18 = arith.constant 0 : index
    %11 = vector.load %arg3[%c0_15, %c0_16, %c0_17, %c0_18] : memref<1x1x17x12xbf16, #tpu.memory_space<vmem>>, vector<1x1x16x12xbf16>
    %12 = vector.shape_cast %11 : vector<1x1x16x12xbf16> to vector<16x12xbf16>
    %c1_19 = arith.constant 1 : index
    %c0_20 = arith.constant 0 : index
    %c0_21 = arith.constant 0 : index
    %c0_22 = arith.constant 0 : index
    %13 = vector.load %arg4[%c1_19, %c0_20, %c0_21, %c0_22] : memref<2x2x12x128xbf16, #tpu.memory_space<vmem>>, vector<1x1x12x128xbf16>
    %14 = vector.shape_cast %13 : vector<1x1x12x128xbf16> to vector<12x128xbf16>
    %cst_23 = arith.constant dense<0.000000e+00> : vector<16x128xf32>
    %15 = tpu.matmul %12, %14, %cst_23 {dimension_numbers = #tpu.dot_dimension_numbers<[1], [0], [0], [1], [0, 0, 1, 1], [], []>} : vector<16x12xbf16>, vector<12x128xbf16>, vector<16x128xf32> -> vector<16x128xf32>
    %16 = arith.addf %10, %15 : vector<16x128xf32>
    %c0_24 = arith.constant 0 : index
    %c0_25 = arith.constant 0 : index
    %c1_26 = arith.constant 1 : index
    %c0_27 = arith.constant 0 : index
    %17 = vector.load %arg3[%c0_24, %c0_25, %c1_26, %c0_27] : memref<1x1x17x12xbf16, #tpu.memory_space<vmem>>, vector<1x1x16x12xbf16>
    %18 = vector.shape_cast %17 : vector<1x1x16x12xbf16> to vector<16x12xbf16>
    %c1_28 = arith.constant 1 : index
    %c1_29 = arith.constant 1 : index
    %c0_30 = arith.constant 0 : index
    %c0_31 = arith.constant 0 : index
    %19 = vector.load %arg4[%c1_28, %c1_29, %c0_30, %c0_31] : memref<2x2x12x128xbf16, #tpu.memory_space<vmem>>, vector<1x1x12x128xbf16>
    %20 = vector.shape_cast %19 : vector<1x1x12x128xbf16> to vector<12x128xbf16>
    %cst_32 = arith.constant dense<0.000000e+00> : vector<16x128xf32>
    %21 = tpu.matmul %18, %20, %cst_32 {dimension_numbers = #tpu.dot_dimension_numbers<[1], [0], [0], [1], [0, 0, 1, 1], [], []>} : vector<16x12xbf16>, vector<12x128xbf16>, vector<16x128xf32> -> vector<16x128xf32>
    %22 = arith.addf %16, %21 : vector<16x128xf32>
    %c0_33 = arith.constant 0 : index
    %c0_34 = arith.constant 0 : index
    %23 = vector.load %arg5[%c0_33, %c0_34] : memref<1x128xf32, #tpu.memory_space<vmem>>, vector<1x128xf32>
    %24 = vector.broadcast %23 : vector<1x128xf32> to vector<16x128xf32>
    %25 = arith.addf %22, %24 : vector<16x128xf32>
    %cst_35 = arith.constant 0.000000e+00 : f32
    %26 = vector.broadcast %cst_35 : f32 to vector<16x128xf32>
    %27 = arith.cmpf oge, %25, %26 : vector<16x128xf32>
    %cst_36 = arith.constant 2.000000e-01 : f32
    %28 = vector.broadcast %cst_36 : f32 to vector<16x128xf32>
    %29 = arith.mulf %28, %25 : vector<16x128xf32>
    %30 = arith.select %27, %25, %29 : vector<16x128xi1>, vector<16x128xf32>
    %31 = arith.truncf %30 : vector<16x128xf32> to vector<16x128xbf16>
    %c0_37 = arith.constant 0 : index
    %c0_38 = arith.constant 0 : index
    %c0_39 = arith.constant 0 : index
    %c0_40 = arith.constant 0 : index
    %32 = vector.load %arg6[%c0_37, %c0_38, %c0_39, %c0_40] : memref<1x1x16x128xbf16, #tpu.memory_space<vmem>>, vector<1x1x16x128xbf16>
    %33 = vector.shape_cast %32 : vector<1x1x16x128xbf16> to vector<16x128xbf16>
    %34 = vector.shape_cast %31 : vector<16x128xbf16> to vector<1x1x16x128xbf16>
    tpu.vector_store %arg6[%c0_37, %c0_38, %c0_39, %c0_40], %34 {strides = array<i32>} : memref<1x1x16x128xbf16, #tpu.memory_space<vmem>>, vector<1x1x16x128xbf16>,
    return
  }
  func.func @transform_0(%arg0: i32, %arg1: i32) -> (i32, i32, i32, i32) {
    %c0_i32 = arith.constant 0 : i32
    %c0_i32_0 = arith.constant 0 : i32
    %c0_i32_1 = arith.constant 0 : i32
    return %arg0, %arg1, %c0_i32, %c0_i32_0 : i32, i32, i32, i32
  }
  func.func @transform_1(%arg0: i32, %arg1: i32) -> (i32, i32, i32, i32) {
    %c1_i32 = arith.constant 1 : i32
    %0 = arith.addi %arg1, %c1_i32 : i32
    %c0_i32 = arith.constant 0 : i32
    %c0_i32_0 = arith.constant 0 : i32
    %c0_i32_1 = arith.constant 0 : i32
    return %arg0, %0, %c0_i32, %c0_i32_0 : i32, i32, i32, i32
  }
  func.func @transform_2(%arg0: i32, %arg1: i32) -> (i32, i32, i32, i32) {
    %c0_i32 = arith.constant 0 : i32
    %c0_i32_0 = arith.constant 0 : i32
    %c0_i32_1 = arith.constant 0 : i32
    %c0_i32_2 = arith.constant 0 : i32
    %c0_i32_3 = arith.constant 0 : i32
    return %c0_i32, %c0_i32_0, %c0_i32_1, %c0_i32_2 : i32, i32, i32, i32
  }
  func.func @transform_3(%arg0: i32, %arg1: i32) -> (i32, i32) {
    %c0_i32 = arith.constant 0 : i32
    %c0_i32_0 = arith.constant 0 : i32
    %c0_i32_1 = arith.constant 0 : i32
    return %c0_i32, %c0_i32_0 : i32, i32
  }
  func.func @transform_4(%arg0: i32, %arg1: i32) -> (i32, i32, i32, i32) {
    %c0_i32 = arith.constant 0 : i32
    %c0_i32_0 = arith.constant 0 : i32
    %c0_i32_1 = arith.constant 0 : i32
    return %arg0, %arg1, %c0_i32, %c0_i32_0 : i32, i32, i32, i32
  }
}

module attributes {stable_mosaic.version = 11 : i64} {
  func.func @_conv_stats_kernel(%arg0: i32, %arg1: i32, %arg2: memref<1x1x9x256xbf16, #tpu.memory_space<vmem>>, %arg3: memref<1x1x9x256xbf16, #tpu.memory_space<vmem>>, %arg4: memref<2x2x256x128xbf16, #tpu.memory_space<vmem>>, %arg5: memref<1x1x8x128xbf16, #tpu.memory_space<vmem>>, %arg6: memref<1x1x2x128xf32, #tpu.memory_space<vmem>>) attributes {dimension_semantics = [#tpu.dimension_semantics<parallel>, #tpu.dimension_semantics<parallel>], iteration_bounds = array<i64: 1, 8>, scalar_prefetch = 0 : i64, scratch_operands = 0 : i64, tpu.core_type = #tpu.core_type<tc>, window_params = [{transform_indices = @transform_0, window_bounds = array<i64: 1, 1, 9, 256>}, {transform_indices = @transform_1, window_bounds = array<i64: 1, 1, 9, 256>}, {pipeline_mode = #tpu.pipeline_mode<synchronous>, transform_indices = @transform_2, window_bounds = array<i64: 2, 2, 256, 128>}, {transform_indices = @transform_3, window_bounds = array<i64: 1, 1, 8, 128>}, {transform_indices = @transform_4, window_bounds = array<i64: 1, 1, 2, 128>}]} {
    %c0 = arith.constant 0 : index
    %c0_0 = arith.constant 0 : index
    %c0_1 = arith.constant 0 : index
    %c0_2 = arith.constant 0 : index
    %0 = vector.load %arg2[%c0, %c0_0, %c0_1, %c0_2] : memref<1x1x9x256xbf16, #tpu.memory_space<vmem>>, vector<1x1x8x256xbf16>
    %1 = vector.shape_cast %0 : vector<1x1x8x256xbf16> to vector<8x256xbf16>
    %c0_3 = arith.constant 0 : index
    %c0_4 = arith.constant 0 : index
    %c0_5 = arith.constant 0 : index
    %c0_6 = arith.constant 0 : index
    %2 = vector.load %arg4[%c0_3, %c0_4, %c0_5, %c0_6] : memref<2x2x256x128xbf16, #tpu.memory_space<vmem>>, vector<1x1x256x128xbf16>
    %3 = vector.shape_cast %2 : vector<1x1x256x128xbf16> to vector<256x128xbf16>
    %cst = arith.constant dense<0.000000e+00> : vector<8x128xf32>
    %4 = tpu.matmul %1, %3, %cst {dimension_numbers = #tpu.dot_dimension_numbers<[1], [0], [0], [1], [0, 0, 1, 1], [], []>} : vector<8x256xbf16>, vector<256x128xbf16>, vector<8x128xf32> -> vector<8x128xf32>
    %c0_7 = arith.constant 0 : index
    %c0_8 = arith.constant 0 : index
    %c1 = arith.constant 1 : index
    %c0_9 = arith.constant 0 : index
    %5 = vector.load %arg2[%c0_7, %c0_8, %c1, %c0_9] : memref<1x1x9x256xbf16, #tpu.memory_space<vmem>>, vector<1x1x8x256xbf16>
    %6 = vector.shape_cast %5 : vector<1x1x8x256xbf16> to vector<8x256xbf16>
    %c0_10 = arith.constant 0 : index
    %c1_11 = arith.constant 1 : index
    %c0_12 = arith.constant 0 : index
    %c0_13 = arith.constant 0 : index
    %7 = vector.load %arg4[%c0_10, %c1_11, %c0_12, %c0_13] : memref<2x2x256x128xbf16, #tpu.memory_space<vmem>>, vector<1x1x256x128xbf16>
    %8 = vector.shape_cast %7 : vector<1x1x256x128xbf16> to vector<256x128xbf16>
    %cst_14 = arith.constant dense<0.000000e+00> : vector<8x128xf32>
    %9 = tpu.matmul %6, %8, %cst_14 {dimension_numbers = #tpu.dot_dimension_numbers<[1], [0], [0], [1], [0, 0, 1, 1], [], []>} : vector<8x256xbf16>, vector<256x128xbf16>, vector<8x128xf32> -> vector<8x128xf32>
    %10 = arith.addf %4, %9 : vector<8x128xf32>
    %c0_15 = arith.constant 0 : index
    %c0_16 = arith.constant 0 : index
    %c0_17 = arith.constant 0 : index
    %c0_18 = arith.constant 0 : index
    %11 = vector.load %arg3[%c0_15, %c0_16, %c0_17, %c0_18] : memref<1x1x9x256xbf16, #tpu.memory_space<vmem>>, vector<1x1x8x256xbf16>
    %12 = vector.shape_cast %11 : vector<1x1x8x256xbf16> to vector<8x256xbf16>
    %c1_19 = arith.constant 1 : index
    %c0_20 = arith.constant 0 : index
    %c0_21 = arith.constant 0 : index
    %c0_22 = arith.constant 0 : index
    %13 = vector.load %arg4[%c1_19, %c0_20, %c0_21, %c0_22] : memref<2x2x256x128xbf16, #tpu.memory_space<vmem>>, vector<1x1x256x128xbf16>
    %14 = vector.shape_cast %13 : vector<1x1x256x128xbf16> to vector<256x128xbf16>
    %cst_23 = arith.constant dense<0.000000e+00> : vector<8x128xf32>
    %15 = tpu.matmul %12, %14, %cst_23 {dimension_numbers = #tpu.dot_dimension_numbers<[1], [0], [0], [1], [0, 0, 1, 1], [], []>} : vector<8x256xbf16>, vector<256x128xbf16>, vector<8x128xf32> -> vector<8x128xf32>
    %16 = arith.addf %10, %15 : vector<8x128xf32>
    %c0_24 = arith.constant 0 : index
    %c0_25 = arith.constant 0 : index
    %c1_26 = arith.constant 1 : index
    %c0_27 = arith.constant 0 : index
    %17 = vector.load %arg3[%c0_24, %c0_25, %c1_26, %c0_27] : memref<1x1x9x256xbf16, #tpu.memory_space<vmem>>, vector<1x1x8x256xbf16>
    %18 = vector.shape_cast %17 : vector<1x1x8x256xbf16> to vector<8x256xbf16>
    %c1_28 = arith.constant 1 : index
    %c1_29 = arith.constant 1 : index
    %c0_30 = arith.constant 0 : index
    %c0_31 = arith.constant 0 : index
    %19 = vector.load %arg4[%c1_28, %c1_29, %c0_30, %c0_31] : memref<2x2x256x128xbf16, #tpu.memory_space<vmem>>, vector<1x1x256x128xbf16>
    %20 = vector.shape_cast %19 : vector<1x1x256x128xbf16> to vector<256x128xbf16>
    %cst_32 = arith.constant dense<0.000000e+00> : vector<8x128xf32>
    %21 = tpu.matmul %18, %20, %cst_32 {dimension_numbers = #tpu.dot_dimension_numbers<[1], [0], [0], [1], [0, 0, 1, 1], [], []>} : vector<8x256xbf16>, vector<256x128xbf16>, vector<8x128xf32> -> vector<8x128xf32>
    %22 = arith.addf %16, %21 : vector<8x128xf32>
    %23 = arith.truncf %22 : vector<8x128xf32> to vector<8x128xbf16>
    %c0_33 = arith.constant 0 : index
    %c0_34 = arith.constant 0 : index
    %c0_35 = arith.constant 0 : index
    %c0_36 = arith.constant 0 : index
    %24 = vector.load %arg5[%c0_33, %c0_34, %c0_35, %c0_36] : memref<1x1x8x128xbf16, #tpu.memory_space<vmem>>, vector<1x1x8x128xbf16>
    %25 = vector.shape_cast %24 : vector<1x1x8x128xbf16> to vector<8x128xbf16>
    %26 = vector.shape_cast %23 : vector<8x128xbf16> to vector<1x1x8x128xbf16>
    tpu.vector_store %arg5[%c0_33, %c0_34, %c0_35, %c0_36], %26 {strides = array<i32>} : memref<1x1x8x128xbf16, #tpu.memory_space<vmem>>, vector<1x1x8x128xbf16>,
    %cst_37 = arith.constant dense<0.000000e+00> : vector<128xf32>
    %27 = vector.multi_reduction <add>, %22, %cst_37 [0] : vector<8x128xf32> to vector<128xf32>
    %28 = vector.shape_cast %27 : vector<128xf32> to vector<1x128xf32>
    %c0_38 = arith.constant 0 : index
    %c0_39 = arith.constant 0 : index
    %c0_40 = arith.constant 0 : index
    %c0_41 = arith.constant 0 : index
    %29 = vector.load %arg6[%c0_38, %c0_39, %c0_40, %c0_41] : memref<1x1x2x128xf32, #tpu.memory_space<vmem>>, vector<1x1x1x128xf32>
    %30 = vector.shape_cast %29 : vector<1x1x1x128xf32> to vector<1x128xf32>
    %31 = vector.shape_cast %28 : vector<1x128xf32> to vector<1x1x1x128xf32>
    tpu.vector_store %arg6[%c0_38, %c0_39, %c0_40, %c0_41], %31 {strides = array<i32>} : memref<1x1x2x128xf32, #tpu.memory_space<vmem>>, vector<1x1x1x128xf32>,
    %32 = arith.mulf %22, %22 : vector<8x128xf32>
    %cst_42 = arith.constant dense<0.000000e+00> : vector<128xf32>
    %33 = vector.multi_reduction <add>, %32, %cst_42 [0] : vector<8x128xf32> to vector<128xf32>
    %34 = vector.shape_cast %33 : vector<128xf32> to vector<1x128xf32>
    %c0_43 = arith.constant 0 : index
    %c0_44 = arith.constant 0 : index
    %c1_45 = arith.constant 1 : index
    %c0_46 = arith.constant 0 : index
    %35 = vector.load %arg6[%c0_43, %c0_44, %c1_45, %c0_46] : memref<1x1x2x128xf32, #tpu.memory_space<vmem>>, vector<1x1x1x128xf32>
    %36 = vector.shape_cast %35 : vector<1x1x1x128xf32> to vector<1x128xf32>
    %37 = vector.shape_cast %34 : vector<1x128xf32> to vector<1x1x1x128xf32>
    tpu.vector_store %arg6[%c0_43, %c0_44, %c1_45, %c0_46], %37 {strides = array<i32>} : memref<1x1x2x128xf32, #tpu.memory_space<vmem>>, vector<1x1x1x128xf32>,
    return
  }
  func.func @transform_0(%arg0: i32, %arg1: i32) -> (i32, i32, i32, i32) {
    %c0_i32 = arith.constant 0 : i32
    %c0_i32_0 = arith.constant 0 : i32
    %c0_i32_1 = arith.constant 0 : i32
    return %arg0, %arg1, %c0_i32, %c0_i32_0 : i32, i32, i32, i32
  }
  func.func @transform_1(%arg0: i32, %arg1: i32) -> (i32, i32, i32, i32) {
    %c1_i32 = arith.constant 1 : i32
    %0 = arith.addi %arg1, %c1_i32 : i32
    %c0_i32 = arith.constant 0 : i32
    %c0_i32_0 = arith.constant 0 : i32
    %c0_i32_1 = arith.constant 0 : i32
    return %arg0, %0, %c0_i32, %c0_i32_0 : i32, i32, i32, i32
  }
  func.func @transform_2(%arg0: i32, %arg1: i32) -> (i32, i32, i32, i32) {
    %c0_i32 = arith.constant 0 : i32
    %c0_i32_0 = arith.constant 0 : i32
    %c0_i32_1 = arith.constant 0 : i32
    %c0_i32_2 = arith.constant 0 : i32
    %c0_i32_3 = arith.constant 0 : i32
    return %c0_i32, %c0_i32_0, %c0_i32_1, %c0_i32_2 : i32, i32, i32, i32
  }
  func.func @transform_3(%arg0: i32, %arg1: i32) -> (i32, i32, i32, i32) {
    %c0_i32 = arith.constant 0 : i32
    %c0_i32_0 = arith.constant 0 : i32
    %c0_i32_1 = arith.constant 0 : i32
    return %arg0, %arg1, %c0_i32, %c0_i32_0 : i32, i32, i32, i32
  }
  func.func @transform_4(%arg0: i32, %arg1: i32) -> (i32, i32, i32, i32) {
    %c0_i32 = arith.constant 0 : i32
    %c0_i32_0 = arith.constant 0 : i32
    %c0_i32_1 = arith.constant 0 : i32
    return %arg0, %arg1, %c0_i32, %c0_i32_0 : i32, i32, i32, i32
  }
}

module attributes {stable_mosaic.version = 11 : i64} {
  func.func @_bn_lrelu_kernel(%arg0: i32, %arg1: i32, %arg2: memref<1x1x8x128xbf16, #tpu.memory_space<vmem>>, %arg3: memref<1x128xf32, #tpu.memory_space<vmem>>, %arg4: memref<1x128xf32, #tpu.memory_space<vmem>>, %arg5: memref<1x1x8x128xbf16, #tpu.memory_space<vmem>>) attributes {dimension_semantics = [#tpu.dimension_semantics<parallel>, #tpu.dimension_semantics<parallel>], iteration_bounds = array<i64: 1, 8>, scalar_prefetch = 0 : i64, scratch_operands = 0 : i64, tpu.core_type = #tpu.core_type<tc>, window_params = [{transform_indices = @transform_0, window_bounds = array<i64: 1, 1, 8, 128>}, {pipeline_mode = #tpu.pipeline_mode<synchronous>, transform_indices = @transform_1, window_bounds = array<i64: 1, 128>}, {pipeline_mode = #tpu.pipeline_mode<synchronous>, transform_indices = @transform_2, window_bounds = array<i64: 1, 128>}, {transform_indices = @transform_3, window_bounds = array<i64: 1, 1, 8, 128>}]} {
    %c0 = arith.constant 0 : index
    %c0_0 = arith.constant 0 : index
    %c0_1 = arith.constant 0 : index
    %c0_2 = arith.constant 0 : index
    %0 = vector.load %arg2[%c0, %c0_0, %c0_1, %c0_2] : memref<1x1x8x128xbf16, #tpu.memory_space<vmem>>, vector<1x1x8x128xbf16>
    %1 = vector.shape_cast %0 : vector<1x1x8x128xbf16> to vector<8x128xbf16>
    %2 = arith.extf %1 : vector<8x128xbf16> to vector<8x128xf32>
    %c0_3 = arith.constant 0 : index
    %c0_4 = arith.constant 0 : index
    %3 = vector.load %arg3[%c0_3, %c0_4] : memref<1x128xf32, #tpu.memory_space<vmem>>, vector<1x128xf32>
    %4 = vector.broadcast %3 : vector<1x128xf32> to vector<8x128xf32>
    %5 = arith.mulf %2, %4 : vector<8x128xf32>
    %c0_5 = arith.constant 0 : index
    %c0_6 = arith.constant 0 : index
    %6 = vector.load %arg4[%c0_5, %c0_6] : memref<1x128xf32, #tpu.memory_space<vmem>>, vector<1x128xf32>
    %7 = vector.broadcast %6 : vector<1x128xf32> to vector<8x128xf32>
    %8 = arith.addf %5, %7 : vector<8x128xf32>
    %cst = arith.constant 0.000000e+00 : f32
    %9 = vector.broadcast %cst : f32 to vector<8x128xf32>
    %10 = arith.cmpf oge, %8, %9 : vector<8x128xf32>
    %cst_7 = arith.constant 2.000000e-01 : f32
    %11 = vector.broadcast %cst_7 : f32 to vector<8x128xf32>
    %12 = arith.mulf %11, %8 : vector<8x128xf32>
    %13 = arith.select %10, %8, %12 : vector<8x128xi1>, vector<8x128xf32>
    %14 = arith.truncf %13 : vector<8x128xf32> to vector<8x128xbf16>
    %c0_8 = arith.constant 0 : index
    %c0_9 = arith.constant 0 : index
    %c0_10 = arith.constant 0 : index
    %c0_11 = arith.constant 0 : index
    %15 = vector.load %arg5[%c0_8, %c0_9, %c0_10, %c0_11] : memref<1x1x8x128xbf16, #tpu.memory_space<vmem>>, vector<1x1x8x128xbf16>
    %16 = vector.shape_cast %15 : vector<1x1x8x128xbf16> to vector<8x128xbf16>
    %17 = vector.shape_cast %14 : vector<8x128xbf16> to vector<1x1x8x128xbf16>
    tpu.vector_store %arg5[%c0_8, %c0_9, %c0_10, %c0_11], %17 {strides = array<i32>} : memref<1x1x8x128xbf16, #tpu.memory_space<vmem>>, vector<1x1x8x128xbf16>,
    return
  }
  func.func @transform_0(%arg0: i32, %arg1: i32) -> (i32, i32, i32, i32) {
    %c0_i32 = arith.constant 0 : i32
    %c0_i32_0 = arith.constant 0 : i32
    %c0_i32_1 = arith.constant 0 : i32
    return %arg0, %arg1, %c0_i32, %c0_i32_0 : i32, i32, i32, i32
  }
  func.func @transform_1(%arg0: i32, %arg1: i32) -> (i32, i32) {
    %c0_i32 = arith.constant 0 : i32
    %c0_i32_0 = arith.constant 0 : i32
    %c0_i32_1 = arith.constant 0 : i32
    return %c0_i32, %c0_i32_0 : i32, i32
  }
  func.func @transform_2(%arg0: i32, %arg1: i32) -> (i32, i32) {
    %c0_i32 = arith.constant 0 : i32
    %c0_i32_0 = arith.constant 0 : i32
    %c0_i32_1 = arith.constant 0 : i32
    return %c0_i32, %c0_i32_0 : i32, i32
  }
  func.func @transform_3(%arg0: i32, %arg1: i32) -> (i32, i32, i32, i32) {
    %c0_i32 = arith.constant 0 : i32
    %c0_i32_0 = arith.constant 0 : i32
    %c0_i32_1 = arith.constant 0 : i32
    return %arg0, %arg1, %c0_i32, %c0_i32_0 : i32, i32, i32, i32
  }
}

module attributes {stable_mosaic.version = 11 : i64} {
  func.func @_conv_stats_kernel(%arg0: i32, %arg1: i32, %arg2: memref<1x1x5x512xbf16, #tpu.memory_space<vmem>>, %arg3: memref<1x1x5x512xbf16, #tpu.memory_space<vmem>>, %arg4: memref<2x2x512x256xbf16, #tpu.memory_space<vmem>>, %arg5: memref<1x1x4x256xbf16, #tpu.memory_space<vmem>>, %arg6: memref<1x1x2x256xf32, #tpu.memory_space<vmem>>) attributes {dimension_semantics = [#tpu.dimension_semantics<parallel>, #tpu.dimension_semantics<parallel>], iteration_bounds = array<i64: 1, 4>, scalar_prefetch = 0 : i64, scratch_operands = 0 : i64, tpu.core_type = #tpu.core_type<tc>, window_params = [{transform_indices = @transform_0, window_bounds = array<i64: 1, 1, 5, 512>}, {transform_indices = @transform_1, window_bounds = array<i64: 1, 1, 5, 512>}, {pipeline_mode = #tpu.pipeline_mode<synchronous>, transform_indices = @transform_2, window_bounds = array<i64: 2, 2, 512, 256>}, {transform_indices = @transform_3, window_bounds = array<i64: 1, 1, 4, 256>}, {transform_indices = @transform_4, window_bounds = array<i64: 1, 1, 2, 256>}]} {
    %c0 = arith.constant 0 : index
    %c0_0 = arith.constant 0 : index
    %c0_1 = arith.constant 0 : index
    %c0_2 = arith.constant 0 : index
    %0 = vector.load %arg2[%c0, %c0_0, %c0_1, %c0_2] : memref<1x1x5x512xbf16, #tpu.memory_space<vmem>>, vector<1x1x4x512xbf16>
    %1 = vector.shape_cast %0 : vector<1x1x4x512xbf16> to vector<4x512xbf16>
    %c0_3 = arith.constant 0 : index
    %c0_4 = arith.constant 0 : index
    %c0_5 = arith.constant 0 : index
    %c0_6 = arith.constant 0 : index
    %2 = vector.load %arg4[%c0_3, %c0_4, %c0_5, %c0_6] : memref<2x2x512x256xbf16, #tpu.memory_space<vmem>>, vector<1x1x512x256xbf16>
    %3 = vector.shape_cast %2 : vector<1x1x512x256xbf16> to vector<512x256xbf16>
    %cst = arith.constant dense<0.000000e+00> : vector<4x256xf32>
    %4 = tpu.matmul %1, %3, %cst {dimension_numbers = #tpu.dot_dimension_numbers<[1], [0], [0], [1], [0, 0, 1, 1], [], []>} : vector<4x512xbf16>, vector<512x256xbf16>, vector<4x256xf32> -> vector<4x256xf32>
    %c0_7 = arith.constant 0 : index
    %c0_8 = arith.constant 0 : index
    %c1 = arith.constant 1 : index
    %c0_9 = arith.constant 0 : index
    %5 = vector.load %arg2[%c0_7, %c0_8, %c1, %c0_9] : memref<1x1x5x512xbf16, #tpu.memory_space<vmem>>, vector<1x1x4x512xbf16>
    %6 = vector.shape_cast %5 : vector<1x1x4x512xbf16> to vector<4x512xbf16>
    %c0_10 = arith.constant 0 : index
    %c1_11 = arith.constant 1 : index
    %c0_12 = arith.constant 0 : index
    %c0_13 = arith.constant 0 : index
    %7 = vector.load %arg4[%c0_10, %c1_11, %c0_12, %c0_13] : memref<2x2x512x256xbf16, #tpu.memory_space<vmem>>, vector<1x1x512x256xbf16>
    %8 = vector.shape_cast %7 : vector<1x1x512x256xbf16> to vector<512x256xbf16>
    %cst_14 = arith.constant dense<0.000000e+00> : vector<4x256xf32>
    %9 = tpu.matmul %6, %8, %cst_14 {dimension_numbers = #tpu.dot_dimension_numbers<[1], [0], [0], [1], [0, 0, 1, 1], [], []>} : vector<4x512xbf16>, vector<512x256xbf16>, vector<4x256xf32> -> vector<4x256xf32>
    %10 = arith.addf %4, %9 : vector<4x256xf32>
    %c0_15 = arith.constant 0 : index
    %c0_16 = arith.constant 0 : index
    %c0_17 = arith.constant 0 : index
    %c0_18 = arith.constant 0 : index
    %11 = vector.load %arg3[%c0_15, %c0_16, %c0_17, %c0_18] : memref<1x1x5x512xbf16, #tpu.memory_space<vmem>>, vector<1x1x4x512xbf16>
    %12 = vector.shape_cast %11 : vector<1x1x4x512xbf16> to vector<4x512xbf16>
    %c1_19 = arith.constant 1 : index
    %c0_20 = arith.constant 0 : index
    %c0_21 = arith.constant 0 : index
    %c0_22 = arith.constant 0 : index
    %13 = vector.load %arg4[%c1_19, %c0_20, %c0_21, %c0_22] : memref<2x2x512x256xbf16, #tpu.memory_space<vmem>>, vector<1x1x512x256xbf16>
    %14 = vector.shape_cast %13 : vector<1x1x512x256xbf16> to vector<512x256xbf16>
    %cst_23 = arith.constant dense<0.000000e+00> : vector<4x256xf32>
    %15 = tpu.matmul %12, %14, %cst_23 {dimension_numbers = #tpu.dot_dimension_numbers<[1], [0], [0], [1], [0, 0, 1, 1], [], []>} : vector<4x512xbf16>, vector<512x256xbf16>, vector<4x256xf32> -> vector<4x256xf32>
    %16 = arith.addf %10, %15 : vector<4x256xf32>
    %c0_24 = arith.constant 0 : index
    %c0_25 = arith.constant 0 : index
    %c1_26 = arith.constant 1 : index
    %c0_27 = arith.constant 0 : index
    %17 = vector.load %arg3[%c0_24, %c0_25, %c1_26, %c0_27] : memref<1x1x5x512xbf16, #tpu.memory_space<vmem>>, vector<1x1x4x512xbf16>
    %18 = vector.shape_cast %17 : vector<1x1x4x512xbf16> to vector<4x512xbf16>
    %c1_28 = arith.constant 1 : index
    %c1_29 = arith.constant 1 : index
    %c0_30 = arith.constant 0 : index
    %c0_31 = arith.constant 0 : index
    %19 = vector.load %arg4[%c1_28, %c1_29, %c0_30, %c0_31] : memref<2x2x512x256xbf16, #tpu.memory_space<vmem>>, vector<1x1x512x256xbf16>
    %20 = vector.shape_cast %19 : vector<1x1x512x256xbf16> to vector<512x256xbf16>
    %cst_32 = arith.constant dense<0.000000e+00> : vector<4x256xf32>
    %21 = tpu.matmul %18, %20, %cst_32 {dimension_numbers = #tpu.dot_dimension_numbers<[1], [0], [0], [1], [0, 0, 1, 1], [], []>} : vector<4x512xbf16>, vector<512x256xbf16>, vector<4x256xf32> -> vector<4x256xf32>
    %22 = arith.addf %16, %21 : vector<4x256xf32>
    %23 = arith.truncf %22 : vector<4x256xf32> to vector<4x256xbf16>
    %c0_33 = arith.constant 0 : index
    %c0_34 = arith.constant 0 : index
    %c0_35 = arith.constant 0 : index
    %c0_36 = arith.constant 0 : index
    %24 = vector.load %arg5[%c0_33, %c0_34, %c0_35, %c0_36] : memref<1x1x4x256xbf16, #tpu.memory_space<vmem>>, vector<1x1x4x256xbf16>
    %25 = vector.shape_cast %24 : vector<1x1x4x256xbf16> to vector<4x256xbf16>
    %26 = vector.shape_cast %23 : vector<4x256xbf16> to vector<1x1x4x256xbf16>
    tpu.vector_store %arg5[%c0_33, %c0_34, %c0_35, %c0_36], %26 {strides = array<i32>} : memref<1x1x4x256xbf16, #tpu.memory_space<vmem>>, vector<1x1x4x256xbf16>,
    %cst_37 = arith.constant dense<0.000000e+00> : vector<256xf32>
    %27 = vector.multi_reduction <add>, %22, %cst_37 [0] : vector<4x256xf32> to vector<256xf32>
    %28 = vector.shape_cast %27 : vector<256xf32> to vector<1x256xf32>
    %c0_38 = arith.constant 0 : index
    %c0_39 = arith.constant 0 : index
    %c0_40 = arith.constant 0 : index
    %c0_41 = arith.constant 0 : index
    %29 = vector.load %arg6[%c0_38, %c0_39, %c0_40, %c0_41] : memref<1x1x2x256xf32, #tpu.memory_space<vmem>>, vector<1x1x1x256xf32>
    %30 = vector.shape_cast %29 : vector<1x1x1x256xf32> to vector<1x256xf32>
    %31 = vector.shape_cast %28 : vector<1x256xf32> to vector<1x1x1x256xf32>
    tpu.vector_store %arg6[%c0_38, %c0_39, %c0_40, %c0_41], %31 {strides = array<i32>} : memref<1x1x2x256xf32, #tpu.memory_space<vmem>>, vector<1x1x1x256xf32>,
    %32 = arith.mulf %22, %22 : vector<4x256xf32>
    %cst_42 = arith.constant dense<0.000000e+00> : vector<256xf32>
    %33 = vector.multi_reduction <add>, %32, %cst_42 [0] : vector<4x256xf32> to vector<256xf32>
    %34 = vector.shape_cast %33 : vector<256xf32> to vector<1x256xf32>
    %c0_43 = arith.constant 0 : index
    %c0_44 = arith.constant 0 : index
    %c1_45 = arith.constant 1 : index
    %c0_46 = arith.constant 0 : index
    %35 = vector.load %arg6[%c0_43, %c0_44, %c1_45, %c0_46] : memref<1x1x2x256xf32, #tpu.memory_space<vmem>>, vector<1x1x1x256xf32>
    %36 = vector.shape_cast %35 : vector<1x1x1x256xf32> to vector<1x256xf32>
    %37 = vector.shape_cast %34 : vector<1x256xf32> to vector<1x1x1x256xf32>
    tpu.vector_store %arg6[%c0_43, %c0_44, %c1_45, %c0_46], %37 {strides = array<i32>} : memref<1x1x2x256xf32, #tpu.memory_space<vmem>>, vector<1x1x1x256xf32>,
    return
  }
  func.func @transform_0(%arg0: i32, %arg1: i32) -> (i32, i32, i32, i32) {
    %c0_i32 = arith.constant 0 : i32
    %c0_i32_0 = arith.constant 0 : i32
    %c0_i32_1 = arith.constant 0 : i32
    return %arg0, %arg1, %c0_i32, %c0_i32_0 : i32, i32, i32, i32
  }
  func.func @transform_1(%arg0: i32, %arg1: i32) -> (i32, i32, i32, i32) {
    %c1_i32 = arith.constant 1 : i32
    %0 = arith.addi %arg1, %c1_i32 : i32
    %c0_i32 = arith.constant 0 : i32
    %c0_i32_0 = arith.constant 0 : i32
    %c0_i32_1 = arith.constant 0 : i32
    return %arg0, %0, %c0_i32, %c0_i32_0 : i32, i32, i32, i32
  }
  func.func @transform_2(%arg0: i32, %arg1: i32) -> (i32, i32, i32, i32) {
    %c0_i32 = arith.constant 0 : i32
    %c0_i32_0 = arith.constant 0 : i32
    %c0_i32_1 = arith.constant 0 : i32
    %c0_i32_2 = arith.constant 0 : i32
    %c0_i32_3 = arith.constant 0 : i32
    return %c0_i32, %c0_i32_0, %c0_i32_1, %c0_i32_2 : i32, i32, i32, i32
  }
  func.func @transform_3(%arg0: i32, %arg1: i32) -> (i32, i32, i32, i32) {
    %c0_i32 = arith.constant 0 : i32
    %c0_i32_0 = arith.constant 0 : i32
    %c0_i32_1 = arith.constant 0 : i32
    return %arg0, %arg1, %c0_i32, %c0_i32_0 : i32, i32, i32, i32
  }
  func.func @transform_4(%arg0: i32, %arg1: i32) -> (i32, i32, i32, i32) {
    %c0_i32 = arith.constant 0 : i32
    %c0_i32_0 = arith.constant 0 : i32
    %c0_i32_1 = arith.constant 0 : i32
    return %arg0, %arg1, %c0_i32, %c0_i32_0 : i32, i32, i32, i32
  }
}

module attributes {stable_mosaic.version = 11 : i64} {
  func.func @_bn_lrelu_kernel(%arg0: i32, %arg1: i32, %arg2: memref<1x1x4x256xbf16, #tpu.memory_space<vmem>>, %arg3: memref<1x256xf32, #tpu.memory_space<vmem>>, %arg4: memref<1x256xf32, #tpu.memory_space<vmem>>, %arg5: memref<1x1x4x256xbf16, #tpu.memory_space<vmem>>) attributes {dimension_semantics = [#tpu.dimension_semantics<parallel>, #tpu.dimension_semantics<parallel>], iteration_bounds = array<i64: 1, 4>, scalar_prefetch = 0 : i64, scratch_operands = 0 : i64, tpu.core_type = #tpu.core_type<tc>, window_params = [{transform_indices = @transform_0, window_bounds = array<i64: 1, 1, 4, 256>}, {pipeline_mode = #tpu.pipeline_mode<synchronous>, transform_indices = @transform_1, window_bounds = array<i64: 1, 256>}, {pipeline_mode = #tpu.pipeline_mode<synchronous>, transform_indices = @transform_2, window_bounds = array<i64: 1, 256>}, {transform_indices = @transform_3, window_bounds = array<i64: 1, 1, 4, 256>}]} {
    %c0 = arith.constant 0 : index
    %c0_0 = arith.constant 0 : index
    %c0_1 = arith.constant 0 : index
    %c0_2 = arith.constant 0 : index
    %0 = vector.load %arg2[%c0, %c0_0, %c0_1, %c0_2] : memref<1x1x4x256xbf16, #tpu.memory_space<vmem>>, vector<1x1x4x256xbf16>
    %1 = vector.shape_cast %0 : vector<1x1x4x256xbf16> to vector<4x256xbf16>
    %2 = arith.extf %1 : vector<4x256xbf16> to vector<4x256xf32>
    %c0_3 = arith.constant 0 : index
    %c0_4 = arith.constant 0 : index
    %3 = vector.load %arg3[%c0_3, %c0_4] : memref<1x256xf32, #tpu.memory_space<vmem>>, vector<1x256xf32>
    %4 = vector.broadcast %3 : vector<1x256xf32> to vector<4x256xf32>
    %5 = arith.mulf %2, %4 : vector<4x256xf32>
    %c0_5 = arith.constant 0 : index
    %c0_6 = arith.constant 0 : index
    %6 = vector.load %arg4[%c0_5, %c0_6] : memref<1x256xf32, #tpu.memory_space<vmem>>, vector<1x256xf32>
    %7 = vector.broadcast %6 : vector<1x256xf32> to vector<4x256xf32>
    %8 = arith.addf %5, %7 : vector<4x256xf32>
    %cst = arith.constant 0.000000e+00 : f32
    %9 = vector.broadcast %cst : f32 to vector<4x256xf32>
    %10 = arith.cmpf oge, %8, %9 : vector<4x256xf32>
    %cst_7 = arith.constant 2.000000e-01 : f32
    %11 = vector.broadcast %cst_7 : f32 to vector<4x256xf32>
    %12 = arith.mulf %11, %8 : vector<4x256xf32>
    %13 = arith.select %10, %8, %12 : vector<4x256xi1>, vector<4x256xf32>
    %14 = arith.truncf %13 : vector<4x256xf32> to vector<4x256xbf16>
    %c0_8 = arith.constant 0 : index
    %c0_9 = arith.constant 0 : index
    %c0_10 = arith.constant 0 : index
    %c0_11 = arith.constant 0 : index
    %15 = vector.load %arg5[%c0_8, %c0_9, %c0_10, %c0_11] : memref<1x1x4x256xbf16, #tpu.memory_space<vmem>>, vector<1x1x4x256xbf16>
    %16 = vector.shape_cast %15 : vector<1x1x4x256xbf16> to vector<4x256xbf16>
    %17 = vector.shape_cast %14 : vector<4x256xbf16> to vector<1x1x4x256xbf16>
    tpu.vector_store %arg5[%c0_8, %c0_9, %c0_10, %c0_11], %17 {strides = array<i32>} : memref<1x1x4x256xbf16, #tpu.memory_space<vmem>>, vector<1x1x4x256xbf16>,
    return
  }
  func.func @transform_0(%arg0: i32, %arg1: i32) -> (i32, i32, i32, i32) {
    %c0_i32 = arith.constant 0 : i32
    %c0_i32_0 = arith.constant 0 : i32
    %c0_i32_1 = arith.constant 0 : i32
    return %arg0, %arg1, %c0_i32, %c0_i32_0 : i32, i32, i32, i32
  }
  func.func @transform_1(%arg0: i32, %arg1: i32) -> (i32, i32) {
    %c0_i32 = arith.constant 0 : i32
    %c0_i32_0 = arith.constant 0 : i32
    %c0_i32_1 = arith.constant 0 : i32
    return %c0_i32, %c0_i32_0 : i32, i32
  }
  func.func @transform_2(%arg0: i32, %arg1: i32) -> (i32, i32) {
    %c0_i32 = arith.constant 0 : i32
    %c0_i32_0 = arith.constant 0 : i32
    %c0_i32_1 = arith.constant 0 : i32
    return %c0_i32, %c0_i32_0 : i32, i32
  }
  func.func @transform_3(%arg0: i32, %arg1: i32) -> (i32, i32, i32, i32) {
    %c0_i32 = arith.constant 0 : i32
    %c0_i32_0 = arith.constant 0 : i32
    %c0_i32_1 = arith.constant 0 : i32
    return %arg0, %arg1, %c0_i32, %c0_i32_0 : i32, i32, i32, i32
  }
}

module attributes {stable_mosaic.version = 11 : i64} {
  func.func @_conv_stats_kernel(%arg0: i32, %arg1: i32, %arg2: memref<1x1x3x1024xbf16, #tpu.memory_space<vmem>>, %arg3: memref<1x1x3x1024xbf16, #tpu.memory_space<vmem>>, %arg4: memref<2x2x1024x512xbf16, #tpu.memory_space<vmem>>, %arg5: memref<1x1x2x512xbf16, #tpu.memory_space<vmem>>, %arg6: memref<1x1x2x512xf32, #tpu.memory_space<vmem>>) attributes {dimension_semantics = [#tpu.dimension_semantics<parallel>, #tpu.dimension_semantics<parallel>], iteration_bounds = array<i64: 1, 2>, scalar_prefetch = 0 : i64, scratch_operands = 0 : i64, tpu.core_type = #tpu.core_type<tc>, window_params = [{transform_indices = @transform_0, window_bounds = array<i64: 1, 1, 3, 1024>}, {transform_indices = @transform_1, window_bounds = array<i64: 1, 1, 3, 1024>}, {pipeline_mode = #tpu.pipeline_mode<synchronous>, transform_indices = @transform_2, window_bounds = array<i64: 2, 2, 1024, 512>}, {transform_indices = @transform_3, window_bounds = array<i64: 1, 1, 2, 512>}, {transform_indices = @transform_4, window_bounds = array<i64: 1, 1, 2, 512>}]} {
    %c0 = arith.constant 0 : index
    %c0_0 = arith.constant 0 : index
    %c0_1 = arith.constant 0 : index
    %c0_2 = arith.constant 0 : index
    %0 = vector.load %arg2[%c0, %c0_0, %c0_1, %c0_2] : memref<1x1x3x1024xbf16, #tpu.memory_space<vmem>>, vector<1x1x2x1024xbf16>
    %1 = vector.shape_cast %0 : vector<1x1x2x1024xbf16> to vector<2x1024xbf16>
    %c0_3 = arith.constant 0 : index
    %c0_4 = arith.constant 0 : index
    %c0_5 = arith.constant 0 : index
    %c0_6 = arith.constant 0 : index
    %2 = vector.load %arg4[%c0_3, %c0_4, %c0_5, %c0_6] : memref<2x2x1024x512xbf16, #tpu.memory_space<vmem>>, vector<1x1x1024x512xbf16>
    %3 = vector.shape_cast %2 : vector<1x1x1024x512xbf16> to vector<1024x512xbf16>
    %cst = arith.constant dense<0.000000e+00> : vector<2x512xf32>
    %4 = tpu.matmul %1, %3, %cst {dimension_numbers = #tpu.dot_dimension_numbers<[1], [0], [0], [1], [0, 0, 1, 1], [], []>} : vector<2x1024xbf16>, vector<1024x512xbf16>, vector<2x512xf32> -> vector<2x512xf32>
    %c0_7 = arith.constant 0 : index
    %c0_8 = arith.constant 0 : index
    %c1 = arith.constant 1 : index
    %c0_9 = arith.constant 0 : index
    %5 = vector.load %arg2[%c0_7, %c0_8, %c1, %c0_9] : memref<1x1x3x1024xbf16, #tpu.memory_space<vmem>>, vector<1x1x2x1024xbf16>
    %6 = vector.shape_cast %5 : vector<1x1x2x1024xbf16> to vector<2x1024xbf16>
    %c0_10 = arith.constant 0 : index
    %c1_11 = arith.constant 1 : index
    %c0_12 = arith.constant 0 : index
    %c0_13 = arith.constant 0 : index
    %7 = vector.load %arg4[%c0_10, %c1_11, %c0_12, %c0_13] : memref<2x2x1024x512xbf16, #tpu.memory_space<vmem>>, vector<1x1x1024x512xbf16>
    %8 = vector.shape_cast %7 : vector<1x1x1024x512xbf16> to vector<1024x512xbf16>
    %cst_14 = arith.constant dense<0.000000e+00> : vector<2x512xf32>
    %9 = tpu.matmul %6, %8, %cst_14 {dimension_numbers = #tpu.dot_dimension_numbers<[1], [0], [0], [1], [0, 0, 1, 1], [], []>} : vector<2x1024xbf16>, vector<1024x512xbf16>, vector<2x512xf32> -> vector<2x512xf32>
    %10 = arith.addf %4, %9 : vector<2x512xf32>
    %c0_15 = arith.constant 0 : index
    %c0_16 = arith.constant 0 : index
    %c0_17 = arith.constant 0 : index
    %c0_18 = arith.constant 0 : index
    %11 = vector.load %arg3[%c0_15, %c0_16, %c0_17, %c0_18] : memref<1x1x3x1024xbf16, #tpu.memory_space<vmem>>, vector<1x1x2x1024xbf16>
    %12 = vector.shape_cast %11 : vector<1x1x2x1024xbf16> to vector<2x1024xbf16>
    %c1_19 = arith.constant 1 : index
    %c0_20 = arith.constant 0 : index
    %c0_21 = arith.constant 0 : index
    %c0_22 = arith.constant 0 : index
    %13 = vector.load %arg4[%c1_19, %c0_20, %c0_21, %c0_22] : memref<2x2x1024x512xbf16, #tpu.memory_space<vmem>>, vector<1x1x1024x512xbf16>
    %14 = vector.shape_cast %13 : vector<1x1x1024x512xbf16> to vector<1024x512xbf16>
    %cst_23 = arith.constant dense<0.000000e+00> : vector<2x512xf32>
    %15 = tpu.matmul %12, %14, %cst_23 {dimension_numbers = #tpu.dot_dimension_numbers<[1], [0], [0], [1], [0, 0, 1, 1], [], []>} : vector<2x1024xbf16>, vector<1024x512xbf16>, vector<2x512xf32> -> vector<2x512xf32>
    %16 = arith.addf %10, %15 : vector<2x512xf32>
    %c0_24 = arith.constant 0 : index
    %c0_25 = arith.constant 0 : index
    %c1_26 = arith.constant 1 : index
    %c0_27 = arith.constant 0 : index
    %17 = vector.load %arg3[%c0_24, %c0_25, %c1_26, %c0_27] : memref<1x1x3x1024xbf16, #tpu.memory_space<vmem>>, vector<1x1x2x1024xbf16>
    %18 = vector.shape_cast %17 : vector<1x1x2x1024xbf16> to vector<2x1024xbf16>
    %c1_28 = arith.constant 1 : index
    %c1_29 = arith.constant 1 : index
    %c0_30 = arith.constant 0 : index
    %c0_31 = arith.constant 0 : index
    %19 = vector.load %arg4[%c1_28, %c1_29, %c0_30, %c0_31] : memref<2x2x1024x512xbf16, #tpu.memory_space<vmem>>, vector<1x1x1024x512xbf16>
    %20 = vector.shape_cast %19 : vector<1x1x1024x512xbf16> to vector<1024x512xbf16>
    %cst_32 = arith.constant dense<0.000000e+00> : vector<2x512xf32>
    %21 = tpu.matmul %18, %20, %cst_32 {dimension_numbers = #tpu.dot_dimension_numbers<[1], [0], [0], [1], [0, 0, 1, 1], [], []>} : vector<2x1024xbf16>, vector<1024x512xbf16>, vector<2x512xf32> -> vector<2x512xf32>
    %22 = arith.addf %16, %21 : vector<2x512xf32>
    %23 = arith.truncf %22 : vector<2x512xf32> to vector<2x512xbf16>
    %c0_33 = arith.constant 0 : index
    %c0_34 = arith.constant 0 : index
    %c0_35 = arith.constant 0 : index
    %c0_36 = arith.constant 0 : index
    %24 = vector.load %arg5[%c0_33, %c0_34, %c0_35, %c0_36] : memref<1x1x2x512xbf16, #tpu.memory_space<vmem>>, vector<1x1x2x512xbf16>
    %25 = vector.shape_cast %24 : vector<1x1x2x512xbf16> to vector<2x512xbf16>
    %26 = vector.shape_cast %23 : vector<2x512xbf16> to vector<1x1x2x512xbf16>
    tpu.vector_store %arg5[%c0_33, %c0_34, %c0_35, %c0_36], %26 {strides = array<i32>} : memref<1x1x2x512xbf16, #tpu.memory_space<vmem>>, vector<1x1x2x512xbf16>,
    %cst_37 = arith.constant dense<0.000000e+00> : vector<512xf32>
    %27 = vector.multi_reduction <add>, %22, %cst_37 [0] : vector<2x512xf32> to vector<512xf32>
    %28 = vector.shape_cast %27 : vector<512xf32> to vector<1x512xf32>
    %c0_38 = arith.constant 0 : index
    %c0_39 = arith.constant 0 : index
    %c0_40 = arith.constant 0 : index
    %c0_41 = arith.constant 0 : index
    %29 = vector.load %arg6[%c0_38, %c0_39, %c0_40, %c0_41] : memref<1x1x2x512xf32, #tpu.memory_space<vmem>>, vector<1x1x1x512xf32>
    %30 = vector.shape_cast %29 : vector<1x1x1x512xf32> to vector<1x512xf32>
    %31 = vector.shape_cast %28 : vector<1x512xf32> to vector<1x1x1x512xf32>
    tpu.vector_store %arg6[%c0_38, %c0_39, %c0_40, %c0_41], %31 {strides = array<i32>} : memref<1x1x2x512xf32, #tpu.memory_space<vmem>>, vector<1x1x1x512xf32>,
    %32 = arith.mulf %22, %22 : vector<2x512xf32>
    %cst_42 = arith.constant dense<0.000000e+00> : vector<512xf32>
    %33 = vector.multi_reduction <add>, %32, %cst_42 [0] : vector<2x512xf32> to vector<512xf32>
    %34 = vector.shape_cast %33 : vector<512xf32> to vector<1x512xf32>
    %c0_43 = arith.constant 0 : index
    %c0_44 = arith.constant 0 : index
    %c1_45 = arith.constant 1 : index
    %c0_46 = arith.constant 0 : index
    %35 = vector.load %arg6[%c0_43, %c0_44, %c1_45, %c0_46] : memref<1x1x2x512xf32, #tpu.memory_space<vmem>>, vector<1x1x1x512xf32>
    %36 = vector.shape_cast %35 : vector<1x1x1x512xf32> to vector<1x512xf32>
    %37 = vector.shape_cast %34 : vector<1x512xf32> to vector<1x1x1x512xf32>
    tpu.vector_store %arg6[%c0_43, %c0_44, %c1_45, %c0_46], %37 {strides = array<i32>} : memref<1x1x2x512xf32, #tpu.memory_space<vmem>>, vector<1x1x1x512xf32>,
    return
  }
  func.func @transform_0(%arg0: i32, %arg1: i32) -> (i32, i32, i32, i32) {
    %c0_i32 = arith.constant 0 : i32
    %c0_i32_0 = arith.constant 0 : i32
    %c0_i32_1 = arith.constant 0 : i32
    return %arg0, %arg1, %c0_i32, %c0_i32_0 : i32, i32, i32, i32
  }
  func.func @transform_1(%arg0: i32, %arg1: i32) -> (i32, i32, i32, i32) {
    %c1_i32 = arith.constant 1 : i32
    %0 = arith.addi %arg1, %c1_i32 : i32
    %c0_i32 = arith.constant 0 : i32
    %c0_i32_0 = arith.constant 0 : i32
    %c0_i32_1 = arith.constant 0 : i32
    return %arg0, %0, %c0_i32, %c0_i32_0 : i32, i32, i32, i32
  }
  func.func @transform_2(%arg0: i32, %arg1: i32) -> (i32, i32, i32, i32) {
    %c0_i32 = arith.constant 0 : i32
    %c0_i32_0 = arith.constant 0 : i32
    %c0_i32_1 = arith.constant 0 : i32
    %c0_i32_2 = arith.constant 0 : i32
    %c0_i32_3 = arith.constant 0 : i32
    return %c0_i32, %c0_i32_0, %c0_i32_1, %c0_i32_2 : i32, i32, i32, i32
  }
  func.func @transform_3(%arg0: i32, %arg1: i32) -> (i32, i32, i32, i32) {
    %c0_i32 = arith.constant 0 : i32
    %c0_i32_0 = arith.constant 0 : i32
    %c0_i32_1 = arith.constant 0 : i32
    return %arg0, %arg1, %c0_i32, %c0_i32_0 : i32, i32, i32, i32
  }
  func.func @transform_4(%arg0: i32, %arg1: i32) -> (i32, i32, i32, i32) {
    %c0_i32 = arith.constant 0 : i32
    %c0_i32_0 = arith.constant 0 : i32
    %c0_i32_1 = arith.constant 0 : i32
    return %arg0, %arg1, %c0_i32, %c0_i32_0 : i32, i32, i32, i32
  }
}

module attributes {stable_mosaic.version = 11 : i64} {
  func.func @_bn_lrelu_kernel(%arg0: i32, %arg1: i32, %arg2: memref<1x1x2x512xbf16, #tpu.memory_space<vmem>>, %arg3: memref<1x512xf32, #tpu.memory_space<vmem>>, %arg4: memref<1x512xf32, #tpu.memory_space<vmem>>, %arg5: memref<1x1x2x512xbf16, #tpu.memory_space<vmem>>) attributes {dimension_semantics = [#tpu.dimension_semantics<parallel>, #tpu.dimension_semantics<parallel>], iteration_bounds = array<i64: 1, 2>, scalar_prefetch = 0 : i64, scratch_operands = 0 : i64, tpu.core_type = #tpu.core_type<tc>, window_params = [{transform_indices = @transform_0, window_bounds = array<i64: 1, 1, 2, 512>}, {pipeline_mode = #tpu.pipeline_mode<synchronous>, transform_indices = @transform_1, window_bounds = array<i64: 1, 512>}, {pipeline_mode = #tpu.pipeline_mode<synchronous>, transform_indices = @transform_2, window_bounds = array<i64: 1, 512>}, {transform_indices = @transform_3, window_bounds = array<i64: 1, 1, 2, 512>}]} {
    %c0 = arith.constant 0 : index
    %c0_0 = arith.constant 0 : index
    %c0_1 = arith.constant 0 : index
    %c0_2 = arith.constant 0 : index
    %0 = vector.load %arg2[%c0, %c0_0, %c0_1, %c0_2] : memref<1x1x2x512xbf16, #tpu.memory_space<vmem>>, vector<1x1x2x512xbf16>
    %1 = vector.shape_cast %0 : vector<1x1x2x512xbf16> to vector<2x512xbf16>
    %2 = arith.extf %1 : vector<2x512xbf16> to vector<2x512xf32>
    %c0_3 = arith.constant 0 : index
    %c0_4 = arith.constant 0 : index
    %3 = vector.load %arg3[%c0_3, %c0_4] : memref<1x512xf32, #tpu.memory_space<vmem>>, vector<1x512xf32>
    %4 = vector.broadcast %3 : vector<1x512xf32> to vector<2x512xf32>
    %5 = arith.mulf %2, %4 : vector<2x512xf32>
    %c0_5 = arith.constant 0 : index
    %c0_6 = arith.constant 0 : index
    %6 = vector.load %arg4[%c0_5, %c0_6] : memref<1x512xf32, #tpu.memory_space<vmem>>, vector<1x512xf32>
    %7 = vector.broadcast %6 : vector<1x512xf32> to vector<2x512xf32>
    %8 = arith.addf %5, %7 : vector<2x512xf32>
    %cst = arith.constant 0.000000e+00 : f32
    %9 = vector.broadcast %cst : f32 to vector<2x512xf32>
    %10 = arith.cmpf oge, %8, %9 : vector<2x512xf32>
    %cst_7 = arith.constant 2.000000e-01 : f32
    %11 = vector.broadcast %cst_7 : f32 to vector<2x512xf32>
    %12 = arith.mulf %11, %8 : vector<2x512xf32>
    %13 = arith.select %10, %8, %12 : vector<2x512xi1>, vector<2x512xf32>
    %14 = arith.truncf %13 : vector<2x512xf32> to vector<2x512xbf16>
    %c0_8 = arith.constant 0 : index
    %c0_9 = arith.constant 0 : index
    %c0_10 = arith.constant 0 : index
    %c0_11 = arith.constant 0 : index
    %15 = vector.load %arg5[%c0_8, %c0_9, %c0_10, %c0_11] : memref<1x1x2x512xbf16, #tpu.memory_space<vmem>>, vector<1x1x2x512xbf16>
    %16 = vector.shape_cast %15 : vector<1x1x2x512xbf16> to vector<2x512xbf16>
    %17 = vector.shape_cast %14 : vector<2x512xbf16> to vector<1x1x2x512xbf16>
    tpu.vector_store %arg5[%c0_8, %c0_9, %c0_10, %c0_11], %17 {strides = array<i32>} : memref<1x1x2x512xbf16, #tpu.memory_space<vmem>>, vector<1x1x2x512xbf16>,
    return
  }
  func.func @transform_0(%arg0: i32, %arg1: i32) -> (i32, i32, i32, i32) {
    %c0_i32 = arith.constant 0 : i32
    %c0_i32_0 = arith.constant 0 : i32
    %c0_i32_1 = arith.constant 0 : i32
    return %arg0, %arg1, %c0_i32, %c0_i32_0 : i32, i32, i32, i32
  }
  func.func @transform_1(%arg0: i32, %arg1: i32) -> (i32, i32) {
    %c0_i32 = arith.constant 0 : i32
    %c0_i32_0 = arith.constant 0 : i32
    %c0_i32_1 = arith.constant 0 : i32
    return %c0_i32, %c0_i32_0 : i32, i32
  }
  func.func @transform_2(%arg0: i32, %arg1: i32) -> (i32, i32) {
    %c0_i32 = arith.constant 0 : i32
    %c0_i32_0 = arith.constant 0 : i32
    %c0_i32_1 = arith.constant 0 : i32
    return %c0_i32, %c0_i32_0 : i32, i32
  }
  func.func @transform_3(%arg0: i32, %arg1: i32) -> (i32, i32, i32, i32) {
    %c0_i32 = arith.constant 0 : i32
    %c0_i32_0 = arith.constant 0 : i32
    %c0_i32_1 = arith.constant 0 : i32
    return %arg0, %arg1, %c0_i32, %c0_i32_0 : i32, i32, i32, i32
  }
}

module attributes {stable_mosaic.version = 11 : i64} {
  func.func @_head_kernel(%arg0: i32, %arg1: memref<1x512xbf16, #tpu.memory_space<vmem>>, %arg2: memref<512x128xbf16, #tpu.memory_space<vmem>>, %arg3: memref<1x128xf32, #tpu.memory_space<vmem>>, %arg4: memref<128x128xf32, #tpu.memory_space<vmem>>, %arg5: memref<1x128xf32, #tpu.memory_space<vmem>>, %arg6: memref<1x128xf32, #tpu.memory_space<vmem>>, %arg7: memref<1x128xf32, #tpu.memory_space<vmem>>) attributes {dimension_semantics = [#tpu.dimension_semantics<arbitrary>], iteration_bounds = array<i64: 4>, scalar_prefetch = 0 : i64, scratch_operands = 1 : i64, tpu.core_type = #tpu.core_type<tc>, window_params = [{transform_indices = @transform_0, window_bounds = array<i64: 1, 512>}, {transform_indices = @transform_1, window_bounds = array<i64: 512, 128>}, {pipeline_mode = #tpu.pipeline_mode<synchronous>, transform_indices = @transform_2, window_bounds = array<i64: 1, 128>}, {pipeline_mode = #tpu.pipeline_mode<synchronous>, transform_indices = @transform_3, window_bounds = array<i64: 128, 128>}, {pipeline_mode = #tpu.pipeline_mode<synchronous>, transform_indices = @transform_4, window_bounds = array<i64: 1, 128>}, {pipeline_mode = #tpu.pipeline_mode<synchronous>, transform_indices = @transform_5, window_bounds = array<i64: 1, 128>}]} {
    %c0_i32 = arith.constant 0 : i32
    %0 = arith.cmpi eq, %arg0, %c0_i32 : i32
    %1 = arith.extui %0 : i1 to i32
    %c0_i32_0 = arith.constant 0 : i32
    %2 = arith.cmpi ne, %1, %c0_i32_0 : i32
    scf.if %2 {
      %cst_9 = arith.constant 0.000000e+00 : f32
      %12 = vector.broadcast %cst_9 : f32 to vector<1x128xf32>
      %c0_10 = arith.constant 0 : index
      %c0_11 = arith.constant 0 : index
      %13 = vector.load %arg7[%c0_10, %c0_11] : memref<1x128xf32, #tpu.memory_space<vmem>>, vector<1x128xf32>
      tpu.vector_store %arg7[%c0_10, %c0_11], %12 {strides = array<i32>} : memref<1x128xf32, #tpu.memory_space<vmem>>, vector<1x128xf32>,
    } else {
    }
    %c0 = arith.constant 0 : index
    %c0_1 = arith.constant 0 : index
    %3 = vector.load %arg7[%c0, %c0_1] : memref<1x128xf32, #tpu.memory_space<vmem>>, vector<1x128xf32>
    %c0_2 = arith.constant 0 : index
    %c0_3 = arith.constant 0 : index
    %4 = vector.load %arg1[%c0_2, %c0_3] : memref<1x512xbf16, #tpu.memory_space<vmem>>, vector<1x512xbf16>
    %c0_4 = arith.constant 0 : index
    %c0_5 = arith.constant 0 : index
    %5 = vector.load %arg2[%c0_4, %c0_5] : memref<512x128xbf16, #tpu.memory_space<vmem>>, vector<512x128xbf16>
    %cst = arith.constant dense<0.000000e+00> : vector<1x128xf32>
    %6 = tpu.matmul %4, %5, %cst {dimension_numbers = #tpu.dot_dimension_numbers<[1], [0], [0], [1], [0, 0, 1, 1], [], []>} : vector<1x512xbf16>, vector<512x128xbf16>, vector<1x128xf32> -> vector<1x128xf32>
    %7 = arith.addf %3, %6 : vector<1x128xf32>
    %c0_6 = arith.constant 0 : index
    %c0_7 = arith.constant 0 : index
    %8 = vector.load %arg7[%c0_6, %c0_7] : memref<1x128xf32, #tpu.memory_space<vmem>>, vector<1x128xf32>
    tpu.vector_store %arg7[%c0_6, %c0_7], %7 {strides = array<i32>} : memref<1x128xf32, #tpu.memory_space<vmem>>, vector<1x128xf32>,
    %c3_i32 = arith.constant 3 : i32
    %9 = arith.cmpi eq, %arg0, %c3_i32 : i32
    %10 = arith.extui %9 : i1 to i32
    %c0_i32_8 = arith.constant 0 : i32
    %11 = arith.cmpi ne, %10, %c0_i32_8 : i32
    scf.if %11 {
      %c0_9 = arith.constant 0 : index
      %c0_10 = arith.constant 0 : index
      %12 = vector.load %arg7[%c0_9, %c0_10] : memref<1x128xf32, #tpu.memory_space<vmem>>, vector<1x128xf32>
      %c0_11 = arith.constant 0 : index
      %c0_12 = arith.constant 0 : index
      %13 = vector.load %arg3[%c0_11, %c0_12] : memref<1x128xf32, #tpu.memory_space<vmem>>, vector<1x128xf32>
      %14 = arith.addf %12, %13 : vector<1x128xf32>
      %c0_13 = arith.constant 0 : index
      %c0_14 = arith.constant 0 : index
      %15 = vector.load %arg4[%c0_13, %c0_14] : memref<128x128xf32, #tpu.memory_space<vmem>>, vector<128x128xf32>
      %cst_15 = arith.constant dense<0.000000e+00> : vector<1x128xf32>
      %16 = tpu.matmul %14, %15, %cst_15 {dimension_numbers = #tpu.dot_dimension_numbers<[1], [0], [0], [1], [0, 0, 1, 1], [], []>} : vector<1x128xf32>, vector<128x128xf32>, vector<1x128xf32> -> vector<1x128xf32>
      %c0_16 = arith.constant 0 : index
      %c0_17 = arith.constant 0 : index
      %17 = vector.load %arg5[%c0_16, %c0_17] : memref<1x128xf32, #tpu.memory_space<vmem>>, vector<1x128xf32>
      %18 = arith.addf %16, %17 : vector<1x128xf32>
      %cst_18 = arith.constant 0.000000e+00 : f32
      %19 = vector.broadcast %cst_18 : f32 to vector<1x128xf32>
      %20 = arith.subf %19, %18 : vector<1x128xf32>
      %21 = math.exp %20 : vector<1x128xf32>
      %cst_19 = arith.constant 1.000000e+00 : f32
      %22 = vector.broadcast %cst_19 : f32 to vector<1x128xf32>
      %23 = arith.addf %22, %21 : vector<1x128xf32>
      %cst_20 = arith.constant 1.000000e+00 : f32
      %24 = vector.broadcast %cst_20 : f32 to vector<1x128xf32>
      %25 = arith.divf %24, %23 : vector<1x128xf32>
      %c0_21 = arith.constant 0 : index
      %c0_22 = arith.constant 0 : index
      %26 = vector.load %arg6[%c0_21, %c0_22] : memref<1x128xf32, #tpu.memory_space<vmem>>, vector<1x128xf32>
      tpu.vector_store %arg6[%c0_21, %c0_22], %25 {strides = array<i32>} : memref<1x128xf32, #tpu.memory_space<vmem>>, vector<1x128xf32>,
    } else {
    }
    return
  }
  func.func @transform_0(%arg0: i32) -> (i32, i32) {
    %c0_i32 = arith.constant 0 : i32
    %c0_i32_0 = arith.constant 0 : i32
    return %c0_i32, %arg0 : i32, i32
  }
  func.func @transform_1(%arg0: i32) -> (i32, i32) {
    %c0_i32 = arith.constant 0 : i32
    %c0_i32_0 = arith.constant 0 : i32
    return %arg0, %c0_i32 : i32, i32
  }
  func.func @transform_2(%arg0: i32) -> (i32, i32) {
    %c0_i32 = arith.constant 0 : i32
    %c0_i32_0 = arith.constant 0 : i32
    %c0_i32_1 = arith.constant 0 : i32
    return %c0_i32, %c0_i32_0 : i32, i32
  }
  func.func @transform_3(%arg0: i32) -> (i32, i32) {
    %c0_i32 = arith.constant 0 : i32
    %c0_i32_0 = arith.constant 0 : i32
    %c0_i32_1 = arith.constant 0 : i32
    return %c0_i32, %c0_i32_0 : i32, i32
  }
  func.func @transform_4(%arg0: i32) -> (i32, i32) {
    %c0_i32 = arith.constant 0 : i32
    %c0_i32_0 = arith.constant 0 : i32
    %c0_i32_1 = arith.constant 0 : i32
    return %c0_i32, %c0_i32_0 : i32, i32
  }
  func.func @transform_5(%arg0: i32) -> (i32, i32) {
    %c0_i32 = arith.constant 0 : i32
    %c0_i32_0 = arith.constant 0 : i32
    %c0_i32_1 = arith.constant 0 : i32
    return %c0_i32, %c0_i32_0 : i32, i32
  }
}

</mosaic_0001>

<bundles_post_ra>
// kernel: discriminator_forward.8
= control target key start
LH: loop header
LB: loop body
LE: loop exit
PB: predicated region body
PF: predicated region fallthrough
CT: control target
= control target key end

     0   :  { %s853_s15 = smov 0   ;;  %s855_s16 = smov 0   ;;  %s925_s0 = inlined_call_operand.vmem [shape: bf16[1,17,17,12], index: 0, kind: input, shape index: {}, may-alias: {0,1}]   ;;  %s926_s1 = inlined_call_operand.vmem [shape: bf16[1,17,17,12], index: 1, kind: input, shape index: {}, may-alias: {0,1}]   ;;  %s927_s2 = inlined_call_operand.vmem [shape: bf16[2,2,12,128], index: 2, kind: input, shape index: {}]   ;;  %s928_s3 = inlined_call_operand.vmem [shape: f32[1,128], index: 3, kind: input, shape index: {}]   ;;  %s929_s4 = inlined_call_operand.vmem [shape: bf16[1,16,16,128], index: 4, kind: output, shape index: {}]  }
   0x1   :  { %s857_s17 = smov 0  }
   0x2 LB: > { %s23_s18 = sadd.s32 1, %s820_s16  ;;  %p696_p0 = scmp.ge.s32.totalorder %s824_s17, 1  ;;  %s824_s17 = sphi %s857_s17, %s14_s17   ;;  %s820_s16 = sphi %s855_s16, %s931_s16   ;;  %s816_s15 = sphi %s853_s15, %s930_s15  }
   0x3   : > { %p24_p1 = scmp.ge.s32.totalorder %s23_s18, 16  ;;  %p202_p2 = scmp.lt.s32.totalorder %s824_s17, 17 }
   0x5   : > { %s933_s18 = smov (%p24_p1, %s23_s18), 0  ;;  %p203_p3 = pnand %p696_p0, %p202_p2 }
   0x6   : > { %p248_p4 = scmp.lt.s32.totalorder (!%p203_p3), %s816_s15, 16  ;;  %s255_s23 = sadd.s32 (!%p203_p3), 1, %s816_s15 }
   0x7   : > { %206 = sbr.rel (%p203_p3) target bundleno = 242 (0xf2), region = 36  ;;  %p258_p5 = scmp.lt.s32.totalorder (!%p203_p3), %s255_s23, 16 }
   0x8   : > { %p268_p6 = scmp.lt.s32.totalorder (!%p203_p3), %s816_s15, 15 }
   0xc   : > { %vm314_vm0 = vcmask 1045504   ;;  %v826_v0 = vmov 0.0   ;;  %v793_v1 = vld [vmem:[%s927_s2] sm:$0x3f]   ;;  %vm827_vm1 = vmmov 0   ;;  %s249_s24 = scalar_select %p248_p4, %s816_s15, 16 }
   0xd   : > { %747 = vmatprep.subr.bf16.mxu1 %v826_v0  ;;  %741 = vmatprep.subr.bf16.mxu0 %v826_v0  ;;  %v794_v2 = vld [vmem:[%s927_s2 + $0x8] sm:$0x3f]   ;;  %v367_v3 = vsel %vm314_vm0, %v793_v1, 0  ;;  %v798_v5 = vld [vmem:[%s927_s2 + $0x18] sm:$0x3f]   ;;  %s935_s23 = smov (!%p258_p5, %s255_s23), 16 }
   0xe   : > { %749 = vmatprep.mubr.msk.bf16.mxu1 %vm827_vm1, %v826_v0  ;;  %743 = vmatprep.mubr.msk.bf16.mxu0 %vm827_vm1, %v826_v0  ;;  %v316_v4 = vsel %vm314_vm0, %v794_v2, 0  ;;  %s765_s25 = smul.u32 12, %s249_s24  ;;  %vm310_vm2 = vcmask 97280   ;;  %v509_v7 = vsel %vm314_vm0, %v798_v5, 0  ;;  %vm292_vm3 = vsmask.f32 7424 }
   0xf   : > { %748 = vmatpush3.bf16.msra.mxu1 %v367_v3  ;;  %742 = vmatpush3.bf16.msra.mxu0 %v316_v4  ;;  %s766_s5 = smul.u32 12, %s935_s23  ;;  %v797_v12 = vld [vmem:[%s927_s2 + $0x10] sm:$0x3f]   ;;  %v720_v42 = vld [vmem:[%s928_s3] ss:$0 sm:$0xff]  ;;  %s937_s15 = smov (!%p268_p6, %s816_s15), 15 }
  0x10   : > { %759 = vmatprep.subr.bf16.mxu1 %v826_v0  ;;  %753 = vmatprep.subr.bf16.mxu0 %v826_v0  ;;  %s254_s30 = scalar_lea.vmem %s925_s0, %s765_s25  ;;  %v429_v20 = vsel %vm314_vm0, %v797_v12, 0  ;;  %s725_s13 = sshll.u32 %s937_s15, 3 }
  0x11   : > { %v795_v6 = vld [vmem:[%s254_s30] sm:$0xff]   ;;  %v796_v8 = vld [vmem:[%s254_s30 + $0x8] ss:$0 sps:$4 sm:$0x11]   ;;  %s264_s10 = scalar_lea.vmem %s926_s1, %s766_s5  ;;  %s274_s20 = scalar_lea.vmem %s929_s4, %s725_s13 }
  0x12   : > { %750 = vmatmul.mubr.msk.bf16.vlgmr.msra.gmra.mxu1 %vm310_vm2, %v795_v6  ;;  %v294_v9 = vshrl.u32 %v795_v6, 16  ;;  %v296_v10 = vshll.u32 %v795_v6, 16  ;;  %v301_v11 = vshll.u32 %v796_v8, 16  ;;  %v799_v14 = vld [vmem:[%s264_s10] sm:$0xff]  }
  0x13   : > { %760 = vmatpush3.bf16.msra.mxu1 %v509_v7  ;;  %761 = vmatprep.mubr.msk.bf16.mxu1 %vm827_vm1, %v826_v0  ;;  %v800_v16 = vld [vmem:[%s264_s10 + $0x8] ss:$0 sps:$4 sm:$0x11]   ;;  %v489_v18 = vshrl.u32 %v799_v14, 16  ;;  %v491_v19 = vshll.u32 %v799_v14, 16  ;;  %v801_v27 = vld [vmem:[%s264_s10] sm:$0xff]  }
  0x14   : > { %v298_v13 = vrot.slane %v296_v10, 1  ;;  %v303_v15 = vrot.slane %v301_v11, 1  ;;  %v496_v21 = vshll.u32 %v800_v16, 16 }
  0x15   : > { %v493_v23 = vrot.slane %v491_v19, 1 }
  0x16   : > { %v299_v17 = vor.u32 %v298_v13, %v294_v9  ;;  %v498_v24 = vrot.slane %v496_v21, 1 }
  0x17   : > { %v494_v25 = vor.u32 %v493_v23, %v489_v18 }
  0x18   : > { %v304_v22 = vsel %vm292_vm3, %v299_v17, %v303_v15 }
  0x19   : > { %744 = vmatmul.mubr.msk.bf16.vlgmr.msra.gmra.mxu0 %vm310_vm2, %v304_v22  ;;  %v499_v26 = vsel %vm292_vm3, %v494_v25, %v498_v24 }
  0x1a   : > { %754 = vmatpush3.bf16.msra.mxu0 %v429_v20  ;;  %755 = vmatprep.mubr.msk.bf16.mxu0 %vm827_vm1, %v826_v0 }
  0x1b   : > { %762 = vmatmul.mubr.msk.bf16.vlgmr.msra.gmra.mxu1 %vm310_vm2, %v499_v26 }
  0x21   : > { %756 = vmatmul.mubr.msk.bf16.vlgmr.msra.gmra.mxu0 %vm310_vm2, %v801_v27 }
  0xd2   : > { %v403_v28 = vpop.f32.mrf.mxu1 }
  0xd4   : > { %v751_v29 = vpop.f32.mrf.mxu1 }
  0xd6   : > { %v406_v30 = vpop.f32.mrf.mxu1 }
  0xd8   : > { %v752_v31 = vpop.f32.mrf.mxu1 }
  0xd9   : > { %v352_v32 = vpop.f32.mrf.mxu0 }
  0xda   : > { %v404_v38 = vadd.f32 %v403_v28, %v352_v32 }
  0xdb   : > { %v745_v33 = vpop.f32.mrf.mxu0  ;;  %v545_v35 = vpop.f32.mrf.mxu1 }
  0xdd   : > { %v355_v34 = vpop.f32.mrf.mxu0  ;;  %v763_v37 = vpop.f32.mrf.mxu1 }
  0xde   : > { %v407_v45 = vadd.f32 %v406_v30, %v355_v34 }
  0xdf   : > { %v746_v36 = vpop.f32.mrf.mxu0  ;;  %v548_v40 = vpop.f32.mrf.mxu1 }
  0xe1   : > { %v465_v39 = vpop.f32.mrf.mxu0  ;;  %v764_v44 = vpop.f32.mrf.mxu1 }
  0xe2   : > { %v472_v41 = vadd.f32 %v465_v39, %v404_v38 }
  0xe3   : > { %v757_v43 = vpop.f32.mrf.mxu0 }
  0xe4   : > { %v552_v46 = vadd.f32 %v545_v35, %v472_v41 }
  0xe5   : > { %v468_v47 = vpop.f32.mrf.mxu0 }
  0xe6   : > { %v561_v48 = vadd.f32 %v720_v42, %v552_v46  ;;  %v473_v49 = vadd.f32 %v468_v47, %v407_v45 }
  0xe7   : > { %v758_v50 = vpop.f32.mrf.mxu0 }
  0xe8   : > { %v553_v51 = vadd.f32 %v548_v40, %v473_v49  ;;  %v565_v52 = vmul.f32 0.2, %v561_v48  ;;  %vm563_vm4 = vcmp.ge.f32.partialorder %v561_v48, 0.0 }
  0xea   : > { %v562_v53 = vadd.f32 %v720_v42, %v553_v51  ;;  %v567_v55 = vsel %vm563_vm4, %v561_v48, %v565_v52 }
  0xec   : > { %vm564_vm5 = vcmp.ge.f32.partialorder %v562_v53, 0.0  ;;  %v566_v54 = vmul.f32 0.2, %v562_v53 }
  0xee   : > { %v568_v56 = vsel %vm564_vm5, %v562_v53, %v566_v54 }
  0xef   : > { %v731_v57 = vpack.c.bf16 %v568_v56, %v567_v55 }
  0xf1   : > { %732 = vst [vmem:[%s274_s20] sm:$0xff] %v731_v57  }
  0xf2 PF: > { %s14_s17 = sadd.s32 1, %s824_s17   ;;  %s930_s15 = smov %s820_s16 }
  0xf3   : > { %p11_p7 = scmp.ge.s32.totalorder %s14_s17, 18   ;;  %s931_s16 = smov %s933_s18 }
  0xf5   :  { %13 = sbr.rel (!%p11_p7) target bundleno = 2 (0x2), region = 72 }

// kernel: discriminator_forward.9
= control target key start
LH: loop header
LB: loop body
LE: loop exit
PB: predicated region body
PF: predicated region fallthrough
CT: control target
= control target key end

     0   :  { %s1623_s15 = smov 0   ;;  %s1625_s16 = smov 0   ;;  %s1861_s0 = inlined_call_operand.vmem [shape: bf16[1,9,9,256], index: 0, kind: input, shape index: {}, may-alias: {0,1}]   ;;  %s1862_s1 = inlined_call_operand.vmem [shape: bf16[1,9,9,256], index: 1, kind: input, shape index: {}, may-alias: {0,1}]   ;;  %s1863_s2 = inlined_call_operand.vmem [shape: bf16[2,2,256,128], index: 2, kind: input, shape index: {}]   ;;  %s1864_s3 = inlined_call_operand.vmem [shape: bf16[1,8,8,128], index: 3, kind: output, shape index: {0}]   ;;  %s1865_s4 = inlined_call_operand.vmem [shape: f32[1,8,2,128], index: 4, kind: output, shape index: {1}]  }
   0x1   :  { %s1627_s17 = smov 0  }
   0x2 LB: > { %s24_s18 = sadd.s32 1, %s1592_s16  ;;  %p1211_p0 = scmp.ge.s32.totalorder %s1596_s17, 1  ;;  %s1596_s17 = sphi %s1627_s17, %s15_s17   ;;  %s1592_s16 = sphi %s1625_s16, %s1867_s16   ;;  %s1588_s15 = sphi %s1623_s15, %s1866_s15  }
   0x3   : > { %p25_p1 = scmp.ge.s32.totalorder %s24_s18, 8  ;;  %p207_p2 = scmp.lt.s32.totalorder %s1596_s17, 9 }
   0x5   : > { %s1869_s18 = smov (%p25_p1, %s24_s18), 0  ;;  %p208_p3 = pnand %p1211_p0, %p207_p2 }
   0x6   : > { %p260_p4 = scmp.lt.s32.totalorder (!%p208_p3), %s1588_s15, 8  ;;  %s267_s28 = sadd.s32 (!%p208_p3), 1, %s1588_s15 }
   0x7   : > { %211 = sbr.rel (%p208_p3) target bundleno = 294 (0x126), region = 32  ;;  %p270_p5 = scmp.lt.s32.totalorder (!%p208_p3), %s267_s28, 8 }
   0x8   : > { %p280_p6 = scmp.lt.s32.totalorder (!%p208_p3), %s1588_s15, 7 }
   0xc   : > { %v1502_v0 = vld [vmem:[%s1863_s2 + $0xf8] sm:$0xff]   ;;  %v1506_v4 = vld [vmem:[%s1863_s2 + $0xf0] sm:$0xff]   ;;  %v1510_v8 = vld [vmem:[%s1863_s2 + $0xe8] sm:$0xff]   ;;  %s261_s21 = scalar_select %p260_p4, %s1588_s15, 8 }
   0xd   : > { %v1503_v1 = vld [vmem:[%s1863_s2 + $0x78] sm:$0xff]   ;;  %1390 = vmatprep.subr.bf16.mxu0 %v1502_v0  ;;  %v1507_v5 = vld [vmem:[%s1863_s2 + $0x70] sm:$0xff]   ;;  %v1511_v9 = vld [vmem:[%s1863_s2 + $0x68] sm:$0xff]   ;;  %s1871_s28 = smov (!%p270_p5, %s267_s28), 8  ;;  %s1873_s15 = smov (!%p280_p6, %s1588_s15), 7 }
   0xe   : > { %v1504_v2 = vld [vmem:[%s1863_s2 + $0xb8] sm:$0xff]   ;;  %1412 = vmatprep.subr.bf16.mxu1 %v1503_v1  ;;  %v1508_v6 = vld [vmem:[%s1863_s2 + $0xb0] sm:$0xff]   ;;  %v1512_v10 = vld [vmem:[%s1863_s2 + $0xa8] sm:$0xff]   ;;  %s1388_s30 = sshll.u32 %s261_s21, 4  ;;  %s1216_s25 = sshll.u32 %s1873_s15, 2 }
   0xf   : > { %v1505_v3 = vld [vmem:[%s1863_s2 + $0x38] sm:$0xff]   ;;  %1391 = vmatpush3.bf16.msra.mxu0 %v1504_v2  ;;  %v1509_v7 = vld [vmem:[%s1863_s2 + $0x30] sm:$0xff]   ;;  %v1513_v11 = vld [vmem:[%s1863_s2 + $0x28] sm:$0xff]   ;;  %s266_s13 = scalar_lea.vmem %s1861_s0, %s1388_s30  ;;  %s1389_s30 = sshll.u32 %s1871_s28, 4 }
  0x10   : > { %1413 = vmatpush3.bf16.msra.mxu1 %v1505_v3  ;;  %1392 = vmatprep.subr.bf16.mxu0 %v1506_v4  ;;  %v1514_v12 = vld [vmem:[%s1863_s2 + $0xe0] sm:$0xff]   ;;  %v1518_v16 = vld [vmem:[%s1863_s2 + $0xd8] sm:$0xff]   ;;  %v1522_v20 = vld [vmem:[%s1863_s2 + $0xd0] sm:$0xff]   ;;  %s285_s29 = scalar_lea.vmem %s1864_s3, %s1216_s25 }
  0x11   : > { %1414 = vmatprep.subr.bf16.mxu1 %v1507_v5  ;;  %v1515_v13 = vld [vmem:[%s1863_s2 + $0x60] sm:$0xff]   ;;  %v1519_v17 = vld [vmem:[%s1863_s2 + $0x58] sm:$0xff]   ;;  %v1523_v21 = vld [vmem:[%s1863_s2 + $0x50] sm:$0xff]  }
  0x12   : > { %v1516_v14 = vld [vmem:[%s1863_s2 + $0xa0] sm:$0xff]   ;;  %v1520_v18 = vld [vmem:[%s1863_s2 + $0x98] sm:$0xff]   ;;  %v1524_v22 = vld [vmem:[%s1863_s2 + $0x90] sm:$0xff]  }
  0x13   : > { %1393 = vmatpush3.bf16.msra.mxu0 %v1508_v6  ;;  %v1517_v15 = vld [vmem:[%s1863_s2 + $0x20] sm:$0xff]   ;;  %v1521_v19 = vld [vmem:[%s1863_s2 + $0x18] sm:$0xff]   ;;  %v1525_v23 = vld [vmem:[%s1863_s2 + $0x10] sm:$0xff]  }
  0x14   : > { %1415 = vmatpush3.bf16.msra.mxu1 %v1509_v7  ;;  %1394 = vmatprep.subr.bf16.mxu0 %v1510_v8  ;;  %v1526_v24 = vld [vmem:[%s1863_s2 + $0xc8] sm:$0xff]   ;;  %v1530_v28 = vld [vmem:[%s1863_s2 + $0xc0] sm:$0xff]   ;;  %v1538_v38 = vld [vmem:[%s1863_s2 + $0x178] sm:$0xff]  }
  0x15   : > { %1416 = vmatprep.subr.bf16.mxu1 %v1511_v9  ;;  %v1527_v25 = vld [vmem:[%s1863_s2 + $0x48] sm:$0xff]   ;;  %v1531_v29 = vld [vmem:[%s1863_s2 + $0x40] sm:$0xff]   ;;  %v1539_v39 = vld [vmem:[%s1863_s2 + $0x1f8] sm:$0xff]  }
  0x16   : > { %v1528_v26 = vld [vmem:[%s1863_s2 + $0x88] sm:$0xff]   ;;  %v1532_v30 = vld [vmem:[%s1863_s2 + $0x80] sm:$0xff]   ;;  %v1540_v46 = vld [vmem:[%s1863_s2 + $0x138] sm:$0xff]  }
  0x17   : > { %1395 = vmatpush3.bf16.msra.mxu0 %v1512_v10  ;;  %v1529_v27 = vld [vmem:[%s1863_s2 + $0x8] sm:$0xff]   ;;  %v1533_v31 = vld [vmem:[%s1863_s2] sm:$0xff]   ;;  %v1541_v47 = vld [vmem:[%s1863_s2 + $0x1b8] sm:$0xff]  }
  0x18   : > { %1417 = vmatpush3.bf16.msra.mxu1 %v1513_v11  ;;  %1396 = vmatprep.subr.bf16.mxu0 %v1514_v12  ;;  %v295_v32 = vld [vmem:[%s266_s13] sm:$0xff]  ;;  %v328_v33 = vld [vmem:[%s266_s13 + $0x8] sm:$0x11]  ;;  %v1543_v50 = vld [vmem:[%s1863_s2 + $0x1f0] sm:$0xff]   ;;  %s276_s13 = scalar_lea.vmem %s1862_s1, %s1389_s30  ;;  %s1217_s30 = sshll.u32 %s1873_s15, 1 }
  0x19   : > { %1418 = vmatprep.subr.bf16.mxu1 %v1515_v13  ;;  %v1250_v34 = vcombine.low %v295_v32, %v328_v33  ;;  %v1251_v35 = vcombine.high %v295_v32, %v328_v33  ;;  %v1269_v36 = vcombine.high %v295_v32, %v295_v32  ;;  %v1268_v37 = vcombine.low %v295_v32, %v295_v32  ;;  %v1542_v51 = vld [vmem:[%s1863_s2 + $0x170] sm:$0xff]   ;;  %v1547_v54 = vld [vmem:[%s1863_s2 + $0x1e8] sm:$0xff]   ;;  %v1551_v58 = vld [vmem:[%s1863_s2 + $0x1e0] sm:$0xff]   ;;  %s293_s7 = scalar_lea.vmem %s1865_s4, %s1217_s30 }
  0x1a   : > { %v1545_v52 = vld [vmem:[%s1863_s2 + $0x1b0] sm:$0xff]   ;;  %v1546_v55 = vld [vmem:[%s1863_s2 + $0x168] sm:$0xff]   ;;  %v1550_v59 = vld [vmem:[%s1863_s2 + $0x160] sm:$0xff]  }
  0x1b   : > { %1397 = vmatpush3.bf16.msra.mxu0 %v1516_v14  ;;  %v378_v40 = vshrl.u32 %v1251_v35, 16  ;;  %v380_v41 = vshll.u32 %v1251_v35, 16  ;;  %654 = vmatprep.mubr.bf16.mxu1 %v1269_v36  ;;  %v371_v42 = vshrl.u32 %v1250_v34, 16  ;;  %v373_v43 = vshll.u32 %v1250_v34, 16  ;;  %v1544_v53 = vld [vmem:[%s1863_s2 + $0x130] sm:$0xff]   ;;  %v1549_v56 = vld [vmem:[%s1863_s2 + $0x1a8] sm:$0xff]  }
  0x1c   : > { %1419 = vmatpush3.bf16.msra.mxu1 %v1517_v15  ;;  %1398 = vmatprep.subr.bf16.mxu0 %v1518_v16  ;;  %v1548_v57 = vld [vmem:[%s1863_s2 + $0x128] sm:$0xff]   ;;  %v1553_v60 = vld [vmem:[%s1863_s2 + $0x1a0] sm:$0xff]   ;;  %v1555_v62 = vld [vmem:[%s1863_s2 + $0x1d8] sm:$0xff]  }
  0x1d   : > { %1420 = vmatprep.subr.bf16.mxu1 %v1519_v17  ;;  %v382_v44 = vrot.slane %v380_v41, 1  ;;  %v375_v45 = vrot.slane %v373_v43, 1  ;;  %v1552_v61 = vld [vmem:[%s1863_s2 + $0x120] sm:$0xff]   ;;  %v1554_v63 = vld [vmem:[%s1863_s2 + $0x158] sm:$0xff]   ;;  %v1559_v2 = vld [vmem:[%s1863_s2 + $0x1d0] sm:$0xff]  }
  0x1e   : > { %v1557_v0 = vld [vmem:[%s1863_s2 + $0x198] sm:$0xff]   ;;  %v1558_v3 = vld [vmem:[%s1863_s2 + $0x150] sm:$0xff]   ;;  %v1563_v6 = vld [vmem:[%s1863_s2 + $0x1c8] sm:$0xff]  }
  0x1f   : > { %1399 = vmatpush3.bf16.msra.mxu0 %v1520_v18  ;;  %v383_v48 = vor.u32 %v382_v44, %v378_v40  ;;  %v376_v49 = vor.u32 %v375_v45, %v371_v42  ;;  %v1556_v1 = vld [vmem:[%s1863_s2 + $0x118] sm:$0xff]   ;;  %v1561_v4 = vld [vmem:[%s1863_s2 + $0x190] sm:$0xff]   ;;  %v1562_v7 = vld [vmem:[%s1863_s2 + $0x148] sm:$0xff]  }
  0x20   : > { %1421 = vmatpush3.bf16.msra.mxu1 %v1521_v19  ;;  %1400 = vmatprep.subr.bf16.mxu0 %v1522_v20  ;;  %v1560_v5 = vld [vmem:[%s1863_s2 + $0x110] sm:$0xff]   ;;  %v1565_v8 = vld [vmem:[%s1863_s2 + $0x188] sm:$0xff]   ;;  %v1567_v10 = vld [vmem:[%s1863_s2 + $0x1c0] sm:$0xff]  }
  0x21   : > { %1422 = vmatprep.subr.bf16.mxu1 %v1523_v21  ;;  %514 = vmatprep.mubr.bf16.mxu0 %v383_v48  ;;  %v1564_v9 = vld [vmem:[%s1863_s2 + $0x108] sm:$0xff]   ;;  %v1566_v11 = vld [vmem:[%s1863_s2 + $0x140] sm:$0xff]  }
  0x22   : > { %v1569_v12 = vld [vmem:[%s1863_s2 + $0x180] sm:$0xff]   ;;  %v841_v14 = vld [vmem:[%s276_s13 + $0x8] sm:$0x11] }
  0x23   : > { %1401 = vmatpush3.bf16.msra.mxu0 %v1524_v22  ;;  %v662_v13 = vld [vmem:[%s276_s13] sm:$0xff] }
  0x24   : > { %1423 = vmatpush3.bf16.msra.mxu1 %v1525_v23  ;;  %1402 = vmatprep.subr.bf16.mxu0 %v1526_v24  ;;  %v1319_v15 = vcombine.high %v662_v13, %v662_v13  ;;  %v1368_v16 = vcombine.low %v662_v13, %v841_v14  ;;  %v1369_v17 = vcombine.high %v662_v13, %v841_v14  ;;  %v1568_v18 = vld [vmem:[%s1863_s2 + $0x100] sm:$0xff]  }
  0x25   : > { %1424 = vmatprep.subr.bf16.mxu1 %v1527_v25  ;;  %v1318_v23 = vcombine.low %v662_v13, %v662_v13 }
  0x26   : > { %v891_v19 = vshrl.u32 %v1369_v17, 16  ;;  %v893_v20 = vshll.u32 %v1369_v17, 16  ;;  %v884_v21 = vshrl.u32 %v1368_v16, 16  ;;  %v886_v22 = vshll.u32 %v1368_v16, 16 }
  0x27   : > { %1403 = vmatpush3.bf16.msra.mxu0 %v1528_v26 }
  0x28   : > { %1425 = vmatpush3.bf16.msra.mxu1 %v1529_v27  ;;  %1404 = vmatprep.subr.bf16.mxu0 %v1530_v28  ;;  %v895_v24 = vrot.slane %v893_v20, 1  ;;  %v888_v25 = vrot.slane %v886_v22, 1 }
  0x29   : > { %1426 = vmatprep.subr.bf16.mxu1 %v1531_v29 }
  0x2a   : > { %v896_v26 = vor.u32 %v895_v24, %v891_v19  ;;  %v889_v27 = vor.u32 %v888_v25, %v884_v21 }
  0x2b   : > { %1405 = vmatpush3.bf16.msra.mxu0 %v1532_v30 }
  0x2c   : > { %1427 = vmatpush3.bf16.msra.mxu1 %v1533_v31  ;;  %1434 = vmatprep.subr.bf16.mxu0 %v1538_v38 }
  0x2d   : > { %1456 = vmatprep.subr.bf16.mxu1 %v1539_v39 }
  0x2e   : > { %515 = vmatmul.mubr.bf16.vlgmr.msra.gmra.mxu0 %v376_v49 }
  0x2f   : > { %655 = vmatmul.mubr.bf16.vlgmr.msra.gmra.mxu1 %v1268_v37  ;;  %1435 = vmatpush3.bf16.msra.mxu0 %v1540_v46 }
  0x30   : > { %1457 = vmatpush3.bf16.msra.mxu1 %v1541_v47  ;;  %1436 = vmatprep.subr.bf16.mxu0 %v1542_v51 }
  0x31   : > { %1458 = vmatprep.subr.bf16.mxu1 %v1543_v50  ;;  %831 = vmatprep.mubr.bf16.mxu0 %v1319_v15 }
  0x32   : > { %1027 = vmatprep.mubr.bf16.mxu1 %v896_v26 }
  0x33   : > { %1437 = vmatpush3.bf16.msra.mxu0 %v1544_v53 }
  0x34   : > { %1459 = vmatpush3.bf16.msra.mxu1 %v1545_v52  ;;  %1438 = vmatprep.subr.bf16.mxu0 %v1546_v55 }
  0x35   : > { %1460 = vmatprep.subr.bf16.mxu1 %v1547_v54 }
  0x37   : > { %1439 = vmatpush3.bf16.msra.mxu0 %v1548_v57 }
  0x38   : > { %1461 = vmatpush3.bf16.msra.mxu1 %v1549_v56  ;;  %1440 = vmatprep.subr.bf16.mxu0 %v1550_v59 }
  0x39   : > { %1462 = vmatprep.subr.bf16.mxu1 %v1551_v58 }
  0x3b   : > { %1441 = vmatpush3.bf16.msra.mxu0 %v1552_v61 }
  0x3c   : > { %1463 = vmatpush3.bf16.msra.mxu1 %v1553_v60  ;;  %1442 = vmatprep.subr.bf16.mxu0 %v1554_v63 }
  0x3d   : > { %1464 = vmatprep.subr.bf16.mxu1 %v1555_v62 }
  0x3f   : > { %1443 = vmatpush3.bf16.msra.mxu0 %v1556_v1 }
  0x40   : > { %1465 = vmatpush3.bf16.msra.mxu1 %v1557_v0  ;;  %1444 = vmatprep.subr.bf16.mxu0 %v1558_v3 }
  0x41   : > { %1466 = vmatprep.subr.bf16.mxu1 %v1559_v2 }
  0x43   : > { %1445 = vmatpush3.bf16.msra.mxu0 %v1560_v5 }
  0x44   : > { %1467 = vmatpush3.bf16.msra.mxu1 %v1561_v4  ;;  %1446 = vmatprep.subr.bf16.mxu0 %v1562_v7 }
  0x45   : > { %1468 = vmatprep.subr.bf16.mxu1 %v1563_v6 }
  0x47   : > { %1447 = vmatpush3.bf16.msra.mxu0 %v1564_v9 }
  0x48   : > { %1469 = vmatpush3.bf16.msra.mxu1 %v1565_v8  ;;  %1448 = vmatprep.subr.bf16.mxu0 %v1566_v11 }
  0x49   : > { %1470 = vmatprep.subr.bf16.mxu1 %v1567_v10 }
  0x4b   : > { %1449 = vmatpush3.bf16.msra.mxu0 %v1568_v18 }
  0x4c   : > { %1471 = vmatpush3.bf16.msra.mxu1 %v1569_v12 }
  0x4e   : > { %832 = vmatmul.mubr.bf16.vlgmr.msra.gmra.mxu0 %v1318_v23 }
  0x4f   : > { %1028 = vmatmul.mubr.bf16.vlgmr.msra.gmra.mxu1 %v889_v27 }
  0xee   : > { %v1406_v31 = vpop.f32.mrf.mxu0 }
  0xef   : > { %v1428_v28 = vpop.f32.mrf.mxu1 }
  0xf0   : > { %v1407_v33 = vpop.f32.mrf.mxu0 }
  0xf1   : > { %v1429_v29 = vpop.f32.mrf.mxu1  ;;  %v1408_v36 = vadd.f32 %v1407_v33, %v1406_v31 }
  0xf2   : > { %v1409_v34 = vpop.f32.mrf.mxu0  ;;  %v1430_v37 = vadd.f32 %v1429_v29, %v1428_v28 }
  0xf3   : > { %v1431_v30 = vpop.f32.mrf.mxu1 }
  0xf4   : > { %v1410_v35 = vpop.f32.mrf.mxu0  ;;  %v657_v41 = vadd.f32 %v1430_v37, %v1408_v36 }
  0xf5   : > { %v1432_v32 = vpop.f32.mrf.mxu1 }
 0x10e   : > { %v1450_v38 = vpop.f32.mrf.mxu0 }
 0x10f   : > { %v1472_v39 = vpop.f32.mrf.mxu1 }
 0x110   : > { %v1451_v40 = vpop.f32.mrf.mxu0 }
 0x111   : > { %v1452_v42 = vadd.f32 %v1451_v40, %v1450_v38  ;;  %v1473_v43 = vpop.f32.mrf.mxu1 }
 0x112   : > { %v1453_v44 = vpop.f32.mrf.mxu0  ;;  %v1474_v46 = vadd.f32 %v1473_v43, %v1472_v39 }
 0x113   : > { %v839_v45 = vadd.f32 %v1452_v42, %v657_v41  ;;  %v1475_v47 = vpop.f32.mrf.mxu1 }
 0x114   : > { %v1454_v48 = vpop.f32.mrf.mxu0 }
 0x115   : > { %v1035_v49 = vadd.f32 %v1474_v46, %v839_v45  ;;  %v1476_v50 = vpop.f32.mrf.mxu1 }
 0x117   : > { %v1036_v51 = vpack.c.bf16 %v1035_v49, %v1035_v49  ;;  %v1038_v52 = vrot.slane %v1035_v49, 4  ;;  %v1045_v53 = vmul.f32 %v1035_v49, %v1035_v49 }
 0x119   : > { %1037 = vst [vmem:[%s285_s29] sm:$0xf] %v1036_v51  ;;  %v1039_v54 = vadd.f32 %v1038_v52, %v1035_v49  ;;  %v1046_v55 = vrot.slane %v1045_v53, 4 }
 0x11b   : > { %v1040_v56 = vrot.slane %v1039_v54, 2  ;;  %v1047_v57 = vadd.f32 %v1046_v55, %v1045_v53 }
 0x11d   : > { %v1041_v58 = vadd.f32 %v1040_v56, %v1039_v54  ;;  %v1048_v59 = vrot.slane %v1047_v57, 2 }
 0x11f   : > { %v1042_v60 = vrot.slane %v1041_v58, 1  ;;  %v1049_v61 = vadd.f32 %v1048_v59, %v1047_v57 }
 0x121   : > { %v1043_v62 = vadd.f32 %v1042_v60, %v1041_v58  ;;  %v1050_v63 = vrot.slane %v1049_v61, 1 }
 0x123   : > { %1044 = vst [vmem:[%s293_s7] sm:$0x1] %v1043_v62  ;;  %v1051_v0 = vadd.f32 %v1050_v63, %v1049_v61 }
 0x125   : > { %1052 = vst [vmem:[%s293_s7 + $0x1] sm:$0x1] %v1051_v0 }
 0x126 PF: > { %s15_s17 = sadd.s32 1, %s1596_s17   ;;  %s1866_s15 = smov %s1592_s16 }
 0x127   : > { %p12_p7 = scmp.ge.s32.totalorder %s15_s17, 10   ;;  %s1867_s16 = smov %s1869_s18 }
 0x129   :  { %14 = sbr.rel (!%p12_p7) target bundleno = 2 (0x2), region = 80 }

// kernel: discriminator_forward.10
= control target key start
LH: loop header
LB: loop body
LE: loop exit
PB: predicated region body
PF: predicated region fallthrough
CT: control target
= control target key end

     0   :  { %s387_s12 = smov 0   ;;  %s389_s13 = smov 0   ;;  %s419_s0 = inlined_call_operand.vmem [shape: bf16[1,8,8,128], index: 0, kind: input, shape index: {}]   ;;  %s420_s1 = inlined_call_operand.vmem [shape: f32[1,128], index: 1, kind: input, shape index: {}]   ;;  %s421_s2 = inlined_call_operand.vmem [shape: f32[1,128], index: 2, kind: input, shape index: {}]   ;;  %s422_s3 = inlined_call_operand.vmem [shape: bf16[1,8,8,128], index: 3, kind: output, shape index: {}]  }
   0x1   :  { %s391_s14 = smov 0  }
   0x2 LB: > { %s22_s15 = sadd.s32 1, %s361_s13  ;;  %p312_p0 = scmp.ge.s32.totalorder %s365_s14, 1  ;;  %s365_s14 = sphi %s391_s14, %s13_s14   ;;  %s361_s13 = sphi %s389_s13, %s424_s13   ;;  %s357_s12 = sphi %s387_s12, %s423_s12  }
   0x3   : > { %p23_p1 = scmp.ge.s32.totalorder %s22_s15, 8  ;;  %p156_p2 = scmp.lt.s32.totalorder %s365_s14, 9 }
   0x5   : > { %s426_s15 = smov (%p23_p1, %s22_s15), 0  ;;  %p157_p3 = pnand %p312_p0, %p156_p2 }
   0x6   : > { %p188_p4 = scmp.lt.s32.totalorder (!%p157_p3), %s357_s12, 7 }
   0x7   : > { %160 = sbr.rel (%p157_p3) target bundleno = 28 (0x1c), region = 32 }
   0xc   : > { %s428_s12 = smov (!%p188_p4, %s357_s12), 7  ;;  %v315_v1 = vld [vmem:[%s420_s1] ss:$0 sm:$0xff] }
   0xd   : > { %s313_s16 = sshll.u32 %s428_s12, 2  ;;  %v316_v3 = vld [vmem:[%s421_s2] ss:$0 sm:$0xff] }
   0xe   : > { %s193_s19 = scalar_lea.vmem %s419_s0, %s313_s16  ;;  %s201_s26 = scalar_lea.vmem %s422_s3, %s313_s16 }
   0xf   : > { %v202_v0 = vld [vmem:[%s193_s19] sm:$0xf] }
  0x10   : > { %v203_v2 = vunpack.c.l.bf16 %v202_v0 }
  0x12   : > { %v211_v4 = vmul.f32 %v315_v1, %v203_v2 }
  0x14   : > { %v219_v5 = vadd.f32 %v316_v3, %v211_v4 }
  0x16   : > { %vm220_vm0 = vcmp.ge.f32.partialorder %v219_v5, 0.0  ;;  %v221_v6 = vmul.f32 0.2, %v219_v5 }
  0x18   : > { %v222_v7 = vsel %vm220_vm0, %v219_v5, %v221_v6 }
  0x19   : > { %v223_v8 = vpack.c.bf16 %v222_v7, %v222_v7 }
  0x1b   : > { %224 = vst [vmem:[%s201_s26] sm:$0xf] %v223_v8 }
  0x1c PF: > { %s13_s14 = sadd.s32 1, %s365_s14   ;;  %s423_s12 = smov %s361_s13 }
  0x1d   : > { %p10_p5 = scmp.ge.s32.totalorder %s13_s14, 10   ;;  %s424_s13 = smov %s426_s15 }
  0x1f   :  { %12 = sbr.rel (!%p10_p5) target bundleno = 2 (0x2), region = 62 }

// kernel: discriminator_forward.12
= control target key start
LH: loop header
LB: loop body
LE: loop exit
PB: predicated region body
PF: predicated region fallthrough
CT: control target
= control target key end

     0   :  { %s430_s12 = smov 0   ;;  %s432_s13 = smov 0   ;;  %s469_s0 = inlined_call_operand.vmem [shape: bf16[1,4,4,256], index: 0, kind: input, shape index: {}]   ;;  %s470_s1 = inlined_call_operand.vmem [shape: f32[1,256], index: 1, kind: input, shape index: {}]   ;;  %s471_s2 = inlined_call_operand.vmem [shape: f32[1,256], index: 2, kind: input, shape index: {}]   ;;  %s472_s3 = inlined_call_operand.vmem [shape: bf16[1,4,4,256], index: 3, kind: output, shape index: {}]  }
   0x1   :  { %s434_s14 = smov 0  }
   0x2 LB: > { %s22_s15 = sadd.s32 1, %s404_s13  ;;  %p351_p0 = scmp.ge.s32.totalorder %s408_s14, 1  ;;  %s408_s14 = sphi %s434_s14, %s13_s14   ;;  %s404_s13 = sphi %s432_s13, %s474_s13   ;;  %s400_s12 = sphi %s430_s12, %s473_s12  }
   0x3   : > { %p23_p1 = scmp.ge.s32.totalorder %s22_s15, 4  ;;  %p157_p2 = scmp.lt.s32.totalorder %s408_s14, 5 }
   0x5   : > { %s476_s15 = smov (%p23_p1, %s22_s15), 0  ;;  %p158_p3 = pnand %p351_p0, %p157_p2 }
   0x6   : > { %p191_p4 = scmp.lt.s32.totalorder (!%p158_p3), %s400_s12, 3 }
   0x7   : > { %161 = sbr.rel (%p158_p3) target bundleno = 34 (0x22), region = 32 }
   0xc   : > { %v211_v0 = vlaneseq  ;;  %s478_s12 = smov (!%p191_p4, %s400_s12), 3  ;;  %v209_v2 = vld [vmem:[%s470_s1] sm:$0x3] }
   0xd   : > { %v222_v3 = vld [vmem:[%s471_s2] sm:$0x3]  ;;  %s360_s20 = sshll.u32 %s478_s12, 2 }
   0xe   : > { %v212_v1 = vshrl.u32 %v211_v0, 7  ;;  %s197_s23 = scalar_lea.vmem %s469_s0, %s360_s20  ;;  %s206_s26 = scalar_lea.vmem %s472_s3, %s360_s20 }
   0xf   : > { %v207_v6 = vld [vmem:[%s197_s23] sm:$0xf] }
  0x10   : > { %v213_v4 = vsub.s32 0, %v212_v1  ;;  %v217_v5 = vsub.s32 1, %v212_v1  ;;  %v208_v11 = vunpack.c.l.bf16 %v207_v6 }
  0x12   : > { %v214_v7 = vrot.slane %v209_v2, %v213_v4  ;;  %v218_v8 = vrot.slane %v209_v2, %v217_v5  ;;  %v227_v9 = vrot.slane %v222_v3, %v213_v4  ;;  %v231_v10 = vrot.slane %v222_v3, %v217_v5 }
  0x14   : > { %v219_v12 = vcombine.low %v214_v7, %v218_v8  ;;  %v232_v13 = vcombine.low %v227_v9, %v231_v10 }
  0x16   : > { %v221_v14 = vmul.f32 %v219_v12, %v208_v11 }
  0x18   : > { %v234_v15 = vadd.f32 %v232_v13, %v221_v14 }
  0x1a   : > { %vm235_vm0 = vcmp.ge.f32.partialorder %v234_v15, 0.0  ;;  %v236_v16 = vmul.f32 0.2, %v234_v15 }
  0x1c   : > { %v237_v17 = vsel %vm235_vm0, %v234_v15, %v236_v16 }
  0x1d   : > { %v239_v18 = vcombine.high %v237_v17, %v237_v17 }
  0x1f   : > { %v356_v19 = vpack.c.bf16 %v239_v18, %v237_v17 }
  0x21   : > { %357 = vst.sshfl [vmem:[%s206_s26] sm:$0x33 pattern:$0x76325410] %v356_v19 }
  0x22 PF: > { %s13_s14 = sadd.s32 1, %s408_s14   ;;  %s473_s12 = smov %s404_s13 }
  0x23   : > { %p10_p5 = scmp.ge.s32.totalorder %s13_s14, 6   ;;  %s474_s13 = smov %s476_s15 }
  0x25   :  { %12 = sbr.rel (!%p10_p5) target bundleno = 2 (0x2), region = 62 }

// kernel: discriminator_forward.11
= control target key start
LH: loop header
LB: loop body
LE: loop exit
PB: predicated region body
PF: predicated region fallthrough
CT: control target
= control target key end

     0   :  { %s3504_s15 = smov 0   ;;  %s3506_s16 = smov 0   ;;  %s4377_s0 = inlined_call_operand.vmem [shape: bf16[1,5,5,512], index: 0, kind: input, shape index: {}, may-alias: {0,1}]   ;;  %s4378_s1 = inlined_call_operand.vmem [shape: bf16[1,5,5,512], index: 1, kind: input, shape index: {}, may-alias: {0,1}]   ;;  %s4379_s2 = inlined_call_operand.vmem [shape: bf16[2,2,512,256], index: 2, kind: input, shape index: {}]   ;;  %s4380_s3 = inlined_call_operand.vmem [shape: bf16[1,4,4,256], index: 3, kind: output, shape index: {0}]   ;;  %s4381_s4 = inlined_call_operand.vmem [shape: f32[1,4,2,256], index: 4, kind: output, shape index: {1}]  }
   0x1   :  { %s3508_s17 = smov 0  }
   0x2 LB: > { %s24_s18 = sadd.s32 1, %s3472_s16  ;;  %p2547_p0 = scmp.ge.s32.totalorder %s3476_s17, 1  ;;  %s3476_s17 = sphi %s3508_s17, %s15_s17   ;;  %s3472_s16 = sphi %s3506_s16, %s4383_s16   ;;  %s3468_s15 = sphi %s3504_s15, %s4382_s15  }
   0x3   : > { %p25_p1 = scmp.ge.s32.totalorder %s24_s18, 4  ;;  %p207_p2 = scmp.lt.s32.totalorder %s3476_s17, 5 }
   0x5   : > { %s4385_s18 = smov (%p25_p1, %s24_s18), 0  ;;  %p208_p3 = pnand %p2547_p0, %p207_p2 }
   0x6   : > { %p262_p4 = scmp.lt.s32.totalorder (!%p208_p3), %s3468_s15, 4  ;;  %s269_s21 = sadd.s32 (!%p208_p3), 1, %s3468_s15 }
   0x7   : > { %211 = sbr.rel (%p208_p3) target bundleno = 491 (0x1eb), region = 32  ;;  %p272_p5 = scmp.lt.s32.totalorder (!%p208_p3), %s269_s21, 4 }
   0x8   : > { %p282_p6 = scmp.lt.s32.totalorder (!%p208_p3), %s3468_s15, 3 }
   0xc   : > { %v3054_v0 = vld [vmem:[%s4379_s2 + $0x274] ss:$8 sps:$4 sm:$0xff]   ;;  %v3058_v2 = vld [vmem:[%s4379_s2 + $0x270] ss:$8 sps:$4 sm:$0xff]   ;;  %v3060_v4 = vld [vmem:[%s4379_s2 + $0x264] ss:$8 sps:$4 sm:$0xff]  }
   0xd   : > { %v3056_v1 = vld [vmem:[%s4379_s2 + $0x374] ss:$8 sps:$4 sm:$0xff]   ;;  %793 = vmatprep.subr.bf16.mxu0 %v3054_v0  ;;  %v3059_v3 = vld [vmem:[%s4379_s2 + $0x370] ss:$8 sps:$4 sm:$0xff]   ;;  %v3062_v5 = vld [vmem:[%s4379_s2 + $0x364] ss:$8 sps:$4 sm:$0xff]  }
   0xe   : > { %834 = vmatprep.subr.bf16.mxu1 %v3056_v1  ;;  %794 = vmatpush1.bf16.msra.mxu0 %v3058_v2  ;;  %v3064_v6 = vld [vmem:[%s4379_s2 + $0x260] ss:$8 sps:$4 sm:$0xff]   ;;  %v3066_v8 = vld [vmem:[%s4379_s2 + $0x254] ss:$8 sps:$4 sm:$0xff]   ;;  %v3070_v10 = vld [vmem:[%s4379_s2 + $0x250] ss:$8 sps:$4 sm:$0xff]  }
   0xf   : > { %835 = vmatpush1.bf16.msra.mxu1 %v3059_v3  ;;  %795 = vmatprep.subr.bf16.mxu0 %v3060_v4  ;;  %v3065_v7 = vld [vmem:[%s4379_s2 + $0x360] ss:$8 sps:$4 sm:$0xff]   ;;  %v3068_v9 = vld [vmem:[%s4379_s2 + $0x354] ss:$8 sps:$4 sm:$0xff]   ;;  %v3071_v11 = vld [vmem:[%s4379_s2 + $0x350] ss:$8 sps:$4 sm:$0xff]  }
  0x10   : > { %836 = vmatprep.subr.bf16.mxu1 %v3062_v5  ;;  %v3072_v12 = vld [vmem:[%s4379_s2 + $0x244] ss:$8 sps:$4 sm:$0xff]   ;;  %v3076_v14 = vld [vmem:[%s4379_s2 + $0x240] ss:$8 sps:$4 sm:$0xff]   ;;  %v3078_v16 = vld [vmem:[%s4379_s2 + $0x234] ss:$8 sps:$4 sm:$0xff]  }
  0x11   : > { %v3074_v13 = vld [vmem:[%s4379_s2 + $0x344] ss:$8 sps:$4 sm:$0xff]   ;;  %v3077_v15 = vld [vmem:[%s4379_s2 + $0x340] ss:$8 sps:$4 sm:$0xff]   ;;  %v3080_v17 = vld [vmem:[%s4379_s2 + $0x334] ss:$8 sps:$4 sm:$0xff]  }
  0x12   : > { %796 = vmatpush1.bf16.msra.mxu0 %v3064_v6  ;;  %v3082_v18 = vld [vmem:[%s4379_s2 + $0x230] ss:$8 sps:$4 sm:$0xff]   ;;  %v3084_v20 = vld [vmem:[%s4379_s2 + $0x224] ss:$8 sps:$4 sm:$0xff]   ;;  %v3088_v22 = vld [vmem:[%s4379_s2 + $0x220] ss:$8 sps:$4 sm:$0xff]  }
  0x13   : > { %837 = vmatpush1.bf16.msra.mxu1 %v3065_v7  ;;  %797 = vmatprep.subr.bf16.mxu0 %v3066_v8  ;;  %v3083_v19 = vld [vmem:[%s4379_s2 + $0x330] ss:$8 sps:$4 sm:$0xff]   ;;  %v3086_v21 = vld [vmem:[%s4379_s2 + $0x324] ss:$8 sps:$4 sm:$0xff]   ;;  %v3089_v23 = vld [vmem:[%s4379_s2 + $0x320] ss:$8 sps:$4 sm:$0xff]  }
  0x14   : > { %838 = vmatprep.subr.bf16.mxu1 %v3068_v9  ;;  %v3090_v24 = vld [vmem:[%s4379_s2 + $0x214] ss:$8 sps:$4 sm:$0xff]   ;;  %v3094_v26 = vld [vmem:[%s4379_s2 + $0x210] ss:$8 sps:$4 sm:$0xff]   ;;  %v3096_v28 = vld [vmem:[%s4379_s2 + $0x204] ss:$8 sps:$4 sm:$0xff]  }
  0x15   : > { %v3092_v25 = vld [vmem:[%s4379_s2 + $0x314] ss:$8 sps:$4 sm:$0xff]   ;;  %v3095_v27 = vld [vmem:[%s4379_s2 + $0x310] ss:$8 sps:$4 sm:$0xff]   ;;  %v3098_v29 = vld [vmem:[%s4379_s2 + $0x304] ss:$8 sps:$4 sm:$0xff]  }
  0x16   : > { %798 = vmatpush1.bf16.msra.mxu0 %v3070_v10  ;;  %v3100_v30 = vld [vmem:[%s4379_s2 + $0x200] ss:$8 sps:$4 sm:$0xff]   ;;  %v3102_v32 = vld [vmem:[%s4379_s2 + $0x2f4] ss:$8 sps:$4 sm:$0xff]   ;;  %v3106_v34 = vld [vmem:[%s4379_s2 + $0x2f0] ss:$8 sps:$4 sm:$0xff]  }
  0x17   : > { %839 = vmatpush1.bf16.msra.mxu1 %v3071_v11  ;;  %799 = vmatprep.subr.bf16.mxu0 %v3072_v12  ;;  %v3101_v31 = vld [vmem:[%s4379_s2 + $0x300] ss:$8 sps:$4 sm:$0xff]   ;;  %v3104_v33 = vld [vmem:[%s4379_s2 + $0x3f4] ss:$8 sps:$4 sm:$0xff]   ;;  %v3107_v35 = vld [vmem:[%s4379_s2 + $0x3f0] ss:$8 sps:$4 sm:$0xff]  }
  0x18   : > { %840 = vmatprep.subr.bf16.mxu1 %v3074_v13  ;;  %v3108_v36 = vld [vmem:[%s4379_s2 + $0x2e4] ss:$8 sps:$4 sm:$0xff]   ;;  %s263_s27 = scalar_select %p262_p4, %s3468_s15, 4  ;;  %v3112_v38 = vld [vmem:[%s4379_s2 + $0x2e0] ss:$8 sps:$4 sm:$0xff]   ;;  %vm2303_vm0 = vcmask 1043456  }
  0x19   : > { %v3110_v37 = vld [vmem:[%s4379_s2 + $0x3e4] ss:$8 sps:$4 sm:$0xff]   ;;  %v3113_v39 = vld [vmem:[%s4379_s2 + $0x3e0] ss:$8 sps:$4 sm:$0xff]   ;;  %v3114_v40 = vld [vmem:[%s4379_s2 + $0x2d4] ss:$8 sps:$4 sm:$0xff]  }
  0x1a   : > { %800 = vmatpush1.bf16.msra.mxu0 %v3076_v14  ;;  %s3025_s10 = sshll.u32 %s263_s27, 4  ;;  %v3116_v41 = vld [vmem:[%s4379_s2 + $0x3d4] ss:$8 sps:$4 sm:$0xff]   ;;  %v3118_v42 = vld [vmem:[%s4379_s2 + $0x2d0] ss:$8 sps:$4 sm:$0xff]   ;;  %s4387_s21 = smov (!%p272_p5, %s269_s21), 4 }
  0x1b   : > { %841 = vmatpush1.bf16.msra.mxu1 %v3077_v15  ;;  %801 = vmatprep.subr.bf16.mxu0 %v3078_v16  ;;  %v3119_v43 = vld [vmem:[%s4379_s2 + $0x3d0] ss:$8 sps:$4 sm:$0xff]   ;;  %s3661_s23 = scalar_lea.vmem %s4377_s0, %s3025_s10  ;;  %v3120_v44 = vld [vmem:[%s4379_s2 + $0x2c4] ss:$8 sps:$4 sm:$0xff]   ;;  %v3124_v46 = vld [vmem:[%s4379_s2 + $0x2c0] ss:$8 sps:$4 sm:$0xff]  }
  0x1c   : > { %842 = vmatprep.subr.bf16.mxu1 %v3080_v17  ;;  %v3122_v45 = vld [vmem:[%s4379_s2 + $0x3c4] ss:$8 sps:$4 sm:$0xff]   ;;  %v3125_v50 = vld [vmem:[%s4379_s2 + $0x3c0] ss:$8 sps:$4 sm:$0xff]   ;;  %v3126_v51 = vld [vmem:[%s4379_s2 + $0x2b4] ss:$8 sps:$4 sm:$0xff]  }
  0x1d   : > { %v364_v47 = vld [vmem:[%s3661_s23] sm:$0x77]  ;;  %v365_v49 = vld [vmem:[%s3661_s23 + $0x8] sm:$0x77]  ;;  %v3128_v53 = vld [vmem:[%s4379_s2 + $0x3b4] ss:$8 sps:$4 sm:$0xff]  }
  0x1e   : > { %802 = vmatpush1.bf16.msra.mxu0 %v3082_v18  ;;  %v2621_v48 = vcombine.high %v364_v47, %v364_v47  ;;  %v2623_v52 = vcombine.high %v365_v49, %v365_v49  ;;  %v3130_v59 = vld [vmem:[%s4379_s2 + $0x2b0] ss:$8 sps:$4 sm:$0xff]   ;;  %v3132_v62 = vld [vmem:[%s4379_s2 + $0x2a4] ss:$8 sps:$4 sm:$0xff]   ;;  %v2620_v2 = vcombine.low %v364_v47, %v364_v47  ;;  %v2622_v3 = vcombine.low %v365_v49, %v365_v49  ;;  %v3136_v4 = vld [vmem:[%s4379_s2 + $0x2a0] ss:$8 sps:$4 sm:$0xff]  }
  0x1f   : > { %843 = vmatpush1.bf16.msra.mxu1 %v3083_v19  ;;  %803 = vmatprep.subr.bf16.mxu0 %v3084_v20  ;;  %v3131_v60 = vld [vmem:[%s4379_s2 + $0x3b0] ss:$8 sps:$4 sm:$0xff]   ;;  %v3134_v63 = vld [vmem:[%s4379_s2 + $0x3a4] ss:$8 sps:$4 sm:$0xff]   ;;  %v3137_v5 = vld [vmem:[%s4379_s2 + $0x3a0] ss:$8 sps:$4 sm:$0xff]  }
  0x20   : > { %844 = vmatprep.subr.bf16.mxu1 %v3086_v21  ;;  %v449_v54 = vshrl.u32 %v2621_v48, 16  ;;  %v451_v55 = vshll.u32 %v2621_v48, 16  ;;  %v463_v56 = vshrl.u32 %v2623_v52, 16  ;;  %v465_v57 = vshll.u32 %v2623_v52, 16  ;;  %v3138_v6 = vld [vmem:[%s4379_s2 + $0x294] ss:$8 sps:$4 sm:$0xff]  }
  0x21   : > { %v3140_v7 = vld [vmem:[%s4379_s2 + $0x394] ss:$8 sps:$4 sm:$0xff]   ;;  %v444_v8 = vshll.u32 %v2620_v2, 16  ;;  %v458_v9 = vshll.u32 %v2622_v3, 16  ;;  %v3142_v10 = vld [vmem:[%s4379_s2 + $0x290] ss:$8 sps:$4 sm:$0xff]  }
  0x22   : > { %804 = vmatpush1.bf16.msra.mxu0 %v3088_v22  ;;  %v453_v58 = vrot.slane %v451_v55, 1  ;;  %v467_v61 = vrot.slane %v465_v57, 1  ;;  %v3143_v11 = vld [vmem:[%s4379_s2 + $0x390] ss:$8 sps:$4 sm:$0xff]   ;;  %v3144_v12 = vld [vmem:[%s4379_s2 + $0x284] ss:$8 sps:$4 sm:$0xff]  }
  0x23   : > { %845 = vmatpush1.bf16.msra.mxu1 %v3089_v23  ;;  %805 = vmatprep.subr.bf16.mxu0 %v3090_v24  ;;  %v3146_v13 = vld [vmem:[%s4379_s2 + $0x384] ss:$8 sps:$4 sm:$0xff]   ;;  %v442_v14 = vshrl.u32 %v2620_v2, 16  ;;  %v446_v15 = vrot.slane %v444_v8, 1  ;;  %v456_v16 = vshrl.u32 %v2622_v3, 16  ;;  %v460_v17 = vrot.slane %v458_v9, 1 }
  0x24   : > { %846 = vmatprep.subr.bf16.mxu1 %v3092_v25  ;;  %v454_v0 = vor.u32 %v453_v58, %v449_v54  ;;  %v468_v1 = vor.u32 %v467_v61, %v463_v56  ;;  %v3148_v18 = vld [vmem:[%s4379_s2 + $0x280] ss:$8 sps:$4 sm:$0xff]   ;;  %v3156_v20 = vld [vmem:[%s4379_s2 + $0x74] ss:$8 sps:$4 sm:$0xff]   ;;  %v3154_v24 = vld [vmem:[%s4379_s2 + $0x70] ss:$8 sps:$4 sm:$0xff]  }
  0x25   : > { %v3149_v19 = vld [vmem:[%s4379_s2 + $0x380] ss:$8 sps:$4 sm:$0xff]   ;;  %v3159_v21 = vld [vmem:[%s4379_s2 + $0x174] ss:$8 sps:$4 sm:$0xff]   ;;  %v447_v22 = vor.u32 %v446_v15, %v442_v14  ;;  %v461_v23 = vor.u32 %v460_v17, %v456_v16  ;;  %v3157_v25 = vld [vmem:[%s4379_s2 + $0x170] ss:$8 sps:$4 sm:$0xff]  }
  0x26   : > { %806 = vmatpush1.bf16.msra.mxu0 %v3094_v26  ;;  %825 = vmatprep.mubr.bf16.mxu0 %v454_v0  ;;  %v3162_v26 = vld [vmem:[%s4379_s2 + $0x64] ss:$8 sps:$4 sm:$0xff]   ;;  %v3195_v47 = vld [vmem:[%s4379_s2 + $0x114] ss:$8 sps:$4 sm:$0xff]   ;;  %v3190_v48 = vld [vmem:[%s4379_s2 + $0x10] ss:$8 sps:$4 sm:$0xff]  }
  0x27   : > { %847 = vmatpush1.bf16.msra.mxu1 %v3095_v27  ;;  %807 = vmatprep.subr.bf16.mxu0 %v3096_v28  ;;  %v3165_v27 = vld [vmem:[%s4379_s2 + $0x164] ss:$8 sps:$4 sm:$0xff]   ;;  %v3160_v28 = vld [vmem:[%s4379_s2 + $0x60] ss:$8 sps:$4 sm:$0xff]   ;;  %v3193_v49 = vld [vmem:[%s4379_s2 + $0x110] ss:$8 sps:$4 sm:$0xff]  }
  0x28   : > { %848 = vmatprep.subr.bf16.mxu1 %v3098_v29  ;;  %866 = vmatprep.mubr.bf16.mxu1 %v468_v1  ;;  %v3163_v29 = vld [vmem:[%s4379_s2 + $0x160] ss:$8 sps:$4 sm:$0xff]   ;;  %v3198_v52 = vld [vmem:[%s4379_s2 + $0x4] ss:$8 sps:$4 sm:$0xff]   ;;  %v3204_v58 = vld [vmem:[%s4379_s2 + $0xf4] ss:$8 sps:$4 sm:$0xff]  }
  0x29   : > { %v3201_v54 = vld [vmem:[%s4379_s2 + $0x104] ss:$8 sps:$4 sm:$0xff]   ;;  %v3196_v56 = vld [vmem:[%s4379_s2] ss:$8 sps:$4 sm:$0xff]   ;;  %v3205_v61 = vld [vmem:[%s4379_s2 + $0x1f0] ss:$8 sps:$4 sm:$0xff]  }
  0x2a   : > { %808 = vmatpush1.bf16.msra.mxu0 %v3100_v30  ;;  %v3168_v30 = vld [vmem:[%s4379_s2 + $0x54] ss:$8 sps:$4 sm:$0xff]   ;;  %v3199_v57 = vld [vmem:[%s4379_s2 + $0x100] ss:$8 sps:$4 sm:$0xff]   ;;  %v3234_v14 = vld [vmem:[%s4379_s2 + $0xa4] ss:$8 sps:$4 sm:$0xff]  }
  0x2b   : > { %849 = vmatpush1.bf16.msra.mxu1 %v3101_v31  ;;  %809 = vmatprep.subr.bf16.mxu0 %v3102_v32  ;;  %v3171_v31 = vld [vmem:[%s4379_s2 + $0x154] ss:$8 sps:$4 sm:$0xff]   ;;  %v3166_v32 = vld [vmem:[%s4379_s2 + $0x50] ss:$8 sps:$4 sm:$0xff]   ;;  %v3208_v0 = vld [vmem:[%s4379_s2 + $0xe0] ss:$8 sps:$4 sm:$0xff]  }
  0x2c   : > { %850 = vmatprep.subr.bf16.mxu1 %v3104_v33  ;;  %v3169_v33 = vld [vmem:[%s4379_s2 + $0x150] ss:$8 sps:$4 sm:$0xff]   ;;  %v3211_v1 = vld [vmem:[%s4379_s2 + $0x1e0] ss:$8 sps:$4 sm:$0xff]   ;;  %v3216_v2 = vld [vmem:[%s4379_s2 + $0xd4] ss:$8 sps:$4 sm:$0xff]  }
  0x2d   : > { %v3219_v3 = vld [vmem:[%s4379_s2 + $0x1d4] ss:$8 sps:$4 sm:$0xff]   ;;  %v3220_v8 = vld [vmem:[%s4379_s2 + $0xc0] ss:$8 sps:$4 sm:$0xff]   ;;  %v3237_v15 = vld [vmem:[%s4379_s2 + $0x1a4] ss:$8 sps:$4 sm:$0xff]  }
  0x2e   : > { %810 = vmatpush2.bf16.msra.mxu0 %v3106_v34  ;;  %v3174_v34 = vld [vmem:[%s4379_s2 + $0x44] ss:$8 sps:$4 sm:$0xff]   ;;  %v3223_v9 = vld [vmem:[%s4379_s2 + $0x1c0] ss:$8 sps:$4 sm:$0xff]   ;;  %s3026_s24 = sshll.u32 %s4387_s21, 4  ;;  %s4389_s15 = smov (!%p282_p6, %s3468_s15), 3 }
  0x2f   : > { %851 = vmatpush2.bf16.msra.mxu1 %v3107_v35  ;;  %811 = vmatprep.subr.bf16.mxu0 %v3108_v36  ;;  %v3177_v35 = vld [vmem:[%s4379_s2 + $0x144] ss:$8 sps:$4 sm:$0xff]   ;;  %v3172_v36 = vld [vmem:[%s4379_s2 + $0x40] ss:$8 sps:$4 sm:$0xff]   ;;  %s3947_s6 = scalar_lea.vmem %s4378_s1, %s3026_s24  ;;  %s3027_s20 = sshll.u32 %s4389_s15, 2 }
  0x30   : > { %852 = vmatprep.subr.bf16.mxu1 %v3110_v37  ;;  %v3175_v37 = vld [vmem:[%s4379_s2 + $0x140] ss:$8 sps:$4 sm:$0xff]   ;;  %s288_s25 = scalar_lea.vmem %s4380_s3, %s3027_s20  ;;  %s297_s28 = scalar_lea.vmem %s4381_s4, %s3027_s20 }
  0x31   : > { %v3232_v16 = vld [vmem:[%s4379_s2 + $0xa0] ss:$8 sps:$4 sm:$0xff]  }
  0x32   : > { %812 = vmatpush2.bf16.msra.mxu0 %v3112_v38  ;;  %v3180_v38 = vld [vmem:[%s4379_s2 + $0x34] ss:$8 sps:$4 sm:$0xff]   ;;  %v3235_v17 = vld [vmem:[%s4379_s2 + $0x1a0] ss:$8 sps:$4 sm:$0xff]  }
  0x33   : > { %853 = vmatpush2.bf16.msra.mxu1 %v3113_v39  ;;  %813 = vmatprep.subr.bf16.mxu0 %v3114_v40  ;;  %v3183_v39 = vld [vmem:[%s4379_s2 + $0x134] ss:$8 sps:$4 sm:$0xff]   ;;  %v3178_v40 = vld [vmem:[%s4379_s2 + $0x30] ss:$8 sps:$4 sm:$0xff]  }
  0x34   : > { %854 = vmatprep.subr.bf16.mxu1 %v3116_v41  ;;  %v3181_v41 = vld [vmem:[%s4379_s2 + $0x130] ss:$8 sps:$4 sm:$0xff]  }
  0x36   : > { %814 = vmatpush2.bf16.msra.mxu0 %v3118_v42  ;;  %v3186_v42 = vld [vmem:[%s4379_s2 + $0x24] ss:$8 sps:$4 sm:$0xff]  }
  0x37   : > { %855 = vmatpush2.bf16.msra.mxu1 %v3119_v43  ;;  %815 = vmatprep.subr.bf16.mxu0 %v3120_v44  ;;  %v3189_v43 = vld [vmem:[%s4379_s2 + $0x124] ss:$8 sps:$4 sm:$0xff]   ;;  %v3184_v44 = vld [vmem:[%s4379_s2 + $0x20] ss:$8 sps:$4 sm:$0xff]  }
  0x38   : > { %856 = vmatprep.subr.bf16.mxu1 %v3122_v45  ;;  %v3187_v45 = vld [vmem:[%s4379_s2 + $0x120] ss:$8 sps:$4 sm:$0xff]  }
  0x3a   : > { %816 = vmatpush2.bf16.msra.mxu0 %v3124_v46  ;;  %v3192_v46 = vld [vmem:[%s4379_s2 + $0x14] ss:$8 sps:$4 sm:$0xff]  }
  0x3b   : > { %857 = vmatpush2.bf16.msra.mxu1 %v3125_v50  ;;  %817 = vmatprep.subr.bf16.mxu0 %v3126_v51  ;;  %v3810_v50 = vld [vmem:[%s3661_s23] sm:$0x33]  ;;  %v3813_v51 = vld [vmem:[%s3661_s23 + $0x8] sm:$0x33] }
  0x3c   : > { %858 = vmatprep.subr.bf16.mxu1 %v3128_v53  ;;  %v2689_v53 = vcombine.high %v3810_v50, %v3810_v50  ;;  %v2691_v55 = vcombine.high %v3813_v51, %v3813_v51 }
  0x3e   : > { %818 = vmatpush2.bf16.msra.mxu0 %v3130_v59  ;;  %v3207_v59 = vld [vmem:[%s4379_s2 + $0x1f4] ss:$8 sps:$4 sm:$0xff]  }
  0x3f   : > { %859 = vmatpush2.bf16.msra.mxu1 %v3131_v60  ;;  %819 = vmatprep.subr.bf16.mxu0 %v3132_v62  ;;  %v3202_v60 = vld [vmem:[%s4379_s2 + $0xf0] ss:$8 sps:$4 sm:$0xff]   ;;  %v3210_v62 = vld [vmem:[%s4379_s2 + $0xe4] ss:$8 sps:$4 sm:$0xff]  }
  0x40   : > { %860 = vmatprep.subr.bf16.mxu1 %v3134_v63  ;;  %v3213_v63 = vld [vmem:[%s4379_s2 + $0x1e4] ss:$8 sps:$4 sm:$0xff]  }
  0x42   : > { %820 = vmatpush2.bf16.msra.mxu0 %v3136_v4  ;;  %v3214_v4 = vld [vmem:[%s4379_s2 + $0xd0] ss:$8 sps:$4 sm:$0xff]  }
  0x43   : > { %861 = vmatpush2.bf16.msra.mxu1 %v3137_v5  ;;  %821 = vmatprep.subr.bf16.mxu0 %v3138_v6  ;;  %v3217_v5 = vld [vmem:[%s4379_s2 + $0x1d0] ss:$8 sps:$4 sm:$0xff]   ;;  %v3222_v6 = vld [vmem:[%s4379_s2 + $0xc4] ss:$8 sps:$4 sm:$0xff]  }
  0x44   : > { %862 = vmatprep.subr.bf16.mxu1 %v3140_v7  ;;  %v3225_v7 = vld [vmem:[%s4379_s2 + $0x1c4] ss:$8 sps:$4 sm:$0xff]  }
  0x46   : > { %822 = vmatpush2.bf16.msra.mxu0 %v3142_v10  ;;  %v3228_v10 = vld [vmem:[%s4379_s2 + $0xb4] ss:$8 sps:$4 sm:$0xff]  }
  0x47   : > { %863 = vmatpush2.bf16.msra.mxu1 %v3143_v11  ;;  %823 = vmatprep.subr.bf16.mxu0 %v3144_v12  ;;  %v3231_v11 = vld [vmem:[%s4379_s2 + $0x1b4] ss:$8 sps:$4 sm:$0xff]   ;;  %v3226_v12 = vld [vmem:[%s4379_s2 + $0xb0] ss:$8 sps:$4 sm:$0xff]  }
  0x48   : > { %864 = vmatprep.subr.bf16.mxu1 %v3146_v13  ;;  %v3229_v13 = vld [vmem:[%s4379_s2 + $0x1b0] ss:$8 sps:$4 sm:$0xff]  }
  0x4a   : > { %824 = vmatpush2.bf16.msra.mxu0 %v3148_v18  ;;  %v3240_v18 = vld [vmem:[%s4379_s2 + $0x94] ss:$8 sps:$4 sm:$0xff]  }
  0x4b   : > { %865 = vmatpush2.bf16.msra.mxu1 %v3149_v19  ;;  %1209 = vmatprep.subr.bf16.mxu0 %v3156_v20  ;;  %v3243_v19 = vld [vmem:[%s4379_s2 + $0x194] ss:$8 sps:$4 sm:$0xff]   ;;  %v3238_v20 = vld [vmem:[%s4379_s2 + $0x90] ss:$8 sps:$4 sm:$0xff]  }
  0x4c   : > { %1250 = vmatprep.subr.bf16.mxu1 %v3159_v21  ;;  %v3241_v21 = vld [vmem:[%s4379_s2 + $0x190] ss:$8 sps:$4 sm:$0xff]  }
  0x4d   : > { %826 = vmatmul.mubr.bf16.vlgmr.msra.gmra.mxu0 %v447_v22  ;;  %v3246_v22 = vld [vmem:[%s4379_s2 + $0x84] ss:$8 sps:$4 sm:$0xff]  }
  0x4e   : > { %867 = vmatmul.mubr.bf16.vlgmr.msra.gmra.mxu1 %v461_v23  ;;  %1210 = vmatpush1.bf16.msra.mxu0 %v3154_v24  ;;  %v3249_v23 = vld [vmem:[%s4379_s2 + $0x184] ss:$8 sps:$4 sm:$0xff]   ;;  %v3244_v24 = vld [vmem:[%s4379_s2 + $0x80] ss:$8 sps:$4 sm:$0xff]  }
  0x4f   : > { %1251 = vmatpush1.bf16.msra.mxu1 %v3157_v25  ;;  %1211 = vmatprep.subr.bf16.mxu0 %v3162_v26  ;;  %v3247_v25 = vld [vmem:[%s4379_s2 + $0x180] ss:$8 sps:$4 sm:$0xff]   ;;  %v3256_v26 = vld [vmem:[%s4379_s2 + $0x474] ss:$8 sps:$4 sm:$0xff]  }
  0x50   : > { %1252 = vmatprep.subr.bf16.mxu1 %v3165_v27  ;;  %1241 = vmatprep.mubr.bf16.mxu0 %v2689_v53  ;;  %v3259_v27 = vld [vmem:[%s4379_s2 + $0x574] ss:$8 sps:$4 sm:$0xff]   ;;  %v3289_v53 = vld [vmem:[%s4379_s2 + $0x524] ss:$8 sps:$4 sm:$0xff]  }
  0x51   : > { %1282 = vmatprep.mubr.bf16.mxu1 %v2691_v55  ;;  %v3287_v55 = vld [vmem:[%s4379_s2 + $0x520] ss:$8 sps:$4 sm:$0xff]  }
  0x52   : > { %1212 = vmatpush1.bf16.msra.mxu0 %v3160_v28  ;;  %v2688_v28 = vcombine.low %v3810_v50, %v3810_v50  ;;  %v3278_v50 = vld [vmem:[%s4379_s2 + $0x430] ss:$8 sps:$4 sm:$0xff]  }
  0x53   : > { %1253 = vmatpush1.bf16.msra.mxu1 %v3163_v29  ;;  %1213 = vmatprep.subr.bf16.mxu0 %v3168_v30  ;;  %v2690_v29 = vcombine.low %v3813_v51, %v3813_v51  ;;  %v3254_v30 = vld [vmem:[%s4379_s2 + $0x470] ss:$8 sps:$4 sm:$0xff]  }
  0x54   : > { %1254 = vmatprep.subr.bf16.mxu1 %v3171_v31  ;;  %v3257_v31 = vld [vmem:[%s4379_s2 + $0x570] ss:$8 sps:$4 sm:$0xff]  }
  0x55   : > { %v3281_v51 = vld [vmem:[%s4379_s2 + $0x530] ss:$8 sps:$4 sm:$0xff]  }
  0x56   : > { %1214 = vmatpush1.bf16.msra.mxu0 %v3166_v32  ;;  %v3262_v32 = vld [vmem:[%s4379_s2 + $0x464] ss:$8 sps:$4 sm:$0xff]  }
  0x57   : > { %1255 = vmatpush1.bf16.msra.mxu1 %v3169_v33  ;;  %1215 = vmatprep.subr.bf16.mxu0 %v3174_v34  ;;  %v3265_v33 = vld [vmem:[%s4379_s2 + $0x564] ss:$8 sps:$4 sm:$0xff]  }
  0x58   : > { %1256 = vmatprep.subr.bf16.mxu1 %v3177_v35  ;;  %v3956_v34 = vld [vmem:[%s3947_s6] sm:$0x33] }
  0x59   : > { %v2821_v35 = vcombine.high %v3956_v34, %v3956_v34 }
  0x5a   : > { %1216 = vmatpush1.bf16.msra.mxu0 %v3172_v36  ;;  %v3961_v36 = vld [vmem:[%s3947_s6 + $0x8] sm:$0x33] }
  0x5b   : > { %1257 = vmatpush1.bf16.msra.mxu1 %v3175_v37  ;;  %1217 = vmatprep.subr.bf16.mxu0 %v3180_v38  ;;  %v3260_v37 = vld [vmem:[%s4379_s2 + $0x460] ss:$8 sps:$4 sm:$0xff]  }
  0x5c   : > { %1258 = vmatprep.subr.bf16.mxu1 %v3183_v39  ;;  %v3263_v38 = vld [vmem:[%s4379_s2 + $0x560] ss:$8 sps:$4 sm:$0xff]   ;;  %v2823_v39 = vcombine.high %v3961_v36, %v3961_v36 }
  0x5e   : > { %1218 = vmatpush1.bf16.msra.mxu0 %v3178_v40  ;;  %v3268_v40 = vld [vmem:[%s4379_s2 + $0x454] ss:$8 sps:$4 sm:$0xff]  }
  0x5f   : > { %1259 = vmatpush1.bf16.msra.mxu1 %v3181_v41  ;;  %1219 = vmatprep.subr.bf16.mxu0 %v3186_v42  ;;  %v3271_v41 = vld [vmem:[%s4379_s2 + $0x554] ss:$8 sps:$4 sm:$0xff]   ;;  %v3266_v42 = vld [vmem:[%s4379_s2 + $0x450] ss:$8 sps:$4 sm:$0xff]  }
  0x60   : > { %1260 = vmatprep.subr.bf16.mxu1 %v3189_v43  ;;  %v3269_v43 = vld [vmem:[%s4379_s2 + $0x550] ss:$8 sps:$4 sm:$0xff]  }
  0x62   : > { %1220 = vmatpush1.bf16.msra.mxu0 %v3184_v44  ;;  %v3274_v44 = vld [vmem:[%s4379_s2 + $0x444] ss:$8 sps:$4 sm:$0xff]  }
  0x63   : > { %1261 = vmatpush1.bf16.msra.mxu1 %v3187_v45  ;;  %1221 = vmatprep.subr.bf16.mxu0 %v3192_v46  ;;  %v3277_v45 = vld [vmem:[%s4379_s2 + $0x544] ss:$8 sps:$4 sm:$0xff]   ;;  %v3272_v46 = vld [vmem:[%s4379_s2 + $0x440] ss:$8 sps:$4 sm:$0xff]  }
  0x64   : > { %1262 = vmatprep.subr.bf16.mxu1 %v3195_v47  ;;  %v3275_v47 = vld [vmem:[%s4379_s2 + $0x540] ss:$8 sps:$4 sm:$0xff]  }
  0x66   : > { %1222 = vmatpush1.bf16.msra.mxu0 %v3190_v48  ;;  %v3280_v48 = vld [vmem:[%s4379_s2 + $0x434] ss:$8 sps:$4 sm:$0xff]  }
  0x67   : > { %1263 = vmatpush1.bf16.msra.mxu1 %v3193_v49  ;;  %1223 = vmatprep.subr.bf16.mxu0 %v3198_v52  ;;  %v3283_v49 = vld [vmem:[%s4379_s2 + $0x534] ss:$8 sps:$4 sm:$0xff]   ;;  %v3286_v52 = vld [vmem:[%s4379_s2 + $0x424] ss:$8 sps:$4 sm:$0xff]  }
  0x68   : > { %1264 = vmatprep.subr.bf16.mxu1 %v3201_v54  ;;  %v3284_v54 = vld [vmem:[%s4379_s2 + $0x420] ss:$8 sps:$4 sm:$0xff]  }
  0x6a   : > { %1224 = vmatpush1.bf16.msra.mxu0 %v3196_v56  ;;  %v3292_v56 = vld [vmem:[%s4379_s2 + $0x414] ss:$8 sps:$4 sm:$0xff]  }
  0x6b   : > { %1265 = vmatpush1.bf16.msra.mxu1 %v3199_v57  ;;  %1225 = vmatprep.subr.bf16.mxu0 %v3204_v58  ;;  %v3295_v57 = vld [vmem:[%s4379_s2 + $0x514] ss:$8 sps:$4 sm:$0xff]   ;;  %v3290_v58 = vld [vmem:[%s4379_s2 + $0x410] ss:$8 sps:$4 sm:$0xff]  }
  0x6c   : > { %1266 = vmatprep.subr.bf16.mxu1 %v3207_v59  ;;  %v3293_v59 = vld [vmem:[%s4379_s2 + $0x510] ss:$8 sps:$4 sm:$0xff]  }
  0x6e   : > { %1226 = vmatpush2.bf16.msra.mxu0 %v3202_v60  ;;  %v3298_v60 = vld [vmem:[%s4379_s2 + $0x404] ss:$8 sps:$4 sm:$0xff]  }
  0x6f   : > { %1267 = vmatpush2.bf16.msra.mxu1 %v3205_v61  ;;  %1227 = vmatprep.subr.bf16.mxu0 %v3210_v62  ;;  %v3301_v61 = vld [vmem:[%s4379_s2 + $0x504] ss:$8 sps:$4 sm:$0xff]   ;;  %v3296_v62 = vld [vmem:[%s4379_s2 + $0x400] ss:$8 sps:$4 sm:$0xff]  }
  0x70   : > { %1268 = vmatprep.subr.bf16.mxu1 %v3213_v63  ;;  %v3299_v63 = vld [vmem:[%s4379_s2 + $0x500] ss:$8 sps:$4 sm:$0xff]  }
  0x72   : > { %1228 = vmatpush2.bf16.msra.mxu0 %v3208_v0  ;;  %v3304_v0 = vld [vmem:[%s4379_s2 + $0x4f4] ss:$8 sps:$4 sm:$0xff]  }
  0x73   : > { %1269 = vmatpush2.bf16.msra.mxu1 %v3211_v1  ;;  %1229 = vmatprep.subr.bf16.mxu0 %v3216_v2  ;;  %v3307_v1 = vld [vmem:[%s4379_s2 + $0x5f4] ss:$8 sps:$4 sm:$0xff]   ;;  %v3302_v2 = vld [vmem:[%s4379_s2 + $0x4f0] ss:$8 sps:$4 sm:$0xff]  }
  0x74   : > { %1270 = vmatprep.subr.bf16.mxu1 %v3219_v3  ;;  %v3305_v3 = vld [vmem:[%s4379_s2 + $0x5f0] ss:$8 sps:$4 sm:$0xff]  }
  0x76   : > { %1230 = vmatpush2.bf16.msra.mxu0 %v3214_v4  ;;  %v3310_v4 = vld [vmem:[%s4379_s2 + $0x4e4] ss:$8 sps:$4 sm:$0xff]  }
  0x77   : > { %1271 = vmatpush2.bf16.msra.mxu1 %v3217_v5  ;;  %1231 = vmatprep.subr.bf16.mxu0 %v3222_v6  ;;  %v3313_v5 = vld [vmem:[%s4379_s2 + $0x5e4] ss:$8 sps:$4 sm:$0xff]   ;;  %v3308_v6 = vld [vmem:[%s4379_s2 + $0x4e0] ss:$8 sps:$4 sm:$0xff]  }
  0x78   : > { %1272 = vmatprep.subr.bf16.mxu1 %v3225_v7  ;;  %v3311_v7 = vld [vmem:[%s4379_s2 + $0x5e0] ss:$8 sps:$4 sm:$0xff]  }
  0x7a   : > { %1232 = vmatpush2.bf16.msra.mxu0 %v3220_v8  ;;  %v3316_v8 = vld [vmem:[%s4379_s2 + $0x4d4] ss:$8 sps:$4 sm:$0xff]  }
  0x7b   : > { %1273 = vmatpush2.bf16.msra.mxu1 %v3223_v9  ;;  %1233 = vmatprep.subr.bf16.mxu0 %v3228_v10  ;;  %v3319_v9 = vld [vmem:[%s4379_s2 + $0x5d4] ss:$8 sps:$4 sm:$0xff]   ;;  %v3314_v10 = vld [vmem:[%s4379_s2 + $0x4d0] ss:$8 sps:$4 sm:$0xff]  }
  0x7c   : > { %1274 = vmatprep.subr.bf16.mxu1 %v3231_v11  ;;  %v3317_v11 = vld [vmem:[%s4379_s2 + $0x5d0] ss:$8 sps:$4 sm:$0xff]  }
  0x7e   : > { %1234 = vmatpush2.bf16.msra.mxu0 %v3226_v12  ;;  %v3322_v12 = vld [vmem:[%s4379_s2 + $0x4c4] ss:$8 sps:$4 sm:$0xff]  }
  0x7f   : > { %1275 = vmatpush2.bf16.msra.mxu1 %v3229_v13  ;;  %1235 = vmatprep.subr.bf16.mxu0 %v3234_v14  ;;  %v3325_v13 = vld [vmem:[%s4379_s2 + $0x5c4] ss:$8 sps:$4 sm:$0xff]   ;;  %v3320_v14 = vld [vmem:[%s4379_s2 + $0x4c0] ss:$8 sps:$4 sm:$0xff]  }
  0x80   : > { %1276 = vmatprep.subr.bf16.mxu1 %v3237_v15  ;;  %v3323_v15 = vld [vmem:[%s4379_s2 + $0x5c0] ss:$8 sps:$4 sm:$0xff]  }
  0x82   : > { %1236 = vmatpush2.bf16.msra.mxu0 %v3232_v16  ;;  %v3328_v16 = vld [vmem:[%s4379_s2 + $0x4b4] ss:$8 sps:$4 sm:$0xff]  }
  0x83   : > { %1277 = vmatpush2.bf16.msra.mxu1 %v3235_v17  ;;  %1237 = vmatprep.subr.bf16.mxu0 %v3240_v18  ;;  %v3331_v17 = vld [vmem:[%s4379_s2 + $0x5b4] ss:$8 sps:$4 sm:$0xff]   ;;  %v3326_v18 = vld [vmem:[%s4379_s2 + $0x4b0] ss:$8 sps:$4 sm:$0xff]  }
  0x84   : > { %1278 = vmatprep.subr.bf16.mxu1 %v3243_v19  ;;  %v3329_v19 = vld [vmem:[%s4379_s2 + $0x5b0] ss:$8 sps:$4 sm:$0xff]  }
  0x86   : > { %1238 = vmatpush2.bf16.msra.mxu0 %v3238_v20  ;;  %v3334_v20 = vld [vmem:[%s4379_s2 + $0x4a4] ss:$8 sps:$4 sm:$0xff]  }
  0x87   : > { %1279 = vmatpush2.bf16.msra.mxu1 %v3241_v21  ;;  %1239 = vmatprep.subr.bf16.mxu0 %v3246_v22  ;;  %v3337_v21 = vld [vmem:[%s4379_s2 + $0x5a4] ss:$8 sps:$4 sm:$0xff]  }
  0x88   : > { %1280 = vmatprep.subr.bf16.mxu1 %v3249_v23  ;;  %v4110_v22 = vld [vmem:[%s3947_s6] sm:$0x77]  ;;  %v4113_v23 = vld [vmem:[%s3947_s6 + $0x8] sm:$0x77] }
  0x8a   : > { %1240 = vmatpush2.bf16.msra.mxu0 %v3244_v24  ;;  %v3332_v24 = vld [vmem:[%s4379_s2 + $0x4a0] ss:$8 sps:$4 sm:$0xff]  }
  0x8b   : > { %1281 = vmatpush2.bf16.msra.mxu1 %v3247_v25  ;;  %1692 = vmatprep.subr.bf16.mxu0 %v3256_v26  ;;  %v3335_v25 = vld [vmem:[%s4379_s2 + $0x5a0] ss:$8 sps:$4 sm:$0xff]   ;;  %v3340_v26 = vld [vmem:[%s4379_s2 + $0x494] ss:$8 sps:$4 sm:$0xff]  }
  0x8c   : > { %1733 = vmatprep.subr.bf16.mxu1 %v3259_v27  ;;  %v3343_v27 = vld [vmem:[%s4379_s2 + $0x594] ss:$8 sps:$4 sm:$0xff]  }
  0x8d   : > { %1242 = vmatmul.mubr.bf16.vlgmr.msra.gmra.mxu0 %v2688_v28  ;;  %v2953_v28 = vcombine.high %v4110_v22, %v4110_v22 }
  0x8e   : > { %1283 = vmatmul.mubr.bf16.vlgmr.msra.gmra.mxu1 %v2690_v29  ;;  %1693 = vmatpush1.bf16.msra.mxu0 %v3254_v30  ;;  %v2955_v29 = vcombine.high %v4113_v23, %v4113_v23  ;;  %v3338_v30 = vld [vmem:[%s4379_s2 + $0x490] ss:$8 sps:$4 sm:$0xff]  }
  0x8f   : > { %1734 = vmatpush1.bf16.msra.mxu1 %v3257_v31  ;;  %1694 = vmatprep.subr.bf16.mxu0 %v3262_v32  ;;  %v3341_v31 = vld [vmem:[%s4379_s2 + $0x590] ss:$8 sps:$4 sm:$0xff]   ;;  %v3346_v32 = vld [vmem:[%s4379_s2 + $0x484] ss:$8 sps:$4 sm:$0xff]  }
  0x90   : > { %1735 = vmatprep.subr.bf16.mxu1 %v3265_v33  ;;  %1724 = vmatprep.mubr.bf16.mxu0 %v2821_v35  ;;  %v3349_v33 = vld [vmem:[%s4379_s2 + $0x584] ss:$8 sps:$4 sm:$0xff]   ;;  %v1863_v35 = vshll.u32 %v2953_v28, 16 }
  0x91   : > { %1765 = vmatprep.mubr.bf16.mxu1 %v2823_v39  ;;  %v3347_v39 = vld [vmem:[%s4379_s2 + $0x580] ss:$8 sps:$4 sm:$0xff]  }
  0x92   : > { %1695 = vmatpush1.bf16.msra.mxu0 %v3260_v37  ;;  %v1877_v37 = vshll.u32 %v2955_v29, 16 }
  0x93   : > { %1736 = vmatpush1.bf16.msra.mxu1 %v3263_v38  ;;  %1696 = vmatprep.subr.bf16.mxu0 %v3268_v40  ;;  %v3344_v38 = vld [vmem:[%s4379_s2 + $0x480] ss:$8 sps:$4 sm:$0xff]   ;;  %v3356_v40 = vld [vmem:[%s4379_s2 + $0x674] ss:$8 sps:$4 sm:$0xff]  }
  0x94   : > { %1737 = vmatprep.subr.bf16.mxu1 %v3271_v41  ;;  %v3359_v41 = vld [vmem:[%s4379_s2 + $0x774] ss:$8 sps:$4 sm:$0xff]  }
  0x96   : > { %1697 = vmatpush1.bf16.msra.mxu0 %v3266_v42  ;;  %v1861_v42 = vshrl.u32 %v2953_v28, 16  ;;  %v3422_v28 = vld [vmem:[%s4379_s2 + $0x6c4] ss:$8 sps:$4 sm:$0xff]  }
  0x97   : > { %1738 = vmatpush1.bf16.msra.mxu1 %v3269_v43  ;;  %1698 = vmatprep.subr.bf16.mxu0 %v3274_v44  ;;  %v1865_v43 = vrot.slane %v1863_v35, 1  ;;  %v1875_v44 = vshrl.u32 %v2955_v29, 16  ;;  %v3425_v29 = vld [vmem:[%s4379_s2 + $0x7c4] ss:$8 sps:$4 sm:$0xff]   ;;  %v3426_v35 = vld [vmem:[%s4379_s2 + $0x6b0] ss:$8 sps:$4 sm:$0xff]  }
  0x98   : > { %1739 = vmatprep.subr.bf16.mxu1 %v3277_v45  ;;  %v1879_v45 = vrot.slane %v1877_v37, 1  ;;  %v3429_v37 = vld [vmem:[%s4379_s2 + $0x7b0] ss:$8 sps:$4 sm:$0xff]  }
  0x9a   : > { %1699 = vmatpush1.bf16.msra.mxu0 %v3272_v46  ;;  %v2820_v46 = vcombine.low %v3956_v34, %v3956_v34  ;;  %v3365_v34 = vld [vmem:[%s4379_s2 + $0x764] ss:$8 sps:$4 sm:$0xff]  }
  0x9b   : > { %1740 = vmatpush1.bf16.msra.mxu1 %v3275_v47  ;;  %1700 = vmatprep.subr.bf16.mxu0 %v3280_v48  ;;  %v2822_v47 = vcombine.low %v3961_v36, %v3961_v36  ;;  %v3354_v48 = vld [vmem:[%s4379_s2 + $0x670] ss:$8 sps:$4 sm:$0xff]   ;;  %v1866_v36 = vor.u32 %v1865_v43, %v1861_v42  ;;  %v3432_v42 = vld [vmem:[%s4379_s2 + $0x6a0] ss:$8 sps:$4 sm:$0xff]  }
  0x9c   : > { %1741 = vmatprep.subr.bf16.mxu1 %v3283_v49  ;;  %v3357_v49 = vld [vmem:[%s4379_s2 + $0x770] ss:$8 sps:$4 sm:$0xff]   ;;  %v3435_v43 = vld [vmem:[%s4379_s2 + $0x7a0] ss:$8 sps:$4 sm:$0xff]  }
  0x9e   : > { %1701 = vmatpush1.bf16.msra.mxu0 %v3278_v50  ;;  %v3362_v50 = vld [vmem:[%s4379_s2 + $0x664] ss:$8 sps:$4 sm:$0xff]  }
  0x9f   : > { %1742 = vmatpush1.bf16.msra.mxu1 %v3281_v51  ;;  %1702 = vmatprep.subr.bf16.mxu0 %v3286_v52  ;;  %v1880_v51 = vor.u32 %v1879_v45, %v1875_v44  ;;  %v3360_v52 = vld [vmem:[%s4379_s2 + $0x660] ss:$8 sps:$4 sm:$0xff]   ;;  %v3440_v44 = vld [vmem:[%s4379_s2 + $0x694] ss:$8 sps:$4 sm:$0xff]  }
  0xa0   : > { %1743 = vmatprep.subr.bf16.mxu1 %v3289_v53  ;;  %v3363_v53 = vld [vmem:[%s4379_s2 + $0x760] ss:$8 sps:$4 sm:$0xff]  }
  0xa2   : > { %1703 = vmatpush1.bf16.msra.mxu0 %v3284_v54  ;;  %v3368_v54 = vld [vmem:[%s4379_s2 + $0x654] ss:$8 sps:$4 sm:$0xff]  }
  0xa3   : > { %1744 = vmatpush1.bf16.msra.mxu1 %v3287_v55  ;;  %1704 = vmatprep.subr.bf16.mxu0 %v3292_v56  ;;  %v3371_v55 = vld [vmem:[%s4379_s2 + $0x754] ss:$8 sps:$4 sm:$0xff]   ;;  %v3366_v56 = vld [vmem:[%s4379_s2 + $0x650] ss:$8 sps:$4 sm:$0xff]  }
  0xa4   : > { %1745 = vmatprep.subr.bf16.mxu1 %v3295_v57  ;;  %v3369_v57 = vld [vmem:[%s4379_s2 + $0x750] ss:$8 sps:$4 sm:$0xff]  }
  0xa6   : > { %1705 = vmatpush1.bf16.msra.mxu0 %v3290_v58  ;;  %v3374_v58 = vld [vmem:[%s4379_s2 + $0x644] ss:$8 sps:$4 sm:$0xff]  }
  0xa7   : > { %1746 = vmatpush1.bf16.msra.mxu1 %v3293_v59  ;;  %1706 = vmatprep.subr.bf16.mxu0 %v3298_v60  ;;  %v3377_v59 = vld [vmem:[%s4379_s2 + $0x744] ss:$8 sps:$4 sm:$0xff]   ;;  %v3372_v60 = vld [vmem:[%s4379_s2 + $0x640] ss:$8 sps:$4 sm:$0xff]  }
  0xa8   : > { %1747 = vmatprep.subr.bf16.mxu1 %v3301_v61  ;;  %v3375_v61 = vld [vmem:[%s4379_s2 + $0x740] ss:$8 sps:$4 sm:$0xff]  }
  0xaa   : > { %1707 = vmatpush1.bf16.msra.mxu0 %v3296_v62  ;;  %v3380_v62 = vld [vmem:[%s4379_s2 + $0x634] ss:$8 sps:$4 sm:$0xff]  }
  0xab   : > { %1748 = vmatpush1.bf16.msra.mxu1 %v3299_v63  ;;  %1708 = vmatprep.subr.bf16.mxu0 %v3304_v0  ;;  %v3383_v63 = vld [vmem:[%s4379_s2 + $0x734] ss:$8 sps:$4 sm:$0xff]   ;;  %v3378_v0 = vld [vmem:[%s4379_s2 + $0x630] ss:$8 sps:$4 sm:$0xff]  }
  0xac   : > { %1749 = vmatprep.subr.bf16.mxu1 %v3307_v1  ;;  %v3381_v1 = vld [vmem:[%s4379_s2 + $0x730] ss:$8 sps:$4 sm:$0xff]  }
  0xae   : > { %1709 = vmatpush2.bf16.msra.mxu0 %v3302_v2  ;;  %v3386_v2 = vld [vmem:[%s4379_s2 + $0x624] ss:$8 sps:$4 sm:$0xff]  }
  0xaf   : > { %1750 = vmatpush2.bf16.msra.mxu1 %v3305_v3  ;;  %1710 = vmatprep.subr.bf16.mxu0 %v3310_v4  ;;  %v3389_v3 = vld [vmem:[%s4379_s2 + $0x724] ss:$8 sps:$4 sm:$0xff]   ;;  %v3384_v4 = vld [vmem:[%s4379_s2 + $0x620] ss:$8 sps:$4 sm:$0xff]  }
  0xb0   : > { %1751 = vmatprep.subr.bf16.mxu1 %v3313_v5  ;;  %v3387_v5 = vld [vmem:[%s4379_s2 + $0x720] ss:$8 sps:$4 sm:$0xff]  }
  0xb2   : > { %1711 = vmatpush2.bf16.msra.mxu0 %v3308_v6  ;;  %v3392_v6 = vld [vmem:[%s4379_s2 + $0x614] ss:$8 sps:$4 sm:$0xff]  }
  0xb3   : > { %1752 = vmatpush2.bf16.msra.mxu1 %v3311_v7  ;;  %1712 = vmatprep.subr.bf16.mxu0 %v3316_v8  ;;  %v3395_v7 = vld [vmem:[%s4379_s2 + $0x714] ss:$8 sps:$4 sm:$0xff]   ;;  %v3390_v8 = vld [vmem:[%s4379_s2 + $0x610] ss:$8 sps:$4 sm:$0xff]  }
  0xb4   : > { %1753 = vmatprep.subr.bf16.mxu1 %v3319_v9  ;;  %v3393_v9 = vld [vmem:[%s4379_s2 + $0x710] ss:$8 sps:$4 sm:$0xff]  }
  0xb6   : > { %1713 = vmatpush2.bf16.msra.mxu0 %v3314_v10  ;;  %v3398_v10 = vld [vmem:[%s4379_s2 + $0x604] ss:$8 sps:$4 sm:$0xff]  }
  0xb7   : > { %1754 = vmatpush2.bf16.msra.mxu1 %v3317_v11  ;;  %1714 = vmatprep.subr.bf16.mxu0 %v3322_v12  ;;  %v3401_v11 = vld [vmem:[%s4379_s2 + $0x704] ss:$8 sps:$4 sm:$0xff]   ;;  %v3396_v12 = vld [vmem:[%s4379_s2 + $0x600] ss:$8 sps:$4 sm:$0xff]  }
  0xb8   : > { %1755 = vmatprep.subr.bf16.mxu1 %v3325_v13  ;;  %v3399_v13 = vld [vmem:[%s4379_s2 + $0x700] ss:$8 sps:$4 sm:$0xff]  }
  0xba   : > { %1715 = vmatpush2.bf16.msra.mxu0 %v3320_v14  ;;  %v3404_v14 = vld [vmem:[%s4379_s2 + $0x6f4] ss:$8 sps:$4 sm:$0xff]  }
  0xbb   : > { %1756 = vmatpush2.bf16.msra.mxu1 %v3323_v15  ;;  %1716 = vmatprep.subr.bf16.mxu0 %v3328_v16  ;;  %v3407_v15 = vld [vmem:[%s4379_s2 + $0x7f4] ss:$8 sps:$4 sm:$0xff]   ;;  %v3402_v16 = vld [vmem:[%s4379_s2 + $0x6f0] ss:$8 sps:$4 sm:$0xff]  }
  0xbc   : > { %1757 = vmatprep.subr.bf16.mxu1 %v3331_v17  ;;  %v3405_v17 = vld [vmem:[%s4379_s2 + $0x7f0] ss:$8 sps:$4 sm:$0xff]  }
  0xbe   : > { %1717 = vmatpush2.bf16.msra.mxu0 %v3326_v18  ;;  %v3410_v18 = vld [vmem:[%s4379_s2 + $0x6e4] ss:$8 sps:$4 sm:$0xff]  }
  0xbf   : > { %1758 = vmatpush2.bf16.msra.mxu1 %v3329_v19  ;;  %1718 = vmatprep.subr.bf16.mxu0 %v3334_v20  ;;  %v3413_v19 = vld [vmem:[%s4379_s2 + $0x7e4] ss:$8 sps:$4 sm:$0xff]   ;;  %v3408_v20 = vld [vmem:[%s4379_s2 + $0x6e0] ss:$8 sps:$4 sm:$0xff]  }
  0xc0   : > { %1759 = vmatprep.subr.bf16.mxu1 %v3337_v21  ;;  %v3411_v21 = vld [vmem:[%s4379_s2 + $0x7e0] ss:$8 sps:$4 sm:$0xff]  }
  0xc2   : > { %1719 = vmatpush2.bf16.msra.mxu0 %v3332_v24  ;;  %v3416_v24 = vld [vmem:[%s4379_s2 + $0x6d4] ss:$8 sps:$4 sm:$0xff]  }
  0xc3   : > { %1760 = vmatpush2.bf16.msra.mxu1 %v3335_v25  ;;  %1720 = vmatprep.subr.bf16.mxu0 %v3340_v26  ;;  %v3419_v25 = vld [vmem:[%s4379_s2 + $0x7d4] ss:$8 sps:$4 sm:$0xff]   ;;  %v3414_v26 = vld [vmem:[%s4379_s2 + $0x6d0] ss:$8 sps:$4 sm:$0xff]  }
  0xc4   : > { %1761 = vmatprep.subr.bf16.mxu1 %v3343_v27  ;;  %v3417_v27 = vld [vmem:[%s4379_s2 + $0x7d0] ss:$8 sps:$4 sm:$0xff]  }
  0xc6   : > { %1721 = vmatpush2.bf16.msra.mxu0 %v3338_v30  ;;  %v3420_v30 = vld [vmem:[%s4379_s2 + $0x6c0] ss:$8 sps:$4 sm:$0xff]  }
  0xc7   : > { %1762 = vmatpush2.bf16.msra.mxu1 %v3341_v31  ;;  %1722 = vmatprep.subr.bf16.mxu0 %v3346_v32  ;;  %v3423_v31 = vld [vmem:[%s4379_s2 + $0x7c0] ss:$8 sps:$4 sm:$0xff]   ;;  %v3428_v32 = vld [vmem:[%s4379_s2 + $0x6b4] ss:$8 sps:$4 sm:$0xff]  }
  0xc8   : > { %1763 = vmatprep.subr.bf16.mxu1 %v3349_v33  ;;  %v3431_v33 = vld [vmem:[%s4379_s2 + $0x7b4] ss:$8 sps:$4 sm:$0xff]  }
  0xca   : > { %1723 = vmatpush2.bf16.msra.mxu0 %v3344_v38  ;;  %v3434_v38 = vld [vmem:[%s4379_s2 + $0x6a4] ss:$8 sps:$4 sm:$0xff]  }
  0xcb   : > { %1764 = vmatpush2.bf16.msra.mxu1 %v3347_v39  ;;  %2205 = vmatprep.subr.bf16.mxu0 %v3356_v40  ;;  %v3437_v39 = vld [vmem:[%s4379_s2 + $0x7a4] ss:$8 sps:$4 sm:$0xff]   ;;  %v2952_v40 = vcombine.low %v4110_v22, %v4110_v22  ;;  %v3443_v22 = vld [vmem:[%s4379_s2 + $0x794] ss:$8 sps:$4 sm:$0xff]  }
  0xcc   : > { %2246 = vmatprep.subr.bf16.mxu1 %v3359_v41  ;;  %v2954_v41 = vcombine.low %v4113_v23, %v4113_v23 }
  0xcd   : > { %1725 = vmatmul.mubr.bf16.vlgmr.msra.gmra.mxu0 %v2820_v46  ;;  %v1856_v23 = vshll.u32 %v2952_v40, 16  ;;  %v3438_v46 = vld [vmem:[%s4379_s2 + $0x690] ss:$8 sps:$4 sm:$0xff]  }
  0xce   : > { %1766 = vmatmul.mubr.bf16.vlgmr.msra.gmra.mxu1 %v2822_v47  ;;  %2206 = vmatpush1.bf16.msra.mxu0 %v3354_v48  ;;  %v1870_v45 = vshll.u32 %v2954_v41, 16  ;;  %v3441_v47 = vld [vmem:[%s4379_s2 + $0x790] ss:$8 sps:$4 sm:$0xff]   ;;  %v3446_v48 = vld [vmem:[%s4379_s2 + $0x684] ss:$8 sps:$4 sm:$0xff]  }
  0xcf   : > { %2247 = vmatpush1.bf16.msra.mxu1 %v3357_v49  ;;  %2207 = vmatprep.subr.bf16.mxu0 %v3362_v50  ;;  %v3449_v49 = vld [vmem:[%s4379_s2 + $0x784] ss:$8 sps:$4 sm:$0xff]   ;;  %v1854_v50 = vshrl.u32 %v2952_v40, 16 }
  0xd0   : > { %2248 = vmatprep.subr.bf16.mxu1 %v3365_v34  ;;  %2237 = vmatprep.mubr.bf16.mxu0 %v1866_v36  ;;  %v1858_v34 = vrot.slane %v1856_v23, 1  ;;  %v1868_v36 = vshrl.u32 %v2954_v41, 16 }
  0xd1   : > { %2278 = vmatprep.mubr.bf16.mxu1 %v1880_v51  ;;  %v1872_v51 = vrot.slane %v1870_v45, 1 }
  0xd2   : > { %2208 = vmatpush1.bf16.msra.mxu0 %v3360_v52  ;;  %v3444_v52 = vld [vmem:[%s4379_s2 + $0x680] ss:$8 sps:$4 sm:$0xff]  }
  0xd3   : > { %2249 = vmatpush1.bf16.msra.mxu1 %v3363_v53  ;;  %2209 = vmatprep.subr.bf16.mxu0 %v3368_v54  ;;  %v3447_v53 = vld [vmem:[%s4379_s2 + $0x780] ss:$8 sps:$4 sm:$0xff]   ;;  %v1859_v54 = vor.u32 %v1858_v34, %v1854_v50  ;;  %v3478_v50 = vmov 1966171168  }
  0xd4   : > { %2250 = vmatprep.subr.bf16.mxu1 %v3371_v55  ;;  %v1873_v55 = vor.u32 %v1872_v51, %v1868_v36  ;;  %v2322_v34 = vunpack.c.l.s4 %v3478_v50  ;;  %v2324_v36 = vlaneseq }
  0xd6   : > { %2210 = vmatpush1.bf16.msra.mxu0 %v3366_v56  ;;  %vm2338_vm1 = vcmp.lt.s32.totalorder %v2324_v36, 256 }
  0xd7   : > { %2251 = vmatpush1.bf16.msra.mxu1 %v3369_v57  ;;  %2211 = vmatprep.subr.bf16.mxu0 %v3374_v58 }
  0xd8   : > { %2252 = vmatprep.subr.bf16.mxu1 %v3377_v59 }
  0xda   : > { %2212 = vmatpush1.bf16.msra.mxu0 %v3372_v60 }
  0xdb   : > { %2253 = vmatpush1.bf16.msra.mxu1 %v3375_v61  ;;  %2213 = vmatprep.subr.bf16.mxu0 %v3380_v62 }
  0xdc   : > { %2254 = vmatprep.subr.bf16.mxu1 %v3383_v63 }
  0xde   : > { %2214 = vmatpush1.bf16.msra.mxu0 %v3378_v0 }
  0xdf   : > { %2255 = vmatpush1.bf16.msra.mxu1 %v3381_v1  ;;  %2215 = vmatprep.subr.bf16.mxu0 %v3386_v2 }
  0xe0   : > { %2256 = vmatprep.subr.bf16.mxu1 %v3389_v3 }
  0xe2   : > { %2216 = vmatpush1.bf16.msra.mxu0 %v3384_v4 }
  0xe3   : > { %2257 = vmatpush1.bf16.msra.mxu1 %v3387_v5  ;;  %2217 = vmatprep.subr.bf16.mxu0 %v3392_v6 }
  0xe4   : > { %2258 = vmatprep.subr.bf16.mxu1 %v3395_v7 }
  0xe6   : > { %2218 = vmatpush1.bf16.msra.mxu0 %v3390_v8 }
  0xe7   : > { %2259 = vmatpush1.bf16.msra.mxu1 %v3393_v9  ;;  %2219 = vmatprep.subr.bf16.mxu0 %v3398_v10 }
  0xe8   : > { %2260 = vmatprep.subr.bf16.mxu1 %v3401_v11 }
  0xea   : > { %2220 = vmatpush1.bf16.msra.mxu0 %v3396_v12 }
  0xeb   : > { %2261 = vmatpush1.bf16.msra.mxu1 %v3399_v13  ;;  %2221 = vmatprep.subr.bf16.mxu0 %v3404_v14 }
  0xec   : > { %2262 = vmatprep.subr.bf16.mxu1 %v3407_v15 }
  0xee   : > { %2222 = vmatpush2.bf16.msra.mxu0 %v3402_v16 }
  0xef   : > { %2263 = vmatpush2.bf16.msra.mxu1 %v3405_v17  ;;  %2223 = vmatprep.subr.bf16.mxu0 %v3410_v18 }
  0xf0   : > { %2264 = vmatprep.subr.bf16.mxu1 %v3413_v19 }
  0xf2   : > { %2224 = vmatpush2.bf16.msra.mxu0 %v3408_v20 }
  0xf3   : > { %2265 = vmatpush2.bf16.msra.mxu1 %v3411_v21  ;;  %2225 = vmatprep.subr.bf16.mxu0 %v3416_v24 }
  0xf4   : > { %2266 = vmatprep.subr.bf16.mxu1 %v3419_v25 }
  0xf6   : > { %2226 = vmatpush2.bf16.msra.mxu0 %v3414_v26 }
  0xf7   : > { %2267 = vmatpush2.bf16.msra.mxu1 %v3417_v27  ;;  %2227 = vmatprep.subr.bf16.mxu0 %v3422_v28 }
  0xf8   : > { %2268 = vmatprep.subr.bf16.mxu1 %v3425_v29 }
  0xfa   : > { %2228 = vmatpush2.bf16.msra.mxu0 %v3420_v30 }
  0xfb   : > { %2269 = vmatpush2.bf16.msra.mxu1 %v3423_v31  ;;  %2229 = vmatprep.subr.bf16.mxu0 %v3428_v32 }
  0xfc   : > { %2270 = vmatprep.subr.bf16.mxu1 %v3431_v33 }
  0xfe   : > { %2230 = vmatpush2.bf16.msra.mxu0 %v3426_v35 }
  0xff   : > { %2271 = vmatpush2.bf16.msra.mxu1 %v3429_v37  ;;  %2231 = vmatprep.subr.bf16.mxu0 %v3434_v38 }
 0x100   : > { %2272 = vmatprep.subr.bf16.mxu1 %v3437_v39 }
 0x102   : > { %2232 = vmatpush2.bf16.msra.mxu0 %v3432_v42 }
 0x103   : > { %2273 = vmatpush2.bf16.msra.mxu1 %v3435_v43  ;;  %2233 = vmatprep.subr.bf16.mxu0 %v3440_v44 }
 0x104   : > { %2274 = vmatprep.subr.bf16.mxu1 %v3443_v22 }
 0x106   : > { %2234 = vmatpush2.bf16.msra.mxu0 %v3438_v46 }
 0x107   : > { %2275 = vmatpush2.bf16.msra.mxu1 %v3441_v47  ;;  %2235 = vmatprep.subr.bf16.mxu0 %v3446_v48 }
 0x108   : > { %2276 = vmatprep.subr.bf16.mxu1 %v3449_v49 }
 0x10a   : > { %2236 = vmatpush2.bf16.msra.mxu0 %v3444_v52 }
 0x10b   : > { %2277 = vmatpush2.bf16.msra.mxu1 %v3447_v53 }
 0x10d   : > { %v827_v56 = vpop.f32.mrf.mxu0  ;;  %2238 = vmatmul.mubr.bf16.vlgmr.msra.gmra.mxu0 %v1859_v54 }
 0x10e   : > { %v868_v57 = vpop.f32.mrf.mxu1  ;;  %2279 = vmatmul.mubr.bf16.vlgmr.msra.gmra.mxu1 %v1873_v55 }
 0x10f   : > { %v869_v58 = vadd.f32 %v868_v57, %v827_v56  ;;  %v829_v59 = vpop.f32.mrf.mxu0 }
 0x110   : > { %v870_v60 = vpop.f32.mrf.mxu1 }
 0x111   : > { %v871_v61 = vadd.f32 %v870_v60, %v829_v59  ;;  %v831_v62 = vpop.f32.mrf.mxu0  ;;  %v2323_v60 = vunpack.c.0.s8 %v2322_v34 }
 0x112   : > { %v872_v63 = vpop.f32.mrf.mxu1 }
 0x113   : > { %v832_v0 = vpop.f32.mrf.mxu0 }
 0x114   : > { %v873_v1 = vpop.f32.mrf.mxu1 }
 0x14d   : > { %v1243_v2 = vpop.f32.mrf.mxu0 }
 0x14e   : > { %v1284_v3 = vpop.f32.mrf.mxu1  ;;  %v1244_v4 = vadd.f32 %v1243_v2, %v869_v58 }
 0x14f   : > { %v1245_v5 = vpop.f32.mrf.mxu0 }
 0x150   : > { %v1286_v6 = vpop.f32.mrf.mxu1  ;;  %v1285_v7 = vadd.f32 %v1284_v3, %v1244_v4  ;;  %v1246_v8 = vadd.f32 %v1245_v5, %v871_v61  ;;  %v2325_v61 = vshrl.u32 %v2324_v36, 7 }
 0x151   : > { %v1247_v9 = vpop.f32.mrf.mxu0 }
 0x152   : > { %v1288_v10 = vpop.f32.mrf.mxu1  ;;  %v1287_v11 = vadd.f32 %v1286_v6, %v1246_v8 }
 0x153   : > { %v1248_v12 = vpop.f32.mrf.mxu0 }
 0x154   : > { %v1289_v13 = vpop.f32.mrf.mxu1 }
 0x18d   : > { %v1726_v14 = vpop.f32.mrf.mxu0 }
 0x18e   : > { %v1767_v15 = vpop.f32.mrf.mxu1 }
 0x18f   : > { %v1768_v16 = vadd.f32 %v1767_v15, %v1726_v14  ;;  %v1728_v17 = vpop.f32.mrf.mxu0 }
 0x190   : > { %v1769_v18 = vpop.f32.mrf.mxu1 }
 0x191   : > { %v1774_v19 = vadd.f32 %v1768_v16, %v1285_v7  ;;  %v1730_v20 = vpop.f32.mrf.mxu0  ;;  %v1770_v26 = vadd.f32 %v1769_v18, %v1728_v17  ;;  %v2326_v7 = vsub.s32 %v2323_v60, %v2325_v61 }
 0x192   : > { %v1771_v21 = vpop.f32.mrf.mxu1 }
 0x193   : > { %v1731_v24 = vpop.f32.mrf.mxu0  ;;  %v1775_v32 = vadd.f32 %v1770_v26, %v1287_v11 }
 0x194   : > { %v1772_v25 = vpop.f32.mrf.mxu1 }
 0x1cd   : > { %v2239_v27 = vpop.f32.mrf.mxu0 }
 0x1ce   : > { %v2280_v28 = vpop.f32.mrf.mxu1 }
 0x1cf   : > { %v2281_v29 = vadd.f32 %v2280_v28, %v2239_v27  ;;  %v2241_v30 = vpop.f32.mrf.mxu0 }
 0x1d0   : > { %v2282_v31 = vpop.f32.mrf.mxu1 }
 0x1d1   : > { %v2287_v33 = vadd.f32 %v2281_v29, %v1774_v19  ;;  %v2283_v35 = vadd.f32 %v2282_v31, %v2241_v30  ;;  %v2243_v37 = vpop.f32.mrf.mxu0 }
 0x1d2   : > { %v2284_v38 = vpop.f32.mrf.mxu1 }
 0x1d3   : > { %v2304_v39 = vsel %vm2303_vm0, %v2287_v33, 0.0  ;;  %v2341_v40 = vmul.f32 %v2287_v33, %v2287_v33  ;;  %v2288_v41 = vadd.f32 %v2283_v35, %v1775_v32  ;;  %v2244_v43 = vpop.f32.mrf.mxu0 }
 0x1d4   : > { %v2305_v42 = vrot.slane %v2304_v39, 4  ;;  %v2285_v44 = vpop.f32.mrf.mxu1 }
 0x1d5   : > { %v2343_v22 = vsel %vm2303_vm0, %v2341_v40, 0.0  ;;  %v3020_v23 = vpack.c.bf16 %v2288_v41, %v2287_v33  ;;  %v2311_v45 = vsel %vm2303_vm0, %v2288_v41, 0.0  ;;  %v2342_v46 = vmul.f32 %v2288_v41, %v2288_v41 }
 0x1d6   : > { %v2306_v47 = vadd.f32 %v2305_v42, %v2304_v39  ;;  %v2344_v48 = vrot.slane %v2343_v22, 4  ;;  %v2312_v49 = vrot.slane %v2311_v45, 4 }
 0x1d7   : > { %3021 = vst.sshfl [vmem:[%s288_s25] sm:$0x33 pattern:$0x76325410] %v3020_v23  ;;  %v2350_v51 = vsel %vm2303_vm0, %v2342_v46, 0.0 }
 0x1d8   : > { %v2307_v52 = vrot.slane %v2306_v47, 2  ;;  %v2345_v53 = vadd.f32 %v2344_v48, %v2343_v22  ;;  %v2313_v54 = vadd.f32 %v2312_v49, %v2311_v45  ;;  %v2351_v55 = vrot.slane %v2350_v51, 4 }
 0x1da   : > { %v2308_v56 = vadd.f32 %v2307_v52, %v2306_v47  ;;  %v2346_v57 = vrot.slane %v2345_v53, 2  ;;  %v2314_v58 = vrot.slane %v2313_v54, 2  ;;  %v2352_v59 = vadd.f32 %v2351_v55, %v2350_v51 }
 0x1dc   : > { %v2309_v62 = vrot.slane %v2308_v56, 1  ;;  %v2347_v63 = vadd.f32 %v2346_v57, %v2345_v53  ;;  %v2315_v0 = vadd.f32 %v2314_v58, %v2313_v54  ;;  %v2353_v1 = vrot.slane %v2352_v59, 2 }
 0x1de   : > { %v2348_v2 = vrot.slane %v2347_v63, 1  ;;  %v2316_v3 = vrot.slane %v2315_v0, 1  ;;  %v2354_v4 = vadd.f32 %v2353_v1, %v2352_v59  ;;  %v2310_v5 = vadd.f32 %v2309_v62, %v2308_v56 }
 0x1e0   : > { %v2317_v6 = vadd.f32 %v2316_v3, %v2315_v0  ;;  %v2355_v8 = vrot.slane %v2354_v4, 1  ;;  %v2349_v9 = vadd.f32 %v2348_v2, %v2347_v63 }
 0x1e2   : > { %v2320_v10 = vcombine.low %v2310_v5, %v2317_v6  ;;  %v2356_v11 = vadd.f32 %v2355_v8, %v2354_v4 }
 0x1e4   : > { %v2327_v12 = vrot.slane %v2320_v10, %v2326_v7  ;;  %v2359_v13 = vcombine.low %v2349_v9, %v2356_v11 }
 0x1e6   : > { %v2334_v14 = vrot.slane %v2327_v12, %v2326_v7  ;;  %v2366_v15 = vrot.slane %v2359_v13, %v2326_v7 }
 0x1e8   : > { %2340 = vst.msk [vmem:[%s297_s28] ss:$2 sm:$0x3] %vm2338_vm1, %v2334_v14  ;;  %v2373_v16 = vrot.slane %v2366_v15, %v2326_v7 }
 0x1ea   : > { %3022 = vst.msk [vmem:[%s297_s28 + $0x1] ss:$2 sm:$0x3] %vm2338_vm1, %v2373_v16 }
 0x1eb PF: > { %s15_s17 = sadd.s32 1, %s3476_s17   ;;  %s4382_s15 = smov %s3472_s16 }
 0x1ec   : > { %p12_p7 = scmp.ge.s32.totalorder %s15_s17, 6   ;;  %s4383_s16 = smov %s4385_s18 }
 0x1ee   :  { %14 = sbr.rel (!%p12_p7) target bundleno = 2 (0x2), region = 81 }

// kernel: discriminator_forward.14
= control target key start
LH: loop header
LB: loop body
LE: loop exit
PB: predicated region body
PF: predicated region fallthrough
CT: control target
= control target key end

     0   :  { %s504_s12 = smov 0   ;;  %s506_s13 = smov 0   ;;  %s550_s0 = inlined_call_operand.vmem [shape: bf16[1,2,2,512], index: 0, kind: input, shape index: {}]   ;;  %s551_s1 = inlined_call_operand.vmem [shape: f32[1,512], index: 1, kind: input, shape index: {}]   ;;  %s552_s2 = inlined_call_operand.vmem [shape: f32[1,512], index: 2, kind: input, shape index: {}]   ;;  %s553_s3 = inlined_call_operand.vmem [shape: bf16[1,2,2,512], index: 3, kind: output, shape index: {}]  }
   0x1   :  { %s508_s14 = smov 0  }
   0x2 LB: > { %s22_s15 = sadd.s32 1, %s476_s13  ;;  %p424_p0 = scmp.ge.s32.totalorder %s480_s14, 1  ;;  %s480_s14 = sphi %s508_s14, %s13_s14   ;;  %s476_s13 = sphi %s506_s13, %s555_s13   ;;  %s472_s12 = sphi %s504_s12, %s554_s12  }
   0x3   : > { %p23_p1 = scmp.ge.s32.totalorder %s22_s15, 2  ;;  %p156_p2 = scmp.lt.s32.totalorder %s480_s14, 3 }
   0x5   : > { %s557_s15 = smov (%p23_p1, %s22_s15), 0  ;;  %p157_p3 = pnand %p424_p0, %p156_p2 }
   0x6   : > { %p188_p4 = scmp.lt.s32.totalorder (!%p157_p3), %s472_s12, 1 }
   0x7   : > { %160 = sbr.rel (%p157_p3) target bundleno = 46 (0x2e), region = 32 }
   0xc   : > { %v206_v0 = vlaneseq  ;;  %v482_v1 = vmov 1983009808   ;;  %s559_s12 = smov (!%p188_p4, %s472_s12), 1  ;;  %v204_v4 = vld [vmem:[%s551_s1] sm:$0xf] }
   0xd   : > { %v225_v2 = vunpack.c.l.s4 %v482_v1  ;;  %v241_v6 = vld [vmem:[%s552_s2] sm:$0xf]  ;;  %s425_s20 = sshll.u32 %s559_s12, 2  ;;  %v483_v33 = vmov 1966171168  }
   0xe   : > { %v207_v3 = vshrl.u32 %v206_v0, 7  ;;  %s193_s23 = scalar_lea.vmem %s550_s0, %s425_s20  ;;  %v314_v34 = vunpack.c.l.s4 %v483_v33  ;;  %s201_s26 = scalar_lea.vmem %s553_s3, %s425_s20 }
   0xf   : > { %v226_v5 = vunpack.c.0.s8 %v225_v2  ;;  %v202_v16 = vld [vmem:[%s193_s23] sm:$0xf] }
  0x10   : > { %v208_v7 = vsub.s32 0, %v207_v3  ;;  %v212_v8 = vsub.s32 1, %v207_v3  ;;  %v216_v9 = vsub.s32 2, %v207_v3  ;;  %v220_v10 = vsub.s32 3, %v207_v3 }
  0x11   : > { %v229_v11 = vsub.s32 %v226_v5, %v207_v3  ;;  %v203_v24 = vunpack.c.l.bf16 %v202_v16  ;;  %v315_v37 = vunpack.c.0.s8 %v314_v34 }
  0x12   : > { %v209_v12 = vrot.slane %v204_v4, %v208_v7  ;;  %v213_v13 = vrot.slane %v204_v4, %v212_v8  ;;  %v217_v14 = vrot.slane %v204_v4, %v216_v9  ;;  %v221_v15 = vrot.slane %v204_v4, %v220_v10 }
  0x13   : > { %v246_v17 = vrot.slane %v241_v6, %v208_v7  ;;  %v250_v18 = vrot.slane %v241_v6, %v212_v8  ;;  %v254_v19 = vrot.slane %v241_v6, %v216_v9  ;;  %v258_v22 = vrot.slane %v241_v6, %v220_v10 }
  0x14   : > { %v222_v20 = vcombine.low %v209_v12, %v213_v13  ;;  %v223_v21 = vcombine.low %v217_v14, %v221_v15  ;;  %v318_v43 = vsub.s32 %v315_v37, %v207_v3 }
  0x15   : > { %v259_v23 = vcombine.low %v246_v17, %v250_v18  ;;  %v260_v27 = vcombine.low %v254_v19, %v258_v22 }
  0x16   : > { %v230_v25 = vrot.slane %v222_v20, %v229_v11  ;;  %v237_v26 = vrot.slane %v223_v21, %v229_v11 }
  0x17   : > { %v267_v28 = vrot.slane %v259_v23, %v229_v11  ;;  %v274_v30 = vrot.slane %v260_v27, %v229_v11 }
  0x18   : > { %v238_v29 = vcombine.low %v230_v25, %v237_v26 }
  0x19   : > { %v275_v32 = vcombine.low %v267_v28, %v274_v30 }
  0x1a   : > { %v240_v31 = vmul.f32 %v238_v29, %v203_v24 }
  0x1c   : > { %v277_v35 = vadd.f32 %v275_v32, %v240_v31 }
  0x1e   : > { %vm278_vm0 = vcmp.ge.f32.partialorder %v277_v35, 0.0  ;;  %v279_v36 = vmul.f32 0.2, %v277_v35 }
  0x20   : > { %v280_v38 = vsel %vm278_vm0, %v277_v35, %v279_v36 }
  0x21   : > { %v282_v39 = vcombine.high %v280_v38, %v280_v38  ;;  %v289_v40 = vrot.slane %v280_v38, %v229_v11 }
  0x23   : > { %v296_v41 = vrot.slane %v282_v39, %v229_v11  ;;  %v297_v42 = vcombine.high %v289_v40, %v289_v40 }
  0x25   : > { %v298_v44 = vcombine.high %v296_v41, %v296_v41  ;;  %v427_v45 = vpack.c.bf16 %v297_v42, %v289_v40 }
  0x27   : > { %v428_v46 = vpack.c.bf16 %v298_v44, %v296_v41  ;;  %v319_v47 = vrot.slane %v427_v45, %v318_v43 }
  0x29   : > { %v326_v48 = vrot.slane %v428_v46, %v318_v43 }
  0x2b   : > { %v327_v49 = vcombine.low %v319_v47, %v326_v48 }
  0x2d   : > { %429 = vst.sshfl [vmem:[%s201_s26] sm:$0x55 pattern:$0x73625140] %v327_v49 }
  0x2e PF: > { %s13_s14 = sadd.s32 1, %s480_s14   ;;  %s554_s12 = smov %s476_s13 }
  0x2f   : > { %p10_p5 = scmp.ge.s32.totalorder %s13_s14, 4   ;;  %s555_s13 = smov %s557_s15 }
  0x31   :  { %12 = sbr.rel (!%p10_p5) target bundleno = 2 (0x2), region = 62 }

// kernel: discriminator_forward.15
= control target key start
LH: loop header
LB: loop body
LE: loop exit
PB: predicated region body
PF: predicated region fallthrough
CT: control target
= control target key end

     0   :  { %10 = vsyncpa [#allocation4], 0  ;;  %s1031_s18 = smov 0   ;;  %s1162_s0 = inlined_call_operand.vmem [shape: bf16[1,2048], index: 0, kind: input, shape index: {}]   ;;  %s1163_s1 = inlined_call_operand.vmem [shape: bf16[2048,128], index: 1, kind: input, shape index: {}]   ;;  %s1164_s2 = inlined_call_operand.vmem [shape: f32[1,128], index: 2, kind: input, shape index: {}]   ;;  %s1165_s3 = inlined_call_operand.vmem [shape: f32[128,128], index: 3, kind: input, shape index: {}]   ;;  %s1166_s4 = inlined_call_operand.vmem [shape: f32[1,128], index: 4, kind: input, shape index: {}]   ;;  %s1167_s5 = inlined_call_operand.hbm [shape: f32[1,128], index: 5, kind: output, shape index: {}]  }
   0x1 LB: > { %s1037_s19 = sadd.s32 4294967295, %s994_s18   ;;  %p766_p0 = scmp.ge.s32.totalorder %s994_s18, 1  ;;  %s994_s18 = sphi %s1031_s18, %s16_s18  }
   0x2   : > { %p194_p1 = scmp.lt.s32.totalorder %s994_s18, 5 }
   0x4   : > { %p195_p2 = pnand %p766_p0, %p194_p1 }
   0x5   : > { %s767_s20 = sshll.u32 (!%p195_p2), %s1037_s19, 2  ;;  %s768_s21 = sshll.u32 (!%p195_p2), %s1037_s19, 6 }
   0x6   : > { %198 = sbr.rel (%p195_p2) target bundleno = 535 (0x217), region = 40  ;;  %p222_p3 = scmp.lt.s32.totalorder (!%p195_p2), %s767_s20, 15 }
   0x7   : > { %p227_p4 = scmp.lt.s32.totalorder (!%p195_p2), %s768_s21, 255  ;;  %p770_p5 = scmp.ne.s32.totalorder (!%p195_p2), %s1037_s19, 0 }
   0xb   : > { %s1169_s20 = smov (!%p222_p3, %s767_s20), 15  ;;  %s1171_s21 = smov (!%p227_p4, %s768_s21), 255 }
   0xc   : > { %s224_s24 = scalar_lea.vmem %s1162_s0, %s1169_s20  ;;  %s769_s25 = sshll.u32 %s1171_s21, 2 }
   0xd   : > { %s1052_s28 = scalar_lea.vmem %s1163_s1, %s769_s25  ;;  %236 = sbr.rel (%p770_p5) target bundleno = 20 (0x14), region = 44 }
  0x12   : > { %v996_v0 = vmov 0.0  }
  0x13   : > { %237 = vst [vmem:[#allocation2] sm:$0x1] %v996_v0 }
  0x14 PF: > { %v924_v1 = vld [vmem:[%s1052_s28 + $0x78] sm:$0xff]   ;;  %v928_v5 = vld [vmem:[%s1052_s28 + $0x70] sm:$0xff]   ;;  %v932_v9 = vld [vmem:[%s1052_s28 + $0x68] sm:$0xff]   ;;  %v316_v31 = vlaneseq  ;;  %v997_v35 = vmov 1966171168   ;;  %p804_p6 = scmp.ne.s32.totalorder %s1037_s19, 3 }
  0x15   : > { %v925_v2 = vld [vmem:[%s1052_s28 + $0xf8] sm:$0xff]   ;;  %809 = vmatprep.subr.bf16.mxu0 %v924_v1  ;;  %v929_v6 = vld [vmem:[%s1052_s28 + $0xf0] sm:$0xff]   ;;  %v933_v10 = vld [vmem:[%s1052_s28 + $0xe8] sm:$0xff]   ;;  %v314_v36 = vunpack.c.l.s4 %v997_v35 }
  0x16   : > { %v926_v3 = vld [vmem:[%s1052_s28 + $0x38] sm:$0xff]   ;;  %831 = vmatprep.subr.bf16.mxu1 %v925_v2  ;;  %v930_v7 = vld [vmem:[%s1052_s28 + $0x30] sm:$0xff]   ;;  %v934_v11 = vld [vmem:[%s1052_s28 + $0x28] sm:$0xff]   ;;  %v317_v37 = vshrl.u32 %v316_v31, 7 }
  0x17   : > { %v927_v4 = vld [vmem:[%s1052_s28 + $0xb8] sm:$0xff]   ;;  %810 = vmatpush3.bf16.msra.mxu0 %v926_v3  ;;  %v931_v8 = vld [vmem:[%s1052_s28 + $0xb0] sm:$0xff]   ;;  %v935_v12 = vld [vmem:[%s1052_s28 + $0xa8] sm:$0xff]   ;;  %v315_v39 = vunpack.c.0.s8 %v314_v36 }
  0x18   : > { %832 = vmatpush3.bf16.msra.mxu1 %v927_v4  ;;  %811 = vmatprep.subr.bf16.mxu0 %v928_v5  ;;  %v936_v13 = vld [vmem:[%s1052_s28 + $0x60] sm:$0xff]   ;;  %v940_v17 = vld [vmem:[%s1052_s28 + $0x58] sm:$0xff]   ;;  %v944_v21 = vld [vmem:[%s1052_s28 + $0x50] sm:$0xff]  }
  0x19   : > { %833 = vmatprep.subr.bf16.mxu1 %v929_v6  ;;  %v937_v14 = vld [vmem:[%s1052_s28 + $0xe0] sm:$0xff]   ;;  %v941_v18 = vld [vmem:[%s1052_s28 + $0xd8] sm:$0xff]   ;;  %v945_v22 = vld [vmem:[%s1052_s28 + $0xd0] sm:$0xff]   ;;  %v318_v40 = vsub.s32 %v315_v39, %v317_v37 }
  0x1a   : > { %v938_v15 = vld [vmem:[%s1052_s28 + $0x20] sm:$0xff]   ;;  %v942_v19 = vld [vmem:[%s1052_s28 + $0x18] sm:$0xff]   ;;  %v946_v23 = vld [vmem:[%s1052_s28 + $0x10] sm:$0xff]  }
  0x1b   : > { %812 = vmatpush3.bf16.msra.mxu0 %v930_v7  ;;  %v939_v16 = vld [vmem:[%s1052_s28 + $0xa0] sm:$0xff]   ;;  %v943_v20 = vld [vmem:[%s1052_s28 + $0x98] sm:$0xff]   ;;  %v947_v24 = vld [vmem:[%s1052_s28 + $0x90] sm:$0xff]  }
  0x1c   : > { %834 = vmatpush3.bf16.msra.mxu1 %v931_v8  ;;  %813 = vmatprep.subr.bf16.mxu0 %v932_v9  ;;  %v948_v25 = vld [vmem:[%s1052_s28 + $0x48] sm:$0xff]   ;;  %v952_v29 = vld [vmem:[%s1052_s28 + $0x40] sm:$0xff]  }
  0x1d   : > { %835 = vmatprep.subr.bf16.mxu1 %v933_v10  ;;  %v949_v26 = vld [vmem:[%s1052_s28 + $0xc8] sm:$0xff]   ;;  %v953_v30 = vld [vmem:[%s1052_s28 + $0xc0] sm:$0xff]  }
  0x1e   : > { %v950_v27 = vld [vmem:[%s1052_s28 + $0x8] sm:$0xff]   ;;  %v954_v32 = vld [vmem:[%s1052_s28] sm:$0xff]  }
  0x1f   : > { %814 = vmatpush3.bf16.msra.mxu0 %v934_v11  ;;  %v951_v28 = vld [vmem:[%s1052_s28 + $0x88] sm:$0xff]   ;;  %v955_v33 = vld [vmem:[%s1052_s28 + $0x80] sm:$0xff]  }
  0x20   : > { %836 = vmatpush3.bf16.msra.mxu1 %v935_v12  ;;  %815 = vmatprep.subr.bf16.mxu0 %v936_v13  ;;  %v771_v34 = vld.sshfl [vmem:[%s224_s24] sm:$0x33 pattern:$0x75316420] }
  0x21   : > { %837 = vmatprep.subr.bf16.mxu1 %v937_v14  ;;  %v312_v38 = vcombine.high %v771_v34, %v771_v34  ;;  %v319_v42 = vrot.slane %v771_v34, %v318_v40  ;;  %v238_v52 = vld [vmem:[#allocation2] sm:$0x1] }
  0x23   : > { %816 = vmatpush3.bf16.msra.mxu0 %v938_v15  ;;  %v326_v41 = vrot.slane %v312_v38, %v318_v40  ;;  %v327_v44 = vcombine.high %v319_v42, %v319_v42 }
  0x24   : > { %838 = vmatpush3.bf16.msra.mxu1 %v939_v16  ;;  %817 = vmatprep.subr.bf16.mxu0 %v940_v17 }
  0x25   : > { %839 = vmatprep.subr.bf16.mxu1 %v941_v18  ;;  %557 = vmatprep.mubr.bf16.mxu0 %v326_v41  ;;  %v328_v43 = vcombine.high %v326_v41, %v326_v41 }
  0x27   : > { %818 = vmatpush3.bf16.msra.mxu0 %v942_v19  ;;  %597 = vmatprep.mubr.bf16.mxu1 %v328_v43 }
  0x28   : > { %840 = vmatpush3.bf16.msra.mxu1 %v943_v20  ;;  %819 = vmatprep.subr.bf16.mxu0 %v944_v21 }
  0x29   : > { %841 = vmatprep.subr.bf16.mxu1 %v945_v22 }
  0x2b   : > { %820 = vmatpush3.bf16.msra.mxu0 %v946_v23 }
  0x2c   : > { %842 = vmatpush3.bf16.msra.mxu1 %v947_v24  ;;  %821 = vmatprep.subr.bf16.mxu0 %v948_v25 }
  0x2d   : > { %843 = vmatprep.subr.bf16.mxu1 %v949_v26 }
  0x2f   : > { %822 = vmatpush3.bf16.msra.mxu0 %v950_v27 }
  0x30   : > { %844 = vmatpush3.bf16.msra.mxu1 %v951_v28  ;;  %823 = vmatprep.subr.bf16.mxu0 %v952_v29 }
  0x31   : > { %845 = vmatprep.subr.bf16.mxu1 %v953_v30 }
  0x33   : > { %824 = vmatpush3.bf16.msra.mxu0 %v954_v32 }
  0x34   : > { %846 = vmatpush3.bf16.msra.mxu1 %v955_v33 }
  0x36   : > { %558 = vmatmul.mubr.bf16.vlgmr.msra.gmra.mxu0 %v319_v42 }
  0x37   : > { %598 = vmatmul.mubr.bf16.vlgmr.msra.gmra.mxu1 %v327_v44 }
  0xf6   : > { %v825_v45 = vpop.f32.mrf.mxu0 }
  0xf7   : > { %v847_v46 = vpop.f32.mrf.mxu1 }
  0xf8   : > { %v826_v47 = vpop.f32.mrf.mxu0 }
  0xf9   : > { %v827_v48 = vadd.f32 %v826_v47, %v825_v45  ;;  %v848_v49 = vpop.f32.mrf.mxu1 }
  0xfa   : > { %v828_v50 = vpop.f32.mrf.mxu0  ;;  %v849_v51 = vadd.f32 %v848_v49, %v847_v46 }
  0xfb   : > { %v850_v53 = vpop.f32.mrf.mxu1 }
  0xfc   : > { %v829_v54 = vpop.f32.mrf.mxu0  ;;  %v600_v55 = vadd.f32 %v849_v51, %v827_v48  ;;  %610 = sbr.rel (%p804_p6) target bundleno = 520 (0x208), region = 48 }
  0xfd   : > { %v851_v56 = vpop.f32.mrf.mxu1 }
  0xfe   : > { %v605_v57 = vadd.f32 %v600_v55, %v238_v52 }
 0x100   : > { %606 = vst [vmem:[#allocation2] sm:$0x1] %v605_v57 }
 0x101   : > { %v629_v58 = vld [vmem:[%s1165_s3 + $0x78] sm:$0xff]  ;;  %v998_v59 = vmov 0.0   ;;  %v628_v60 = vld [vmem:[%s1165_s3 + $0x70] sm:$0xff]  ;;  %vm999_vm0 = vmmov 0   ;;  %v627_v61 = vld [vmem:[%s1165_s3 + $0x68] sm:$0xff] }
 0x102   : > { %870 = vmatprep.subr.mxu0 %v998_v59  ;;  %902 = vmatprep.mubr.msk.f32.mxu0 %vm999_vm0, %v998_v59  ;;  %v626_v62 = vld [vmem:[%s1165_s3 + $0x60] sm:$0xff]  ;;  %v625_v63 = vld [vmem:[%s1165_s3 + $0x58] sm:$0xff]  ;;  %v624_v0 = vld [vmem:[%s1165_s3 + $0x50] sm:$0xff] }
 0x103   : > { %871 = vmatpush3.msra.mxu0 %v629_v58  ;;  %v623_v1 = vld [vmem:[%s1165_s3 + $0x48] sm:$0xff]  ;;  %v622_v2 = vld [vmem:[%s1165_s3 + $0x40] sm:$0xff]  ;;  %v621_v3 = vld [vmem:[%s1165_s3 + $0x38] sm:$0xff] }
 0x104   : > { %872 = vmatprep.subr.mxu0 %v998_v59  ;;  %v620_v4 = vld [vmem:[%s1165_s3 + $0x30] sm:$0xff]  ;;  %v619_v5 = vld [vmem:[%s1165_s3 + $0x28] sm:$0xff]  ;;  %v618_v6 = vld [vmem:[%s1165_s3 + $0x20] sm:$0xff] }
 0x105   : > { %873 = vmatpush3.msra.mxu0 %v628_v60  ;;  %v617_v7 = vld [vmem:[%s1165_s3 + $0x18] sm:$0xff]  ;;  %v616_v8 = vld [vmem:[%s1165_s3 + $0x10] sm:$0xff]  ;;  %v612_v10 = vld [vmem:[%s1164_s2] sm:$0x1] }
 0x106   : > { %874 = vmatprep.subr.mxu0 %v998_v59  ;;  %v615_v11 = vld [vmem:[%s1165_s3 + $0x8] sm:$0xff]  ;;  %v614_v12 = vld [vmem:[%s1165_s3] sm:$0xff] }
 0x107   : > { %875 = vmatpush3.msra.mxu0 %v627_v61  ;;  %v611_v9 = vld [vmem:[#allocation2] sm:$0x1] }
 0x108   : > { %876 = vmatprep.subr.mxu0 %v998_v59  ;;  %v613_v13 = vadd.f32 %v612_v10, %v611_v9  ;;  %v630_v14 = vld [vmem:[%s1166_s4] sm:$0x1] }
 0x109   : > { %877 = vmatpush3.msra.mxu0 %v626_v62 }
 0x10a   : > { %878 = vmatprep.subr.mxu0 %v998_v59 }
 0x10b   : > { %879 = vmatpush3.msra.mxu0 %v625_v63 }
 0x10c   : > { %880 = vmatprep.subr.mxu0 %v998_v59 }
 0x10d   : > { %881 = vmatpush3.msra.mxu0 %v624_v0 }
 0x10e   : > { %882 = vmatprep.subr.mxu0 %v998_v59 }
 0x10f   : > { %883 = vmatpush3.msra.mxu0 %v623_v1 }
 0x110   : > { %884 = vmatprep.subr.mxu0 %v998_v59 }
 0x111   : > { %885 = vmatpush3.msra.mxu0 %v622_v2 }
 0x112   : > { %886 = vmatprep.subr.mxu0 %v998_v59 }
 0x113   : > { %887 = vmatpush3.msra.mxu0 %v621_v3 }
 0x114   : > { %888 = vmatprep.subr.mxu0 %v998_v59 }
 0x115   : > { %889 = vmatpush3.msra.mxu0 %v620_v4 }
 0x116   : > { %890 = vmatprep.subr.mxu0 %v998_v59 }
 0x117   : > { %891 = vmatpush3.msra.mxu0 %v619_v5 }
 0x118   : > { %892 = vmatprep.subr.mxu0 %v998_v59 }
 0x119   : > { %893 = vmatpush3.msra.mxu0 %v618_v6 }
 0x11a   : > { %894 = vmatprep.subr.mxu0 %v998_v59 }
 0x11b   : > { %895 = vmatpush3.msra.mxu0 %v617_v7 }
 0x11c   : > { %896 = vmatprep.subr.mxu0 %v998_v59 }
 0x11d   : > { %897 = vmatpush3.msra.mxu0 %v616_v8 }
 0x11e   : > { %898 = vmatprep.subr.mxu0 %v998_v59 }
 0x11f   : > { %899 = vmatpush3.msra.mxu0 %v615_v11 }
 0x120   : > { %900 = vmatprep.subr.mxu0 %v998_v59 }
 0x121   : > { %901 = vmatpush3.msra.mxu0 %v614_v12 }
 0x122   : > { %903 = vmatmul.mubr.f32.vlgmr.msra.gmra.mxu0 %v613_v13 }
 0x1e2   : > { %v697_v15 = vpop.f32.mrf.mxu0 }
 0x1e3   : > { %v698_v16 = vadd.f32 %v697_v15, %v630_v14 }
 0x1e4   : > { %v904_v17 = vpop.f32.mrf.mxu0 }
 0x1e5   : > { %v701_v18 = vsub.f32 0.0, %v698_v16 }
 0x1e7   : > { %v702_v19 = vmul.f32 1.442695, %v701_v18 }
 0x1e9   : > { %956 = vpow2.f32 %v702_v19 }
 0x1f6   : > { %v957_v20 = vpop.eup %956 }
 0x1f7   : > { %v704_v21 = vadd.f32 1.0, %v957_v20 }
 0x1f9   : > { %958 = vrcp.f32 %v704_v21 }
 0x206   : > { %v959_v22 = vpop.eup %958 }
 0x207   : > { %707 = vst [vmem:[#allocation3] sm:$0x1] %v959_v22 }
 0x208 PF: > { %p909_p7 = scmp.eq.s32.totalorder %s1037_s19, 3  ;;  %s1000_s21 = smov [#allocation3]  }
 0x209   : > { %s715_s22 = sshll.u32 %s1000_s21, 4  ;;  %s716_s22 = int_to_ptr.vmem [resolvable:$true] %s715_s22 }
 0x20a   : > { %s960_s23 = scalar_lea.vmem %s716_s22, 16  ;;  %s966_s24 = scalar_lea.vmem %s716_s22, 32 }
 0x20b   : > { %p961_p8 = scmp.ne.s32.totalorder %s716_s22, %s960_s23  ;;  %p967_p11 = scmp.lt.s32.totalorder %s716_s22, %s716_s22 }
 0x20c   : > { %p968_p12 = scmp.lt.s32.totalorder %s966_s24, %s960_s23 }
 0x20d   : > { %p962_p9 = pnand %p961_p8, %p909_p7 }
 0x20e   : > { %p969_p13 = por %p968_p12, %p967_p11 }
 0x20f   : > { %p963_p10 = pneg %p962_p9 }
 0x211   : > { %p970_p0 = pnand %p969_p13, %p963_p10 }
 0x213   : > { %973 = shalt.err (!%p970_p0)
}
 0x214   : > { %906 = dma.vmem_to_hbm [thread:$0]  (%p909_p7), %s716_s22, 16, %s1167_s5, [#allocation4]  }
 0x215   : > { %989 = dma.done.wait (%p909_p7), [#allocation4], 16  }
 0x216   : > { %991 = vsyncadd (%p909_p7), [#allocation4], 4294967280 }
 0x217 PF: > { %s16_s18 = sadd.s32 1, %s994_s18  }
 0x218   : > { %p13_p1 = scmp.ge.s32.totalorder %s16_s18, 6  }
 0x21a   :  { %15 = sbr.rel (!%p13_p1) target bundleno = 1 (0x1), region = 78 }
 0x21f   :  { %728 = vsyncpa [#allocation4], 1 }
 0x220   :  { %730 = vsyncpa [#allocation4 + $0x1], 1 }

// kernel: discriminator_forward.13
= control target key start
LH: loop header
LB: loop body
LE: loop exit
PB: predicated region body
PF: predicated region fallthrough
CT: control target
= control target key end

     0   :  { %s11813_s15 = smov 0   ;;  %s11815_s16 = smov 0   ;;  %s15264_s0 = inlined_call_operand.vmem [shape: bf16[1,3,3,1024], index: 0, kind: input, shape index: {}, may-alias: {0,1}]   ;;  %s15265_s1 = inlined_call_operand.vmem [shape: bf16[1,3,3,1024], index: 1, kind: input, shape index: {}, may-alias: {0,1}]   ;;  %s15266_s2 = inlined_call_operand.vmem [shape: bf16[2,2,1024,512], index: 2, kind: input, shape index: {}]   ;;  %s15267_s3 = inlined_call_operand.vmem [shape: bf16[1,2,2,512], index: 3, kind: output, shape index: {0}]   ;;  %s15268_s4 = inlined_call_operand.vmem [shape: f32[1,2,2,512], index: 4, kind: output, shape index: {1}]  }
   0x1   :  { %s11817_s17 = smov 0  }
   0x2 LB: > { %s24_s18 = sadd.s32 1, %s11780_s16  ;;  %p8383_p0 = scmp.ge.s32.totalorder %s11784_s17, 1  ;;  %s11784_s17 = sphi %s11817_s17, %s15_s17   ;;  %s11780_s16 = sphi %s11815_s16, %s15270_s16   ;;  %s11776_s15 = sphi %s11813_s15, %s15269_s15  }
   0x3   : > { %p25_p1 = scmp.ge.s32.totalorder %s24_s18, 2  ;;  %p207_p2 = scmp.lt.s32.totalorder %s11784_s17, 3 }
   0x5   : > { %s15272_s18 = smov (%p25_p1, %s24_s18), 0  ;;  %p208_p3 = pnand %p8383_p0, %p207_p2 }
   0x6   : > { %p261_p4 = scmp.lt.s32.totalorder (!%p208_p3), %s11776_s15, 2  ;;  %s268_s9 = sadd.s32 (!%p208_p3), 1, %s11776_s15 }
   0x7   : > { %211 = sbr.rel (%p208_p3) target bundleno = 1262 (0x4ee), region = 32  ;;  %p271_p5 = scmp.lt.s32.totalorder (!%p208_p3), %s268_s9, 2 }
   0x8   : > { %p281_p6 = scmp.lt.s32.totalorder (!%p208_p3), %s11776_s15, 1 }
   0xc   : > { %v10218_v0 = vld [vmem:[%s15266_s2 + $0x8e4] ss:$16 sps:$4 sm:$0xff]   ;;  %v10222_v2 = vld [vmem:[%s15266_s2 + $0x8e0] ss:$16 sps:$4 sm:$0xff]   ;;  %v11786_v36 = vmov 1983009808   ;;  %v819_v38 = vlaneseq }
   0xd   : > { %v10220_v1 = vld [vmem:[%s15266_s2 + $0xae4] ss:$16 sps:$4 sm:$0xff]   ;;  %2193 = vmatprep.subr.bf16.mxu0 %v10218_v0  ;;  %v10223_v3 = vld [vmem:[%s15266_s2 + $0xae0] ss:$16 sps:$4 sm:$0xff]   ;;  %v817_v37 = vunpack.c.l.s4 %v11786_v36  ;;  %s262_s27 = scalar_select %p261_p4, %s11776_s15, 2  ;;  %vm8093_vm0 = vcmask 1041408  }
   0xe   : > { %2234 = vmatprep.subr.bf16.mxu1 %v10220_v1  ;;  %v10224_v4 = vld [vmem:[%s15266_s2 + $0x8c4] ss:$16 sps:$4 sm:$0xff]   ;;  %2194 = vmatpush1.bf16.msra.mxu0 %v10222_v2  ;;  %v10228_v6 = vld [vmem:[%s15266_s2 + $0x8c0] ss:$16 sps:$4 sm:$0xff]   ;;  %v11953_v43 = vshrl.u32 %v819_v38, 7  ;;  %s15274_s9 = smov (!%p271_p5, %s268_s9), 2 }
   0xf   : > { %2235 = vmatpush1.bf16.msra.mxu1 %v10223_v3  ;;  %v10226_v5 = vld [vmem:[%s15266_s2 + $0xac4] ss:$16 sps:$4 sm:$0xff]   ;;  %2195 = vmatprep.subr.bf16.mxu0 %v10224_v4  ;;  %v10229_v7 = vld [vmem:[%s15266_s2 + $0xac0] ss:$16 sps:$4 sm:$0xff]   ;;  %v818_v42 = vunpack.c.0.s8 %v817_v37  ;;  %s10189_s10 = sshll.u32 %s262_s27, 4  ;;  %s10190_s8 = sshll.u32 %s15274_s9, 4 }
  0x10   : > { %2236 = vmatprep.subr.bf16.mxu1 %v10226_v5  ;;  %v10230_v8 = vld [vmem:[%s15266_s2 + $0x8a4] ss:$16 sps:$4 sm:$0xff]   ;;  %v10234_v10 = vld [vmem:[%s15266_s2 + $0x8a0] ss:$16 sps:$4 sm:$0xff]   ;;  %s11973_s23 = scalar_lea.vmem %s15264_s0, %s10189_s10  ;;  %s15276_s15 = smov (!%p281_p6, %s11776_s15), 1  ;;  %vm8153_vm1 = vcmp.lt.s32.totalorder %v819_v38, 512 }
  0x11   : > { %v10232_v9 = vld [vmem:[%s15266_s2 + $0xaa4] ss:$16 sps:$4 sm:$0xff]   ;;  %v10235_v11 = vld [vmem:[%s15266_s2 + $0xaa0] ss:$16 sps:$4 sm:$0xff]   ;;  %v11976_v49 = vsub.s32 %v818_v42, %v11953_v43  ;;  %s8388_s20 = sshll.u32 %s15276_s15, 2  ;;  %s10191_s24 = sshll.u32 %s15276_s15, 3 }
  0x12   : > { %2196 = vmatpush1.bf16.msra.mxu0 %v10228_v6  ;;  %v10236_v12 = vld [vmem:[%s15266_s2 + $0x884] ss:$16 sps:$4 sm:$0xff]   ;;  %v10240_v14 = vld [vmem:[%s15266_s2 + $0x880] ss:$16 sps:$4 sm:$0xff]   ;;  %s286_s22 = scalar_lea.vmem %s15267_s3, %s8388_s20  ;;  %s295_s26 = scalar_lea.vmem %s15268_s4, %s10191_s24 }
  0x13   : > { %2237 = vmatpush1.bf16.msra.mxu1 %v10229_v7  ;;  %2197 = vmatprep.subr.bf16.mxu0 %v10230_v8  ;;  %v10238_v13 = vld [vmem:[%s15266_s2 + $0xa84] ss:$16 sps:$4 sm:$0xff]   ;;  %v10241_v15 = vld [vmem:[%s15266_s2 + $0xa80] ss:$16 sps:$4 sm:$0xff]  }
  0x14   : > { %2238 = vmatprep.subr.bf16.mxu1 %v10232_v9  ;;  %v10242_v16 = vld [vmem:[%s15266_s2 + $0x864] ss:$16 sps:$4 sm:$0xff]   ;;  %v10246_v18 = vld [vmem:[%s15266_s2 + $0x860] ss:$16 sps:$4 sm:$0xff]  }
  0x15   : > { %v10244_v17 = vld [vmem:[%s15266_s2 + $0xa64] ss:$16 sps:$4 sm:$0xff]   ;;  %v10247_v19 = vld [vmem:[%s15266_s2 + $0xa60] ss:$16 sps:$4 sm:$0xff]  }
  0x16   : > { %2198 = vmatpush1.bf16.msra.mxu0 %v10234_v10  ;;  %v10248_v20 = vld [vmem:[%s15266_s2 + $0x844] ss:$16 sps:$4 sm:$0xff]   ;;  %v10252_v22 = vld [vmem:[%s15266_s2 + $0x840] ss:$16 sps:$4 sm:$0xff]  }
  0x17   : > { %2239 = vmatpush1.bf16.msra.mxu1 %v10235_v11  ;;  %2199 = vmatprep.subr.bf16.mxu0 %v10236_v12  ;;  %v10250_v21 = vld [vmem:[%s15266_s2 + $0xa44] ss:$16 sps:$4 sm:$0xff]   ;;  %v10253_v23 = vld [vmem:[%s15266_s2 + $0xa40] ss:$16 sps:$4 sm:$0xff]  }
  0x18   : > { %2240 = vmatprep.subr.bf16.mxu1 %v10238_v13  ;;  %v10254_v24 = vld [vmem:[%s15266_s2 + $0x824] ss:$16 sps:$4 sm:$0xff]   ;;  %v10258_v26 = vld [vmem:[%s15266_s2 + $0x820] ss:$16 sps:$4 sm:$0xff]  }
  0x19   : > { %v10256_v25 = vld [vmem:[%s15266_s2 + $0xa24] ss:$16 sps:$4 sm:$0xff]   ;;  %v10259_v27 = vld [vmem:[%s15266_s2 + $0xa20] ss:$16 sps:$4 sm:$0xff]  }
  0x1a   : > { %2200 = vmatpush1.bf16.msra.mxu0 %v10240_v14  ;;  %v10260_v28 = vld [vmem:[%s15266_s2 + $0x804] ss:$16 sps:$4 sm:$0xff]   ;;  %v10264_v30 = vld [vmem:[%s15266_s2 + $0x800] ss:$16 sps:$4 sm:$0xff]  }
  0x1b   : > { %2241 = vmatpush1.bf16.msra.mxu1 %v10241_v15  ;;  %2201 = vmatprep.subr.bf16.mxu0 %v10242_v16  ;;  %v10262_v29 = vld [vmem:[%s15266_s2 + $0xa04] ss:$16 sps:$4 sm:$0xff]   ;;  %v10265_v31 = vld [vmem:[%s15266_s2 + $0xa00] ss:$16 sps:$4 sm:$0xff]  }
  0x1c   : > { %2242 = vmatprep.subr.bf16.mxu1 %v10244_v17  ;;  %v10266_v32 = vld [vmem:[%s15266_s2 + $0x9e4] ss:$16 sps:$4 sm:$0xff]   ;;  %v10270_v34 = vld [vmem:[%s15266_s2 + $0x9e0] ss:$16 sps:$4 sm:$0xff]  }
  0x1d   : > { %v10268_v33 = vld [vmem:[%s15266_s2 + $0xbe4] ss:$16 sps:$4 sm:$0xff]   ;;  %v10271_v35 = vld [vmem:[%s15266_s2 + $0xbe0] ss:$16 sps:$4 sm:$0xff]  }
  0x1e   : > { %2202 = vmatpush1.bf16.msra.mxu0 %v10246_v18  ;;  %v10272_v39 = vld [vmem:[%s15266_s2 + $0x9c4] ss:$16 sps:$4 sm:$0xff]   ;;  %v10276_v41 = vld [vmem:[%s15266_s2 + $0x9c0] ss:$16 sps:$4 sm:$0xff]  }
  0x1f   : > { %2243 = vmatpush1.bf16.msra.mxu1 %v10247_v19  ;;  %2203 = vmatprep.subr.bf16.mxu0 %v10248_v20  ;;  %v10274_v40 = vld [vmem:[%s15266_s2 + $0xbc4] ss:$16 sps:$4 sm:$0xff]   ;;  %v10277_v44 = vld [vmem:[%s15266_s2 + $0xbc0] ss:$16 sps:$4 sm:$0xff]  }
  0x20   : > { %2244 = vmatprep.subr.bf16.mxu1 %v10250_v21  ;;  %v10278_v45 = vld [vmem:[%s15266_s2 + $0x9a4] ss:$16 sps:$4 sm:$0xff]   ;;  %v10282_v47 = vld [vmem:[%s15266_s2 + $0x9a0] ss:$16 sps:$4 sm:$0xff]  }
  0x21   : > { %v10280_v46 = vld [vmem:[%s15266_s2 + $0xba4] ss:$16 sps:$4 sm:$0xff]   ;;  %v10283_v48 = vld [vmem:[%s15266_s2 + $0xba0] ss:$16 sps:$4 sm:$0xff]  }
  0x22   : > { %2204 = vmatpush1.bf16.msra.mxu0 %v10252_v22  ;;  %v10284_v50 = vld [vmem:[%s15266_s2 + $0x984] ss:$16 sps:$4 sm:$0xff]   ;;  %v10288_v53 = vld [vmem:[%s15266_s2 + $0x980] ss:$16 sps:$4 sm:$0xff]  }
  0x23   : > { %2245 = vmatpush1.bf16.msra.mxu1 %v10253_v23  ;;  %2205 = vmatprep.subr.bf16.mxu0 %v10254_v24  ;;  %v10286_v51 = vld [vmem:[%s15266_s2 + $0xb84] ss:$16 sps:$4 sm:$0xff]   ;;  %v10289_v56 = vld [vmem:[%s15266_s2 + $0xb80] ss:$16 sps:$4 sm:$0xff]  }
  0x24   : > { %2246 = vmatprep.subr.bf16.mxu1 %v10256_v25  ;;  %v554_v52 = vld [vmem:[%s11973_s23] sm:$0xff] }
  0x25   : > { %v822_v54 = vrot.slane %v554_v52, %v11976_v49  ;;  %v815_v55 = vcombine.high %v554_v52, %v554_v52  ;;  %v10290_v57 = vld [vmem:[%s15266_s2 + $0x964] ss:$16 sps:$4 sm:$0xff]   ;;  %v10294_v61 = vld [vmem:[%s15266_s2 + $0x960] ss:$16 sps:$4 sm:$0xff]  }
  0x26   : > { %2206 = vmatpush1.bf16.msra.mxu0 %v10258_v26  ;;  %v10292_v58 = vld [vmem:[%s15266_s2 + $0xb64] ss:$16 sps:$4 sm:$0xff]   ;;  %v10295_v62 = vld [vmem:[%s15266_s2 + $0xb60] ss:$16 sps:$4 sm:$0xff]  }
  0x27   : > { %2247 = vmatpush1.bf16.msra.mxu1 %v10259_v27  ;;  %2207 = vmatprep.subr.bf16.mxu0 %v10260_v28  ;;  %v830_v59 = vcombine.high %v822_v54, %v822_v54  ;;  %v829_v60 = vrot.slane %v815_v55, %v11976_v49  ;;  %v10296_v2 = vld [vmem:[%s15266_s2 + $0x944] ss:$16 sps:$4 sm:$0xff]   ;;  %v10300_v7 = vld [vmem:[%s15266_s2 + $0x940] ss:$16 sps:$4 sm:$0xff]   ;;  %v852_v16 = vshll.u32 %v822_v54, 16  ;;  %v850_v22 = vshrl.u32 %v822_v54, 16 }
  0x28   : > { %2248 = vmatprep.subr.bf16.mxu1 %v10262_v29  ;;  %v10298_v3 = vld [vmem:[%s15266_s2 + $0xb44] ss:$16 sps:$4 sm:$0xff]   ;;  %v10301_v8 = vld [vmem:[%s15266_s2 + $0xb40] ss:$16 sps:$4 sm:$0xff]  }
  0x29   : > { %v857_v63 = vshrl.u32 %v830_v59, 16  ;;  %v859_v0 = vshll.u32 %v830_v59, 16  ;;  %v831_v1 = vcombine.high %v829_v60, %v829_v60  ;;  %v10302_v11 = vld [vmem:[%s15266_s2 + $0x924] ss:$16 sps:$4 sm:$0xff]   ;;  %v10306_v14 = vld [vmem:[%s15266_s2 + $0x920] ss:$16 sps:$4 sm:$0xff]  }
  0x2a   : > { %2208 = vmatpush1.bf16.msra.mxu0 %v10264_v30  ;;  %v10304_v12 = vld [vmem:[%s15266_s2 + $0xb24] ss:$16 sps:$4 sm:$0xff]   ;;  %v10307_v15 = vld [vmem:[%s15266_s2 + $0xb20] ss:$16 sps:$4 sm:$0xff]   ;;  %v866_v17 = vshll.u32 %v829_v60, 16  ;;  %v854_v23 = vrot.slane %v852_v16, 1 }
  0x2b   : > { %2249 = vmatpush1.bf16.msra.mxu1 %v10265_v31  ;;  %2209 = vmatprep.subr.bf16.mxu0 %v10266_v32  ;;  %v861_v4 = vrot.slane %v859_v0, 1  ;;  %v871_v5 = vshrl.u32 %v831_v1, 16  ;;  %v873_v6 = vshll.u32 %v831_v1, 16  ;;  %v10308_v18 = vld [vmem:[%s15266_s2 + $0x904] ss:$16 sps:$4 sm:$0xff]   ;;  %v864_v24 = vshrl.u32 %v829_v60, 16 }
  0x2c   : > { %2250 = vmatprep.subr.bf16.mxu1 %v10268_v33  ;;  %v10310_v19 = vld [vmem:[%s15266_s2 + $0xb04] ss:$16 sps:$4 sm:$0xff]   ;;  %v10312_v20 = vld [vmem:[%s15266_s2 + $0x900] ss:$16 sps:$4 sm:$0xff]   ;;  %v868_v25 = vrot.slane %v866_v17, 1  ;;  %v12053_v28 = vor.u32 %v854_v23, %v850_v22 }
  0x2d   : > { %v12017_v9 = vor.u32 %v861_v4, %v857_v63  ;;  %v875_v10 = vrot.slane %v873_v6, 1  ;;  %v10313_v21 = vld [vmem:[%s15266_s2 + $0xb00] ss:$16 sps:$4 sm:$0xff]   ;;  %v10317_v26 = vld [vmem:[%s15266_s2 + $0xce4] ss:$16 sps:$4 sm:$0xff]  }
  0x2e   : > { %2210 = vmatpush2.bf16.msra.mxu0 %v10270_v34  ;;  %v10320_v27 = vld [vmem:[%s15266_s2 + $0xee4] ss:$16 sps:$4 sm:$0xff]   ;;  %v12055_v29 = vor.u32 %v868_v25, %v864_v24  ;;  %v10315_v30 = vld [vmem:[%s15266_s2 + $0xce0] ss:$16 sps:$4 sm:$0xff]  }
  0x2f   : > { %2251 = vmatpush2.bf16.msra.mxu1 %v10271_v35  ;;  %2211 = vmatprep.subr.bf16.mxu0 %v10272_v39  ;;  %v12025_v13 = vor.u32 %v875_v10, %v871_v5  ;;  %v10318_v31 = vld [vmem:[%s15266_s2 + $0xee0] ss:$16 sps:$4 sm:$0xff]   ;;  %v10323_v32 = vld [vmem:[%s15266_s2 + $0xcc4] ss:$16 sps:$4 sm:$0xff]  }
  0x30   : > { %2252 = vmatprep.subr.bf16.mxu1 %v10274_v40  ;;  %2225 = vmatprep.mubr.bf16.mxu0 %v12017_v9  ;;  %v10326_v33 = vld [vmem:[%s15266_s2 + $0xec4] ss:$16 sps:$4 sm:$0xff]   ;;  %v10321_v34 = vld [vmem:[%s15266_s2 + $0xcc0] ss:$16 sps:$4 sm:$0xff]  }
  0x31   : > { %2266 = vmatprep.mubr.bf16.mxu1 %v12025_v13  ;;  %v10324_v35 = vld [vmem:[%s15266_s2 + $0xec0] ss:$16 sps:$4 sm:$0xff]   ;;  %v10329_v36 = vld [vmem:[%s15266_s2 + $0xca4] ss:$16 sps:$4 sm:$0xff]  }
  0x32   : > { %2212 = vmatpush2.bf16.msra.mxu0 %v10276_v41  ;;  %v10332_v37 = vld [vmem:[%s15266_s2 + $0xea4] ss:$16 sps:$4 sm:$0xff]   ;;  %v10327_v39 = vld [vmem:[%s15266_s2 + $0xca0] ss:$16 sps:$4 sm:$0xff]  }
  0x33   : > { %2253 = vmatpush2.bf16.msra.mxu1 %v10277_v44  ;;  %2213 = vmatprep.subr.bf16.mxu0 %v10278_v45  ;;  %v10330_v40 = vld [vmem:[%s15266_s2 + $0xea0] ss:$16 sps:$4 sm:$0xff]   ;;  %v10335_v41 = vld [vmem:[%s15266_s2 + $0xc84] ss:$16 sps:$4 sm:$0xff]  }
  0x34   : > { %2254 = vmatprep.subr.bf16.mxu1 %v10280_v46  ;;  %v10338_v42 = vld [vmem:[%s15266_s2 + $0xe84] ss:$16 sps:$4 sm:$0xff]   ;;  %v10333_v44 = vld [vmem:[%s15266_s2 + $0xc80] ss:$16 sps:$4 sm:$0xff]  }
  0x35   : > { %v10336_v45 = vld [vmem:[%s15266_s2 + $0xe80] ss:$16 sps:$4 sm:$0xff]   ;;  %v10341_v46 = vld [vmem:[%s15266_s2 + $0xc64] ss:$16 sps:$4 sm:$0xff]  }
  0x36   : > { %2214 = vmatpush2.bf16.msra.mxu0 %v10282_v47  ;;  %v10344_v47 = vld [vmem:[%s15266_s2 + $0xe64] ss:$16 sps:$4 sm:$0xff]   ;;  %v10348_v54 = vld [vmem:[%s15266_s2 + $0xe40] ss:$16 sps:$4 sm:$0xff]  }
  0x37   : > { %2255 = vmatpush2.bf16.msra.mxu1 %v10283_v48  ;;  %2215 = vmatprep.subr.bf16.mxu0 %v10284_v50  ;;  %v10339_v48 = vld [vmem:[%s15266_s2 + $0xc60] ss:$16 sps:$4 sm:$0xff]   ;;  %v10350_v52 = vld [vmem:[%s15266_s2 + $0xe44] ss:$16 sps:$4 sm:$0xff]  }
  0x38   : > { %2256 = vmatprep.subr.bf16.mxu1 %v10286_v51  ;;  %v10342_v50 = vld [vmem:[%s15266_s2 + $0xe60] ss:$16 sps:$4 sm:$0xff]   ;;  %v10347_v51 = vld [vmem:[%s15266_s2 + $0xc44] ss:$16 sps:$4 sm:$0xff]  }
  0x39   : > { %v10353_v55 = vld [vmem:[%s15266_s2 + $0xc24] ss:$16 sps:$4 sm:$0xff]   ;;  %v10372_v22 = vld [vmem:[%s15266_s2 + $0xfc0] ss:$16 sps:$4 sm:$0xff]  }
  0x3a   : > { %2216 = vmatpush2.bf16.msra.mxu0 %v10288_v53  ;;  %v10345_v53 = vld [vmem:[%s15266_s2 + $0xc40] ss:$16 sps:$4 sm:$0xff]   ;;  %v10362_v63 = vld [vmem:[%s15266_s2 + $0xe04] ss:$16 sps:$4 sm:$0xff]  }
  0x3b   : > { %2257 = vmatpush2.bf16.msra.mxu1 %v10289_v56  ;;  %2217 = vmatprep.subr.bf16.mxu0 %v10290_v57  ;;  %v10356_v56 = vld [vmem:[%s15266_s2 + $0xe24] ss:$16 sps:$4 sm:$0xff]   ;;  %v555_v57 = vld [vmem:[%s11973_s23 + $0x8] sm:$0xff]  ;;  %v10375_v25 = vld [vmem:[%s15266_s2 + $0xda0] ss:$16 sps:$4 sm:$0xff]  }
  0x3c   : > { %2258 = vmatprep.subr.bf16.mxu1 %v10292_v58  ;;  %v10351_v58 = vld [vmem:[%s15266_s2 + $0xc20] ss:$16 sps:$4 sm:$0xff]   ;;  %v12136_v59 = vrot.slane %v555_v57, %v11976_v49  ;;  %v832_v60 = vcombine.high %v555_v57, %v555_v57  ;;  %v10377_v23 = vld [vmem:[%s15266_s2 + $0xda4] ss:$16 sps:$4 sm:$0xff]  }
  0x3d   : > { %v10380_v24 = vld [vmem:[%s15266_s2 + $0xfa4] ss:$16 sps:$4 sm:$0xff]  }
  0x3e   : > { %2218 = vmatpush2.bf16.msra.mxu0 %v10294_v61  ;;  %v10354_v61 = vld [vmem:[%s15266_s2 + $0xe20] ss:$16 sps:$4 sm:$0xff]   ;;  %v847_v0 = vcombine.high %v12136_v59, %v12136_v59  ;;  %v12150_v1 = vrot.slane %v832_v60, %v11976_v49  ;;  %v10417_v60 = vld [vmem:[%s15266_s2 + $0xaec] ss:$16 sps:$4 sm:$0xff]  }
  0x3f   : > { %2259 = vmatpush2.bf16.msra.mxu1 %v10295_v62  ;;  %2219 = vmatprep.subr.bf16.mxu0 %v10296_v2  ;;  %v10359_v62 = vld [vmem:[%s15266_s2 + $0xc04] ss:$16 sps:$4 sm:$0xff]   ;;  %v10357_v2 = vld [vmem:[%s15266_s2 + $0xc00] ss:$16 sps:$4 sm:$0xff]  }
  0x40   : > { %2260 = vmatprep.subr.bf16.mxu1 %v10298_v3  ;;  %v10360_v3 = vld [vmem:[%s15266_s2 + $0xe00] ss:$16 sps:$4 sm:$0xff]   ;;  %v885_v4 = vshrl.u32 %v847_v0, 16  ;;  %v887_v5 = vshll.u32 %v847_v0, 16  ;;  %v848_v6 = vcombine.high %v12150_v1, %v12150_v1  ;;  %v10420_v0 = vld [vmem:[%s15266_s2 + $0x8cc] ss:$16 sps:$4 sm:$0xff]  }
  0x42   : > { %2220 = vmatpush2.bf16.msra.mxu0 %v10300_v7  ;;  %v10365_v7 = vld [vmem:[%s15266_s2 + $0xde4] ss:$16 sps:$4 sm:$0xff]   ;;  %v889_v10 = vrot.slane %v887_v5, 1  ;;  %v10429_v5 = vld [vmem:[%s15266_s2 + $0xaac] ss:$16 sps:$4 sm:$0xff]  }
  0x43   : > { %2261 = vmatpush2.bf16.msra.mxu1 %v10301_v8  ;;  %2221 = vmatprep.subr.bf16.mxu0 %v10302_v11  ;;  %v10368_v8 = vld [vmem:[%s15266_s2 + $0xfe4] ss:$16 sps:$4 sm:$0xff]   ;;  %v899_v11 = vshrl.u32 %v848_v6, 16 }
  0x44   : > { %2262 = vmatprep.subr.bf16.mxu1 %v10304_v12  ;;  %v901_v12 = vshll.u32 %v848_v6, 16  ;;  %v12172_v16 = vor.u32 %v889_v10, %v885_v4  ;;  %v10426_v4 = vld [vmem:[%s15266_s2 + $0x8ac] ss:$16 sps:$4 sm:$0xff]   ;;  %v10424_v6 = vld [vmem:[%s15266_s2 + $0x8a8] ss:$16 sps:$4 sm:$0xff]  }
  0x45   : > { %v10433_v10 = vld [vmem:[%s15266_s2 + $0xa88] ss:$16 sps:$4 sm:$0xff]  }
  0x46   : > { %2222 = vmatpush2.bf16.msra.mxu0 %v10306_v14  ;;  %v10363_v14 = vld [vmem:[%s15266_s2 + $0xde0] ss:$16 sps:$4 sm:$0xff]   ;;  %v903_v17 = vrot.slane %v901_v12, 1  ;;  %v10441_v12 = vld [vmem:[%s15266_s2 + $0xa6c] ss:$16 sps:$4 sm:$0xff]  }
  0x47   : > { %2263 = vmatpush2.bf16.msra.mxu1 %v10307_v15  ;;  %2223 = vmatprep.subr.bf16.mxu0 %v10308_v18  ;;  %v10366_v15 = vld [vmem:[%s15266_s2 + $0xfe0] ss:$16 sps:$4 sm:$0xff]   ;;  %v10371_v18 = vld [vmem:[%s15266_s2 + $0xdc4] ss:$16 sps:$4 sm:$0xff]  }
  0x48   : > { %2264 = vmatprep.subr.bf16.mxu1 %v10310_v19  ;;  %v10374_v19 = vld [vmem:[%s15266_s2 + $0xfc4] ss:$16 sps:$4 sm:$0xff]  }
  0x4a   : > { %2224 = vmatpush2.bf16.msra.mxu0 %v10312_v20  ;;  %v12180_v20 = vor.u32 %v903_v17, %v899_v11  ;;  %v10438_v11 = vld [vmem:[%s15266_s2 + $0x86c] ss:$16 sps:$4 sm:$0xff]  }
  0x4b   : > { %2265 = vmatpush2.bf16.msra.mxu1 %v10313_v21  ;;  %2275 = vmatprep.subr.bf16.mxu0 %v10317_v26  ;;  %v10369_v21 = vld [vmem:[%s15266_s2 + $0xdc0] ss:$16 sps:$4 sm:$0xff]   ;;  %v10444_v17 = vld [vmem:[%s15266_s2 + $0x84c] ss:$16 sps:$4 sm:$0xff]  }
  0x4c   : > { %2316 = vmatprep.subr.bf16.mxu1 %v10320_v27  ;;  %v10378_v26 = vld [vmem:[%s15266_s2 + $0xfa0] ss:$16 sps:$4 sm:$0xff]   ;;  %v10383_v27 = vld [vmem:[%s15266_s2 + $0xd84] ss:$16 sps:$4 sm:$0xff]  }
  0x4d   : > { %2226 = vmatmul.mubr.bf16.vlgmr.msra.gmra.mxu0 %v12053_v28 }
  0x4e   : > { %2267 = vmatmul.mubr.bf16.vlgmr.msra.gmra.mxu1 %v12055_v29  ;;  %2276 = vmatpush1.bf16.msra.mxu0 %v10315_v30  ;;  %v10386_v30 = vld [vmem:[%s15266_s2 + $0xf84] ss:$16 sps:$4 sm:$0xff]  }
  0x4f   : > { %2317 = vmatpush1.bf16.msra.mxu1 %v10318_v31  ;;  %2277 = vmatprep.subr.bf16.mxu0 %v10323_v32  ;;  %v10381_v31 = vld [vmem:[%s15266_s2 + $0xd80] ss:$16 sps:$4 sm:$0xff]  }
  0x50   : > { %2318 = vmatprep.subr.bf16.mxu1 %v10326_v33  ;;  %2307 = vmatprep.mubr.bf16.mxu0 %v12172_v16  ;;  %v10384_v32 = vld [vmem:[%s15266_s2 + $0xf80] ss:$16 sps:$4 sm:$0xff]   ;;  %v10389_v33 = vld [vmem:[%s15266_s2 + $0xd64] ss:$16 sps:$4 sm:$0xff]  }
  0x51   : > { %2348 = vmatprep.mubr.bf16.mxu1 %v12180_v20 }
  0x52   : > { %2278 = vmatpush1.bf16.msra.mxu0 %v10321_v34  ;;  %v10392_v34 = vld [vmem:[%s15266_s2 + $0xf64] ss:$16 sps:$4 sm:$0xff]  }
  0x53   : > { %2319 = vmatpush1.bf16.msra.mxu1 %v10324_v35  ;;  %2279 = vmatprep.subr.bf16.mxu0 %v10329_v36  ;;  %v10387_v35 = vld [vmem:[%s15266_s2 + $0xd60] ss:$16 sps:$4 sm:$0xff]  }
  0x54   : > { %2320 = vmatprep.subr.bf16.mxu1 %v10332_v37  ;;  %v10390_v36 = vld [vmem:[%s15266_s2 + $0xf60] ss:$16 sps:$4 sm:$0xff]   ;;  %v10395_v37 = vld [vmem:[%s15266_s2 + $0xd44] ss:$16 sps:$4 sm:$0xff]  }
  0x56   : > { %2280 = vmatpush1.bf16.msra.mxu0 %v10327_v39  ;;  %v10398_v39 = vld [vmem:[%s15266_s2 + $0xf44] ss:$16 sps:$4 sm:$0xff]  }
  0x57   : > { %2321 = vmatpush1.bf16.msra.mxu1 %v10330_v40  ;;  %2281 = vmatprep.subr.bf16.mxu0 %v10335_v41  ;;  %v10393_v40 = vld [vmem:[%s15266_s2 + $0xd40] ss:$16 sps:$4 sm:$0xff]  }
  0x58   : > { %2322 = vmatprep.subr.bf16.mxu1 %v10338_v42  ;;  %v10396_v41 = vld [vmem:[%s15266_s2 + $0xf40] ss:$16 sps:$4 sm:$0xff]   ;;  %v10401_v42 = vld [vmem:[%s15266_s2 + $0xd24] ss:$16 sps:$4 sm:$0xff]  }
  0x5a   : > { %2282 = vmatpush1.bf16.msra.mxu0 %v10333_v44  ;;  %v10404_v44 = vld [vmem:[%s15266_s2 + $0xf24] ss:$16 sps:$4 sm:$0xff]  }
  0x5b   : > { %2323 = vmatpush1.bf16.msra.mxu1 %v10336_v45  ;;  %2283 = vmatprep.subr.bf16.mxu0 %v10341_v46  ;;  %v10399_v45 = vld [vmem:[%s15266_s2 + $0xd20] ss:$16 sps:$4 sm:$0xff]  }
  0x5c   : > { %2324 = vmatprep.subr.bf16.mxu1 %v10344_v47  ;;  %v10402_v46 = vld [vmem:[%s15266_s2 + $0xf20] ss:$16 sps:$4 sm:$0xff]   ;;  %v880_v47 = vshll.u32 %v12136_v59, 16 }
  0x5e   : > { %2284 = vmatpush1.bf16.msra.mxu0 %v10339_v48  ;;  %v894_v48 = vshll.u32 %v12150_v1, 16 }
  0x5f   : > { %2325 = vmatpush1.bf16.msra.mxu1 %v10342_v50  ;;  %2285 = vmatprep.subr.bf16.mxu0 %v10347_v51  ;;  %v10407_v50 = vld [vmem:[%s15266_s2 + $0xd04] ss:$16 sps:$4 sm:$0xff]  }
  0x60   : > { %2326 = vmatprep.subr.bf16.mxu1 %v10350_v52  ;;  %v10410_v51 = vld [vmem:[%s15266_s2 + $0xf04] ss:$16 sps:$4 sm:$0xff]   ;;  %v10405_v52 = vld [vmem:[%s15266_s2 + $0xd00] ss:$16 sps:$4 sm:$0xff]   ;;  %v896_v57 = vrot.slane %v894_v48, 1 }
  0x61   : > { %v10478_v48 = vld [vmem:[%s15266_s2 + $0x988] ss:$16 sps:$4 sm:$0xff]  }
  0x62   : > { %2286 = vmatpush1.bf16.msra.mxu0 %v10345_v53  ;;  %v10408_v53 = vld [vmem:[%s15266_s2 + $0xf00] ss:$16 sps:$4 sm:$0xff]  }
  0x63   : > { %2327 = vmatpush1.bf16.msra.mxu1 %v10348_v54  ;;  %2287 = vmatprep.subr.bf16.mxu0 %v10353_v55  ;;  %v878_v54 = vshrl.u32 %v12136_v59, 16  ;;  %v882_v55 = vrot.slane %v880_v47, 1  ;;  %v10412_v59 = vld [vmem:[%s15266_s2 + $0x8e8] ss:$16 sps:$4 sm:$0xff]   ;;  %v10483_v47 = vld [vmem:[%s15266_s2 + $0xb8c] ss:$16 sps:$4 sm:$0xff]  }
  0x64   : > { %2328 = vmatprep.subr.bf16.mxu1 %v10356_v56  ;;  %v892_v56 = vshrl.u32 %v12150_v1, 16  ;;  %v10423_v1 = vld [vmem:[%s15266_s2 + $0xacc] ss:$16 sps:$4 sm:$0xff]  }
  0x66   : > { %2288 = vmatpush1.bf16.msra.mxu0 %v10351_v58  ;;  %v10414_v58 = vld [vmem:[%s15266_s2 + $0x8ec] ss:$16 sps:$4 sm:$0xff]  }
  0x67   : > { %2329 = vmatpush1.bf16.msra.mxu1 %v10354_v61  ;;  %2289 = vmatprep.subr.bf16.mxu0 %v10359_v62  ;;  %v12272_v61 = vor.u32 %v882_v55, %v878_v54  ;;  %v12274_v62 = vor.u32 %v896_v57, %v892_v56  ;;  %v10487_v54 = vld [vmem:[%s15266_s2 + $0xb68] ss:$16 sps:$4 sm:$0xff]   ;;  %v10492_v55 = vld [vmem:[%s15266_s2 + $0x94c] ss:$16 sps:$4 sm:$0xff]  }
  0x68   : > { %2330 = vmatprep.subr.bf16.mxu1 %v10362_v63  ;;  %v10415_v63 = vld [vmem:[%s15266_s2 + $0xae8] ss:$16 sps:$4 sm:$0xff]   ;;  %v10495_v56 = vld [vmem:[%s15266_s2 + $0xb4c] ss:$16 sps:$4 sm:$0xff]  }
  0x69   : > { %v10490_v57 = vld [vmem:[%s15266_s2 + $0x948] ss:$16 sps:$4 sm:$0xff]  }
  0x6a   : > { %2290 = vmatpush1.bf16.msra.mxu0 %v10357_v2  ;;  %v10418_v2 = vld [vmem:[%s15266_s2 + $0x8c8] ss:$16 sps:$4 sm:$0xff]  }
  0x6b   : > { %2331 = vmatpush1.bf16.msra.mxu1 %v10360_v3  ;;  %2291 = vmatprep.subr.bf16.mxu0 %v10365_v7  ;;  %v10421_v3 = vld [vmem:[%s15266_s2 + $0xac8] ss:$16 sps:$4 sm:$0xff]  }
  0x6c   : > { %2332 = vmatprep.subr.bf16.mxu1 %v10368_v8  ;;  %v10427_v7 = vld [vmem:[%s15266_s2 + $0xaa8] ss:$16 sps:$4 sm:$0xff]   ;;  %v10432_v8 = vld [vmem:[%s15266_s2 + $0x88c] ss:$16 sps:$4 sm:$0xff]  }
  0x6e   : > { %2292 = vmatpush2.bf16.msra.mxu0 %v10363_v14  ;;  %v10436_v14 = vld [vmem:[%s15266_s2 + $0x868] ss:$16 sps:$4 sm:$0xff]  }
  0x6f   : > { %2333 = vmatpush2.bf16.msra.mxu1 %v10366_v15  ;;  %2293 = vmatprep.subr.bf16.mxu0 %v10371_v18  ;;  %v10439_v15 = vld [vmem:[%s15266_s2 + $0xa68] ss:$16 sps:$4 sm:$0xff]   ;;  %v10447_v18 = vld [vmem:[%s15266_s2 + $0xa4c] ss:$16 sps:$4 sm:$0xff]  }
  0x70   : > { %2334 = vmatprep.subr.bf16.mxu1 %v10374_v19  ;;  %v10442_v19 = vld [vmem:[%s15266_s2 + $0x848] ss:$16 sps:$4 sm:$0xff]  }
  0x72   : > { %2294 = vmatpush2.bf16.msra.mxu0 %v10369_v21  ;;  %v10445_v21 = vld [vmem:[%s15266_s2 + $0xa48] ss:$16 sps:$4 sm:$0xff]  }
  0x73   : > { %2335 = vmatpush2.bf16.msra.mxu1 %v10372_v22  ;;  %2295 = vmatprep.subr.bf16.mxu0 %v10377_v23  ;;  %v10450_v22 = vld [vmem:[%s15266_s2 + $0x82c] ss:$16 sps:$4 sm:$0xff]  }
  0x74   : > { %2336 = vmatprep.subr.bf16.mxu1 %v10380_v24  ;;  %v10453_v23 = vld [vmem:[%s15266_s2 + $0xa2c] ss:$16 sps:$4 sm:$0xff]   ;;  %v10448_v24 = vld [vmem:[%s15266_s2 + $0x828] ss:$16 sps:$4 sm:$0xff]  }
  0x76   : > { %2296 = vmatpush2.bf16.msra.mxu0 %v10375_v25  ;;  %v10451_v25 = vld [vmem:[%s15266_s2 + $0xa28] ss:$16 sps:$4 sm:$0xff]  }
  0x77   : > { %2337 = vmatpush2.bf16.msra.mxu1 %v10378_v26  ;;  %2297 = vmatprep.subr.bf16.mxu0 %v10383_v27  ;;  %v10456_v26 = vld [vmem:[%s15266_s2 + $0x80c] ss:$16 sps:$4 sm:$0xff]  }
  0x78   : > { %2338 = vmatprep.subr.bf16.mxu1 %v10386_v30  ;;  %v10459_v27 = vld [vmem:[%s15266_s2 + $0xa0c] ss:$16 sps:$4 sm:$0xff]   ;;  %v10454_v30 = vld [vmem:[%s15266_s2 + $0x808] ss:$16 sps:$4 sm:$0xff]  }
  0x7a   : > { %2298 = vmatpush2.bf16.msra.mxu0 %v10381_v31  ;;  %v10457_v31 = vld [vmem:[%s15266_s2 + $0xa08] ss:$16 sps:$4 sm:$0xff]  }
  0x7b   : > { %2339 = vmatpush2.bf16.msra.mxu1 %v10384_v32  ;;  %2299 = vmatprep.subr.bf16.mxu0 %v10389_v33  ;;  %v10462_v32 = vld [vmem:[%s15266_s2 + $0x9ec] ss:$16 sps:$4 sm:$0xff]  }
  0x7c   : > { %2340 = vmatprep.subr.bf16.mxu1 %v10392_v34  ;;  %v10465_v33 = vld [vmem:[%s15266_s2 + $0xbec] ss:$16 sps:$4 sm:$0xff]   ;;  %v10460_v34 = vld [vmem:[%s15266_s2 + $0x9e8] ss:$16 sps:$4 sm:$0xff]  }
  0x7e   : > { %2300 = vmatpush2.bf16.msra.mxu0 %v10387_v35  ;;  %v10463_v35 = vld [vmem:[%s15266_s2 + $0xbe8] ss:$16 sps:$4 sm:$0xff]  }
  0x7f   : > { %2341 = vmatpush2.bf16.msra.mxu1 %v10390_v36  ;;  %2301 = vmatprep.subr.bf16.mxu0 %v10395_v37  ;;  %v10468_v36 = vld [vmem:[%s15266_s2 + $0x9cc] ss:$16 sps:$4 sm:$0xff]  }
  0x80   : > { %2342 = vmatprep.subr.bf16.mxu1 %v10398_v39  ;;  %v10471_v37 = vld [vmem:[%s15266_s2 + $0xbcc] ss:$16 sps:$4 sm:$0xff]   ;;  %v10466_v39 = vld [vmem:[%s15266_s2 + $0x9c8] ss:$16 sps:$4 sm:$0xff]  }
  0x82   : > { %2302 = vmatpush2.bf16.msra.mxu0 %v10393_v40  ;;  %v10469_v40 = vld [vmem:[%s15266_s2 + $0xbc8] ss:$16 sps:$4 sm:$0xff]  }
  0x83   : > { %2343 = vmatpush2.bf16.msra.mxu1 %v10396_v41  ;;  %2303 = vmatprep.subr.bf16.mxu0 %v10401_v42  ;;  %v10474_v41 = vld [vmem:[%s15266_s2 + $0x9ac] ss:$16 sps:$4 sm:$0xff]  }
  0x84   : > { %2344 = vmatprep.subr.bf16.mxu1 %v10404_v44  ;;  %v10477_v42 = vld [vmem:[%s15266_s2 + $0xbac] ss:$16 sps:$4 sm:$0xff]   ;;  %v10472_v44 = vld [vmem:[%s15266_s2 + $0x9a8] ss:$16 sps:$4 sm:$0xff]  }
  0x86   : > { %2304 = vmatpush2.bf16.msra.mxu0 %v10399_v45  ;;  %v10475_v45 = vld [vmem:[%s15266_s2 + $0xba8] ss:$16 sps:$4 sm:$0xff]  }
  0x87   : > { %2345 = vmatpush2.bf16.msra.mxu1 %v10402_v46  ;;  %2305 = vmatprep.subr.bf16.mxu0 %v10407_v50  ;;  %v10480_v46 = vld [vmem:[%s15266_s2 + $0x98c] ss:$16 sps:$4 sm:$0xff]   ;;  %v10481_v50 = vld [vmem:[%s15266_s2 + $0xb88] ss:$16 sps:$4 sm:$0xff]  }
  0x88   : > { %2346 = vmatprep.subr.bf16.mxu1 %v10410_v51  ;;  %v10486_v51 = vld [vmem:[%s15266_s2 + $0x96c] ss:$16 sps:$4 sm:$0xff]  }
  0x8a   : > { %2306 = vmatpush2.bf16.msra.mxu0 %v10405_v52  ;;  %v10489_v52 = vld [vmem:[%s15266_s2 + $0xb6c] ss:$16 sps:$4 sm:$0xff]  }
  0x8b   : > { %2347 = vmatpush2.bf16.msra.mxu1 %v10408_v53  ;;  %2357 = vmatprep.subr.bf16.mxu0 %v10414_v58  ;;  %v10484_v53 = vld [vmem:[%s15266_s2 + $0x968] ss:$16 sps:$4 sm:$0xff]  }
  0x8c   : > { %2398 = vmatprep.subr.bf16.mxu1 %v10417_v60  ;;  %v10493_v58 = vld [vmem:[%s15266_s2 + $0xb48] ss:$16 sps:$4 sm:$0xff]   ;;  %v10498_v60 = vld [vmem:[%s15266_s2 + $0x92c] ss:$16 sps:$4 sm:$0xff]  }
  0x8d   : > { %2308 = vmatmul.mubr.bf16.vlgmr.msra.gmra.mxu0 %v12272_v61 }
  0x8e   : > { %2349 = vmatmul.mubr.bf16.vlgmr.msra.gmra.mxu1 %v12274_v62  ;;  %2358 = vmatpush1.bf16.msra.mxu0 %v10412_v59  ;;  %v10501_v59 = vld [vmem:[%s15266_s2 + $0xb2c] ss:$16 sps:$4 sm:$0xff]  }
  0x8f   : > { %2399 = vmatpush1.bf16.msra.mxu1 %v10415_v63  ;;  %2359 = vmatprep.subr.bf16.mxu0 %v10420_v0  ;;  %v10496_v63 = vld [vmem:[%s15266_s2 + $0x928] ss:$16 sps:$4 sm:$0xff]  }
  0x90   : > { %2400 = vmatprep.subr.bf16.mxu1 %v10423_v1  ;;  %2389 = vmatprep.mubr.bf16.mxu0 %v12017_v9  ;;  %v10435_v9 = vld [vmem:[%s15266_s2 + $0xa8c] ss:$16 sps:$4 sm:$0xff]   ;;  %v10499_v0 = vld [vmem:[%s15266_s2 + $0xb28] ss:$16 sps:$4 sm:$0xff]  }
  0x91   : > { %2430 = vmatprep.mubr.bf16.mxu1 %v12025_v13  ;;  %v10430_v13 = vld [vmem:[%s15266_s2 + $0x888] ss:$16 sps:$4 sm:$0xff]   ;;  %v10504_v1 = vld [vmem:[%s15266_s2 + $0x90c] ss:$16 sps:$4 sm:$0xff]  }
  0x92   : > { %2360 = vmatpush1.bf16.msra.mxu0 %v10418_v2  ;;  %v10507_v2 = vld [vmem:[%s15266_s2 + $0xb0c] ss:$16 sps:$4 sm:$0xff]  }
  0x93   : > { %2401 = vmatpush1.bf16.msra.mxu1 %v10421_v3  ;;  %2361 = vmatprep.subr.bf16.mxu0 %v10426_v4  ;;  %v10502_v3 = vld [vmem:[%s15266_s2 + $0x908] ss:$16 sps:$4 sm:$0xff]  }
  0x94   : > { %2402 = vmatprep.subr.bf16.mxu1 %v10429_v5  ;;  %v10505_v4 = vld [vmem:[%s15266_s2 + $0xb08] ss:$16 sps:$4 sm:$0xff]   ;;  %v10510_v5 = vld [vmem:[%s15266_s2 + $0xcec] ss:$16 sps:$4 sm:$0xff]  }
  0x96   : > { %2362 = vmatpush1.bf16.msra.mxu0 %v10424_v6  ;;  %v10513_v6 = vld [vmem:[%s15266_s2 + $0xeec] ss:$16 sps:$4 sm:$0xff]  }
  0x97   : > { %2403 = vmatpush1.bf16.msra.mxu1 %v10427_v7  ;;  %2363 = vmatprep.subr.bf16.mxu0 %v10432_v8  ;;  %v10508_v7 = vld [vmem:[%s15266_s2 + $0xce8] ss:$16 sps:$4 sm:$0xff]  }
  0x98   : > { %2404 = vmatprep.subr.bf16.mxu1 %v10435_v9  ;;  %v10511_v8 = vld [vmem:[%s15266_s2 + $0xee8] ss:$16 sps:$4 sm:$0xff]   ;;  %v10516_v9 = vld [vmem:[%s15266_s2 + $0xccc] ss:$16 sps:$4 sm:$0xff]  }
  0x9a   : > { %2364 = vmatpush1.bf16.msra.mxu0 %v10430_v13  ;;  %v10519_v13 = vld [vmem:[%s15266_s2 + $0xecc] ss:$16 sps:$4 sm:$0xff]  }
  0x9b   : > { %2405 = vmatpush1.bf16.msra.mxu1 %v10433_v10  ;;  %2365 = vmatprep.subr.bf16.mxu0 %v10438_v11  ;;  %v10514_v10 = vld [vmem:[%s15266_s2 + $0xcc8] ss:$16 sps:$4 sm:$0xff]  }
  0x9c   : > { %2406 = vmatprep.subr.bf16.mxu1 %v10441_v12  ;;  %v10517_v11 = vld [vmem:[%s15266_s2 + $0xec8] ss:$16 sps:$4 sm:$0xff]   ;;  %v10522_v12 = vld [vmem:[%s15266_s2 + $0xcac] ss:$16 sps:$4 sm:$0xff]  }
  0x9e   : > { %2366 = vmatpush1.bf16.msra.mxu0 %v10436_v14  ;;  %v10523_v14 = vld [vmem:[%s15266_s2 + $0xea8] ss:$16 sps:$4 sm:$0xff]  }
  0x9f   : > { %2407 = vmatpush1.bf16.msra.mxu1 %v10439_v15  ;;  %2367 = vmatprep.subr.bf16.mxu0 %v10444_v17  ;;  %v10528_v15 = vld [vmem:[%s15266_s2 + $0xc8c] ss:$16 sps:$4 sm:$0xff]   ;;  %v10529_v17 = vld [vmem:[%s15266_s2 + $0xe88] ss:$16 sps:$4 sm:$0xff]  }
  0xa0   : > { %2408 = vmatprep.subr.bf16.mxu1 %v10447_v18  ;;  %v10534_v18 = vld [vmem:[%s15266_s2 + $0xc6c] ss:$16 sps:$4 sm:$0xff]  }
  0xa2   : > { %2368 = vmatpush1.bf16.msra.mxu0 %v10442_v19  ;;  %v10537_v19 = vld [vmem:[%s15266_s2 + $0xe6c] ss:$16 sps:$4 sm:$0xff]  }
  0xa3   : > { %2409 = vmatpush1.bf16.msra.mxu1 %v10445_v21  ;;  %2369 = vmatprep.subr.bf16.mxu0 %v10450_v22  ;;  %v10532_v21 = vld [vmem:[%s15266_s2 + $0xc68] ss:$16 sps:$4 sm:$0xff]  }
  0xa4   : > { %2410 = vmatprep.subr.bf16.mxu1 %v10453_v23  ;;  %v10535_v22 = vld [vmem:[%s15266_s2 + $0xe68] ss:$16 sps:$4 sm:$0xff]   ;;  %v10540_v23 = vld [vmem:[%s15266_s2 + $0xc4c] ss:$16 sps:$4 sm:$0xff]  }
  0xa6   : > { %2370 = vmatpush1.bf16.msra.mxu0 %v10448_v24  ;;  %v10543_v24 = vld [vmem:[%s15266_s2 + $0xe4c] ss:$16 sps:$4 sm:$0xff]  }
  0xa7   : > { %2411 = vmatpush1.bf16.msra.mxu1 %v10451_v25  ;;  %2371 = vmatprep.subr.bf16.mxu0 %v10456_v26  ;;  %v10538_v25 = vld [vmem:[%s15266_s2 + $0xc48] ss:$16 sps:$4 sm:$0xff]  }
  0xa8   : > { %2412 = vmatprep.subr.bf16.mxu1 %v10459_v27  ;;  %v10541_v26 = vld [vmem:[%s15266_s2 + $0xe48] ss:$16 sps:$4 sm:$0xff]   ;;  %v10546_v27 = vld [vmem:[%s15266_s2 + $0xc2c] ss:$16 sps:$4 sm:$0xff]  }
  0xaa   : > { %2372 = vmatpush1.bf16.msra.mxu0 %v10454_v30  ;;  %v10549_v30 = vld [vmem:[%s15266_s2 + $0xe2c] ss:$16 sps:$4 sm:$0xff]  }
  0xab   : > { %2413 = vmatpush1.bf16.msra.mxu1 %v10457_v31  ;;  %2373 = vmatprep.subr.bf16.mxu0 %v10462_v32  ;;  %v10544_v31 = vld [vmem:[%s15266_s2 + $0xc28] ss:$16 sps:$4 sm:$0xff]  }
  0xac   : > { %2414 = vmatprep.subr.bf16.mxu1 %v10465_v33  ;;  %v10547_v32 = vld [vmem:[%s15266_s2 + $0xe28] ss:$16 sps:$4 sm:$0xff]   ;;  %v10552_v33 = vld [vmem:[%s15266_s2 + $0xc0c] ss:$16 sps:$4 sm:$0xff]  }
  0xae   : > { %2374 = vmatpush2.bf16.msra.mxu0 %v10460_v34  ;;  %v10555_v34 = vld [vmem:[%s15266_s2 + $0xe0c] ss:$16 sps:$4 sm:$0xff]  }
  0xaf   : > { %2415 = vmatpush2.bf16.msra.mxu1 %v10463_v35  ;;  %2375 = vmatprep.subr.bf16.mxu0 %v10468_v36  ;;  %v10550_v35 = vld [vmem:[%s15266_s2 + $0xc08] ss:$16 sps:$4 sm:$0xff]  }
  0xb0   : > { %2416 = vmatprep.subr.bf16.mxu1 %v10471_v37  ;;  %v10553_v36 = vld [vmem:[%s15266_s2 + $0xe08] ss:$16 sps:$4 sm:$0xff]   ;;  %v10558_v37 = vld [vmem:[%s15266_s2 + $0xdec] ss:$16 sps:$4 sm:$0xff]  }
  0xb2   : > { %2376 = vmatpush2.bf16.msra.mxu0 %v10466_v39  ;;  %v10561_v39 = vld [vmem:[%s15266_s2 + $0xfec] ss:$16 sps:$4 sm:$0xff]  }
  0xb3   : > { %2417 = vmatpush2.bf16.msra.mxu1 %v10469_v40  ;;  %2377 = vmatprep.subr.bf16.mxu0 %v10474_v41  ;;  %v10556_v40 = vld [vmem:[%s15266_s2 + $0xde8] ss:$16 sps:$4 sm:$0xff]  }
  0xb4   : > { %2418 = vmatprep.subr.bf16.mxu1 %v10477_v42  ;;  %v10559_v41 = vld [vmem:[%s15266_s2 + $0xfe8] ss:$16 sps:$4 sm:$0xff]   ;;  %v10564_v42 = vld [vmem:[%s15266_s2 + $0xdcc] ss:$16 sps:$4 sm:$0xff]  }
  0xb6   : > { %2378 = vmatpush2.bf16.msra.mxu0 %v10472_v44  ;;  %v10567_v44 = vld [vmem:[%s15266_s2 + $0xfcc] ss:$16 sps:$4 sm:$0xff]  }
  0xb7   : > { %2419 = vmatpush2.bf16.msra.mxu1 %v10475_v45  ;;  %2379 = vmatprep.subr.bf16.mxu0 %v10480_v46  ;;  %v10562_v45 = vld [vmem:[%s15266_s2 + $0xdc8] ss:$16 sps:$4 sm:$0xff]  }
  0xb8   : > { %2420 = vmatprep.subr.bf16.mxu1 %v10483_v47  ;;  %v10565_v46 = vld [vmem:[%s15266_s2 + $0xfc8] ss:$16 sps:$4 sm:$0xff]   ;;  %v10570_v47 = vld [vmem:[%s15266_s2 + $0xdac] ss:$16 sps:$4 sm:$0xff]  }
  0xba   : > { %2380 = vmatpush2.bf16.msra.mxu0 %v10478_v48  ;;  %v10573_v48 = vld [vmem:[%s15266_s2 + $0xfac] ss:$16 sps:$4 sm:$0xff]  }
  0xbb   : > { %2421 = vmatpush2.bf16.msra.mxu1 %v10481_v50  ;;  %2381 = vmatprep.subr.bf16.mxu0 %v10486_v51  ;;  %v10568_v50 = vld [vmem:[%s15266_s2 + $0xda8] ss:$16 sps:$4 sm:$0xff]  }
  0xbc   : > { %2422 = vmatprep.subr.bf16.mxu1 %v10489_v52  ;;  %v10571_v51 = vld [vmem:[%s15266_s2 + $0xfa8] ss:$16 sps:$4 sm:$0xff]   ;;  %v10576_v52 = vld [vmem:[%s15266_s2 + $0xd8c] ss:$16 sps:$4 sm:$0xff]  }
  0xbe   : > { %2382 = vmatpush2.bf16.msra.mxu0 %v10484_v53  ;;  %v10579_v53 = vld [vmem:[%s15266_s2 + $0xf8c] ss:$16 sps:$4 sm:$0xff]  }
  0xbf   : > { %2423 = vmatpush2.bf16.msra.mxu1 %v10487_v54  ;;  %2383 = vmatprep.subr.bf16.mxu0 %v10492_v55  ;;  %v10574_v54 = vld [vmem:[%s15266_s2 + $0xd88] ss:$16 sps:$4 sm:$0xff]  }
  0xc0   : > { %2424 = vmatprep.subr.bf16.mxu1 %v10495_v56  ;;  %v10577_v55 = vld [vmem:[%s15266_s2 + $0xf88] ss:$16 sps:$4 sm:$0xff]   ;;  %v10582_v56 = vld [vmem:[%s15266_s2 + $0xd6c] ss:$16 sps:$4 sm:$0xff]  }
  0xc2   : > { %2384 = vmatpush2.bf16.msra.mxu0 %v10490_v57  ;;  %v10585_v57 = vld [vmem:[%s15266_s2 + $0xf6c] ss:$16 sps:$4 sm:$0xff]  }
  0xc3   : > { %2425 = vmatpush2.bf16.msra.mxu1 %v10493_v58  ;;  %2385 = vmatprep.subr.bf16.mxu0 %v10498_v60  ;;  %v10580_v58 = vld [vmem:[%s15266_s2 + $0xd68] ss:$16 sps:$4 sm:$0xff]  }
  0xc4   : > { %2426 = vmatprep.subr.bf16.mxu1 %v10501_v59  ;;  %v10583_v60 = vld [vmem:[%s15266_s2 + $0xf68] ss:$16 sps:$4 sm:$0xff]   ;;  %v10588_v59 = vld [vmem:[%s15266_s2 + $0xd4c] ss:$16 sps:$4 sm:$0xff]  }
  0xc6   : > { %2386 = vmatpush2.bf16.msra.mxu0 %v10496_v63  ;;  %v10591_v63 = vld [vmem:[%s15266_s2 + $0xf4c] ss:$16 sps:$4 sm:$0xff]  }
  0xc7   : > { %2427 = vmatpush2.bf16.msra.mxu1 %v10499_v0  ;;  %2387 = vmatprep.subr.bf16.mxu0 %v10504_v1  ;;  %v10586_v0 = vld [vmem:[%s15266_s2 + $0xd48] ss:$16 sps:$4 sm:$0xff]  }
  0xc8   : > { %2428 = vmatprep.subr.bf16.mxu1 %v10507_v2  ;;  %v10589_v1 = vld [vmem:[%s15266_s2 + $0xf48] ss:$16 sps:$4 sm:$0xff]   ;;  %v10594_v2 = vld [vmem:[%s15266_s2 + $0xd2c] ss:$16 sps:$4 sm:$0xff]  }
  0xca   : > { %2388 = vmatpush2.bf16.msra.mxu0 %v10502_v3  ;;  %v10597_v3 = vld [vmem:[%s15266_s2 + $0xf2c] ss:$16 sps:$4 sm:$0xff]  }
  0xcb   : > { %2429 = vmatpush2.bf16.msra.mxu1 %v10505_v4  ;;  %2439 = vmatprep.subr.bf16.mxu0 %v10510_v5  ;;  %v10592_v4 = vld [vmem:[%s15266_s2 + $0xd28] ss:$16 sps:$4 sm:$0xff]   ;;  %v296_v5 = vld [vmem:[%s11973_s23] sm:$0x55] }
  0xcc   : > { %2480 = vmatprep.subr.bf16.mxu1 %v10513_v6  ;;  %v10595_v6 = vld [vmem:[%s15266_s2 + $0xf28] ss:$16 sps:$4 sm:$0xff]  }
  0xcd   : > { %2390 = vmatmul.mubr.bf16.vlgmr.msra.gmra.mxu0 %v12053_v28  ;;  %v10525_v28 = vld [vmem:[%s15266_s2 + $0xeac] ss:$16 sps:$4 sm:$0xff]  }
  0xce   : > { %2431 = vmatmul.mubr.bf16.vlgmr.msra.gmra.mxu1 %v12055_v29  ;;  %2440 = vmatpush1.bf16.msra.mxu0 %v10508_v7  ;;  %v10520_v29 = vld [vmem:[%s15266_s2 + $0xca8] ss:$16 sps:$4 sm:$0xff]   ;;  %v10600_v7 = vld [vmem:[%s15266_s2 + $0xd0c] ss:$16 sps:$4 sm:$0xff]  }
  0xcf   : > { %2481 = vmatpush1.bf16.msra.mxu1 %v10511_v8  ;;  %2441 = vmatprep.subr.bf16.mxu0 %v10516_v9  ;;  %v10603_v8 = vld [vmem:[%s15266_s2 + $0xf0c] ss:$16 sps:$4 sm:$0xff]   ;;  %v2523_v9 = vcombine.high %v296_v5, %v296_v5 }
  0xd0   : > { %2482 = vmatprep.subr.bf16.mxu1 %v10519_v13  ;;  %2471 = vmatprep.mubr.bf16.mxu0 %v12172_v16  ;;  %v10531_v16 = vld [vmem:[%s15266_s2 + $0xe8c] ss:$16 sps:$4 sm:$0xff]   ;;  %v10598_v13 = vld [vmem:[%s15266_s2 + $0xd08] ss:$16 sps:$4 sm:$0xff]  }
  0xd1   : > { %2512 = vmatprep.mubr.bf16.mxu1 %v12180_v20  ;;  %v10526_v20 = vld [vmem:[%s15266_s2 + $0xc88] ss:$16 sps:$4 sm:$0xff]  }
  0xd2   : > { %2442 = vmatpush1.bf16.msra.mxu0 %v10514_v10  ;;  %v10601_v10 = vld [vmem:[%s15266_s2 + $0xf08] ss:$16 sps:$4 sm:$0xff]  }
  0xd3   : > { %2483 = vmatpush1.bf16.msra.mxu1 %v10517_v11  ;;  %2443 = vmatprep.subr.bf16.mxu0 %v10522_v12  ;;  %v10606_v11 = vld [vmem:[%s15266_s2 + $0xe4] ss:$16 sps:$4 sm:$0xff]  }
  0xd4   : > { %2484 = vmatprep.subr.bf16.mxu1 %v10525_v28  ;;  %v10609_v12 = vld [vmem:[%s15266_s2 + $0x2e4] ss:$16 sps:$4 sm:$0xff]   ;;  %v12670_v28 = vrot.slane %v296_v5, %v11976_v49 }
  0xd5   : > { %v10666_v5 = vld [vmem:[%s15266_s2 + $0x1a4] ss:$16 sps:$4 sm:$0xff]  }
  0xd6   : > { %2444 = vmatpush1.bf16.msra.mxu0 %v10520_v29  ;;  %v12673_v29 = vrot.slane %v2523_v9, %v11976_v49  ;;  %v10672_v9 = vld [vmem:[%s15266_s2 + $0x184] ss:$16 sps:$4 sm:$0xff]  }
  0xd7   : > { %2485 = vmatpush1.bf16.msra.mxu1 %v10523_v14  ;;  %2445 = vmatprep.subr.bf16.mxu0 %v10528_v15  ;;  %v10604_v14 = vld [vmem:[%s15266_s2 + $0xe0] ss:$16 sps:$4 sm:$0xff]  }
  0xd8   : > { %2486 = vmatprep.subr.bf16.mxu1 %v10531_v16  ;;  %v10607_v15 = vld [vmem:[%s15266_s2 + $0x2e0] ss:$16 sps:$4 sm:$0xff]   ;;  %v10612_v16 = vld [vmem:[%s15266_s2 + $0xc4] ss:$16 sps:$4 sm:$0xff]  }
  0xda   : > { %2446 = vmatpush1.bf16.msra.mxu0 %v10526_v20  ;;  %v10615_v20 = vld [vmem:[%s15266_s2 + $0x2c4] ss:$16 sps:$4 sm:$0xff]  }
  0xdb   : > { %2487 = vmatpush1.bf16.msra.mxu1 %v10529_v17  ;;  %2447 = vmatprep.subr.bf16.mxu0 %v10534_v18  ;;  %v12689_v17 = vcombine.high %v12670_v28, %v12670_v28  ;;  %v12693_v18 = vcombine.high %v12673_v29, %v12673_v29 }
  0xdc   : > { %2488 = vmatprep.subr.bf16.mxu1 %v10537_v19 }
  0xde   : > { %2448 = vmatpush1.bf16.msra.mxu0 %v10532_v21 }
  0xdf   : > { %2489 = vmatpush1.bf16.msra.mxu1 %v10535_v22  ;;  %2449 = vmatprep.subr.bf16.mxu0 %v10540_v23  ;;  %v10610_v23 = vld [vmem:[%s15266_s2 + $0xc0] ss:$16 sps:$4 sm:$0xff]  }
  0xe0   : > { %2490 = vmatprep.subr.bf16.mxu1 %v10543_v24  ;;  %v10613_v24 = vld [vmem:[%s15266_s2 + $0x2c0] ss:$16 sps:$4 sm:$0xff]  }
  0xe2   : > { %2450 = vmatpush1.bf16.msra.mxu0 %v10538_v25 }
  0xe3   : > { %2491 = vmatpush1.bf16.msra.mxu1 %v10541_v26  ;;  %2451 = vmatprep.subr.bf16.mxu0 %v10546_v27 }
  0xe4   : > { %2492 = vmatprep.subr.bf16.mxu1 %v10549_v30 }
  0xe6   : > { %2452 = vmatpush1.bf16.msra.mxu0 %v10544_v31 }
  0xe7   : > { %2493 = vmatpush1.bf16.msra.mxu1 %v10547_v32  ;;  %2453 = vmatprep.subr.bf16.mxu0 %v10552_v33  ;;  %v10616_v32 = vld [vmem:[%s15266_s2 + $0xa0] ss:$16 sps:$4 sm:$0xff]  }
  0xe8   : > { %2494 = vmatprep.subr.bf16.mxu1 %v10555_v34  ;;  %v10619_v33 = vld [vmem:[%s15266_s2 + $0x2a0] ss:$16 sps:$4 sm:$0xff]  }
  0xea   : > { %2454 = vmatpush1.bf16.msra.mxu0 %v10550_v35 }
  0xeb   : > { %2495 = vmatpush1.bf16.msra.mxu1 %v10553_v36  ;;  %2455 = vmatprep.subr.bf16.mxu0 %v10558_v37  ;;  %v10624_v36 = vld [vmem:[%s15266_s2 + $0x84] ss:$16 sps:$4 sm:$0xff]  }
  0xec   : > { %2496 = vmatprep.subr.bf16.mxu1 %v10561_v39  ;;  %v10627_v37 = vld [vmem:[%s15266_s2 + $0x284] ss:$16 sps:$4 sm:$0xff]   ;;  %v10622_v39 = vld [vmem:[%s15266_s2 + $0x80] ss:$16 sps:$4 sm:$0xff]  }
  0xee   : > { %2456 = vmatpush2.bf16.msra.mxu0 %v10556_v40  ;;  %v10625_v40 = vld [vmem:[%s15266_s2 + $0x280] ss:$16 sps:$4 sm:$0xff]  }
  0xef   : > { %2497 = vmatpush2.bf16.msra.mxu1 %v10559_v41  ;;  %2457 = vmatprep.subr.bf16.mxu0 %v10564_v42  ;;  %v10630_v41 = vld [vmem:[%s15266_s2 + $0x64] ss:$16 sps:$4 sm:$0xff]  }
  0xf0   : > { %2498 = vmatprep.subr.bf16.mxu1 %v10567_v44  ;;  %v10633_v42 = vld [vmem:[%s15266_s2 + $0x264] ss:$16 sps:$4 sm:$0xff]   ;;  %v10628_v44 = vld [vmem:[%s15266_s2 + $0x60] ss:$16 sps:$4 sm:$0xff]  }
  0xf2   : > { %2458 = vmatpush2.bf16.msra.mxu0 %v10562_v45  ;;  %v10631_v45 = vld [vmem:[%s15266_s2 + $0x260] ss:$16 sps:$4 sm:$0xff]  }
  0xf3   : > { %2499 = vmatpush2.bf16.msra.mxu1 %v10565_v46  ;;  %2459 = vmatprep.subr.bf16.mxu0 %v10570_v47  ;;  %v10636_v46 = vld [vmem:[%s15266_s2 + $0x44] ss:$16 sps:$4 sm:$0xff]  }
  0xf4   : > { %2500 = vmatprep.subr.bf16.mxu1 %v10573_v48  ;;  %v10639_v47 = vld [vmem:[%s15266_s2 + $0x244] ss:$16 sps:$4 sm:$0xff]   ;;  %v10634_v48 = vld [vmem:[%s15266_s2 + $0x40] ss:$16 sps:$4 sm:$0xff]  }
  0xf6   : > { %2460 = vmatpush2.bf16.msra.mxu0 %v10568_v50  ;;  %v10637_v50 = vld [vmem:[%s15266_s2 + $0x240] ss:$16 sps:$4 sm:$0xff]  }
  0xf7   : > { %2501 = vmatpush2.bf16.msra.mxu1 %v10571_v51  ;;  %2461 = vmatprep.subr.bf16.mxu0 %v10576_v52  ;;  %v10642_v51 = vld [vmem:[%s15266_s2 + $0x24] ss:$16 sps:$4 sm:$0xff]  }
  0xf8   : > { %2502 = vmatprep.subr.bf16.mxu1 %v10579_v53  ;;  %v10645_v52 = vld [vmem:[%s15266_s2 + $0x224] ss:$16 sps:$4 sm:$0xff]   ;;  %v10640_v53 = vld [vmem:[%s15266_s2 + $0x20] ss:$16 sps:$4 sm:$0xff]  }
  0xfa   : > { %2462 = vmatpush2.bf16.msra.mxu0 %v10574_v54  ;;  %v10643_v54 = vld [vmem:[%s15266_s2 + $0x220] ss:$16 sps:$4 sm:$0xff]  }
  0xfb   : > { %2503 = vmatpush2.bf16.msra.mxu1 %v10577_v55  ;;  %2463 = vmatprep.subr.bf16.mxu0 %v10582_v56  ;;  %v10648_v55 = vld [vmem:[%s15266_s2 + $0x4] ss:$16 sps:$4 sm:$0xff]  }
  0xfc   : > { %2504 = vmatprep.subr.bf16.mxu1 %v10585_v57  ;;  %v10651_v56 = vld [vmem:[%s15266_s2 + $0x204] ss:$16 sps:$4 sm:$0xff]   ;;  %v10646_v57 = vld [vmem:[%s15266_s2] ss:$16 sps:$4 sm:$0xff]  }
  0xfe   : > { %2464 = vmatpush2.bf16.msra.mxu0 %v10580_v58  ;;  %v10649_v58 = vld [vmem:[%s15266_s2 + $0x200] ss:$16 sps:$4 sm:$0xff]  }
  0xff   : > { %2505 = vmatpush2.bf16.msra.mxu1 %v10583_v60  ;;  %2465 = vmatprep.subr.bf16.mxu0 %v10588_v59  ;;  %v10654_v60 = vld [vmem:[%s15266_s2 + $0x1e4] ss:$16 sps:$4 sm:$0xff]  }
 0x100   : > { %2506 = vmatprep.subr.bf16.mxu1 %v10591_v63  ;;  %v10657_v59 = vld [vmem:[%s15266_s2 + $0x3e4] ss:$16 sps:$4 sm:$0xff]   ;;  %v10652_v63 = vld [vmem:[%s15266_s2 + $0x1e0] ss:$16 sps:$4 sm:$0xff]  }
 0x102   : > { %2466 = vmatpush2.bf16.msra.mxu0 %v10586_v0  ;;  %v10655_v0 = vld [vmem:[%s15266_s2 + $0x3e0] ss:$16 sps:$4 sm:$0xff]  }
 0x103   : > { %2507 = vmatpush2.bf16.msra.mxu1 %v10589_v1  ;;  %2467 = vmatprep.subr.bf16.mxu0 %v10594_v2  ;;  %v10660_v1 = vld [vmem:[%s15266_s2 + $0x1c4] ss:$16 sps:$4 sm:$0xff]  }
 0x104   : > { %2508 = vmatprep.subr.bf16.mxu1 %v10597_v3  ;;  %v10663_v2 = vld [vmem:[%s15266_s2 + $0x3c4] ss:$16 sps:$4 sm:$0xff]   ;;  %v10658_v3 = vld [vmem:[%s15266_s2 + $0x1c0] ss:$16 sps:$4 sm:$0xff]  }
 0x106   : > { %2468 = vmatpush2.bf16.msra.mxu0 %v10592_v4  ;;  %v10661_v4 = vld [vmem:[%s15266_s2 + $0x3c0] ss:$16 sps:$4 sm:$0xff]  }
 0x107   : > { %2509 = vmatpush2.bf16.msra.mxu1 %v10595_v6  ;;  %2469 = vmatprep.subr.bf16.mxu0 %v10600_v7  ;;  %v10669_v6 = vld [vmem:[%s15266_s2 + $0x3a4] ss:$16 sps:$4 sm:$0xff]   ;;  %v10664_v7 = vld [vmem:[%s15266_s2 + $0x1a0] ss:$16 sps:$4 sm:$0xff]  }
 0x108   : > { %2510 = vmatprep.subr.bf16.mxu1 %v10603_v8  ;;  %v10667_v8 = vld [vmem:[%s15266_s2 + $0x3a0] ss:$16 sps:$4 sm:$0xff]  }
 0x10a   : > { %2470 = vmatpush2.bf16.msra.mxu0 %v10598_v13  ;;  %v10675_v13 = vld [vmem:[%s15266_s2 + $0x384] ss:$16 sps:$4 sm:$0xff]  }
 0x10b   : > { %2511 = vmatpush2.bf16.msra.mxu1 %v10601_v10  ;;  %3845 = vmatprep.subr.bf16.mxu0 %v10606_v11  ;;  %v10670_v10 = vld [vmem:[%s15266_s2 + $0x180] ss:$16 sps:$4 sm:$0xff]  }
 0x10c   : > { %3886 = vmatprep.subr.bf16.mxu1 %v10609_v12  ;;  %v10673_v11 = vld [vmem:[%s15266_s2 + $0x380] ss:$16 sps:$4 sm:$0xff]   ;;  %v10678_v12 = vld [vmem:[%s15266_s2 + $0x164] ss:$16 sps:$4 sm:$0xff]  }
 0x10d   : > { %v2227_v19 = vpop.f32.mrf.mxu0  ;;  %2472 = vmatmul.mubr.bf16.vlgmr.msra.gmra.mxu0 %v12272_v61  ;;  %v10618_v61 = vld [vmem:[%s15266_s2 + $0xa4] ss:$16 sps:$4 sm:$0xff]  }
 0x10e   : > { %v2268_v21 = vpop.f32.mrf.mxu1  ;;  %2513 = vmatmul.mubr.bf16.vlgmr.msra.gmra.mxu1 %v12274_v62  ;;  %3846 = vmatpush1.bf16.msra.mxu0 %v10604_v14  ;;  %v10621_v62 = vld [vmem:[%s15266_s2 + $0x2a4] ss:$16 sps:$4 sm:$0xff]  }
 0x10f   : > { %v12697_v22 = vadd.f32 %v2268_v21, %v2227_v19  ;;  %3887 = vmatpush1.bf16.msra.mxu1 %v10607_v15  ;;  %v2229_v25 = vpop.f32.mrf.mxu0  ;;  %3847 = vmatprep.subr.bf16.mxu0 %v10612_v16  ;;  %v10681_v14 = vld [vmem:[%s15266_s2 + $0x364] ss:$16 sps:$4 sm:$0xff]   ;;  %v10676_v15 = vld [vmem:[%s15266_s2 + $0x160] ss:$16 sps:$4 sm:$0xff]  }
 0x110   : > { %v2270_v26 = vpop.f32.mrf.mxu1  ;;  %3888 = vmatprep.subr.bf16.mxu1 %v10615_v20  ;;  %3877 = vmatprep.mubr.bf16.mxu0 %v12689_v17  ;;  %v10679_v16 = vld [vmem:[%s15266_s2 + $0x360] ss:$16 sps:$4 sm:$0xff]   ;;  %v10684_v20 = vld [vmem:[%s15266_s2 + $0x144] ss:$16 sps:$4 sm:$0xff]  }
 0x111   : > { %v12711_v27 = vadd.f32 %v2270_v26, %v2229_v25  ;;  %3918 = vmatprep.mubr.bf16.mxu1 %v12693_v18  ;;  %v2231_v30 = vpop.f32.mrf.mxu0  ;;  %v10687_v19 = vld [vmem:[%s15266_s2 + $0x344] ss:$16 sps:$4 sm:$0xff]   ;;  %v10682_v21 = vld [vmem:[%s15266_s2 + $0x140] ss:$16 sps:$4 sm:$0xff]   ;;  %v297_v26 = vld [vmem:[%s11973_s23 + $0x8] sm:$0x55]  ;;  %s13473_s23 = scalar_lea.vmem %s15265_s1, %s10190_s8 }
 0x112   : > { %v2272_v31 = vpop.f32.mrf.mxu1  ;;  %3848 = vmatpush1.bf16.msra.mxu0 %v10610_v23  ;;  %v10685_v23 = vld [vmem:[%s15266_s2 + $0x340] ss:$16 sps:$4 sm:$0xff]   ;;  %v10693_v25 = vld [vmem:[%s15266_s2 + $0x324] ss:$16 sps:$4 sm:$0xff]  }
 0x113   : > { %3889 = vmatpush1.bf16.msra.mxu1 %v10613_v24  ;;  %v2232_v34 = vpop.f32.mrf.mxu0  ;;  %3849 = vmatprep.subr.bf16.mxu0 %v10618_v61  ;;  %v10690_v24 = vld [vmem:[%s15266_s2 + $0x124] ss:$16 sps:$4 sm:$0xff]   ;;  %v10688_v61 = vld [vmem:[%s15266_s2 + $0x120] ss:$16 sps:$4 sm:$0xff]  }
 0x114   : > { %v2273_v35 = vpop.f32.mrf.mxu1  ;;  %3890 = vmatprep.subr.bf16.mxu1 %v10621_v62  ;;  %v10691_v62 = vld [vmem:[%s15266_s2 + $0x320] ss:$16 sps:$4 sm:$0xff]   ;;  %v10696_v30 = vld [vmem:[%s15266_s2 + $0x104] ss:$16 sps:$4 sm:$0xff]  }
 0x115   : > { %v10699_v31 = vld [vmem:[%s15266_s2 + $0x304] ss:$16 sps:$4 sm:$0xff]   ;;  %v10697_v34 = vld [vmem:[%s15266_s2 + $0x300] ss:$16 sps:$4 sm:$0xff]  }
 0x116   : > { %3850 = vmatpush1.bf16.msra.mxu0 %v10616_v32  ;;  %v2540_v32 = vcombine.high %v297_v26, %v297_v26  ;;  %v10703_v35 = vld [vmem:[%s15266_s2 + $0x4e4] ss:$16 sps:$4 sm:$0xff]  }
 0x117   : > { %3891 = vmatpush1.bf16.msra.mxu1 %v10619_v33  ;;  %3851 = vmatprep.subr.bf16.mxu0 %v10624_v36  ;;  %v10694_v33 = vld [vmem:[%s15266_s2 + $0x100] ss:$16 sps:$4 sm:$0xff]   ;;  %v10706_v36 = vld [vmem:[%s15266_s2 + $0x6e4] ss:$16 sps:$4 sm:$0xff]  }
 0x118   : > { %3892 = vmatprep.subr.bf16.mxu1 %v10627_v37  ;;  %v10701_v37 = vld [vmem:[%s15266_s2 + $0x4e0] ss:$16 sps:$4 sm:$0xff]  }
 0x11a   : > { %3852 = vmatpush1.bf16.msra.mxu0 %v10622_v39  ;;  %v10704_v39 = vld [vmem:[%s15266_s2 + $0x6e0] ss:$16 sps:$4 sm:$0xff]  }
 0x11b   : > { %3893 = vmatpush1.bf16.msra.mxu1 %v10625_v40  ;;  %3853 = vmatprep.subr.bf16.mxu0 %v10630_v41  ;;  %v12891_v40 = vrot.slane %v297_v26, %v11976_v49  ;;  %v12894_v41 = vrot.slane %v2540_v32, %v11976_v49  ;;  %v10754_v26 = vld [vmem:[%s15266_s2 + $0x7e4] ss:$16 sps:$4 sm:$0xff]   ;;  %v10755_v32 = vld [vmem:[%s15266_s2 + $0x5c0] ss:$16 sps:$4 sm:$0xff]  }
 0x11c   : > { %3894 = vmatprep.subr.bf16.mxu1 %v10633_v42  ;;  %v10709_v42 = vld [vmem:[%s15266_s2 + $0x4c4] ss:$16 sps:$4 sm:$0xff]  }
 0x11e   : > { %3854 = vmatpush1.bf16.msra.mxu0 %v10628_v44  ;;  %v10712_v44 = vld [vmem:[%s15266_s2 + $0x6c4] ss:$16 sps:$4 sm:$0xff]  }
 0x11f   : > { %3895 = vmatpush1.bf16.msra.mxu1 %v10631_v45  ;;  %3855 = vmatprep.subr.bf16.mxu0 %v10636_v46  ;;  %v10707_v45 = vld [vmem:[%s15266_s2 + $0x4c0] ss:$16 sps:$4 sm:$0xff]  }
 0x120   : > { %3896 = vmatprep.subr.bf16.mxu1 %v10639_v47  ;;  %v10710_v46 = vld [vmem:[%s15266_s2 + $0x6c0] ss:$16 sps:$4 sm:$0xff]   ;;  %v12910_v47 = vcombine.high %v12891_v40, %v12891_v40 }
 0x122   : > { %3856 = vmatpush1.bf16.msra.mxu0 %v10634_v48  ;;  %v12914_v48 = vcombine.high %v12894_v41, %v12894_v41 }
 0x123   : > { %3897 = vmatpush1.bf16.msra.mxu1 %v10637_v50  ;;  %3857 = vmatprep.subr.bf16.mxu0 %v10642_v51 }
 0x124   : > { %3898 = vmatprep.subr.bf16.mxu1 %v10645_v52 }
 0x126   : > { %3858 = vmatpush1.bf16.msra.mxu0 %v10640_v53 }
 0x127   : > { %3899 = vmatpush1.bf16.msra.mxu1 %v10643_v54  ;;  %3859 = vmatprep.subr.bf16.mxu0 %v10648_v55  ;;  %v10715_v55 = vld [vmem:[%s15266_s2 + $0x4a4] ss:$16 sps:$4 sm:$0xff]  }
 0x128   : > { %3900 = vmatprep.subr.bf16.mxu1 %v10651_v56  ;;  %v10718_v56 = vld [vmem:[%s15266_s2 + $0x6a4] ss:$16 sps:$4 sm:$0xff]  }
 0x12a   : > { %3860 = vmatpush1.bf16.msra.mxu0 %v10646_v57 }
 0x12b   : > { %3901 = vmatpush1.bf16.msra.mxu1 %v10649_v58  ;;  %3861 = vmatprep.subr.bf16.mxu0 %v10654_v60  ;;  %v10716_v60 = vld [vmem:[%s15266_s2 + $0x6a0] ss:$16 sps:$4 sm:$0xff]  }
 0x12c   : > { %3902 = vmatprep.subr.bf16.mxu1 %v10657_v59 }
 0x12e   : > { %3862 = vmatpush2.bf16.msra.mxu0 %v10652_v63 }
 0x12f   : > { %3903 = vmatpush2.bf16.msra.mxu1 %v10655_v0  ;;  %3863 = vmatprep.subr.bf16.mxu0 %v10660_v1 }
 0x130   : > { %3904 = vmatprep.subr.bf16.mxu1 %v10663_v2  ;;  %v10721_v2 = vld [vmem:[%s15266_s2 + $0x484] ss:$16 sps:$4 sm:$0xff]  }
 0x132   : > { %3864 = vmatpush2.bf16.msra.mxu0 %v10658_v3  ;;  %v10724_v3 = vld [vmem:[%s15266_s2 + $0x684] ss:$16 sps:$4 sm:$0xff]  }
 0x133   : > { %3905 = vmatpush2.bf16.msra.mxu1 %v10661_v4  ;;  %3865 = vmatprep.subr.bf16.mxu0 %v10666_v5  ;;  %v10719_v4 = vld [vmem:[%s15266_s2 + $0x480] ss:$16 sps:$4 sm:$0xff]  }
 0x134   : > { %3906 = vmatprep.subr.bf16.mxu1 %v10669_v6  ;;  %v10722_v5 = vld [vmem:[%s15266_s2 + $0x680] ss:$16 sps:$4 sm:$0xff]   ;;  %v10727_v6 = vld [vmem:[%s15266_s2 + $0x464] ss:$16 sps:$4 sm:$0xff]  }
 0x136   : > { %3866 = vmatpush2.bf16.msra.mxu0 %v10664_v7  ;;  %v10730_v7 = vld [vmem:[%s15266_s2 + $0x664] ss:$16 sps:$4 sm:$0xff]  }
 0x137   : > { %3907 = vmatpush2.bf16.msra.mxu1 %v10667_v8  ;;  %3867 = vmatprep.subr.bf16.mxu0 %v10672_v9  ;;  %v10725_v8 = vld [vmem:[%s15266_s2 + $0x460] ss:$16 sps:$4 sm:$0xff]  }
 0x138   : > { %3908 = vmatprep.subr.bf16.mxu1 %v10675_v13  ;;  %v10728_v9 = vld [vmem:[%s15266_s2 + $0x660] ss:$16 sps:$4 sm:$0xff]   ;;  %v10733_v13 = vld [vmem:[%s15266_s2 + $0x444] ss:$16 sps:$4 sm:$0xff]  }
 0x13a   : > { %3868 = vmatpush2.bf16.msra.mxu0 %v10670_v10  ;;  %v10736_v10 = vld [vmem:[%s15266_s2 + $0x644] ss:$16 sps:$4 sm:$0xff]  }
 0x13b   : > { %3909 = vmatpush2.bf16.msra.mxu1 %v10673_v11  ;;  %3869 = vmatprep.subr.bf16.mxu0 %v10678_v12  ;;  %v10731_v11 = vld [vmem:[%s15266_s2 + $0x440] ss:$16 sps:$4 sm:$0xff]  }
 0x13c   : > { %3910 = vmatprep.subr.bf16.mxu1 %v10681_v14  ;;  %v10734_v12 = vld [vmem:[%s15266_s2 + $0x640] ss:$16 sps:$4 sm:$0xff]   ;;  %v10739_v14 = vld [vmem:[%s15266_s2 + $0x424] ss:$16 sps:$4 sm:$0xff]  }
 0x13e   : > { %3870 = vmatpush2.bf16.msra.mxu0 %v10676_v15  ;;  %v10742_v15 = vld [vmem:[%s15266_s2 + $0x624] ss:$16 sps:$4 sm:$0xff]  }
 0x13f   : > { %3911 = vmatpush2.bf16.msra.mxu1 %v10679_v16  ;;  %3871 = vmatprep.subr.bf16.mxu0 %v10684_v20  ;;  %v10737_v16 = vld [vmem:[%s15266_s2 + $0x420] ss:$16 sps:$4 sm:$0xff]  }
 0x140   : > { %3912 = vmatprep.subr.bf16.mxu1 %v10687_v19  ;;  %v10740_v20 = vld [vmem:[%s15266_s2 + $0x620] ss:$16 sps:$4 sm:$0xff]   ;;  %v10745_v19 = vld [vmem:[%s15266_s2 + $0x404] ss:$16 sps:$4 sm:$0xff]  }
 0x142   : > { %3872 = vmatpush2.bf16.msra.mxu0 %v10682_v21  ;;  %v10748_v21 = vld [vmem:[%s15266_s2 + $0x604] ss:$16 sps:$4 sm:$0xff]  }
 0x143   : > { %3913 = vmatpush2.bf16.msra.mxu1 %v10685_v23  ;;  %3873 = vmatprep.subr.bf16.mxu0 %v10690_v24  ;;  %v10743_v23 = vld [vmem:[%s15266_s2 + $0x400] ss:$16 sps:$4 sm:$0xff]  }
 0x144   : > { %3914 = vmatprep.subr.bf16.mxu1 %v10693_v25  ;;  %v10746_v24 = vld [vmem:[%s15266_s2 + $0x600] ss:$16 sps:$4 sm:$0xff]   ;;  %v10751_v25 = vld [vmem:[%s15266_s2 + $0x5e4] ss:$16 sps:$4 sm:$0xff]  }
 0x146   : > { %3874 = vmatpush2.bf16.msra.mxu0 %v10688_v61  ;;  %v10749_v61 = vld [vmem:[%s15266_s2 + $0x5e0] ss:$16 sps:$4 sm:$0xff]  }
 0x147   : > { %3915 = vmatpush2.bf16.msra.mxu1 %v10691_v62  ;;  %3875 = vmatprep.subr.bf16.mxu0 %v10696_v30  ;;  %v10752_v62 = vld [vmem:[%s15266_s2 + $0x7e0] ss:$16 sps:$4 sm:$0xff]   ;;  %v10757_v30 = vld [vmem:[%s15266_s2 + $0x5c4] ss:$16 sps:$4 sm:$0xff]  }
 0x148   : > { %3916 = vmatprep.subr.bf16.mxu1 %v10699_v31  ;;  %v10760_v31 = vld [vmem:[%s15266_s2 + $0x7c4] ss:$16 sps:$4 sm:$0xff]  }
 0x14a   : > { %3876 = vmatpush2.bf16.msra.mxu0 %v10694_v33  ;;  %v10758_v33 = vld [vmem:[%s15266_s2 + $0x7c0] ss:$16 sps:$4 sm:$0xff]  }
 0x14b   : > { %3917 = vmatpush2.bf16.msra.mxu1 %v10697_v34  ;;  %3927 = vmatprep.subr.bf16.mxu0 %v10703_v35  ;;  %v10763_v34 = vld [vmem:[%s15266_s2 + $0x5a4] ss:$16 sps:$4 sm:$0xff]  }
 0x14c   : > { %3968 = vmatprep.subr.bf16.mxu1 %v10706_v36  ;;  %v10766_v35 = vld [vmem:[%s15266_s2 + $0x7a4] ss:$16 sps:$4 sm:$0xff]   ;;  %v10761_v36 = vld [vmem:[%s15266_s2 + $0x5a0] ss:$16 sps:$4 sm:$0xff]  }
 0x14d   : > { %v2309_v50 = vpop.f32.mrf.mxu0  ;;  %3878 = vmatmul.mubr.bf16.vlgmr.msra.gmra.mxu0 %v12670_v28 }
 0x14e   : > { %v2350_v51 = vpop.f32.mrf.mxu1  ;;  %3919 = vmatmul.mubr.bf16.vlgmr.msra.gmra.mxu1 %v12673_v29  ;;  %v2310_v52 = vadd.f32 %v2309_v50, %v12697_v22  ;;  %3928 = vmatpush1.bf16.msra.mxu0 %v10701_v37  ;;  %v10713_v22 = vld [vmem:[%s15266_s2 + $0x4a0] ss:$16 sps:$4 sm:$0xff]   ;;  %v10778_v50 = vld [vmem:[%s15266_s2 + $0x764] ss:$16 sps:$4 sm:$0xff]  }
 0x14f   : > { %3969 = vmatpush1.bf16.msra.mxu1 %v10704_v39  ;;  %v2311_v53 = vpop.f32.mrf.mxu0  ;;  %3929 = vmatprep.subr.bf16.mxu0 %v10709_v42  ;;  %v10764_v37 = vld [vmem:[%s15266_s2 + $0x7a0] ss:$16 sps:$4 sm:$0xff]   ;;  %v10769_v39 = vld [vmem:[%s15266_s2 + $0x584] ss:$16 sps:$4 sm:$0xff]  }
 0x150   : > { %v2352_v54 = vpop.f32.mrf.mxu1  ;;  %3970 = vmatprep.subr.bf16.mxu1 %v10712_v44  ;;  %v12925_v57 = vadd.f32 %v2350_v51, %v2310_v52  ;;  %v2312_v58 = vadd.f32 %v2311_v53, %v12711_v27  ;;  %3959 = vmatprep.mubr.bf16.mxu0 %v12910_v47  ;;  %v10772_v42 = vld [vmem:[%s15266_s2 + $0x784] ss:$16 sps:$4 sm:$0xff]   ;;  %v10767_v44 = vld [vmem:[%s15266_s2 + $0x580] ss:$16 sps:$4 sm:$0xff]  }
 0x151   : > { %4000 = vmatprep.mubr.bf16.mxu1 %v12914_v48  ;;  %v2313_v59 = vpop.f32.mrf.mxu0  ;;  %v10773_v51 = vld [vmem:[%s15266_s2 + $0x560] ss:$16 sps:$4 sm:$0xff]   ;;  %v10781_v53 = vld [vmem:[%s15266_s2 + $0x544] ss:$16 sps:$4 sm:$0xff]  }
 0x152   : > { %v2354_v63 = vpop.f32.mrf.mxu1  ;;  %v12936_v0 = vadd.f32 %v2352_v54, %v2312_v58  ;;  %3930 = vmatpush1.bf16.msra.mxu0 %v10707_v45  ;;  %v10770_v45 = vld [vmem:[%s15266_s2 + $0x780] ss:$16 sps:$4 sm:$0xff]   ;;  %v10784_v54 = vld [vmem:[%s15266_s2 + $0x744] ss:$16 sps:$4 sm:$0xff]  }
 0x153   : > { %3971 = vmatpush1.bf16.msra.mxu1 %v10710_v46  ;;  %v2314_v1 = vpop.f32.mrf.mxu0  ;;  %3931 = vmatprep.subr.bf16.mxu0 %v10715_v55  ;;  %v10775_v46 = vld [vmem:[%s15266_s2 + $0x564] ss:$16 sps:$4 sm:$0xff]   ;;  %v10776_v52 = vld [vmem:[%s15266_s2 + $0x760] ss:$16 sps:$4 sm:$0xff]  }
 0x154   : > { %v2355_v27 = vpop.f32.mrf.mxu1  ;;  %3972 = vmatprep.subr.bf16.mxu1 %v10718_v56  ;;  %v10779_v55 = vld [vmem:[%s15266_s2 + $0x540] ss:$16 sps:$4 sm:$0xff]   ;;  %v10787_v58 = vld [vmem:[%s15266_s2 + $0x524] ss:$16 sps:$4 sm:$0xff]  }
 0x155   : > { %v10782_v56 = vld [vmem:[%s15266_s2 + $0x740] ss:$16 sps:$4 sm:$0xff]   ;;  %v10793_v63 = vld [vmem:[%s15266_s2 + $0x504] ss:$16 sps:$4 sm:$0xff]  }
 0x156   : > { %3932 = vmatpush1.bf16.msra.mxu0 %v10713_v22  ;;  %v10790_v22 = vld [vmem:[%s15266_s2 + $0x724] ss:$16 sps:$4 sm:$0xff]   ;;  %v10788_v59 = vld [vmem:[%s15266_s2 + $0x720] ss:$16 sps:$4 sm:$0xff]  }
 0x157   : > { %3973 = vmatpush1.bf16.msra.mxu1 %v10716_v60  ;;  %3933 = vmatprep.subr.bf16.mxu0 %v10721_v2  ;;  %v10785_v60 = vld [vmem:[%s15266_s2 + $0x520] ss:$16 sps:$4 sm:$0xff]   ;;  %v10796_v1 = vld [vmem:[%s15266_s2 + $0x704] ss:$16 sps:$4 sm:$0xff]  }
 0x158   : > { %3974 = vmatprep.subr.bf16.mxu1 %v10724_v3  ;;  %v10791_v27 = vld [vmem:[%s15266_s2 + $0x500] ss:$16 sps:$4 sm:$0xff]   ;;  %v10800_v3 = vld [vmem:[%s15266_s2 + $0xec] ss:$16 sps:$4 sm:$0xff]  }
 0x159   : > { %v10794_v2 = vld [vmem:[%s15266_s2 + $0x700] ss:$16 sps:$4 sm:$0xff]  }
 0x15a   : > { %3934 = vmatpush1.bf16.msra.mxu0 %v10719_v4  ;;  %v10803_v4 = vld [vmem:[%s15266_s2 + $0x2ec] ss:$16 sps:$4 sm:$0xff]  }
 0x15b   : > { %3975 = vmatpush1.bf16.msra.mxu1 %v10722_v5  ;;  %3935 = vmatprep.subr.bf16.mxu0 %v10727_v6  ;;  %v10798_v5 = vld [vmem:[%s15266_s2 + $0xe8] ss:$16 sps:$4 sm:$0xff]  }
 0x15c   : > { %3976 = vmatprep.subr.bf16.mxu1 %v10730_v7  ;;  %v10801_v6 = vld [vmem:[%s15266_s2 + $0x2e8] ss:$16 sps:$4 sm:$0xff]   ;;  %v10806_v7 = vld [vmem:[%s15266_s2 + $0xcc] ss:$16 sps:$4 sm:$0xff]  }
 0x15e   : > { %3936 = vmatpush1.bf16.msra.mxu0 %v10725_v8  ;;  %v10809_v8 = vld [vmem:[%s15266_s2 + $0x2cc] ss:$16 sps:$4 sm:$0xff]  }
 0x15f   : > { %3977 = vmatpush1.bf16.msra.mxu1 %v10728_v9  ;;  %3937 = vmatprep.subr.bf16.mxu0 %v10733_v13  ;;  %v10804_v9 = vld [vmem:[%s15266_s2 + $0xc8] ss:$16 sps:$4 sm:$0xff]  }
 0x160   : > { %3978 = vmatprep.subr.bf16.mxu1 %v10736_v10  ;;  %v10807_v13 = vld [vmem:[%s15266_s2 + $0x2c8] ss:$16 sps:$4 sm:$0xff]  }
 0x162   : > { %3938 = vmatpush1.bf16.msra.mxu0 %v10731_v11 }
 0x163   : > { %3979 = vmatpush1.bf16.msra.mxu1 %v10734_v12  ;;  %3939 = vmatprep.subr.bf16.mxu0 %v10739_v14 }
 0x164   : > { %3980 = vmatprep.subr.bf16.mxu1 %v10742_v15 }
 0x166   : > { %3940 = vmatpush1.bf16.msra.mxu0 %v10737_v16  ;;  %v10812_v16 = vld [vmem:[%s15266_s2 + $0xac] ss:$16 sps:$4 sm:$0xff]  }
 0x167   : > { %3981 = vmatpush1.bf16.msra.mxu1 %v10740_v20  ;;  %3941 = vmatprep.subr.bf16.mxu0 %v10745_v19  ;;  %v10815_v20 = vld [vmem:[%s15266_s2 + $0x2ac] ss:$16 sps:$4 sm:$0xff]  }
 0x168   : > { %3982 = vmatprep.subr.bf16.mxu1 %v10748_v21  ;;  %v10810_v21 = vld [vmem:[%s15266_s2 + $0xa8] ss:$16 sps:$4 sm:$0xff]  }
 0x16a   : > { %3942 = vmatpush1.bf16.msra.mxu0 %v10743_v23  ;;  %v10813_v23 = vld [vmem:[%s15266_s2 + $0x2a8] ss:$16 sps:$4 sm:$0xff]  }
 0x16b   : > { %3983 = vmatpush1.bf16.msra.mxu1 %v10746_v24  ;;  %3943 = vmatprep.subr.bf16.mxu0 %v10751_v25 }
 0x16c   : > { %3984 = vmatprep.subr.bf16.mxu1 %v10754_v26 }
 0x16e   : > { %3944 = vmatpush2.bf16.msra.mxu0 %v10749_v61 }
 0x16f   : > { %3985 = vmatpush2.bf16.msra.mxu1 %v10752_v62  ;;  %3945 = vmatprep.subr.bf16.mxu0 %v10757_v30  ;;  %v10818_v62 = vld [vmem:[%s15266_s2 + $0x8c] ss:$16 sps:$4 sm:$0xff]  }
 0x170   : > { %3986 = vmatprep.subr.bf16.mxu1 %v10760_v31  ;;  %v10821_v30 = vld [vmem:[%s15266_s2 + $0x28c] ss:$16 sps:$4 sm:$0xff]  }
 0x171   : > { %v10824_v31 = vld [vmem:[%s15266_s2 + $0x6c] ss:$16 sps:$4 sm:$0xff]  }
 0x172   : > { %3946 = vmatpush2.bf16.msra.mxu0 %v10755_v32  ;;  %v10827_v32 = vld [vmem:[%s15266_s2 + $0x26c] ss:$16 sps:$4 sm:$0xff]  }
 0x173   : > { %3987 = vmatpush2.bf16.msra.mxu1 %v10758_v33  ;;  %3947 = vmatprep.subr.bf16.mxu0 %v10763_v34  ;;  %v10822_v33 = vld [vmem:[%s15266_s2 + $0x68] ss:$16 sps:$4 sm:$0xff]  }
 0x174   : > { %3988 = vmatprep.subr.bf16.mxu1 %v10766_v35  ;;  %v10825_v34 = vld [vmem:[%s15266_s2 + $0x268] ss:$16 sps:$4 sm:$0xff]   ;;  %v10830_v35 = vld [vmem:[%s15266_s2 + $0x4c] ss:$16 sps:$4 sm:$0xff]  }
 0x176   : > { %3948 = vmatpush2.bf16.msra.mxu0 %v10761_v36  ;;  %v10833_v36 = vld [vmem:[%s15266_s2 + $0x24c] ss:$16 sps:$4 sm:$0xff]  }
 0x177   : > { %3989 = vmatpush2.bf16.msra.mxu1 %v10764_v37  ;;  %3949 = vmatprep.subr.bf16.mxu0 %v10769_v39  ;;  %v10828_v37 = vld [vmem:[%s15266_s2 + $0x48] ss:$16 sps:$4 sm:$0xff]  }
 0x178   : > { %3990 = vmatprep.subr.bf16.mxu1 %v10772_v42  ;;  %v10831_v39 = vld [vmem:[%s15266_s2 + $0x248] ss:$16 sps:$4 sm:$0xff]   ;;  %v10836_v42 = vld [vmem:[%s15266_s2 + $0x2c] ss:$16 sps:$4 sm:$0xff]  }
 0x17a   : > { %3950 = vmatpush2.bf16.msra.mxu0 %v10767_v44  ;;  %v10839_v44 = vld [vmem:[%s15266_s2 + $0x22c] ss:$16 sps:$4 sm:$0xff]  }
 0x17b   : > { %3991 = vmatpush2.bf16.msra.mxu1 %v10770_v45  ;;  %3951 = vmatprep.subr.bf16.mxu0 %v10775_v46  ;;  %v10834_v45 = vld [vmem:[%s15266_s2 + $0x28] ss:$16 sps:$4 sm:$0xff]  }
 0x17c   : > { %3992 = vmatprep.subr.bf16.mxu1 %v10778_v50  ;;  %v10837_v46 = vld [vmem:[%s15266_s2 + $0x228] ss:$16 sps:$4 sm:$0xff]   ;;  %v10842_v50 = vld [vmem:[%s15266_s2 + $0xc] ss:$16 sps:$4 sm:$0xff]  }
 0x17e   : > { %3952 = vmatpush2.bf16.msra.mxu0 %v10773_v51  ;;  %v10845_v51 = vld [vmem:[%s15266_s2 + $0x20c] ss:$16 sps:$4 sm:$0xff]  }
 0x17f   : > { %3993 = vmatpush2.bf16.msra.mxu1 %v10776_v52  ;;  %3953 = vmatprep.subr.bf16.mxu0 %v10781_v53  ;;  %v10840_v52 = vld [vmem:[%s15266_s2 + $0x8] ss:$16 sps:$4 sm:$0xff]  }
 0x180   : > { %3994 = vmatprep.subr.bf16.mxu1 %v10784_v54  ;;  %v10843_v53 = vld [vmem:[%s15266_s2 + $0x208] ss:$16 sps:$4 sm:$0xff]   ;;  %v10848_v54 = vld [vmem:[%s15266_s2 + $0x1ec] ss:$16 sps:$4 sm:$0xff]  }
 0x182   : > { %3954 = vmatpush2.bf16.msra.mxu0 %v10779_v55  ;;  %v10851_v55 = vld [vmem:[%s15266_s2 + $0x3ec] ss:$16 sps:$4 sm:$0xff]  }
 0x183   : > { %3995 = vmatpush2.bf16.msra.mxu1 %v10782_v56  ;;  %3955 = vmatprep.subr.bf16.mxu0 %v10787_v58  ;;  %v10846_v56 = vld [vmem:[%s15266_s2 + $0x1e8] ss:$16 sps:$4 sm:$0xff]  }
 0x184   : > { %3996 = vmatprep.subr.bf16.mxu1 %v10790_v22  ;;  %v10849_v58 = vld [vmem:[%s15266_s2 + $0x3e8] ss:$16 sps:$4 sm:$0xff]   ;;  %v10854_v22 = vld [vmem:[%s15266_s2 + $0x1cc] ss:$16 sps:$4 sm:$0xff]  }
 0x186   : > { %3956 = vmatpush2.bf16.msra.mxu0 %v10785_v60  ;;  %v10857_v60 = vld [vmem:[%s15266_s2 + $0x3cc] ss:$16 sps:$4 sm:$0xff]  }
 0x187   : > { %3997 = vmatpush2.bf16.msra.mxu1 %v10788_v59  ;;  %3957 = vmatprep.subr.bf16.mxu0 %v10793_v63  ;;  %v10852_v59 = vld [vmem:[%s15266_s2 + $0x1c8] ss:$16 sps:$4 sm:$0xff]  }
 0x188   : > { %3998 = vmatprep.subr.bf16.mxu1 %v10796_v1  ;;  %v10855_v63 = vld [vmem:[%s15266_s2 + $0x3c8] ss:$16 sps:$4 sm:$0xff]   ;;  %v10860_v1 = vld [vmem:[%s15266_s2 + $0x1ac] ss:$16 sps:$4 sm:$0xff]  }
 0x18a   : > { %3958 = vmatpush2.bf16.msra.mxu0 %v10791_v27  ;;  %v10863_v27 = vld [vmem:[%s15266_s2 + $0x3ac] ss:$16 sps:$4 sm:$0xff]  }
 0x18b   : > { %3999 = vmatpush2.bf16.msra.mxu1 %v10794_v2  ;;  %4009 = vmatprep.subr.bf16.mxu0 %v10800_v3  ;;  %v10858_v2 = vld [vmem:[%s15266_s2 + $0x1a8] ss:$16 sps:$4 sm:$0xff]  }
 0x18c   : > { %4050 = vmatprep.subr.bf16.mxu1 %v10803_v4  ;;  %v10861_v3 = vld [vmem:[%s15266_s2 + $0x3a8] ss:$16 sps:$4 sm:$0xff]   ;;  %v10866_v4 = vld [vmem:[%s15266_s2 + $0x18c] ss:$16 sps:$4 sm:$0xff]  }
 0x18d   : > { %v2391_v10 = vpop.f32.mrf.mxu0  ;;  %3960 = vmatmul.mubr.bf16.vlgmr.msra.gmra.mxu0 %v12891_v40 }
 0x18e   : > { %v2432_v11 = vpop.f32.mrf.mxu1  ;;  %4001 = vmatmul.mubr.bf16.vlgmr.msra.gmra.mxu1 %v12894_v41  ;;  %4010 = vmatpush1.bf16.msra.mxu0 %v10798_v5  ;;  %v10869_v5 = vld [vmem:[%s15266_s2 + $0x38c] ss:$16 sps:$4 sm:$0xff]  }
 0x18f   : > { %v13120_v12 = vadd.f32 %v2432_v11, %v2391_v10  ;;  %4051 = vmatpush1.bf16.msra.mxu1 %v10801_v6  ;;  %v2393_v14 = vpop.f32.mrf.mxu0  ;;  %4011 = vmatprep.subr.bf16.mxu0 %v10806_v7  ;;  %v10864_v6 = vld [vmem:[%s15266_s2 + $0x188] ss:$16 sps:$4 sm:$0xff]   ;;  %v10878_v11 = vld [vmem:[%s15266_s2 + $0x14c] ss:$16 sps:$4 sm:$0xff]  }
 0x190   : > { %v2434_v15 = vpop.f32.mrf.mxu1  ;;  %4052 = vmatprep.subr.bf16.mxu1 %v10809_v8  ;;  %4041 = vmatprep.mubr.bf16.mxu0 %v12689_v17  ;;  %v10816_v17 = vld [vmem:[%s15266_s2 + $0x88] ss:$16 sps:$4 sm:$0xff]   ;;  %v10872_v8 = vld [vmem:[%s15266_s2 + $0x16c] ss:$16 sps:$4 sm:$0xff]  }
 0x191   : > { %v13128_v19 = vadd.f32 %v2434_v15, %v2393_v14  ;;  %4082 = vmatprep.mubr.bf16.mxu1 %v12693_v18  ;;  %v2395_v24 = vpop.f32.mrf.mxu0  ;;  %v10819_v18 = vld [vmem:[%s15266_s2 + $0x288] ss:$16 sps:$4 sm:$0xff]   ;;  %v10881_v14 = vld [vmem:[%s15266_s2 + $0x34c] ss:$16 sps:$4 sm:$0xff]  }
 0x192   : > { %v2436_v25 = vpop.f32.mrf.mxu1  ;;  %4012 = vmatpush1.bf16.msra.mxu0 %v10804_v9  ;;  %v10867_v7 = vld [vmem:[%s15266_s2 + $0x388] ss:$16 sps:$4 sm:$0xff]   ;;  %v10875_v9 = vld [vmem:[%s15266_s2 + $0x36c] ss:$16 sps:$4 sm:$0xff]  }
 0x193   : > { %4053 = vmatpush1.bf16.msra.mxu1 %v10807_v13  ;;  %v2396_v26 = vpop.f32.mrf.mxu0  ;;  %4013 = vmatprep.subr.bf16.mxu0 %v10812_v16  ;;  %v10870_v13 = vld [vmem:[%s15266_s2 + $0x168] ss:$16 sps:$4 sm:$0xff]   ;;  %v10890_v25 = vld [vmem:[%s15266_s2 + $0x10c] ss:$16 sps:$4 sm:$0xff]  }
 0x194   : > { %v2437_v61 = vpop.f32.mrf.mxu1  ;;  %4054 = vmatprep.subr.bf16.mxu1 %v10815_v20  ;;  %v10873_v10 = vld [vmem:[%s15266_s2 + $0x368] ss:$16 sps:$4 sm:$0xff]   ;;  %v10884_v20 = vld [vmem:[%s15266_s2 + $0x12c] ss:$16 sps:$4 sm:$0xff]  }
 0x195   : > { %v10876_v15 = vld [vmem:[%s15266_s2 + $0x148] ss:$16 sps:$4 sm:$0xff]   ;;  %v10893_v26 = vld [vmem:[%s15266_s2 + $0x30c] ss:$16 sps:$4 sm:$0xff]  }
 0x196   : > { %4014 = vmatpush1.bf16.msra.mxu0 %v10810_v21  ;;  %v10879_v16 = vld [vmem:[%s15266_s2 + $0x348] ss:$16 sps:$4 sm:$0xff]   ;;  %v10887_v21 = vld [vmem:[%s15266_s2 + $0x32c] ss:$16 sps:$4 sm:$0xff]  }
 0x197   : > { %4055 = vmatpush1.bf16.msra.mxu1 %v10813_v23  ;;  %4015 = vmatprep.subr.bf16.mxu0 %v10818_v62  ;;  %v10882_v23 = vld [vmem:[%s15266_s2 + $0x128] ss:$16 sps:$4 sm:$0xff]  }
 0x198   : > { %4056 = vmatprep.subr.bf16.mxu1 %v10821_v30  ;;  %v10885_v24 = vld [vmem:[%s15266_s2 + $0x328] ss:$16 sps:$4 sm:$0xff]   ;;  %v10896_v30 = vld [vmem:[%s15266_s2 + $0x4ec] ss:$16 sps:$4 sm:$0xff]  }
 0x199   : > { %v10888_v61 = vld [vmem:[%s15266_s2 + $0x108] ss:$16 sps:$4 sm:$0xff]  }
 0x19a   : > { %4016 = vmatpush1.bf16.msra.mxu0 %v10816_v17  ;;  %v10891_v62 = vld [vmem:[%s15266_s2 + $0x308] ss:$16 sps:$4 sm:$0xff]   ;;  %v10899_v17 = vld [vmem:[%s15266_s2 + $0x6ec] ss:$16 sps:$4 sm:$0xff]  }
 0x19b   : > { %4057 = vmatpush1.bf16.msra.mxu1 %v10819_v18  ;;  %4017 = vmatprep.subr.bf16.mxu0 %v10824_v31  ;;  %v10894_v18 = vld [vmem:[%s15266_s2 + $0x4e8] ss:$16 sps:$4 sm:$0xff]  }
 0x19c   : > { %4058 = vmatprep.subr.bf16.mxu1 %v10827_v32  ;;  %v10897_v31 = vld [vmem:[%s15266_s2 + $0x6e8] ss:$16 sps:$4 sm:$0xff]   ;;  %v10902_v32 = vld [vmem:[%s15266_s2 + $0x4cc] ss:$16 sps:$4 sm:$0xff]  }
 0x19e   : > { %4018 = vmatpush1.bf16.msra.mxu0 %v10822_v33  ;;  %v10905_v33 = vld [vmem:[%s15266_s2 + $0x6cc] ss:$16 sps:$4 sm:$0xff]  }
 0x19f   : > { %4059 = vmatpush1.bf16.msra.mxu1 %v10825_v34  ;;  %4019 = vmatprep.subr.bf16.mxu0 %v10830_v35  ;;  %v10900_v34 = vld [vmem:[%s15266_s2 + $0x4c8] ss:$16 sps:$4 sm:$0xff]  }
 0x1a0   : > { %4060 = vmatprep.subr.bf16.mxu1 %v10833_v36  ;;  %v10903_v35 = vld [vmem:[%s15266_s2 + $0x6c8] ss:$16 sps:$4 sm:$0xff]  }
 0x1a2   : > { %4020 = vmatpush1.bf16.msra.mxu0 %v10828_v37 }
 0x1a3   : > { %4061 = vmatpush1.bf16.msra.mxu1 %v10831_v39  ;;  %4021 = vmatprep.subr.bf16.mxu0 %v10836_v42 }
 0x1a4   : > { %4062 = vmatprep.subr.bf16.mxu1 %v10839_v44 }
 0x1a6   : > { %4022 = vmatpush1.bf16.msra.mxu0 %v10834_v45  ;;  %v10908_v45 = vld [vmem:[%s15266_s2 + $0x4ac] ss:$16 sps:$4 sm:$0xff]  }
 0x1a7   : > { %4063 = vmatpush1.bf16.msra.mxu1 %v10837_v46  ;;  %4023 = vmatprep.subr.bf16.mxu0 %v10842_v50  ;;  %v10911_v46 = vld [vmem:[%s15266_s2 + $0x6ac] ss:$16 sps:$4 sm:$0xff]  }
 0x1a8   : > { %4064 = vmatprep.subr.bf16.mxu1 %v10845_v51 }
 0x1aa   : > { %4024 = vmatpush1.bf16.msra.mxu0 %v10840_v52 }
 0x1ab   : > { %4065 = vmatpush1.bf16.msra.mxu1 %v10843_v53  ;;  %4025 = vmatprep.subr.bf16.mxu0 %v10848_v54 }
 0x1ac   : > { %4066 = vmatprep.subr.bf16.mxu1 %v10851_v55  ;;  %v10914_v55 = vld [vmem:[%s15266_s2 + $0x48c] ss:$16 sps:$4 sm:$0xff]  }
 0x1ae   : > { %4026 = vmatpush2.bf16.msra.mxu0 %v10846_v56  ;;  %v10915_v56 = vld [vmem:[%s15266_s2 + $0x688] ss:$16 sps:$4 sm:$0xff]  }
 0x1af   : > { %4067 = vmatpush2.bf16.msra.mxu1 %v10849_v58  ;;  %4027 = vmatprep.subr.bf16.mxu0 %v10854_v22  ;;  %v10920_v58 = vld [vmem:[%s15266_s2 + $0x46c] ss:$16 sps:$4 sm:$0xff]  }
 0x1b0   : > { %4068 = vmatprep.subr.bf16.mxu1 %v10857_v60  ;;  %v10923_v22 = vld [vmem:[%s15266_s2 + $0x66c] ss:$16 sps:$4 sm:$0xff]   ;;  %v10918_v60 = vld [vmem:[%s15266_s2 + $0x468] ss:$16 sps:$4 sm:$0xff]  }
 0x1b2   : > { %4028 = vmatpush2.bf16.msra.mxu0 %v10852_v59  ;;  %v10921_v59 = vld [vmem:[%s15266_s2 + $0x668] ss:$16 sps:$4 sm:$0xff]  }
 0x1b3   : > { %4069 = vmatpush2.bf16.msra.mxu1 %v10855_v63  ;;  %4029 = vmatprep.subr.bf16.mxu0 %v10860_v1  ;;  %v10926_v63 = vld [vmem:[%s15266_s2 + $0x44c] ss:$16 sps:$4 sm:$0xff]  }
 0x1b4   : > { %4070 = vmatprep.subr.bf16.mxu1 %v10863_v27  ;;  %v10929_v1 = vld [vmem:[%s15266_s2 + $0x64c] ss:$16 sps:$4 sm:$0xff]   ;;  %v10924_v27 = vld [vmem:[%s15266_s2 + $0x448] ss:$16 sps:$4 sm:$0xff]  }
 0x1b6   : > { %4030 = vmatpush2.bf16.msra.mxu0 %v10858_v2  ;;  %v10927_v2 = vld [vmem:[%s15266_s2 + $0x648] ss:$16 sps:$4 sm:$0xff]  }
 0x1b7   : > { %4071 = vmatpush2.bf16.msra.mxu1 %v10861_v3  ;;  %4031 = vmatprep.subr.bf16.mxu0 %v10866_v4  ;;  %v10932_v3 = vld [vmem:[%s15266_s2 + $0x42c] ss:$16 sps:$4 sm:$0xff]  }
 0x1b8   : > { %4072 = vmatprep.subr.bf16.mxu1 %v10869_v5  ;;  %v10935_v4 = vld [vmem:[%s15266_s2 + $0x62c] ss:$16 sps:$4 sm:$0xff]   ;;  %v10930_v5 = vld [vmem:[%s15266_s2 + $0x428] ss:$16 sps:$4 sm:$0xff]  }
 0x1ba   : > { %4032 = vmatpush2.bf16.msra.mxu0 %v10864_v6  ;;  %v10933_v6 = vld [vmem:[%s15266_s2 + $0x628] ss:$16 sps:$4 sm:$0xff]  }
 0x1bb   : > { %4073 = vmatpush2.bf16.msra.mxu1 %v10867_v7  ;;  %4033 = vmatprep.subr.bf16.mxu0 %v10872_v8  ;;  %v10938_v7 = vld [vmem:[%s15266_s2 + $0x40c] ss:$16 sps:$4 sm:$0xff]  }
 0x1bc   : > { %4074 = vmatprep.subr.bf16.mxu1 %v10875_v9  ;;  %v10941_v8 = vld [vmem:[%s15266_s2 + $0x60c] ss:$16 sps:$4 sm:$0xff]   ;;  %v10936_v9 = vld [vmem:[%s15266_s2 + $0x408] ss:$16 sps:$4 sm:$0xff]  }
 0x1be   : > { %4034 = vmatpush2.bf16.msra.mxu0 %v10870_v13  ;;  %v10939_v13 = vld [vmem:[%s15266_s2 + $0x608] ss:$16 sps:$4 sm:$0xff]  }
 0x1bf   : > { %4075 = vmatpush2.bf16.msra.mxu1 %v10873_v10  ;;  %4035 = vmatprep.subr.bf16.mxu0 %v10878_v11  ;;  %v10944_v10 = vld [vmem:[%s15266_s2 + $0x5ec] ss:$16 sps:$4 sm:$0xff]  }
 0x1c0   : > { %4076 = vmatprep.subr.bf16.mxu1 %v10881_v14  ;;  %v10947_v11 = vld [vmem:[%s15266_s2 + $0x7ec] ss:$16 sps:$4 sm:$0xff]   ;;  %v10942_v14 = vld [vmem:[%s15266_s2 + $0x5e8] ss:$16 sps:$4 sm:$0xff]  }
 0x1c2   : > { %4036 = vmatpush2.bf16.msra.mxu0 %v10876_v15  ;;  %v10945_v15 = vld [vmem:[%s15266_s2 + $0x7e8] ss:$16 sps:$4 sm:$0xff]  }
 0x1c3   : > { %4077 = vmatpush2.bf16.msra.mxu1 %v10879_v16  ;;  %4037 = vmatprep.subr.bf16.mxu0 %v10884_v20  ;;  %v10950_v16 = vld [vmem:[%s15266_s2 + $0x5cc] ss:$16 sps:$4 sm:$0xff]  }
 0x1c4   : > { %4078 = vmatprep.subr.bf16.mxu1 %v10887_v21  ;;  %v10953_v20 = vld [vmem:[%s15266_s2 + $0x7cc] ss:$16 sps:$4 sm:$0xff]   ;;  %v10948_v21 = vld [vmem:[%s15266_s2 + $0x5c8] ss:$16 sps:$4 sm:$0xff]  }
 0x1c6   : > { %4038 = vmatpush2.bf16.msra.mxu0 %v10882_v23  ;;  %v10951_v23 = vld [vmem:[%s15266_s2 + $0x7c8] ss:$16 sps:$4 sm:$0xff]  }
 0x1c7   : > { %4079 = vmatpush2.bf16.msra.mxu1 %v10885_v24  ;;  %4039 = vmatprep.subr.bf16.mxu0 %v10890_v25  ;;  %v10956_v24 = vld [vmem:[%s15266_s2 + $0x5ac] ss:$16 sps:$4 sm:$0xff]  }
 0x1c8   : > { %4080 = vmatprep.subr.bf16.mxu1 %v10893_v26  ;;  %v10959_v25 = vld [vmem:[%s15266_s2 + $0x7ac] ss:$16 sps:$4 sm:$0xff]   ;;  %v10954_v26 = vld [vmem:[%s15266_s2 + $0x5a8] ss:$16 sps:$4 sm:$0xff]  }
 0x1ca   : > { %4040 = vmatpush2.bf16.msra.mxu0 %v10888_v61  ;;  %v10957_v61 = vld [vmem:[%s15266_s2 + $0x7a8] ss:$16 sps:$4 sm:$0xff]  }
 0x1cb   : > { %4081 = vmatpush2.bf16.msra.mxu1 %v10891_v62  ;;  %4091 = vmatprep.subr.bf16.mxu0 %v10896_v30  ;;  %v10962_v62 = vld [vmem:[%s15266_s2 + $0x58c] ss:$16 sps:$4 sm:$0xff]  }
 0x1cc   : > { %4132 = vmatprep.subr.bf16.mxu1 %v10899_v17  ;;  %v10965_v30 = vld [vmem:[%s15266_s2 + $0x78c] ss:$16 sps:$4 sm:$0xff]   ;;  %v10960_v17 = vld [vmem:[%s15266_s2 + $0x588] ss:$16 sps:$4 sm:$0xff]  }
 0x1cd   : > { %v2473_v36 = vpop.f32.mrf.mxu0  ;;  %4042 = vmatmul.mubr.bf16.vlgmr.msra.gmra.mxu0 %v12670_v28 }
 0x1ce   : > { %v2514_v37 = vpop.f32.mrf.mxu1  ;;  %4083 = vmatmul.mubr.bf16.vlgmr.msra.gmra.mxu1 %v12673_v29  ;;  %v2474_v39 = vadd.f32 %v2473_v36, %v13120_v12  ;;  %4092 = vmatpush1.bf16.msra.mxu0 %v10894_v18  ;;  %v10906_v29 = vld [vmem:[%s15266_s2 + $0x4a8] ss:$16 sps:$4 sm:$0xff]   ;;  %v10977_v36 = vld [vmem:[%s15266_s2 + $0x74c] ss:$16 sps:$4 sm:$0xff]  }
 0x1cf   : > { %4133 = vmatpush1.bf16.msra.mxu1 %v10897_v31  ;;  %v2475_v42 = vpop.f32.mrf.mxu0  ;;  %4093 = vmatprep.subr.bf16.mxu0 %v10902_v32  ;;  %v10909_v12 = vld [vmem:[%s15266_s2 + $0x6a8] ss:$16 sps:$4 sm:$0xff]   ;;  %v10968_v31 = vld [vmem:[%s15266_s2 + $0x56c] ss:$16 sps:$4 sm:$0xff]  }
 0x1d0   : > { %v2516_v44 = vpop.f32.mrf.mxu1  ;;  %4134 = vmatprep.subr.bf16.mxu1 %v10905_v33  ;;  %v13327_v50 = vadd.f32 %v2514_v37, %v2474_v39  ;;  %v2476_v28 = vadd.f32 %v2475_v42, %v13128_v19  ;;  %4123 = vmatprep.mubr.bf16.mxu0 %v12910_v47  ;;  %v10917_v47 = vld [vmem:[%s15266_s2 + $0x68c] ss:$16 sps:$4 sm:$0xff]   ;;  %v10963_v18 = vld [vmem:[%s15266_s2 + $0x788] ss:$16 sps:$4 sm:$0xff]  }
 0x1d1   : > { %4164 = vmatprep.mubr.bf16.mxu1 %v12914_v48  ;;  %v2477_v51 = vpop.f32.mrf.mxu0  ;;  %v10912_v48 = vld [vmem:[%s15266_s2 + $0x488] ss:$16 sps:$4 sm:$0xff]   ;;  %v10971_v32 = vld [vmem:[%s15266_s2 + $0x76c] ss:$16 sps:$4 sm:$0xff]  }
 0x1d2   : > { %v2518_v52 = vpop.f32.mrf.mxu1  ;;  %v13338_v53 = vadd.f32 %v2516_v44, %v2476_v28  ;;  %4094 = vmatpush1.bf16.msra.mxu0 %v10900_v34  ;;  %v10966_v33 = vld [vmem:[%s15266_s2 + $0x568] ss:$16 sps:$4 sm:$0xff]   ;;  %v10980_v42 = vld [vmem:[%s15266_s2 + $0x52c] ss:$16 sps:$4 sm:$0xff]  }
 0x1d3   : > { %4135 = vmatpush1.bf16.msra.mxu1 %v10903_v35  ;;  %v2478_v54 = vpop.f32.mrf.mxu0  ;;  %4095 = vmatprep.subr.bf16.mxu0 %v10908_v45  ;;  %v10969_v34 = vld [vmem:[%s15266_s2 + $0x768] ss:$16 sps:$4 sm:$0xff]   ;;  %v10974_v35 = vld [vmem:[%s15266_s2 + $0x54c] ss:$16 sps:$4 sm:$0xff]   ;;  %v4173_v45 = vld [vmem:[%s13473_s23] sm:$0x55] }
 0x1d4   : > { %v2519_v19 = vpop.f32.mrf.mxu1  ;;  %4136 = vmatprep.subr.bf16.mxu1 %v10911_v46  ;;  %v10972_v37 = vld [vmem:[%s15266_s2 + $0x548] ss:$16 sps:$4 sm:$0xff]   ;;  %v10983_v44 = vld [vmem:[%s15266_s2 + $0x72c] ss:$16 sps:$4 sm:$0xff]   ;;  %v4434_v51 = vcombine.high %v4173_v45, %v4173_v45 }
 0x1d5   : > { %v10975_v39 = vld [vmem:[%s15266_s2 + $0x748] ss:$16 sps:$4 sm:$0xff]   ;;  %v10992_v19 = vld [vmem:[%s15266_s2 + $0x10e4] ss:$16 sps:$4 sm:$0xff]  }
 0x1d6   : > { %4096 = vmatpush1.bf16.msra.mxu0 %v10906_v29  ;;  %v10978_v46 = vld [vmem:[%s15266_s2 + $0x528] ss:$16 sps:$4 sm:$0xff]   ;;  %v10986_v29 = vld [vmem:[%s15266_s2 + $0x50c] ss:$16 sps:$4 sm:$0xff]  }
 0x1d7   : > { %4137 = vmatpush1.bf16.msra.mxu1 %v10909_v12  ;;  %4097 = vmatprep.subr.bf16.mxu0 %v10914_v55  ;;  %v10981_v28 = vld [vmem:[%s15266_s2 + $0x728] ss:$16 sps:$4 sm:$0xff]   ;;  %v10989_v12 = vld [vmem:[%s15266_s2 + $0x70c] ss:$16 sps:$4 sm:$0xff]   ;;  %v10995_v55 = vld [vmem:[%s15266_s2 + $0x12e4] ss:$16 sps:$4 sm:$0xff]  }
 0x1d8   : > { %4138 = vmatprep.subr.bf16.mxu1 %v10917_v47  ;;  %v10984_v52 = vld [vmem:[%s15266_s2 + $0x508] ss:$16 sps:$4 sm:$0xff]   ;;  %v10990_v47 = vld [vmem:[%s15266_s2 + $0x10e0] ss:$16 sps:$4 sm:$0xff]  }
 0x1d9   : > { %v10987_v54 = vld [vmem:[%s15266_s2 + $0x708] ss:$16 sps:$4 sm:$0xff]  }
 0x1da   : > { %4098 = vmatpush1.bf16.msra.mxu0 %v10912_v48  ;;  %v10993_v48 = vld [vmem:[%s15266_s2 + $0x12e0] ss:$16 sps:$4 sm:$0xff]  }
 0x1db   : > { %4139 = vmatpush1.bf16.msra.mxu1 %v10915_v56  ;;  %4099 = vmatprep.subr.bf16.mxu0 %v10920_v58  ;;  %v13516_v56 = vrot.slane %v4173_v45, %v11976_v49  ;;  %v13519_v58 = vrot.slane %v4434_v51, %v11976_v49  ;;  %v11041_v45 = vld [vmem:[%s15266_s2 + $0x13e0] ss:$16 sps:$4 sm:$0xff]   ;;  %v11052_v51 = vld [vmem:[%s15266_s2 + $0x11a4] ss:$16 sps:$4 sm:$0xff]  }
 0x1dc   : > { %4140 = vmatprep.subr.bf16.mxu1 %v10923_v22  ;;  %v10998_v22 = vld [vmem:[%s15266_s2 + $0x10c4] ss:$16 sps:$4 sm:$0xff]  }
 0x1de   : > { %4100 = vmatpush1.bf16.msra.mxu0 %v10918_v60  ;;  %v11001_v60 = vld [vmem:[%s15266_s2 + $0x12c4] ss:$16 sps:$4 sm:$0xff]  }
 0x1df   : > { %4141 = vmatpush1.bf16.msra.mxu1 %v10921_v59  ;;  %4101 = vmatprep.subr.bf16.mxu0 %v10926_v63  ;;  %v10996_v59 = vld [vmem:[%s15266_s2 + $0x10c0] ss:$16 sps:$4 sm:$0xff]  }
 0x1e0   : > { %4142 = vmatprep.subr.bf16.mxu1 %v10929_v1  ;;  %v10999_v63 = vld [vmem:[%s15266_s2 + $0x12c0] ss:$16 sps:$4 sm:$0xff]   ;;  %v13535_v1 = vcombine.high %v13516_v56, %v13516_v56 }
 0x1e2   : > { %4102 = vmatpush1.bf16.msra.mxu0 %v10924_v27  ;;  %v13539_v27 = vcombine.high %v13519_v58, %v13519_v58 }
 0x1e3   : > { %4143 = vmatpush1.bf16.msra.mxu1 %v10927_v2  ;;  %4103 = vmatprep.subr.bf16.mxu0 %v10932_v3 }
 0x1e4   : > { %4144 = vmatprep.subr.bf16.mxu1 %v10935_v4 }
 0x1e6   : > { %4104 = vmatpush1.bf16.msra.mxu0 %v10930_v5 }
 0x1e7   : > { %4145 = vmatpush1.bf16.msra.mxu1 %v10933_v6  ;;  %4105 = vmatprep.subr.bf16.mxu0 %v10938_v7  ;;  %v11004_v7 = vld [vmem:[%s15266_s2 + $0x10a4] ss:$16 sps:$4 sm:$0xff]  }
 0x1e8   : > { %4146 = vmatprep.subr.bf16.mxu1 %v10941_v8  ;;  %v11007_v8 = vld [vmem:[%s15266_s2 + $0x12a4] ss:$16 sps:$4 sm:$0xff]  }
 0x1ea   : > { %4106 = vmatpush1.bf16.msra.mxu0 %v10936_v9 }
 0x1eb   : > { %4147 = vmatpush1.bf16.msra.mxu1 %v10939_v13  ;;  %4107 = vmatprep.subr.bf16.mxu0 %v10944_v10 }
 0x1ec   : > { %4148 = vmatprep.subr.bf16.mxu1 %v10947_v11 }
 0x1ee   : > { %4108 = vmatpush2.bf16.msra.mxu0 %v10942_v14 }
 0x1ef   : > { %4149 = vmatpush2.bf16.msra.mxu1 %v10945_v15  ;;  %4109 = vmatprep.subr.bf16.mxu0 %v10950_v16  ;;  %v11010_v15 = vld [vmem:[%s15266_s2 + $0x1084] ss:$16 sps:$4 sm:$0xff]  }
 0x1f0   : > { %4150 = vmatprep.subr.bf16.mxu1 %v10953_v20  ;;  %v11013_v16 = vld [vmem:[%s15266_s2 + $0x1284] ss:$16 sps:$4 sm:$0xff]   ;;  %v11008_v20 = vld [vmem:[%s15266_s2 + $0x1080] ss:$16 sps:$4 sm:$0xff]  }
 0x1f2   : > { %4110 = vmatpush2.bf16.msra.mxu0 %v10948_v21  ;;  %v11011_v21 = vld [vmem:[%s15266_s2 + $0x1280] ss:$16 sps:$4 sm:$0xff]  }
 0x1f3   : > { %4151 = vmatpush2.bf16.msra.mxu1 %v10951_v23  ;;  %4111 = vmatprep.subr.bf16.mxu0 %v10956_v24  ;;  %v11016_v23 = vld [vmem:[%s15266_s2 + $0x1064] ss:$16 sps:$4 sm:$0xff]  }
 0x1f4   : > { %4152 = vmatprep.subr.bf16.mxu1 %v10959_v25  ;;  %v11019_v24 = vld [vmem:[%s15266_s2 + $0x1264] ss:$16 sps:$4 sm:$0xff]   ;;  %v11014_v25 = vld [vmem:[%s15266_s2 + $0x1060] ss:$16 sps:$4 sm:$0xff]  }
 0x1f6   : > { %4112 = vmatpush2.bf16.msra.mxu0 %v10954_v26  ;;  %v11017_v26 = vld [vmem:[%s15266_s2 + $0x1260] ss:$16 sps:$4 sm:$0xff]  }
 0x1f7   : > { %4153 = vmatpush2.bf16.msra.mxu1 %v10957_v61  ;;  %4113 = vmatprep.subr.bf16.mxu0 %v10962_v62  ;;  %v11022_v61 = vld [vmem:[%s15266_s2 + $0x1044] ss:$16 sps:$4 sm:$0xff]  }
 0x1f8   : > { %4154 = vmatprep.subr.bf16.mxu1 %v10965_v30  ;;  %v11025_v62 = vld [vmem:[%s15266_s2 + $0x1244] ss:$16 sps:$4 sm:$0xff]   ;;  %v11020_v30 = vld [vmem:[%s15266_s2 + $0x1040] ss:$16 sps:$4 sm:$0xff]  }
 0x1fa   : > { %4114 = vmatpush2.bf16.msra.mxu0 %v10960_v17  ;;  %v11023_v17 = vld [vmem:[%s15266_s2 + $0x1240] ss:$16 sps:$4 sm:$0xff]  }
 0x1fb   : > { %4155 = vmatpush2.bf16.msra.mxu1 %v10963_v18  ;;  %4115 = vmatprep.subr.bf16.mxu0 %v10968_v31  ;;  %v11028_v18 = vld [vmem:[%s15266_s2 + $0x1024] ss:$16 sps:$4 sm:$0xff]  }
 0x1fc   : > { %4156 = vmatprep.subr.bf16.mxu1 %v10971_v32  ;;  %v11031_v31 = vld [vmem:[%s15266_s2 + $0x1224] ss:$16 sps:$4 sm:$0xff]   ;;  %v11026_v32 = vld [vmem:[%s15266_s2 + $0x1020] ss:$16 sps:$4 sm:$0xff]  }
 0x1fe   : > { %4116 = vmatpush2.bf16.msra.mxu0 %v10966_v33  ;;  %v11029_v33 = vld [vmem:[%s15266_s2 + $0x1220] ss:$16 sps:$4 sm:$0xff]  }
 0x1ff   : > { %4157 = vmatpush2.bf16.msra.mxu1 %v10969_v34  ;;  %4117 = vmatprep.subr.bf16.mxu0 %v10974_v35  ;;  %v11034_v34 = vld [vmem:[%s15266_s2 + $0x1004] ss:$16 sps:$4 sm:$0xff]  }
 0x200   : > { %4158 = vmatprep.subr.bf16.mxu1 %v10977_v36  ;;  %v11037_v35 = vld [vmem:[%s15266_s2 + $0x1204] ss:$16 sps:$4 sm:$0xff]   ;;  %v11032_v36 = vld [vmem:[%s15266_s2 + $0x1000] ss:$16 sps:$4 sm:$0xff]  }
 0x202   : > { %4118 = vmatpush2.bf16.msra.mxu0 %v10972_v37  ;;  %v11035_v37 = vld [vmem:[%s15266_s2 + $0x1200] ss:$16 sps:$4 sm:$0xff]  }
 0x203   : > { %4159 = vmatpush2.bf16.msra.mxu1 %v10975_v39  ;;  %4119 = vmatprep.subr.bf16.mxu0 %v10980_v42  ;;  %v11040_v39 = vld [vmem:[%s15266_s2 + $0x11e4] ss:$16 sps:$4 sm:$0xff]  }
 0x204   : > { %4160 = vmatprep.subr.bf16.mxu1 %v10983_v44  ;;  %v11043_v42 = vld [vmem:[%s15266_s2 + $0x13e4] ss:$16 sps:$4 sm:$0xff]   ;;  %v11038_v44 = vld [vmem:[%s15266_s2 + $0x11e0] ss:$16 sps:$4 sm:$0xff]  }
 0x206   : > { %4120 = vmatpush2.bf16.msra.mxu0 %v10978_v46  ;;  %v11046_v46 = vld [vmem:[%s15266_s2 + $0x11c4] ss:$16 sps:$4 sm:$0xff]  }
 0x207   : > { %4161 = vmatpush2.bf16.msra.mxu1 %v10981_v28  ;;  %4121 = vmatprep.subr.bf16.mxu0 %v10986_v29  ;;  %v11049_v28 = vld [vmem:[%s15266_s2 + $0x13c4] ss:$16 sps:$4 sm:$0xff]   ;;  %v11044_v29 = vld [vmem:[%s15266_s2 + $0x11c0] ss:$16 sps:$4 sm:$0xff]  }
 0x208   : > { %4162 = vmatprep.subr.bf16.mxu1 %v10989_v12  ;;  %v11047_v12 = vld [vmem:[%s15266_s2 + $0x13c0] ss:$16 sps:$4 sm:$0xff]  }
 0x20a   : > { %4122 = vmatpush2.bf16.msra.mxu0 %v10984_v52  ;;  %v11055_v52 = vld [vmem:[%s15266_s2 + $0x13a4] ss:$16 sps:$4 sm:$0xff]  }
 0x20b   : > { %4163 = vmatpush2.bf16.msra.mxu1 %v10987_v54  ;;  %5756 = vmatprep.subr.bf16.mxu0 %v10992_v19  ;;  %v11050_v54 = vld [vmem:[%s15266_s2 + $0x11a0] ss:$16 sps:$4 sm:$0xff]  }
 0x20c   : > { %5797 = vmatprep.subr.bf16.mxu1 %v10995_v55  ;;  %v11053_v19 = vld [vmem:[%s15266_s2 + $0x13a0] ss:$16 sps:$4 sm:$0xff]   ;;  %v11058_v55 = vld [vmem:[%s15266_s2 + $0x1184] ss:$16 sps:$4 sm:$0xff]  }
 0x20d   : > { %v3879_v2 = vpop.f32.mrf.mxu0  ;;  %4124 = vmatmul.mubr.bf16.vlgmr.msra.gmra.mxu0 %v12891_v40 }
 0x20e   : > { %v3920_v3 = vpop.f32.mrf.mxu1  ;;  %4165 = vmatmul.mubr.bf16.vlgmr.msra.gmra.mxu1 %v12894_v41  ;;  %v3880_v4 = vadd.f32 %v3879_v2, %v12925_v57  ;;  %5757 = vmatpush1.bf16.msra.mxu0 %v10990_v47  ;;  %v11002_v41 = vld [vmem:[%s15266_s2 + $0x10a0] ss:$16 sps:$4 sm:$0xff]   ;;  %v11061_v47 = vld [vmem:[%s15266_s2 + $0x1384] ss:$16 sps:$4 sm:$0xff]  }
 0x20f   : > { %5798 = vmatpush1.bf16.msra.mxu1 %v10993_v48  ;;  %v3881_v5 = vpop.f32.mrf.mxu0  ;;  %5758 = vmatprep.subr.bf16.mxu0 %v10998_v22  ;;  %v11005_v57 = vld [vmem:[%s15266_s2 + $0x12a0] ss:$16 sps:$4 sm:$0xff]  }
 0x210   : > { %v3922_v6 = vpop.f32.mrf.mxu1  ;;  %5799 = vmatprep.subr.bf16.mxu1 %v11001_v60  ;;  %v13550_v9 = vadd.f32 %v3920_v3, %v3880_v4  ;;  %v3882_v40 = vadd.f32 %v3881_v5, %v12936_v0  ;;  %5788 = vmatprep.mubr.bf16.mxu0 %v13535_v1  ;;  %v11056_v48 = vld [vmem:[%s15266_s2 + $0x1180] ss:$16 sps:$4 sm:$0xff]   ;;  %v11064_v60 = vld [vmem:[%s15266_s2 + $0x1164] ss:$16 sps:$4 sm:$0xff]  }
 0x211   : > { %5829 = vmatprep.mubr.bf16.mxu1 %v13539_v27  ;;  %v3883_v13 = vpop.f32.mrf.mxu0  ;;  %v11059_v22 = vld [vmem:[%s15266_s2 + $0x1380] ss:$16 sps:$4 sm:$0xff]   ;;  %v11070_v3 = vld [vmem:[%s15266_s2 + $0x1144] ss:$16 sps:$4 sm:$0xff]  }
 0x212   : > { %v3924_v10 = vpop.f32.mrf.mxu1  ;;  %v13561_v11 = vadd.f32 %v3922_v6, %v3882_v40  ;;  %5759 = vmatpush1.bf16.msra.mxu0 %v10996_v59  ;;  %v11067_v59 = vld [vmem:[%s15266_s2 + $0x1364] ss:$16 sps:$4 sm:$0xff]   ;;  %v11065_v2 = vld [vmem:[%s15266_s2 + $0x1360] ss:$16 sps:$4 sm:$0xff]   ;;  %v4174_v40 = vld [vmem:[%s13473_s23 + $0x8] sm:$0x55] }
 0x213   : > { %5800 = vmatpush1.bf16.msra.mxu1 %v10999_v63  ;;  %v3884_v14 = vpop.f32.mrf.mxu0  ;;  %5760 = vmatprep.subr.bf16.mxu0 %v11004_v7  ;;  %v11062_v63 = vld [vmem:[%s15266_s2 + $0x1160] ss:$16 sps:$4 sm:$0xff]   ;;  %v11073_v4 = vld [vmem:[%s15266_s2 + $0x1344] ss:$16 sps:$4 sm:$0xff]  }
 0x214   : > { %v3925_v0 = vpop.f32.mrf.mxu1  ;;  %5801 = vmatprep.subr.bf16.mxu1 %v11007_v8  ;;  %v11068_v5 = vld [vmem:[%s15266_s2 + $0x1140] ss:$16 sps:$4 sm:$0xff]   ;;  %v11076_v7 = vld [vmem:[%s15266_s2 + $0x1124] ss:$16 sps:$4 sm:$0xff]   ;;  %v4451_v14 = vcombine.high %v4174_v40, %v4174_v40 }
 0x215   : > { %v11071_v6 = vld [vmem:[%s15266_s2 + $0x1340] ss:$16 sps:$4 sm:$0xff]   ;;  %v11079_v8 = vld [vmem:[%s15266_s2 + $0x1324] ss:$16 sps:$4 sm:$0xff]  }
 0x216   : > { %5761 = vmatpush1.bf16.msra.mxu0 %v11002_v41  ;;  %v11074_v41 = vld [vmem:[%s15266_s2 + $0x1120] ss:$16 sps:$4 sm:$0xff]   ;;  %v11082_v13 = vld [vmem:[%s15266_s2 + $0x1104] ss:$16 sps:$4 sm:$0xff]  }
 0x217   : > { %5802 = vmatpush1.bf16.msra.mxu1 %v11005_v57  ;;  %5762 = vmatprep.subr.bf16.mxu0 %v11010_v15  ;;  %v11077_v57 = vld [vmem:[%s15266_s2 + $0x1320] ss:$16 sps:$4 sm:$0xff]   ;;  %v11085_v10 = vld [vmem:[%s15266_s2 + $0x1304] ss:$16 sps:$4 sm:$0xff]  }
 0x218   : > { %5803 = vmatprep.subr.bf16.mxu1 %v11013_v16  ;;  %v11080_v0 = vld [vmem:[%s15266_s2 + $0x1100] ss:$16 sps:$4 sm:$0xff]   ;;  %v11089_v16 = vld [vmem:[%s15266_s2 + $0x14e4] ss:$16 sps:$4 sm:$0xff]  }
 0x219   : > { %v11083_v15 = vld [vmem:[%s15266_s2 + $0x1300] ss:$16 sps:$4 sm:$0xff]  }
 0x21a   : > { %5763 = vmatpush1.bf16.msra.mxu0 %v11008_v20  ;;  %v11092_v20 = vld [vmem:[%s15266_s2 + $0x16e4] ss:$16 sps:$4 sm:$0xff]  }
 0x21b   : > { %5804 = vmatpush1.bf16.msra.mxu1 %v11011_v21  ;;  %5764 = vmatprep.subr.bf16.mxu0 %v11016_v23  ;;  %v11087_v21 = vld [vmem:[%s15266_s2 + $0x14e0] ss:$16 sps:$4 sm:$0xff]  }
 0x21c   : > { %5805 = vmatprep.subr.bf16.mxu1 %v11019_v24  ;;  %v11090_v23 = vld [vmem:[%s15266_s2 + $0x16e0] ss:$16 sps:$4 sm:$0xff]   ;;  %v13733_v24 = vrot.slane %v4174_v40, %v11976_v49 }
 0x21d   : > { %v11132_v40 = vld [vmem:[%s15266_s2 + $0x1600] ss:$16 sps:$4 sm:$0xff]  }
 0x21e   : > { %5765 = vmatpush1.bf16.msra.mxu0 %v11014_v25  ;;  %v13736_v25 = vrot.slane %v4451_v14, %v11976_v49  ;;  %v11143_v14 = vld [vmem:[%s15266_s2 + $0x15c4] ss:$16 sps:$4 sm:$0xff]  }
 0x21f   : > { %5806 = vmatpush1.bf16.msra.mxu1 %v11017_v26  ;;  %5766 = vmatprep.subr.bf16.mxu0 %v11022_v61  ;;  %v11095_v26 = vld [vmem:[%s15266_s2 + $0x14c4] ss:$16 sps:$4 sm:$0xff]  }
 0x220   : > { %5807 = vmatprep.subr.bf16.mxu1 %v11025_v62  ;;  %v11098_v61 = vld [vmem:[%s15266_s2 + $0x16c4] ss:$16 sps:$4 sm:$0xff]   ;;  %v11093_v62 = vld [vmem:[%s15266_s2 + $0x14c0] ss:$16 sps:$4 sm:$0xff]  }
 0x222   : > { %5767 = vmatpush1.bf16.msra.mxu0 %v11020_v30  ;;  %v11096_v30 = vld [vmem:[%s15266_s2 + $0x16c0] ss:$16 sps:$4 sm:$0xff]  }
 0x223   : > { %5808 = vmatpush1.bf16.msra.mxu1 %v11023_v17  ;;  %5768 = vmatprep.subr.bf16.mxu0 %v11028_v18  ;;  %v13752_v17 = vcombine.high %v13733_v24, %v13733_v24  ;;  %v13756_v18 = vcombine.high %v13736_v25, %v13736_v25 }
 0x224   : > { %5809 = vmatprep.subr.bf16.mxu1 %v11031_v31 }
 0x226   : > { %5769 = vmatpush1.bf16.msra.mxu0 %v11026_v32 }
 0x227   : > { %5810 = vmatpush1.bf16.msra.mxu1 %v11029_v33  ;;  %5770 = vmatprep.subr.bf16.mxu0 %v11034_v34 }
 0x228   : > { %5811 = vmatprep.subr.bf16.mxu1 %v11037_v35 }
 0x22a   : > { %5771 = vmatpush1.bf16.msra.mxu0 %v11032_v36  ;;  %v11101_v36 = vld [vmem:[%s15266_s2 + $0x14a4] ss:$16 sps:$4 sm:$0xff]  }
 0x22b   : > { %5812 = vmatpush1.bf16.msra.mxu1 %v11035_v37  ;;  %5772 = vmatprep.subr.bf16.mxu0 %v11040_v39  ;;  %v11104_v37 = vld [vmem:[%s15266_s2 + $0x16a4] ss:$16 sps:$4 sm:$0xff]  }
 0x22c   : > { %5813 = vmatprep.subr.bf16.mxu1 %v11043_v42 }
 0x22e   : > { %5773 = vmatpush2.bf16.msra.mxu0 %v11038_v44 }
 0x22f   : > { %5814 = vmatpush2.bf16.msra.mxu1 %v11041_v45  ;;  %5774 = vmatprep.subr.bf16.mxu0 %v11046_v46  ;;  %v11099_v46 = vld [vmem:[%s15266_s2 + $0x14a0] ss:$16 sps:$4 sm:$0xff]  }
 0x230   : > { %5815 = vmatprep.subr.bf16.mxu1 %v11049_v28  ;;  %v11102_v28 = vld [vmem:[%s15266_s2 + $0x16a0] ss:$16 sps:$4 sm:$0xff]  }
 0x232   : > { %5775 = vmatpush2.bf16.msra.mxu0 %v11044_v29 }
 0x233   : > { %5816 = vmatpush2.bf16.msra.mxu1 %v11047_v12  ;;  %5776 = vmatprep.subr.bf16.mxu0 %v11052_v51  ;;  %v11107_v12 = vld [vmem:[%s15266_s2 + $0x1484] ss:$16 sps:$4 sm:$0xff]  }
 0x234   : > { %5817 = vmatprep.subr.bf16.mxu1 %v11055_v52  ;;  %v11110_v51 = vld [vmem:[%s15266_s2 + $0x1684] ss:$16 sps:$4 sm:$0xff]   ;;  %v11105_v52 = vld [vmem:[%s15266_s2 + $0x1480] ss:$16 sps:$4 sm:$0xff]  }
 0x236   : > { %5777 = vmatpush2.bf16.msra.mxu0 %v11050_v54  ;;  %v11108_v54 = vld [vmem:[%s15266_s2 + $0x1680] ss:$16 sps:$4 sm:$0xff]  }
 0x237   : > { %5818 = vmatpush2.bf16.msra.mxu1 %v11053_v19  ;;  %5778 = vmatprep.subr.bf16.mxu0 %v11058_v55  ;;  %v11113_v19 = vld [vmem:[%s15266_s2 + $0x1464] ss:$16 sps:$4 sm:$0xff]  }
 0x238   : > { %5819 = vmatprep.subr.bf16.mxu1 %v11061_v47  ;;  %v11116_v55 = vld [vmem:[%s15266_s2 + $0x1664] ss:$16 sps:$4 sm:$0xff]   ;;  %v11111_v47 = vld [vmem:[%s15266_s2 + $0x1460] ss:$16 sps:$4 sm:$0xff]  }
 0x23a   : > { %5779 = vmatpush2.bf16.msra.mxu0 %v11056_v48  ;;  %v11114_v48 = vld [vmem:[%s15266_s2 + $0x1660] ss:$16 sps:$4 sm:$0xff]  }
 0x23b   : > { %5820 = vmatpush2.bf16.msra.mxu1 %v11059_v22  ;;  %5780 = vmatprep.subr.bf16.mxu0 %v11064_v60  ;;  %v11119_v22 = vld [vmem:[%s15266_s2 + $0x1444] ss:$16 sps:$4 sm:$0xff]  }
 0x23c   : > { %5821 = vmatprep.subr.bf16.mxu1 %v11067_v59  ;;  %v11122_v60 = vld [vmem:[%s15266_s2 + $0x1644] ss:$16 sps:$4 sm:$0xff]   ;;  %v11117_v59 = vld [vmem:[%s15266_s2 + $0x1440] ss:$16 sps:$4 sm:$0xff]  }
 0x23e   : > { %5781 = vmatpush2.bf16.msra.mxu0 %v11062_v63  ;;  %v11120_v63 = vld [vmem:[%s15266_s2 + $0x1640] ss:$16 sps:$4 sm:$0xff]  }
 0x23f   : > { %5822 = vmatpush2.bf16.msra.mxu1 %v11065_v2  ;;  %5782 = vmatprep.subr.bf16.mxu0 %v11070_v3  ;;  %v11125_v2 = vld [vmem:[%s15266_s2 + $0x1424] ss:$16 sps:$4 sm:$0xff]  }
 0x240   : > { %5823 = vmatprep.subr.bf16.mxu1 %v11073_v4  ;;  %v11128_v3 = vld [vmem:[%s15266_s2 + $0x1624] ss:$16 sps:$4 sm:$0xff]   ;;  %v11123_v4 = vld [vmem:[%s15266_s2 + $0x1420] ss:$16 sps:$4 sm:$0xff]  }
 0x242   : > { %5783 = vmatpush2.bf16.msra.mxu0 %v11068_v5  ;;  %v11126_v5 = vld [vmem:[%s15266_s2 + $0x1620] ss:$16 sps:$4 sm:$0xff]  }
 0x243   : > { %5824 = vmatpush2.bf16.msra.mxu1 %v11071_v6  ;;  %5784 = vmatprep.subr.bf16.mxu0 %v11076_v7  ;;  %v11131_v6 = vld [vmem:[%s15266_s2 + $0x1404] ss:$16 sps:$4 sm:$0xff]  }
 0x244   : > { %5825 = vmatprep.subr.bf16.mxu1 %v11079_v8  ;;  %v11134_v7 = vld [vmem:[%s15266_s2 + $0x1604] ss:$16 sps:$4 sm:$0xff]   ;;  %v11129_v8 = vld [vmem:[%s15266_s2 + $0x1400] ss:$16 sps:$4 sm:$0xff]  }
 0x246   : > { %5785 = vmatpush2.bf16.msra.mxu0 %v11074_v41  ;;  %v11137_v41 = vld [vmem:[%s15266_s2 + $0x15e4] ss:$16 sps:$4 sm:$0xff]  }
 0x247   : > { %5826 = vmatpush2.bf16.msra.mxu1 %v11077_v57  ;;  %5786 = vmatprep.subr.bf16.mxu0 %v11082_v13  ;;  %v11140_v57 = vld [vmem:[%s15266_s2 + $0x17e4] ss:$16 sps:$4 sm:$0xff]   ;;  %v11135_v13 = vld [vmem:[%s15266_s2 + $0x15e0] ss:$16 sps:$4 sm:$0xff]  }
 0x248   : > { %5827 = vmatprep.subr.bf16.mxu1 %v11085_v10  ;;  %v11138_v10 = vld [vmem:[%s15266_s2 + $0x17e0] ss:$16 sps:$4 sm:$0xff]  }
 0x24a   : > { %5787 = vmatpush2.bf16.msra.mxu0 %v11080_v0  ;;  %v11146_v0 = vld [vmem:[%s15266_s2 + $0x17c4] ss:$16 sps:$4 sm:$0xff]  }
 0x24b   : > { %5828 = vmatpush2.bf16.msra.mxu1 %v11083_v15  ;;  %5838 = vmatprep.subr.bf16.mxu0 %v11089_v16  ;;  %v11141_v15 = vld [vmem:[%s15266_s2 + $0x15c0] ss:$16 sps:$4 sm:$0xff]  }
 0x24c   : > { %5879 = vmatprep.subr.bf16.mxu1 %v11092_v20  ;;  %v11144_v16 = vld [vmem:[%s15266_s2 + $0x17c0] ss:$16 sps:$4 sm:$0xff]   ;;  %v11149_v20 = vld [vmem:[%s15266_s2 + $0x15a4] ss:$16 sps:$4 sm:$0xff]  }
 0x24d   : > { %v3961_v31 = vpop.f32.mrf.mxu0  ;;  %5789 = vmatmul.mubr.bf16.vlgmr.msra.gmra.mxu0 %v13516_v56 }
 0x24e   : > { %v4002_v32 = vpop.f32.mrf.mxu1  ;;  %5830 = vmatmul.mubr.bf16.vlgmr.msra.gmra.mxu1 %v13519_v58  ;;  %v3962_v33 = vadd.f32 %v3961_v31, %v13550_v9  ;;  %5839 = vmatpush1.bf16.msra.mxu0 %v11087_v21  ;;  %v11152_v21 = vld [vmem:[%s15266_s2 + $0x17a4] ss:$16 sps:$4 sm:$0xff]   ;;  %v11156_v31 = vld [vmem:[%s15266_s2 + $0x1780] ss:$16 sps:$4 sm:$0xff]  }
 0x24f   : > { %5880 = vmatpush1.bf16.msra.mxu1 %v11090_v23  ;;  %v3963_v34 = vpop.f32.mrf.mxu0  ;;  %5840 = vmatprep.subr.bf16.mxu0 %v11095_v26  ;;  %v11147_v23 = vld [vmem:[%s15266_s2 + $0x15a0] ss:$16 sps:$4 sm:$0xff]  }
 0x250   : > { %v4004_v35 = vpop.f32.mrf.mxu1  ;;  %5881 = vmatprep.subr.bf16.mxu1 %v11098_v61  ;;  %v13767_v39 = vadd.f32 %v4002_v32, %v3962_v33  ;;  %v3964_v42 = vadd.f32 %v3963_v34, %v13561_v11  ;;  %5870 = vmatprep.mubr.bf16.mxu0 %v13752_v17  ;;  %v11150_v26 = vld [vmem:[%s15266_s2 + $0x17a0] ss:$16 sps:$4 sm:$0xff]   ;;  %v11155_v61 = vld [vmem:[%s15266_s2 + $0x1584] ss:$16 sps:$4 sm:$0xff]  }
 0x251   : > { %5911 = vmatprep.mubr.bf16.mxu1 %v13756_v18  ;;  %v3965_v9 = vpop.f32.mrf.mxu0  ;;  %v11161_v32 = vld [vmem:[%s15266_s2 + $0x1564] ss:$16 sps:$4 sm:$0xff]   ;;  %v11159_v34 = vld [vmem:[%s15266_s2 + $0x1560] ss:$16 sps:$4 sm:$0xff]  }
 0x252   : > { %v4006_v44 = vpop.f32.mrf.mxu1  ;;  %v13772_v45 = vadd.f32 %v4004_v35, %v3964_v42  ;;  %5841 = vmatpush1.bf16.msra.mxu0 %v11093_v62  ;;  %v11158_v62 = vld [vmem:[%s15266_s2 + $0x1784] ss:$16 sps:$4 sm:$0xff]   ;;  %v11162_v35 = vld [vmem:[%s15266_s2 + $0x1760] ss:$16 sps:$4 sm:$0xff]  }
 0x253   : > { %5882 = vmatpush1.bf16.msra.mxu1 %v11096_v30  ;;  %v3966_v29 = vpop.f32.mrf.mxu0  ;;  %5842 = vmatprep.subr.bf16.mxu0 %v11101_v36  ;;  %v11153_v30 = vld [vmem:[%s15266_s2 + $0x1580] ss:$16 sps:$4 sm:$0xff]   ;;  %v11164_v33 = vld [vmem:[%s15266_s2 + $0x1764] ss:$16 sps:$4 sm:$0xff]  }
 0x254   : > { %v4007_v11 = vpop.f32.mrf.mxu1  ;;  %5883 = vmatprep.subr.bf16.mxu1 %v11104_v37  ;;  %v11167_v36 = vld [vmem:[%s15266_s2 + $0x1544] ss:$16 sps:$4 sm:$0xff]   ;;  %v11165_v42 = vld [vmem:[%s15266_s2 + $0x1540] ss:$16 sps:$4 sm:$0xff]  }
 0x255   : > { %v11170_v37 = vld [vmem:[%s15266_s2 + $0x1744] ss:$16 sps:$4 sm:$0xff]   ;;  %v11168_v9 = vld [vmem:[%s15266_s2 + $0x1740] ss:$16 sps:$4 sm:$0xff]  }
 0x256   : > { %5843 = vmatpush1.bf16.msra.mxu0 %v11099_v46  ;;  %v11173_v44 = vld [vmem:[%s15266_s2 + $0x1524] ss:$16 sps:$4 sm:$0xff]   ;;  %v11174_v29 = vld [vmem:[%s15266_s2 + $0x1720] ss:$16 sps:$4 sm:$0xff]  }
 0x257   : > { %5884 = vmatpush1.bf16.msra.mxu1 %v11102_v28  ;;  %5844 = vmatprep.subr.bf16.mxu0 %v11107_v12  ;;  %v11176_v46 = vld [vmem:[%s15266_s2 + $0x1724] ss:$16 sps:$4 sm:$0xff]   ;;  %v11171_v28 = vld [vmem:[%s15266_s2 + $0x1520] ss:$16 sps:$4 sm:$0xff]  }
 0x258   : > { %5885 = vmatprep.subr.bf16.mxu1 %v11110_v51  ;;  %v11179_v11 = vld [vmem:[%s15266_s2 + $0x1504] ss:$16 sps:$4 sm:$0xff]   ;;  %v11177_v51 = vld [vmem:[%s15266_s2 + $0x1500] ss:$16 sps:$4 sm:$0xff]  }
 0x259   : > { %v11182_v12 = vld [vmem:[%s15266_s2 + $0x1704] ss:$16 sps:$4 sm:$0xff]  }
 0x25a   : > { %5845 = vmatpush1.bf16.msra.mxu0 %v11105_v52  ;;  %v11180_v52 = vld [vmem:[%s15266_s2 + $0x1700] ss:$16 sps:$4 sm:$0xff]  }
 0x25b   : > { %5886 = vmatpush1.bf16.msra.mxu1 %v11108_v54  ;;  %5846 = vmatprep.subr.bf16.mxu0 %v11113_v19  ;;  %v11186_v54 = vld [vmem:[%s15266_s2 + $0x10ec] ss:$16 sps:$4 sm:$0xff]  }
 0x25c   : > { %5887 = vmatprep.subr.bf16.mxu1 %v11116_v55  ;;  %v11189_v19 = vld [vmem:[%s15266_s2 + $0x12ec] ss:$16 sps:$4 sm:$0xff]   ;;  %v11184_v55 = vld [vmem:[%s15266_s2 + $0x10e8] ss:$16 sps:$4 sm:$0xff]  }
 0x25e   : > { %5847 = vmatpush1.bf16.msra.mxu0 %v11111_v47  ;;  %v11187_v47 = vld [vmem:[%s15266_s2 + $0x12e8] ss:$16 sps:$4 sm:$0xff]  }
 0x25f   : > { %5888 = vmatpush1.bf16.msra.mxu1 %v11114_v48  ;;  %5848 = vmatprep.subr.bf16.mxu0 %v11119_v22  ;;  %v11192_v48 = vld [vmem:[%s15266_s2 + $0x10cc] ss:$16 sps:$4 sm:$0xff]  }
 0x260   : > { %5889 = vmatprep.subr.bf16.mxu1 %v11122_v60  ;;  %v11195_v22 = vld [vmem:[%s15266_s2 + $0x12cc] ss:$16 sps:$4 sm:$0xff]  }
 0x262   : > { %5849 = vmatpush1.bf16.msra.mxu0 %v11117_v59 }
 0x263   : > { %5890 = vmatpush1.bf16.msra.mxu1 %v11120_v63  ;;  %5850 = vmatprep.subr.bf16.mxu0 %v11125_v2  ;;  %v11190_v2 = vld [vmem:[%s15266_s2 + $0x10c8] ss:$16 sps:$4 sm:$0xff]  }
 0x264   : > { %5891 = vmatprep.subr.bf16.mxu1 %v11128_v3  ;;  %v11193_v3 = vld [vmem:[%s15266_s2 + $0x12c8] ss:$16 sps:$4 sm:$0xff]  }
 0x266   : > { %5851 = vmatpush1.bf16.msra.mxu0 %v11123_v4 }
 0x267   : > { %5892 = vmatpush1.bf16.msra.mxu1 %v11126_v5  ;;  %5852 = vmatprep.subr.bf16.mxu0 %v11131_v6  ;;  %v11198_v6 = vld [vmem:[%s15266_s2 + $0x10ac] ss:$16 sps:$4 sm:$0xff]  }
 0x268   : > { %5893 = vmatprep.subr.bf16.mxu1 %v11134_v7 }
 0x26a   : > { %5853 = vmatpush1.bf16.msra.mxu0 %v11129_v8 }
 0x26b   : > { %5894 = vmatpush1.bf16.msra.mxu1 %v11132_v40  ;;  %5854 = vmatprep.subr.bf16.mxu0 %v11137_v41 }
 0x26c   : > { %5895 = vmatprep.subr.bf16.mxu1 %v11140_v57 }
 0x26e   : > { %5855 = vmatpush2.bf16.msra.mxu0 %v11135_v13  ;;  %v11196_v13 = vld [vmem:[%s15266_s2 + $0x10a8] ss:$16 sps:$4 sm:$0xff]  }
 0x26f   : > { %5896 = vmatpush2.bf16.msra.mxu1 %v11138_v10  ;;  %5856 = vmatprep.subr.bf16.mxu0 %v11143_v14  ;;  %v11199_v10 = vld [vmem:[%s15266_s2 + $0x12a8] ss:$16 sps:$4 sm:$0xff]  }
 0x270   : > { %5897 = vmatprep.subr.bf16.mxu1 %v11146_v0  ;;  %v11202_v0 = vld [vmem:[%s15266_s2 + $0x1088] ss:$16 sps:$4 sm:$0xff]  }
 0x272   : > { %5857 = vmatpush2.bf16.msra.mxu0 %v11141_v15  ;;  %v11205_v15 = vld [vmem:[%s15266_s2 + $0x1288] ss:$16 sps:$4 sm:$0xff]  }
 0x273   : > { %5898 = vmatpush2.bf16.msra.mxu1 %v11144_v16  ;;  %5858 = vmatprep.subr.bf16.mxu0 %v11149_v20  ;;  %v11210_v16 = vld [vmem:[%s15266_s2 + $0x106c] ss:$16 sps:$4 sm:$0xff]  }
 0x274   : > { %5899 = vmatprep.subr.bf16.mxu1 %v11152_v21  ;;  %v11213_v20 = vld [vmem:[%s15266_s2 + $0x126c] ss:$16 sps:$4 sm:$0xff]   ;;  %v11208_v21 = vld [vmem:[%s15266_s2 + $0x1068] ss:$16 sps:$4 sm:$0xff]  }
 0x276   : > { %5859 = vmatpush2.bf16.msra.mxu0 %v11147_v23  ;;  %v11211_v23 = vld [vmem:[%s15266_s2 + $0x1268] ss:$16 sps:$4 sm:$0xff]  }
 0x277   : > { %5900 = vmatpush2.bf16.msra.mxu1 %v11150_v26  ;;  %5860 = vmatprep.subr.bf16.mxu0 %v11155_v61  ;;  %v11216_v26 = vld [vmem:[%s15266_s2 + $0x104c] ss:$16 sps:$4 sm:$0xff]  }
 0x278   : > { %5901 = vmatprep.subr.bf16.mxu1 %v11158_v62  ;;  %v11219_v61 = vld [vmem:[%s15266_s2 + $0x124c] ss:$16 sps:$4 sm:$0xff]   ;;  %v11214_v62 = vld [vmem:[%s15266_s2 + $0x1048] ss:$16 sps:$4 sm:$0xff]  }
 0x27a   : > { %5861 = vmatpush2.bf16.msra.mxu0 %v11153_v30  ;;  %v11217_v30 = vld [vmem:[%s15266_s2 + $0x1248] ss:$16 sps:$4 sm:$0xff]  }
 0x27b   : > { %5902 = vmatpush2.bf16.msra.mxu1 %v11156_v31  ;;  %5862 = vmatprep.subr.bf16.mxu0 %v11161_v32  ;;  %v11222_v31 = vld [vmem:[%s15266_s2 + $0x102c] ss:$16 sps:$4 sm:$0xff]  }
 0x27c   : > { %5903 = vmatprep.subr.bf16.mxu1 %v11164_v33  ;;  %v11225_v32 = vld [vmem:[%s15266_s2 + $0x122c] ss:$16 sps:$4 sm:$0xff]   ;;  %v11220_v33 = vld [vmem:[%s15266_s2 + $0x1028] ss:$16 sps:$4 sm:$0xff]  }
 0x27e   : > { %5863 = vmatpush2.bf16.msra.mxu0 %v11159_v34  ;;  %v11223_v34 = vld [vmem:[%s15266_s2 + $0x1228] ss:$16 sps:$4 sm:$0xff]  }
 0x27f   : > { %5904 = vmatpush2.bf16.msra.mxu1 %v11162_v35  ;;  %5864 = vmatprep.subr.bf16.mxu0 %v11167_v36  ;;  %v11228_v35 = vld [vmem:[%s15266_s2 + $0x100c] ss:$16 sps:$4 sm:$0xff]  }
 0x280   : > { %5905 = vmatprep.subr.bf16.mxu1 %v11170_v37  ;;  %v11231_v36 = vld [vmem:[%s15266_s2 + $0x120c] ss:$16 sps:$4 sm:$0xff]   ;;  %v11226_v37 = vld [vmem:[%s15266_s2 + $0x1008] ss:$16 sps:$4 sm:$0xff]  }
 0x282   : > { %5865 = vmatpush2.bf16.msra.mxu0 %v11165_v42  ;;  %v11229_v42 = vld [vmem:[%s15266_s2 + $0x1208] ss:$16 sps:$4 sm:$0xff]  }
 0x283   : > { %5906 = vmatpush2.bf16.msra.mxu1 %v11168_v9  ;;  %5866 = vmatprep.subr.bf16.mxu0 %v11173_v44  ;;  %v11234_v9 = vld [vmem:[%s15266_s2 + $0x11ec] ss:$16 sps:$4 sm:$0xff]  }
 0x284   : > { %5907 = vmatprep.subr.bf16.mxu1 %v11176_v46  ;;  %v11237_v44 = vld [vmem:[%s15266_s2 + $0x13ec] ss:$16 sps:$4 sm:$0xff]   ;;  %v11232_v46 = vld [vmem:[%s15266_s2 + $0x11e8] ss:$16 sps:$4 sm:$0xff]  }
 0x286   : > { %5867 = vmatpush2.bf16.msra.mxu0 %v11171_v28  ;;  %v11235_v28 = vld [vmem:[%s15266_s2 + $0x13e8] ss:$16 sps:$4 sm:$0xff]  }
 0x287   : > { %5908 = vmatpush2.bf16.msra.mxu1 %v11174_v29  ;;  %5868 = vmatprep.subr.bf16.mxu0 %v11179_v11  ;;  %v11240_v29 = vld [vmem:[%s15266_s2 + $0x11cc] ss:$16 sps:$4 sm:$0xff]  }
 0x288   : > { %5909 = vmatprep.subr.bf16.mxu1 %v11182_v12  ;;  %v11243_v11 = vld [vmem:[%s15266_s2 + $0x13cc] ss:$16 sps:$4 sm:$0xff]   ;;  %v11238_v12 = vld [vmem:[%s15266_s2 + $0x11c8] ss:$16 sps:$4 sm:$0xff]  }
 0x28a   : > { %5869 = vmatpush2.bf16.msra.mxu0 %v11177_v51  ;;  %v11241_v51 = vld [vmem:[%s15266_s2 + $0x13c8] ss:$16 sps:$4 sm:$0xff]  }
 0x28b   : > { %5910 = vmatpush2.bf16.msra.mxu1 %v11180_v52  ;;  %5920 = vmatprep.subr.bf16.mxu0 %v11186_v54  ;;  %v11246_v52 = vld [vmem:[%s15266_s2 + $0x11ac] ss:$16 sps:$4 sm:$0xff]  }
 0x28c   : > { %5961 = vmatprep.subr.bf16.mxu1 %v11189_v19  ;;  %v11249_v54 = vld [vmem:[%s15266_s2 + $0x13ac] ss:$16 sps:$4 sm:$0xff]   ;;  %v11244_v19 = vld [vmem:[%s15266_s2 + $0x11a8] ss:$16 sps:$4 sm:$0xff]  }
 0x28d   : > { %v4043_v60 = vpop.f32.mrf.mxu0  ;;  %5871 = vmatmul.mubr.bf16.vlgmr.msra.gmra.mxu0 %v13733_v24 }
 0x28e   : > { %v4084_v59 = vpop.f32.mrf.mxu1  ;;  %5912 = vmatmul.mubr.bf16.vlgmr.msra.gmra.mxu1 %v13736_v25  ;;  %v4044_v63 = vadd.f32 %v4043_v60, %v13327_v50  ;;  %5921 = vmatpush1.bf16.msra.mxu0 %v11184_v55  ;;  %v11201_v50 = vld [vmem:[%s15266_s2 + $0x12ac] ss:$16 sps:$4 sm:$0xff]   ;;  %v11247_v55 = vld [vmem:[%s15266_s2 + $0x13a8] ss:$16 sps:$4 sm:$0xff]  }
 0x28f   : > { %5962 = vmatpush1.bf16.msra.mxu1 %v11187_v47  ;;  %v4045_v4 = vpop.f32.mrf.mxu0  ;;  %5922 = vmatprep.subr.bf16.mxu0 %v11192_v48  ;;  %v11252_v47 = vld [vmem:[%s15266_s2 + $0x118c] ss:$16 sps:$4 sm:$0xff]   ;;  %v11253_v60 = vld [vmem:[%s15266_s2 + $0x1388] ss:$16 sps:$4 sm:$0xff]  }
 0x290   : > { %v4086_v5 = vpop.f32.mrf.mxu1  ;;  %5963 = vmatprep.subr.bf16.mxu1 %v11195_v22  ;;  %v13969_v7 = vadd.f32 %v4084_v59, %v4044_v63  ;;  %v4046_v8 = vadd.f32 %v4045_v4, %v13338_v53  ;;  %5952 = vmatprep.mubr.bf16.mxu0 %v13535_v1  ;;  %v11204_v1 = vld [vmem:[%s15266_s2 + $0x108c] ss:$16 sps:$4 sm:$0xff]   ;;  %v11250_v22 = vld [vmem:[%s15266_s2 + $0x1188] ss:$16 sps:$4 sm:$0xff]  }
 0x291   : > { %5993 = vmatprep.mubr.bf16.mxu1 %v13539_v27  ;;  %v4047_v40 = vpop.f32.mrf.mxu0  ;;  %v11207_v27 = vld [vmem:[%s15266_s2 + $0x128c] ss:$16 sps:$4 sm:$0xff]  }
 0x292   : > { %v4088_v41 = vpop.f32.mrf.mxu1  ;;  %v13974_v57 = vadd.f32 %v4086_v5, %v4046_v8  ;;  %5923 = vmatpush1.bf16.msra.mxu0 %v11190_v2  ;;  %v11255_v48 = vld [vmem:[%s15266_s2 + $0x138c] ss:$16 sps:$4 sm:$0xff]   ;;  %v11256_v2 = vld [vmem:[%s15266_s2 + $0x1168] ss:$16 sps:$4 sm:$0xff]  }
 0x293   : > { %5964 = vmatpush1.bf16.msra.mxu1 %v11193_v3  ;;  %v4048_v14 = vpop.f32.mrf.mxu0  ;;  %5924 = vmatprep.subr.bf16.mxu0 %v11198_v6  ;;  %v11258_v59 = vld [vmem:[%s15266_s2 + $0x116c] ss:$16 sps:$4 sm:$0xff]   ;;  %v11259_v3 = vld [vmem:[%s15266_s2 + $0x1368] ss:$16 sps:$4 sm:$0xff]  }
 0x294   : > { %v4089_v53 = vpop.f32.mrf.mxu1  ;;  %5965 = vmatprep.subr.bf16.mxu1 %v11201_v50  ;;  %v11261_v63 = vld [vmem:[%s15266_s2 + $0x136c] ss:$16 sps:$4 sm:$0xff]   ;;  %v11262_v6 = vld [vmem:[%s15266_s2 + $0x1148] ss:$16 sps:$4 sm:$0xff]  }
 0x295   : > { %v11264_v4 = vld [vmem:[%s15266_s2 + $0x114c] ss:$16 sps:$4 sm:$0xff]   ;;  %v11265_v50 = vld [vmem:[%s15266_s2 + $0x1348] ss:$16 sps:$4 sm:$0xff]  }
 0x296   : > { %5925 = vmatpush1.bf16.msra.mxu0 %v11196_v13  ;;  %v11267_v5 = vld [vmem:[%s15266_s2 + $0x134c] ss:$16 sps:$4 sm:$0xff]   ;;  %v11268_v41 = vld [vmem:[%s15266_s2 + $0x1128] ss:$16 sps:$4 sm:$0xff]  }
 0x297   : > { %5966 = vmatpush1.bf16.msra.mxu1 %v11199_v10  ;;  %5926 = vmatprep.subr.bf16.mxu0 %v11204_v1  ;;  %v11270_v8 = vld [vmem:[%s15266_s2 + $0x112c] ss:$16 sps:$4 sm:$0xff]   ;;  %v11271_v13 = vld [vmem:[%s15266_s2 + $0x1328] ss:$16 sps:$4 sm:$0xff]  }
 0x298   : > { %5967 = vmatprep.subr.bf16.mxu1 %v11207_v27  ;;  %v11273_v40 = vld [vmem:[%s15266_s2 + $0x132c] ss:$16 sps:$4 sm:$0xff]   ;;  %v11274_v53 = vld [vmem:[%s15266_s2 + $0x1108] ss:$16 sps:$4 sm:$0xff]  }
 0x299   : > { %v11276_v10 = vld [vmem:[%s15266_s2 + $0x110c] ss:$16 sps:$4 sm:$0xff]   ;;  %v11277_v1 = vld [vmem:[%s15266_s2 + $0x1308] ss:$16 sps:$4 sm:$0xff]  }
 0x29a   : > { %5927 = vmatpush1.bf16.msra.mxu0 %v11202_v0  ;;  %v11279_v14 = vld [vmem:[%s15266_s2 + $0x130c] ss:$16 sps:$4 sm:$0xff]  }
 0x29b   : > { %5968 = vmatpush1.bf16.msra.mxu1 %v11205_v15  ;;  %5928 = vmatprep.subr.bf16.mxu0 %v11210_v16  ;;  %v11282_v27 = vld [vmem:[%s15266_s2 + $0x14ec] ss:$16 sps:$4 sm:$0xff]   ;;  %v11280_v15 = vld [vmem:[%s15266_s2 + $0x14e8] ss:$16 sps:$4 sm:$0xff]  }
 0x29c   : > { %5969 = vmatprep.subr.bf16.mxu1 %v11213_v20  ;;  %v11285_v0 = vld [vmem:[%s15266_s2 + $0x16ec] ss:$16 sps:$4 sm:$0xff]   ;;  %v11283_v16 = vld [vmem:[%s15266_s2 + $0x16e8] ss:$16 sps:$4 sm:$0xff]  }
 0x29d   : > { %v11288_v20 = vld [vmem:[%s15266_s2 + $0x14cc] ss:$16 sps:$4 sm:$0xff]  }
 0x29e   : > { %5929 = vmatpush1.bf16.msra.mxu0 %v11208_v21  ;;  %v11291_v21 = vld [vmem:[%s15266_s2 + $0x16cc] ss:$16 sps:$4 sm:$0xff]  }
 0x29f   : > { %5970 = vmatpush1.bf16.msra.mxu1 %v11211_v23  ;;  %5930 = vmatprep.subr.bf16.mxu0 %v11216_v26 }
 0x2a0   : > { %5971 = vmatprep.subr.bf16.mxu1 %v11219_v61 }
 0x2a2   : > { %5931 = vmatpush1.bf16.msra.mxu0 %v11214_v62  ;;  %v11286_v62 = vld [vmem:[%s15266_s2 + $0x14c8] ss:$16 sps:$4 sm:$0xff]  }
 0x2a3   : > { %5972 = vmatpush1.bf16.msra.mxu1 %v11217_v30  ;;  %5932 = vmatprep.subr.bf16.mxu0 %v11222_v31  ;;  %v11289_v30 = vld [vmem:[%s15266_s2 + $0x16c8] ss:$16 sps:$4 sm:$0xff]  }
 0x2a4   : > { %5973 = vmatprep.subr.bf16.mxu1 %v11225_v32 }
 0x2a6   : > { %5933 = vmatpush1.bf16.msra.mxu0 %v11220_v33 }
 0x2a7   : > { %5974 = vmatpush1.bf16.msra.mxu1 %v11223_v34  ;;  %5934 = vmatprep.subr.bf16.mxu0 %v11228_v35 }
 0x2a8   : > { %5975 = vmatprep.subr.bf16.mxu1 %v11231_v36 }
 0x2aa   : > { %5935 = vmatpush1.bf16.msra.mxu0 %v11226_v37  ;;  %v11292_v37 = vld [vmem:[%s15266_s2 + $0x14a8] ss:$16 sps:$4 sm:$0xff]  }
 0x2ab   : > { %5976 = vmatpush1.bf16.msra.mxu1 %v11229_v42  ;;  %5936 = vmatprep.subr.bf16.mxu0 %v11234_v9  ;;  %v11295_v42 = vld [vmem:[%s15266_s2 + $0x16a8] ss:$16 sps:$4 sm:$0xff]  }
 0x2ac   : > { %5977 = vmatprep.subr.bf16.mxu1 %v11237_v44  ;;  %v11298_v44 = vld [vmem:[%s15266_s2 + $0x1488] ss:$16 sps:$4 sm:$0xff]  }
 0x2ae   : > { %5937 = vmatpush2.bf16.msra.mxu0 %v11232_v46  ;;  %v11301_v46 = vld [vmem:[%s15266_s2 + $0x1688] ss:$16 sps:$4 sm:$0xff]  }
 0x2af   : > { %5978 = vmatpush2.bf16.msra.mxu1 %v11235_v28  ;;  %5938 = vmatprep.subr.bf16.mxu0 %v11240_v29  ;;  %v11306_v28 = vld [vmem:[%s15266_s2 + $0x146c] ss:$16 sps:$4 sm:$0xff]  }
 0x2b0   : > { %5979 = vmatprep.subr.bf16.mxu1 %v11243_v11  ;;  %v11309_v29 = vld [vmem:[%s15266_s2 + $0x166c] ss:$16 sps:$4 sm:$0xff]   ;;  %v11304_v11 = vld [vmem:[%s15266_s2 + $0x1468] ss:$16 sps:$4 sm:$0xff]  }
 0x2b2   : > { %5939 = vmatpush2.bf16.msra.mxu0 %v11238_v12  ;;  %v11307_v12 = vld [vmem:[%s15266_s2 + $0x1668] ss:$16 sps:$4 sm:$0xff]  }
 0x2b3   : > { %5980 = vmatpush2.bf16.msra.mxu1 %v11241_v51  ;;  %5940 = vmatprep.subr.bf16.mxu0 %v11246_v52  ;;  %v11312_v51 = vld [vmem:[%s15266_s2 + $0x144c] ss:$16 sps:$4 sm:$0xff]  }
 0x2b4   : > { %5981 = vmatprep.subr.bf16.mxu1 %v11249_v54  ;;  %v11315_v52 = vld [vmem:[%s15266_s2 + $0x164c] ss:$16 sps:$4 sm:$0xff]   ;;  %v11310_v54 = vld [vmem:[%s15266_s2 + $0x1448] ss:$16 sps:$4 sm:$0xff]  }
 0x2b6   : > { %5941 = vmatpush2.bf16.msra.mxu0 %v11244_v19  ;;  %v11313_v19 = vld [vmem:[%s15266_s2 + $0x1648] ss:$16 sps:$4 sm:$0xff]  }
 0x2b7   : > { %5982 = vmatpush2.bf16.msra.mxu1 %v11247_v55  ;;  %5942 = vmatprep.subr.bf16.mxu0 %v11252_v47  ;;  %v11318_v55 = vld [vmem:[%s15266_s2 + $0x142c] ss:$16 sps:$4 sm:$0xff]  }
 0x2b8   : > { %5983 = vmatprep.subr.bf16.mxu1 %v11255_v48  ;;  %v11321_v47 = vld [vmem:[%s15266_s2 + $0x162c] ss:$16 sps:$4 sm:$0xff]   ;;  %v11316_v48 = vld [vmem:[%s15266_s2 + $0x1428] ss:$16 sps:$4 sm:$0xff]  }
 0x2ba   : > { %5943 = vmatpush2.bf16.msra.mxu0 %v11250_v22  ;;  %v11319_v22 = vld [vmem:[%s15266_s2 + $0x1628] ss:$16 sps:$4 sm:$0xff]  }
 0x2bb   : > { %5984 = vmatpush2.bf16.msra.mxu1 %v11253_v60  ;;  %5944 = vmatprep.subr.bf16.mxu0 %v11258_v59  ;;  %v11324_v60 = vld [vmem:[%s15266_s2 + $0x140c] ss:$16 sps:$4 sm:$0xff]  }
 0x2bc   : > { %5985 = vmatprep.subr.bf16.mxu1 %v11261_v63  ;;  %v11327_v59 = vld [vmem:[%s15266_s2 + $0x160c] ss:$16 sps:$4 sm:$0xff]   ;;  %v11322_v63 = vld [vmem:[%s15266_s2 + $0x1408] ss:$16 sps:$4 sm:$0xff]  }
 0x2be   : > { %5945 = vmatpush2.bf16.msra.mxu0 %v11256_v2  ;;  %v11325_v2 = vld [vmem:[%s15266_s2 + $0x1608] ss:$16 sps:$4 sm:$0xff]  }
 0x2bf   : > { %5986 = vmatpush2.bf16.msra.mxu1 %v11259_v3  ;;  %5946 = vmatprep.subr.bf16.mxu0 %v11264_v4  ;;  %v11330_v3 = vld [vmem:[%s15266_s2 + $0x15ec] ss:$16 sps:$4 sm:$0xff]  }
 0x2c0   : > { %5987 = vmatprep.subr.bf16.mxu1 %v11267_v5  ;;  %v11333_v4 = vld [vmem:[%s15266_s2 + $0x17ec] ss:$16 sps:$4 sm:$0xff]   ;;  %v11328_v5 = vld [vmem:[%s15266_s2 + $0x15e8] ss:$16 sps:$4 sm:$0xff]  }
 0x2c2   : > { %5947 = vmatpush2.bf16.msra.mxu0 %v11262_v6  ;;  %v11331_v6 = vld [vmem:[%s15266_s2 + $0x17e8] ss:$16 sps:$4 sm:$0xff]  }
 0x2c3   : > { %5988 = vmatpush2.bf16.msra.mxu1 %v11265_v50  ;;  %5948 = vmatprep.subr.bf16.mxu0 %v11270_v8  ;;  %v11336_v50 = vld [vmem:[%s15266_s2 + $0x15cc] ss:$16 sps:$4 sm:$0xff]  }
 0x2c4   : > { %5989 = vmatprep.subr.bf16.mxu1 %v11273_v40  ;;  %v11339_v8 = vld [vmem:[%s15266_s2 + $0x17cc] ss:$16 sps:$4 sm:$0xff]   ;;  %v11334_v40 = vld [vmem:[%s15266_s2 + $0x15c8] ss:$16 sps:$4 sm:$0xff]  }
 0x2c6   : > { %5949 = vmatpush2.bf16.msra.mxu0 %v11268_v41  ;;  %v11337_v41 = vld [vmem:[%s15266_s2 + $0x17c8] ss:$16 sps:$4 sm:$0xff]  }
 0x2c7   : > { %5990 = vmatpush2.bf16.msra.mxu1 %v11271_v13  ;;  %5950 = vmatprep.subr.bf16.mxu0 %v11276_v10  ;;  %v11342_v13 = vld [vmem:[%s15266_s2 + $0x15ac] ss:$16 sps:$4 sm:$0xff]  }
 0x2c8   : > { %5991 = vmatprep.subr.bf16.mxu1 %v11279_v14  ;;  %v11345_v10 = vld [vmem:[%s15266_s2 + $0x17ac] ss:$16 sps:$4 sm:$0xff]   ;;  %v11340_v14 = vld [vmem:[%s15266_s2 + $0x15a8] ss:$16 sps:$4 sm:$0xff]  }
 0x2ca   : > { %5951 = vmatpush2.bf16.msra.mxu0 %v11274_v53  ;;  %v11343_v53 = vld [vmem:[%s15266_s2 + $0x17a8] ss:$16 sps:$4 sm:$0xff]  }
 0x2cb   : > { %5992 = vmatpush2.bf16.msra.mxu1 %v11277_v1  ;;  %6002 = vmatprep.subr.bf16.mxu0 %v11282_v27  ;;  %v11348_v1 = vld [vmem:[%s15266_s2 + $0x158c] ss:$16 sps:$4 sm:$0xff]  }
 0x2cc   : > { %6043 = vmatprep.subr.bf16.mxu1 %v11285_v0  ;;  %v11351_v27 = vld [vmem:[%s15266_s2 + $0x178c] ss:$16 sps:$4 sm:$0xff]   ;;  %v6088_v0 = vld [vmem:[%s13473_s23] sm:$0xff] }
 0x2cd   : > { %v4125_v23 = vpop.f32.mrf.mxu0  ;;  %5953 = vmatmul.mubr.bf16.vlgmr.msra.gmra.mxu0 %v13516_v56  ;;  %v11294_v56 = vld [vmem:[%s15266_s2 + $0x14ac] ss:$16 sps:$4 sm:$0xff]  }
 0x2ce   : > { %v4166_v26 = vpop.f32.mrf.mxu1  ;;  %5994 = vmatmul.mubr.bf16.vlgmr.msra.gmra.mxu1 %v13519_v58  ;;  %v4126_v61 = vadd.f32 %v4125_v23, %v13969_v7  ;;  %6003 = vmatpush1.bf16.msra.mxu0 %v11280_v15  ;;  %v11297_v58 = vld [vmem:[%s15266_s2 + $0x16ac] ss:$16 sps:$4 sm:$0xff]   ;;  %v11346_v15 = vld [vmem:[%s15266_s2 + $0x1588] ss:$16 sps:$4 sm:$0xff]   ;;  %v6349_v23 = vcombine.high %v6088_v0, %v6088_v0 }
 0x2cf   : > { %6044 = vmatpush1.bf16.msra.mxu1 %v11283_v16  ;;  %v4127_v31 = vpop.f32.mrf.mxu0  ;;  %6004 = vmatprep.subr.bf16.mxu0 %v11288_v20  ;;  %v11349_v16 = vld [vmem:[%s15266_s2 + $0x1788] ss:$16 sps:$4 sm:$0xff]   ;;  %v11354_v20 = vld [vmem:[%s15266_s2 + $0x156c] ss:$16 sps:$4 sm:$0xff]  }
 0x2d0   : > { %v4168_v32 = vpop.f32.mrf.mxu1  ;;  %6045 = vmatprep.subr.bf16.mxu1 %v11291_v21  ;;  %v14171_v7 = vadd.f32 %v4166_v26, %v4126_v61  ;;  %v4128_v33 = vadd.f32 %v4127_v31, %v13974_v57  ;;  %6034 = vmatprep.mubr.bf16.mxu0 %v13752_v17  ;;  %v11300_v17 = vld [vmem:[%s15266_s2 + $0x148c] ss:$16 sps:$4 sm:$0xff]   ;;  %v11352_v26 = vld [vmem:[%s15266_s2 + $0x1568] ss:$16 sps:$4 sm:$0xff]   ;;  %v14312_v31 = vrot.slane %v6088_v0, %v11976_v49  ;;  %v11397_v0 = vld [vmem:[%s15266_s2 + $0x1a80] ss:$16 sps:$4 sm:$0xff]  }
 0x2d1   : > { %6075 = vmatprep.mubr.bf16.mxu1 %v13756_v18  ;;  %v4129_v34 = vpop.f32.mrf.mxu0  ;;  %v11303_v18 = vld [vmem:[%s15266_s2 + $0x168c] ss:$16 sps:$4 sm:$0xff]   ;;  %v11355_v61 = vld [vmem:[%s15266_s2 + $0x1768] ss:$16 sps:$4 sm:$0xff]  }
 0x2d2   : > { %v4170_v35 = vpop.f32.mrf.mxu1  ;;  %v14176_v36 = vadd.f32 %v4168_v32, %v4128_v33  ;;  %6005 = vmatpush1.bf16.msra.mxu0 %v11286_v62  ;;  %v11357_v21 = vld [vmem:[%s15266_s2 + $0x176c] ss:$16 sps:$4 sm:$0xff]   ;;  %v14315_v32 = vrot.slane %v6349_v23, %v11976_v49  ;;  %v11408_v23 = vld [vmem:[%s15266_s2 + $0x1844] ss:$16 sps:$4 sm:$0xff]  }
 0x2d3   : > { %6046 = vmatpush1.bf16.msra.mxu1 %v11289_v30  ;;  %v4130_v9 = vpop.f32.mrf.mxu0  ;;  %6006 = vmatprep.subr.bf16.mxu0 %v11294_v56  ;;  %v11360_v62 = vld [vmem:[%s15266_s2 + $0x154c] ss:$16 sps:$4 sm:$0xff]   ;;  %v11358_v56 = vld [vmem:[%s15266_s2 + $0x1548] ss:$16 sps:$4 sm:$0xff]   ;;  %v6364_v35 = vcombine.high %v14312_v31, %v14312_v31 }
 0x2d4   : > { %v4171_v57 = vpop.f32.mrf.mxu1  ;;  %6047 = vmatprep.subr.bf16.mxu1 %v11297_v58  ;;  %v11363_v30 = vld [vmem:[%s15266_s2 + $0x174c] ss:$16 sps:$4 sm:$0xff]   ;;  %v11361_v58 = vld [vmem:[%s15266_s2 + $0x1748] ss:$16 sps:$4 sm:$0xff]  }
 0x2d5   : > { %v11366_v33 = vld [vmem:[%s15266_s2 + $0x152c] ss:$16 sps:$4 sm:$0xff]   ;;  %v11367_v9 = vld [vmem:[%s15266_s2 + $0x1728] ss:$16 sps:$4 sm:$0xff]  }
 0x2d6   : > { %6007 = vmatpush1.bf16.msra.mxu0 %v11292_v37  ;;  %v11369_v34 = vld [vmem:[%s15266_s2 + $0x172c] ss:$16 sps:$4 sm:$0xff]   ;;  %v6365_v37 = vcombine.high %v14315_v32, %v14315_v32 }
 0x2d7   : > { %6048 = vmatpush1.bf16.msra.mxu1 %v11295_v42  ;;  %6008 = vmatprep.subr.bf16.mxu0 %v11300_v17  ;;  %v11364_v42 = vld [vmem:[%s15266_s2 + $0x1528] ss:$16 sps:$4 sm:$0xff]   ;;  %v11372_v57 = vld [vmem:[%s15266_s2 + $0x150c] ss:$16 sps:$4 sm:$0xff]  }
 0x2d8   : > { %6049 = vmatprep.subr.bf16.mxu1 %v11303_v18  ;;  %v11375_v17 = vld [vmem:[%s15266_s2 + $0x170c] ss:$16 sps:$4 sm:$0xff]   ;;  %v6393_v18 = vshll.u32 %v6364_v35, 16 }
 0x2da   : > { %6009 = vmatpush1.bf16.msra.mxu0 %v11298_v44  ;;  %v6407_v44 = vshll.u32 %v6365_v37, 16 }
 0x2db   : > { %6050 = vmatpush1.bf16.msra.mxu1 %v11301_v46  ;;  %6010 = vmatprep.subr.bf16.mxu0 %v11306_v28  ;;  %v11370_v46 = vld [vmem:[%s15266_s2 + $0x1508] ss:$16 sps:$4 sm:$0xff]  }
 0x2dc   : > { %6051 = vmatprep.subr.bf16.mxu1 %v11309_v29  ;;  %v11373_v28 = vld [vmem:[%s15266_s2 + $0x1708] ss:$16 sps:$4 sm:$0xff]   ;;  %v11378_v29 = vld [vmem:[%s15266_s2 + $0x18e4] ss:$16 sps:$4 sm:$0xff]  }
 0x2de   : > { %6011 = vmatpush1.bf16.msra.mxu0 %v11304_v11  ;;  %v11381_v11 = vld [vmem:[%s15266_s2 + $0x1ae4] ss:$16 sps:$4 sm:$0xff]  }
 0x2df   : > { %6052 = vmatpush1.bf16.msra.mxu1 %v11307_v12  ;;  %6012 = vmatprep.subr.bf16.mxu0 %v11312_v51  ;;  %v6391_v12 = vshrl.u32 %v6364_v35, 16  ;;  %v6395_v51 = vrot.slane %v6393_v18, 1  ;;  %v11423_v35 = vld [vmem:[%s15266_s2 + $0x1a04] ss:$16 sps:$4 sm:$0xff]   ;;  %v11427_v18 = vld [vmem:[%s15266_s2 + $0x1be0] ss:$16 sps:$4 sm:$0xff]  }
 0x2e0   : > { %6053 = vmatprep.subr.bf16.mxu1 %v11315_v52  ;;  %v6405_v52 = vshrl.u32 %v6365_v37, 16  ;;  %v11418_v37 = vld [vmem:[%s15266_s2 + $0x1800] ss:$16 sps:$4 sm:$0xff]  }
 0x2e2   : > { %6013 = vmatpush1.bf16.msra.mxu0 %v11310_v54  ;;  %v6409_v54 = vrot.slane %v6407_v44, 1  ;;  %v11432_v44 = vld [vmem:[%s15266_s2 + $0x19c4] ss:$16 sps:$4 sm:$0xff]  }
 0x2e3   : > { %6054 = vmatpush1.bf16.msra.mxu1 %v11313_v19  ;;  %6014 = vmatprep.subr.bf16.mxu0 %v11318_v55  ;;  %v11376_v19 = vld [vmem:[%s15266_s2 + $0x18e0] ss:$16 sps:$4 sm:$0xff]  }
 0x2e4   : > { %6055 = vmatprep.subr.bf16.mxu1 %v11321_v47  ;;  %v11379_v55 = vld [vmem:[%s15266_s2 + $0x1ae0] ss:$16 sps:$4 sm:$0xff]   ;;  %v11384_v47 = vld [vmem:[%s15266_s2 + $0x18c4] ss:$16 sps:$4 sm:$0xff]  }
 0x2e6   : > { %6015 = vmatpush1.bf16.msra.mxu0 %v11316_v48  ;;  %v11387_v48 = vld [vmem:[%s15266_s2 + $0x1ac4] ss:$16 sps:$4 sm:$0xff]  }
 0x2e7   : > { %6056 = vmatpush1.bf16.msra.mxu1 %v11319_v22  ;;  %6016 = vmatprep.subr.bf16.mxu0 %v11324_v60  ;;  %v14369_v22 = vor.u32 %v6395_v51, %v6391_v12  ;;  %v14371_v60 = vor.u32 %v6409_v54, %v6405_v52  ;;  %v11441_v12 = vld [vmem:[%s15266_s2 + $0x1ba4] ss:$16 sps:$4 sm:$0xff]   ;;  %v11436_v51 = vld [vmem:[%s15266_s2 + $0x19a0] ss:$16 sps:$4 sm:$0xff]  }
 0x2e8   : > { %6057 = vmatprep.subr.bf16.mxu1 %v11327_v59  ;;  %v11439_v52 = vld [vmem:[%s15266_s2 + $0x1ba0] ss:$16 sps:$4 sm:$0xff]   ;;  %v11444_v54 = vld [vmem:[%s15266_s2 + $0x1984] ss:$16 sps:$4 sm:$0xff]  }
 0x2ea   : > { %6017 = vmatpush1.bf16.msra.mxu0 %v11322_v63 }
 0x2eb   : > { %6058 = vmatpush1.bf16.msra.mxu1 %v11325_v2  ;;  %6018 = vmatprep.subr.bf16.mxu0 %v11330_v3  ;;  %v11382_v3 = vld [vmem:[%s15266_s2 + $0x18c0] ss:$16 sps:$4 sm:$0xff]  }
 0x2ec   : > { %6059 = vmatprep.subr.bf16.mxu1 %v11333_v4  ;;  %v11385_v4 = vld [vmem:[%s15266_s2 + $0x1ac0] ss:$16 sps:$4 sm:$0xff]  }
 0x2ee   : > { %6019 = vmatpush2.bf16.msra.mxu0 %v11328_v5 }
 0x2ef   : > { %6060 = vmatpush2.bf16.msra.mxu1 %v11331_v6  ;;  %6020 = vmatprep.subr.bf16.mxu0 %v11336_v50 }
 0x2f0   : > { %6061 = vmatprep.subr.bf16.mxu1 %v11339_v8 }
 0x2f2   : > { %6021 = vmatpush2.bf16.msra.mxu0 %v11334_v40 }
 0x2f3   : > { %6062 = vmatpush2.bf16.msra.mxu1 %v11337_v41  ;;  %6022 = vmatprep.subr.bf16.mxu0 %v11342_v13  ;;  %v11388_v41 = vld [vmem:[%s15266_s2 + $0x18a0] ss:$16 sps:$4 sm:$0xff]  }
 0x2f4   : > { %6063 = vmatprep.subr.bf16.mxu1 %v11345_v10  ;;  %v11391_v13 = vld [vmem:[%s15266_s2 + $0x1aa0] ss:$16 sps:$4 sm:$0xff]  }
 0x2f6   : > { %6023 = vmatpush2.bf16.msra.mxu0 %v11340_v14 }
 0x2f7   : > { %6064 = vmatpush2.bf16.msra.mxu1 %v11343_v53  ;;  %6024 = vmatprep.subr.bf16.mxu0 %v11348_v1  ;;  %v11396_v53 = vld [vmem:[%s15266_s2 + $0x1884] ss:$16 sps:$4 sm:$0xff]  }
 0x2f8   : > { %6065 = vmatprep.subr.bf16.mxu1 %v11351_v27  ;;  %v11399_v1 = vld [vmem:[%s15266_s2 + $0x1a84] ss:$16 sps:$4 sm:$0xff]   ;;  %v11394_v27 = vld [vmem:[%s15266_s2 + $0x1880] ss:$16 sps:$4 sm:$0xff]  }
 0x2fa   : > { %6025 = vmatpush2.bf16.msra.mxu0 %v11346_v15  ;;  %v11402_v15 = vld [vmem:[%s15266_s2 + $0x1864] ss:$16 sps:$4 sm:$0xff]  }
 0x2fb   : > { %6066 = vmatpush2.bf16.msra.mxu1 %v11349_v16  ;;  %6026 = vmatprep.subr.bf16.mxu0 %v11354_v20  ;;  %v11405_v16 = vld [vmem:[%s15266_s2 + $0x1a64] ss:$16 sps:$4 sm:$0xff]   ;;  %v11400_v20 = vld [vmem:[%s15266_s2 + $0x1860] ss:$16 sps:$4 sm:$0xff]  }
 0x2fc   : > { %6067 = vmatprep.subr.bf16.mxu1 %v11357_v21  ;;  %v11403_v21 = vld [vmem:[%s15266_s2 + $0x1a60] ss:$16 sps:$4 sm:$0xff]  }
 0x2fe   : > { %6027 = vmatpush2.bf16.msra.mxu0 %v11352_v26  ;;  %v11411_v26 = vld [vmem:[%s15266_s2 + $0x1a44] ss:$16 sps:$4 sm:$0xff]  }
 0x2ff   : > { %6068 = vmatpush2.bf16.msra.mxu1 %v11355_v61  ;;  %6028 = vmatprep.subr.bf16.mxu0 %v11360_v62  ;;  %v11406_v61 = vld [vmem:[%s15266_s2 + $0x1840] ss:$16 sps:$4 sm:$0xff]  }
 0x300   : > { %6069 = vmatprep.subr.bf16.mxu1 %v11363_v30  ;;  %v11409_v62 = vld [vmem:[%s15266_s2 + $0x1a40] ss:$16 sps:$4 sm:$0xff]   ;;  %v11414_v30 = vld [vmem:[%s15266_s2 + $0x1824] ss:$16 sps:$4 sm:$0xff]  }
 0x302   : > { %6029 = vmatpush2.bf16.msra.mxu0 %v11358_v56  ;;  %v11417_v56 = vld [vmem:[%s15266_s2 + $0x1a24] ss:$16 sps:$4 sm:$0xff]  }
 0x303   : > { %6070 = vmatpush2.bf16.msra.mxu1 %v11361_v58  ;;  %6030 = vmatprep.subr.bf16.mxu0 %v11366_v33  ;;  %v11412_v58 = vld [vmem:[%s15266_s2 + $0x1820] ss:$16 sps:$4 sm:$0xff]  }
 0x304   : > { %6071 = vmatprep.subr.bf16.mxu1 %v11369_v34  ;;  %v11415_v33 = vld [vmem:[%s15266_s2 + $0x1a20] ss:$16 sps:$4 sm:$0xff]   ;;  %v11420_v34 = vld [vmem:[%s15266_s2 + $0x1804] ss:$16 sps:$4 sm:$0xff]  }
 0x306   : > { %6031 = vmatpush2.bf16.msra.mxu0 %v11364_v42  ;;  %v11421_v42 = vld [vmem:[%s15266_s2 + $0x1a00] ss:$16 sps:$4 sm:$0xff]  }
 0x307   : > { %6072 = vmatpush2.bf16.msra.mxu1 %v11367_v9  ;;  %6032 = vmatprep.subr.bf16.mxu0 %v11372_v57  ;;  %v11426_v9 = vld [vmem:[%s15266_s2 + $0x19e4] ss:$16 sps:$4 sm:$0xff]  }
 0x308   : > { %6073 = vmatprep.subr.bf16.mxu1 %v11375_v17  ;;  %v11429_v57 = vld [vmem:[%s15266_s2 + $0x1be4] ss:$16 sps:$4 sm:$0xff]   ;;  %v11424_v17 = vld [vmem:[%s15266_s2 + $0x19e0] ss:$16 sps:$4 sm:$0xff]  }
 0x30a   : > { %6033 = vmatpush2.bf16.msra.mxu0 %v11370_v46  ;;  %v11435_v46 = vld [vmem:[%s15266_s2 + $0x1bc4] ss:$16 sps:$4 sm:$0xff]  }
 0x30b   : > { %6074 = vmatpush2.bf16.msra.mxu1 %v11373_v28  ;;  %7727 = vmatprep.subr.bf16.mxu0 %v11378_v29  ;;  %v11430_v28 = vld [vmem:[%s15266_s2 + $0x19c0] ss:$16 sps:$4 sm:$0xff]  }
 0x30c   : > { %7768 = vmatprep.subr.bf16.mxu1 %v11381_v11  ;;  %v11433_v29 = vld [vmem:[%s15266_s2 + $0x1bc0] ss:$16 sps:$4 sm:$0xff]   ;;  %v11438_v11 = vld [vmem:[%s15266_s2 + $0x19a4] ss:$16 sps:$4 sm:$0xff]  }
 0x30d   : > { %v5790_v59 = vpop.f32.mrf.mxu0  ;;  %6035 = vmatmul.mubr.bf16.vlgmr.msra.gmra.mxu0 %v13733_v24  ;;  %v11390_v24 = vld [vmem:[%s15266_s2 + $0x18a4] ss:$16 sps:$4 sm:$0xff]  }
 0x30e   : > { %v5831_v63 = vpop.f32.mrf.mxu1  ;;  %6076 = vmatmul.mubr.bf16.vlgmr.msra.gmra.mxu1 %v13736_v25  ;;  %7728 = vmatpush1.bf16.msra.mxu0 %v11376_v19  ;;  %v11393_v25 = vld [vmem:[%s15266_s2 + $0x1aa4] ss:$16 sps:$4 sm:$0xff]  }
 0x30f   : > { %v14375_v2 = vadd.f32 %v5831_v63, %v5790_v59  ;;  %7769 = vmatpush1.bf16.msra.mxu1 %v11379_v55  ;;  %v5792_v5 = vpop.f32.mrf.mxu0  ;;  %7729 = vmatprep.subr.bf16.mxu0 %v11384_v47  ;;  %v11447_v19 = vld [vmem:[%s15266_s2 + $0x1b84] ss:$16 sps:$4 sm:$0xff]   ;;  %v6089_v55 = vld [vmem:[%s13473_s23 + $0x8] sm:$0xff]  ;;  %v11442_v47 = vld [vmem:[%s15266_s2 + $0x1980] ss:$16 sps:$4 sm:$0xff]  }
 0x310   : > { %v5833_v6 = vpop.f32.mrf.mxu1  ;;  %7770 = vmatprep.subr.bf16.mxu1 %v11387_v48  ;;  %7759 = vmatprep.mubr.bf16.mxu0 %v14369_v22  ;;  %v11445_v48 = vld [vmem:[%s15266_s2 + $0x1b80] ss:$16 sps:$4 sm:$0xff]   ;;  %v11450_v59 = vld [vmem:[%s15266_s2 + $0x1964] ss:$16 sps:$4 sm:$0xff]  }
 0x311   : > { %v14389_v50 = vadd.f32 %v5833_v6, %v5792_v5  ;;  %7800 = vmatprep.mubr.bf16.mxu1 %v14371_v60  ;;  %v5794_v8 = vpop.f32.mrf.mxu0  ;;  %v11453_v63 = vld [vmem:[%s15266_s2 + $0x1b64] ss:$16 sps:$4 sm:$0xff]   ;;  %v11451_v5 = vld [vmem:[%s15266_s2 + $0x1b60] ss:$16 sps:$4 sm:$0xff]  }
 0x312   : > { %v5835_v40 = vpop.f32.mrf.mxu1  ;;  %7730 = vmatpush1.bf16.msra.mxu0 %v11382_v3  ;;  %v6366_v3 = vcombine.high %v6089_v55, %v6089_v55  ;;  %v11456_v6 = vld [vmem:[%s15266_s2 + $0x1944] ss:$16 sps:$4 sm:$0xff]  }
 0x313   : > { %7771 = vmatpush1.bf16.msra.mxu1 %v11385_v4  ;;  %v5795_v10 = vpop.f32.mrf.mxu0  ;;  %7731 = vmatprep.subr.bf16.mxu0 %v11390_v24  ;;  %v11448_v4 = vld [vmem:[%s15266_s2 + $0x1960] ss:$16 sps:$4 sm:$0xff]   ;;  %v11459_v24 = vld [vmem:[%s15266_s2 + $0x1b44] ss:$16 sps:$4 sm:$0xff]  }
 0x314   : > { %v5836_v14 = vpop.f32.mrf.mxu1  ;;  %7772 = vmatprep.subr.bf16.mxu1 %v11393_v25  ;;  %v14527_v25 = vrot.slane %v6089_v55, %v11976_v49  ;;  %v14530_v8 = vrot.slane %v6366_v3, %v11976_v49  ;;  %v11454_v40 = vld [vmem:[%s15266_s2 + $0x1940] ss:$16 sps:$4 sm:$0xff]   ;;  %v11465_v49 = vld [vmem:[%s15266_s2 + $0x1b24] ss:$16 sps:$4 sm:$0xff]  }
 0x316   : > { %7732 = vmatpush1.bf16.msra.mxu0 %v11388_v41  ;;  %v11457_v41 = vld [vmem:[%s15266_s2 + $0x1b40] ss:$16 sps:$4 sm:$0xff]   ;;  %v6381_v10 = vcombine.high %v14527_v25, %v14527_v25  ;;  %v6382_v14 = vcombine.high %v14530_v8, %v14530_v8 }
 0x317   : > { %7773 = vmatpush1.bf16.msra.mxu1 %v11391_v13  ;;  %7733 = vmatprep.subr.bf16.mxu0 %v11396_v53  ;;  %v11462_v13 = vld [vmem:[%s15266_s2 + $0x1924] ss:$16 sps:$4 sm:$0xff]   ;;  %v6386_v53 = vshll.u32 %v14312_v31, 16 }
 0x318   : > { %7774 = vmatprep.subr.bf16.mxu1 %v11399_v1  ;;  %v6400_v1 = vshll.u32 %v14315_v32, 16 }
 0x31a   : > { %7734 = vmatpush1.bf16.msra.mxu0 %v11394_v27  ;;  %v11460_v27 = vld [vmem:[%s15266_s2 + $0x1920] ss:$16 sps:$4 sm:$0xff]  }
 0x31b   : > { %7775 = vmatpush1.bf16.msra.mxu1 %v11397_v0  ;;  %7735 = vmatprep.subr.bf16.mxu0 %v11402_v15  ;;  %v11463_v0 = vld [vmem:[%s15266_s2 + $0x1b20] ss:$16 sps:$4 sm:$0xff]   ;;  %v11468_v15 = vld [vmem:[%s15266_s2 + $0x1904] ss:$16 sps:$4 sm:$0xff]  }
 0x31c   : > { %7776 = vmatprep.subr.bf16.mxu1 %v11405_v16  ;;  %v11471_v16 = vld [vmem:[%s15266_s2 + $0x1b04] ss:$16 sps:$4 sm:$0xff]  }
 0x31e   : > { %7736 = vmatpush1.bf16.msra.mxu0 %v11400_v20  ;;  %v6421_v20 = vshll.u32 %v6381_v10, 16 }
 0x31f   : > { %7777 = vmatpush1.bf16.msra.mxu1 %v11403_v21  ;;  %7737 = vmatprep.subr.bf16.mxu0 %v11408_v23  ;;  %v6435_v21 = vshll.u32 %v6382_v14, 16  ;;  %v6384_v23 = vshrl.u32 %v14312_v31, 16  ;;  %v11475_v31 = vld [vmem:[%s15266_s2 + $0x1ce4] ss:$16 sps:$4 sm:$0xff]  }
 0x320   : > { %7778 = vmatprep.subr.bf16.mxu1 %v11411_v26  ;;  %v6388_v26 = vrot.slane %v6386_v53, 1  ;;  %v11505_v53 = vld [vmem:[%s15266_s2 + $0x1c44] ss:$16 sps:$4 sm:$0xff]  }
 0x322   : > { %7738 = vmatpush1.bf16.msra.mxu0 %v11406_v61  ;;  %v6398_v61 = vshrl.u32 %v14315_v32, 16  ;;  %v11478_v32 = vld [vmem:[%s15266_s2 + $0x1ee4] ss:$16 sps:$4 sm:$0xff]  }
 0x323   : > { %7779 = vmatpush1.bf16.msra.mxu1 %v11409_v62  ;;  %7739 = vmatprep.subr.bf16.mxu0 %v11414_v30  ;;  %v6402_v62 = vrot.slane %v6400_v1, 1  ;;  %v11466_v30 = vld [vmem:[%s15266_s2 + $0x1900] ss:$16 sps:$4 sm:$0xff]   ;;  %v11508_v1 = vld [vmem:[%s15266_s2 + $0x1e44] ss:$16 sps:$4 sm:$0xff]  }
 0x324   : > { %7780 = vmatprep.subr.bf16.mxu1 %v11417_v56  ;;  %v11469_v56 = vld [vmem:[%s15266_s2 + $0x1b00] ss:$16 sps:$4 sm:$0xff]  }
 0x326   : > { %7740 = vmatpush1.bf16.msra.mxu0 %v11412_v58  ;;  %v6419_v58 = vshrl.u32 %v6381_v10, 16  ;;  %v11497_v10 = vld [vmem:[%s15266_s2 + $0x1c60] ss:$16 sps:$4 sm:$0xff]  }
 0x327   : > { %7781 = vmatpush1.bf16.msra.mxu1 %v11415_v33  ;;  %7741 = vmatprep.subr.bf16.mxu0 %v11420_v34  ;;  %v6423_v33 = vrot.slane %v6421_v20, 1  ;;  %v6433_v34 = vshrl.u32 %v6382_v14, 16  ;;  %v11500_v14 = vld [vmem:[%s15266_s2 + $0x1e60] ss:$16 sps:$4 sm:$0xff]  }
 0x328   : > { %7782 = vmatprep.subr.bf16.mxu1 %v11423_v35  ;;  %v6437_v35 = vrot.slane %v6435_v21, 1  ;;  %v11509_v20 = vld [vmem:[%s15266_s2 + $0x1c20] ss:$16 sps:$4 sm:$0xff]  }
 0x329   : > { %v11512_v21 = vld [vmem:[%s15266_s2 + $0x1e20] ss:$16 sps:$4 sm:$0xff]  }
 0x32a   : > { %7742 = vmatpush1.bf16.msra.mxu0 %v11418_v37  ;;  %v14576_v37 = vor.u32 %v6388_v26, %v6384_v23  ;;  %v11517_v23 = vld [vmem:[%s15266_s2 + $0x1c04] ss:$16 sps:$4 sm:$0xff]  }
 0x32b   : > { %7783 = vmatpush1.bf16.msra.mxu1 %v11421_v42  ;;  %7743 = vmatprep.subr.bf16.mxu0 %v11426_v9  ;;  %v14578_v42 = vor.u32 %v6402_v62, %v6398_v61  ;;  %v11473_v9 = vld [vmem:[%s15266_s2 + $0x1ce0] ss:$16 sps:$4 sm:$0xff]   ;;  %v11520_v26 = vld [vmem:[%s15266_s2 + $0x1e04] ss:$16 sps:$4 sm:$0xff]  }
 0x32c   : > { %7784 = vmatprep.subr.bf16.mxu1 %v11429_v57  ;;  %v11476_v57 = vld [vmem:[%s15266_s2 + $0x1ee0] ss:$16 sps:$4 sm:$0xff]  }
 0x32d   : > { %v11515_v61 = vld [vmem:[%s15266_s2 + $0x1c00] ss:$16 sps:$4 sm:$0xff]  }
 0x32e   : > { %7744 = vmatpush2.bf16.msra.mxu0 %v11424_v17  ;;  %v11481_v17 = vld [vmem:[%s15266_s2 + $0x1cc4] ss:$16 sps:$4 sm:$0xff]   ;;  %v11518_v62 = vld [vmem:[%s15266_s2 + $0x1e00] ss:$16 sps:$4 sm:$0xff]  }
 0x32f   : > { %7785 = vmatpush2.bf16.msra.mxu1 %v11427_v18  ;;  %7745 = vmatprep.subr.bf16.mxu0 %v11432_v44  ;;  %v11484_v18 = vld [vmem:[%s15266_s2 + $0x1ec4] ss:$16 sps:$4 sm:$0xff]   ;;  %v14592_v44 = vor.u32 %v6423_v33, %v6419_v58 }
 0x330   : > { %7786 = vmatprep.subr.bf16.mxu1 %v11435_v46  ;;  %v14594_v46 = vor.u32 %v6437_v35, %v6433_v34  ;;  %v11529_v58 = vld [vmem:[%s15266_s2 + $0x1dc4] ss:$16 sps:$4 sm:$0xff]   ;;  %v11527_v34 = vld [vmem:[%s15266_s2 + $0x1dc0] ss:$16 sps:$4 sm:$0xff]  }
 0x331   : > { %v11532_v33 = vld [vmem:[%s15266_s2 + $0x1fc4] ss:$16 sps:$4 sm:$0xff]   ;;  %v11530_v35 = vld [vmem:[%s15266_s2 + $0x1fc0] ss:$16 sps:$4 sm:$0xff]  }
 0x332   : > { %7746 = vmatpush2.bf16.msra.mxu0 %v11430_v28 }
 0x333   : > { %7787 = vmatpush2.bf16.msra.mxu1 %v11433_v29  ;;  %7747 = vmatprep.subr.bf16.mxu0 %v11438_v11 }
 0x334   : > { %7788 = vmatprep.subr.bf16.mxu1 %v11441_v12  ;;  %v11479_v12 = vld [vmem:[%s15266_s2 + $0x1cc0] ss:$16 sps:$4 sm:$0xff]  }
 0x336   : > { %7748 = vmatpush2.bf16.msra.mxu0 %v11436_v51  ;;  %v11482_v51 = vld [vmem:[%s15266_s2 + $0x1ec0] ss:$16 sps:$4 sm:$0xff]  }
 0x337   : > { %7789 = vmatpush2.bf16.msra.mxu1 %v11439_v52  ;;  %7749 = vmatprep.subr.bf16.mxu0 %v11444_v54 }
 0x338   : > { %7790 = vmatprep.subr.bf16.mxu1 %v11447_v19  ;;  %v11487_v19 = vld [vmem:[%s15266_s2 + $0x1ca4] ss:$16 sps:$4 sm:$0xff]  }
 0x33a   : > { %7750 = vmatpush2.bf16.msra.mxu0 %v11442_v47 }
 0x33b   : > { %7791 = vmatpush2.bf16.msra.mxu1 %v11445_v48  ;;  %7751 = vmatprep.subr.bf16.mxu0 %v11450_v59 }
 0x33c   : > { %7792 = vmatprep.subr.bf16.mxu1 %v11453_v63 }
 0x33e   : > { %7752 = vmatpush2.bf16.msra.mxu0 %v11448_v4  ;;  %v11485_v4 = vld [vmem:[%s15266_s2 + $0x1ca0] ss:$16 sps:$4 sm:$0xff]  }
 0x33f   : > { %7793 = vmatpush2.bf16.msra.mxu1 %v11451_v5  ;;  %7753 = vmatprep.subr.bf16.mxu0 %v11456_v6 }
 0x340   : > { %7794 = vmatprep.subr.bf16.mxu1 %v11459_v24  ;;  %v11496_v24 = vld [vmem:[%s15266_s2 + $0x1e84] ss:$16 sps:$4 sm:$0xff]  }
 0x342   : > { %7754 = vmatpush2.bf16.msra.mxu0 %v11454_v40 }
 0x343   : > { %7795 = vmatpush2.bf16.msra.mxu1 %v11457_v41  ;;  %7755 = vmatprep.subr.bf16.mxu0 %v11462_v13  ;;  %v11491_v41 = vld [vmem:[%s15266_s2 + $0x1c80] ss:$16 sps:$4 sm:$0xff]  }
 0x344   : > { %7796 = vmatprep.subr.bf16.mxu1 %v11465_v49  ;;  %v11494_v13 = vld [vmem:[%s15266_s2 + $0x1e80] ss:$16 sps:$4 sm:$0xff]   ;;  %v11499_v49 = vld [vmem:[%s15266_s2 + $0x1c64] ss:$16 sps:$4 sm:$0xff]  }
 0x346   : > { %7756 = vmatpush2.bf16.msra.mxu0 %v11460_v27  ;;  %v11503_v27 = vld [vmem:[%s15266_s2 + $0x1c40] ss:$16 sps:$4 sm:$0xff]  }
 0x347   : > { %7797 = vmatpush2.bf16.msra.mxu1 %v11463_v0  ;;  %7757 = vmatprep.subr.bf16.mxu0 %v11468_v15  ;;  %v11506_v0 = vld [vmem:[%s15266_s2 + $0x1e40] ss:$16 sps:$4 sm:$0xff]   ;;  %v11511_v15 = vld [vmem:[%s15266_s2 + $0x1c24] ss:$16 sps:$4 sm:$0xff]  }
 0x348   : > { %7798 = vmatprep.subr.bf16.mxu1 %v11471_v16  ;;  %v11514_v16 = vld [vmem:[%s15266_s2 + $0x1e24] ss:$16 sps:$4 sm:$0xff]  }
 0x34a   : > { %7758 = vmatpush2.bf16.msra.mxu0 %v11466_v30  ;;  %v11523_v30 = vld [vmem:[%s15266_s2 + $0x1de4] ss:$16 sps:$4 sm:$0xff]  }
 0x34b   : > { %7799 = vmatpush2.bf16.msra.mxu1 %v11469_v56  ;;  %7809 = vmatprep.subr.bf16.mxu0 %v11475_v31  ;;  %v11526_v56 = vld [vmem:[%s15266_s2 + $0x1fe4] ss:$16 sps:$4 sm:$0xff]   ;;  %v11521_v31 = vld [vmem:[%s15266_s2 + $0x1de0] ss:$16 sps:$4 sm:$0xff]  }
 0x34c   : > { %7850 = vmatprep.subr.bf16.mxu1 %v11478_v32  ;;  %v11524_v32 = vld [vmem:[%s15266_s2 + $0x1fe0] ss:$16 sps:$4 sm:$0xff]  }
 0x34d   : > { %v5872_v28 = vpop.f32.mrf.mxu0  ;;  %7760 = vmatmul.mubr.bf16.vlgmr.msra.gmra.mxu0 %v14576_v37 }
 0x34e   : > { %v5913_v29 = vpop.f32.mrf.mxu1  ;;  %7801 = vmatmul.mubr.bf16.vlgmr.msra.gmra.mxu1 %v14578_v42  ;;  %v5873_v11 = vadd.f32 %v5872_v28, %v14375_v2  ;;  %7810 = vmatpush1.bf16.msra.mxu0 %v11473_v9  ;;  %v11490_v2 = vld [vmem:[%s15266_s2 + $0x1ea4] ss:$16 sps:$4 sm:$0xff]  }
 0x34f   : > { %7851 = vmatpush1.bf16.msra.mxu1 %v11476_v57  ;;  %v5874_v52 = vpop.f32.mrf.mxu0  ;;  %7811 = vmatprep.subr.bf16.mxu0 %v11481_v17  ;;  %v11535_v9 = vld [vmem:[%s15266_s2 + $0x1da4] ss:$16 sps:$4 sm:$0xff]   ;;  %v11533_v17 = vld [vmem:[%s15266_s2 + $0x1da0] ss:$16 sps:$4 sm:$0xff]  }
 0x350   : > { %v5915_v54 = vpop.f32.mrf.mxu1  ;;  %7852 = vmatprep.subr.bf16.mxu1 %v11484_v18  ;;  %v5914_v55 = vadd.f32 %v5913_v29, %v5873_v11  ;;  %v5875_v47 = vadd.f32 %v5874_v52, %v14389_v50  ;;  %7841 = vmatprep.mubr.bf16.mxu0 %v14592_v44  ;;  %v11488_v50 = vld [vmem:[%s15266_s2 + $0x1ea0] ss:$16 sps:$4 sm:$0xff]   ;;  %v11538_v57 = vld [vmem:[%s15266_s2 + $0x1fa4] ss:$16 sps:$4 sm:$0xff]  }
 0x351   : > { %7882 = vmatprep.mubr.bf16.mxu1 %v14594_v46  ;;  %v5876_v48 = vpop.f32.mrf.mxu0  ;;  %v11536_v18 = vld [vmem:[%s15266_s2 + $0x1fa0] ss:$16 sps:$4 sm:$0xff]   ;;  %v11541_v28 = vld [vmem:[%s15266_s2 + $0x1d84] ss:$16 sps:$4 sm:$0xff]  }
 0x352   : > { %v5917_v59 = vpop.f32.mrf.mxu1  ;;  %v14615_v63 = vadd.f32 %v5914_v55, %v13767_v39  ;;  %v5916_v3 = vadd.f32 %v5915_v54, %v5875_v47  ;;  %7812 = vmatpush1.bf16.msra.mxu0 %v11479_v12  ;;  %v11493_v39 = vld [vmem:[%s15266_s2 + $0x1c84] ss:$16 sps:$4 sm:$0xff]   ;;  %v11539_v11 = vld [vmem:[%s15266_s2 + $0x1d80] ss:$16 sps:$4 sm:$0xff]  }
 0x353   : > { %7853 = vmatpush1.bf16.msra.mxu1 %v11482_v51  ;;  %v5877_v5 = vpop.f32.mrf.mxu0  ;;  %7813 = vmatprep.subr.bf16.mxu0 %v11487_v19  ;;  %v11544_v29 = vld [vmem:[%s15266_s2 + $0x1f84] ss:$16 sps:$4 sm:$0xff]   ;;  %v11542_v12 = vld [vmem:[%s15266_s2 + $0x1f80] ss:$16 sps:$4 sm:$0xff]  }
 0x354   : > { %v5918_v6 = vpop.f32.mrf.mxu1  ;;  %7854 = vmatprep.subr.bf16.mxu1 %v11490_v2  ;;  %v14630_v40 = vadd.f32 %v5916_v3, %v13772_v45  ;;  %v11502_v45 = vld [vmem:[%s15266_s2 + $0x1e64] ss:$16 sps:$4 sm:$0xff]   ;;  %v11545_v54 = vld [vmem:[%s15266_s2 + $0x1d60] ss:$16 sps:$4 sm:$0xff]  }
 0x355   : > { %v11547_v51 = vld [vmem:[%s15266_s2 + $0x1d64] ss:$16 sps:$4 sm:$0xff]   ;;  %v11548_v19 = vld [vmem:[%s15266_s2 + $0x1f60] ss:$16 sps:$4 sm:$0xff]  }
 0x356   : > { %7814 = vmatpush1.bf16.msra.mxu0 %v11485_v4  ;;  %v11550_v52 = vld [vmem:[%s15266_s2 + $0x1f64] ss:$16 sps:$4 sm:$0xff]   ;;  %v11551_v47 = vld [vmem:[%s15266_s2 + $0x1d40] ss:$16 sps:$4 sm:$0xff]   ;;  %v6414_v4 = vshll.u32 %v14527_v25, 16 }
 0x357   : > { %7855 = vmatpush1.bf16.msra.mxu1 %v11488_v50  ;;  %7815 = vmatprep.subr.bf16.mxu0 %v11493_v39  ;;  %v11553_v2 = vld [vmem:[%s15266_s2 + $0x1d44] ss:$16 sps:$4 sm:$0xff]   ;;  %v11554_v48 = vld [vmem:[%s15266_s2 + $0x1f40] ss:$16 sps:$4 sm:$0xff]   ;;  %v6428_v50 = vshll.u32 %v14530_v8, 16 }
 0x358   : > { %7856 = vmatprep.subr.bf16.mxu1 %v11496_v24  ;;  %v11556_v55 = vld [vmem:[%s15266_s2 + $0x1f44] ss:$16 sps:$4 sm:$0xff]   ;;  %v11557_v5 = vld [vmem:[%s15266_s2 + $0x1d20] ss:$16 sps:$4 sm:$0xff]  }
 0x359   : > { %v11559_v59 = vld [vmem:[%s15266_s2 + $0x1d24] ss:$16 sps:$4 sm:$0xff]   ;;  %v11560_v6 = vld [vmem:[%s15266_s2 + $0x1f20] ss:$16 sps:$4 sm:$0xff]  }
 0x35a   : > { %7816 = vmatpush1.bf16.msra.mxu0 %v11491_v41  ;;  %v11562_v3 = vld [vmem:[%s15266_s2 + $0x1f24] ss:$16 sps:$4 sm:$0xff]   ;;  %v6412_v41 = vshrl.u32 %v14527_v25, 16  ;;  %v11572_v25 = vld [vmem:[%s15266_s2 + $0x18ec] ss:$16 sps:$4 sm:$0xff]  }
 0x35b   : > { %7857 = vmatpush1.bf16.msra.mxu1 %v11494_v13  ;;  %7817 = vmatprep.subr.bf16.mxu0 %v11499_v49  ;;  %v11565_v39 = vld [vmem:[%s15266_s2 + $0x1d04] ss:$16 sps:$4 sm:$0xff]   ;;  %v6416_v13 = vrot.slane %v6414_v4, 1  ;;  %v6426_v49 = vshrl.u32 %v14530_v8, 16  ;;  %v11575_v8 = vld [vmem:[%s15266_s2 + $0x1aec] ss:$16 sps:$4 sm:$0xff]  }
 0x35c   : > { %7858 = vmatprep.subr.bf16.mxu1 %v11502_v45  ;;  %v11568_v24 = vld [vmem:[%s15266_s2 + $0x1f04] ss:$16 sps:$4 sm:$0xff]   ;;  %v6430_v45 = vrot.slane %v6428_v50, 1  ;;  %v11612_v4 = vld [vmem:[%s15266_s2 + $0x1808] ss:$16 sps:$4 sm:$0xff]  }
 0x35d   : > { %v11615_v50 = vld [vmem:[%s15266_s2 + $0x1a08] ss:$16 sps:$4 sm:$0xff]  }
 0x35e   : > { %7818 = vmatpush1.bf16.msra.mxu0 %v11497_v10  ;;  %v11563_v10 = vld [vmem:[%s15266_s2 + $0x1d00] ss:$16 sps:$4 sm:$0xff]  }
 0x35f   : > { %7859 = vmatpush1.bf16.msra.mxu1 %v11500_v14  ;;  %7819 = vmatprep.subr.bf16.mxu0 %v11505_v53  ;;  %v11566_v14 = vld [vmem:[%s15266_s2 + $0x1f00] ss:$16 sps:$4 sm:$0xff]   ;;  %v14792_v53 = vor.u32 %v6416_v13, %v6412_v41  ;;  %v11626_v41 = vld [vmem:[%s15266_s2 + $0x19cc] ss:$16 sps:$4 sm:$0xff]  }
 0x360   : > { %7860 = vmatprep.subr.bf16.mxu1 %v11508_v1  ;;  %v14794_v1 = vor.u32 %v6430_v45, %v6426_v49  ;;  %v11629_v13 = vld [vmem:[%s15266_s2 + $0x1bcc] ss:$16 sps:$4 sm:$0xff]   ;;  %v11624_v49 = vld [vmem:[%s15266_s2 + $0x19c8] ss:$16 sps:$4 sm:$0xff]  }
 0x361   : > { %v11627_v45 = vld [vmem:[%s15266_s2 + $0x1bc8] ss:$16 sps:$4 sm:$0xff]  }
 0x362   : > { %7820 = vmatpush1.bf16.msra.mxu0 %v11503_v27  ;;  %v11570_v27 = vld [vmem:[%s15266_s2 + $0x18e8] ss:$16 sps:$4 sm:$0xff]  }
 0x363   : > { %7861 = vmatpush1.bf16.msra.mxu1 %v11506_v0  ;;  %7821 = vmatprep.subr.bf16.mxu0 %v11511_v15  ;;  %v11573_v0 = vld [vmem:[%s15266_s2 + $0x1ae8] ss:$16 sps:$4 sm:$0xff]   ;;  %v11578_v15 = vld [vmem:[%s15266_s2 + $0x18cc] ss:$16 sps:$4 sm:$0xff]  }
 0x364   : > { %7862 = vmatprep.subr.bf16.mxu1 %v11514_v16  ;;  %v11581_v16 = vld [vmem:[%s15266_s2 + $0x1acc] ss:$16 sps:$4 sm:$0xff]  }
 0x366   : > { %7822 = vmatpush1.bf16.msra.mxu0 %v11509_v20 }
 0x367   : > { %7863 = vmatpush1.bf16.msra.mxu1 %v11512_v21  ;;  %7823 = vmatprep.subr.bf16.mxu0 %v11517_v23 }
 0x368   : > { %7864 = vmatprep.subr.bf16.mxu1 %v11520_v26  ;;  %v11576_v26 = vld [vmem:[%s15266_s2 + $0x18c8] ss:$16 sps:$4 sm:$0xff]  }
 0x36a   : > { %7824 = vmatpush1.bf16.msra.mxu0 %v11515_v61  ;;  %v11579_v61 = vld [vmem:[%s15266_s2 + $0x1ac8] ss:$16 sps:$4 sm:$0xff]  }
 0x36b   : > { %7865 = vmatpush1.bf16.msra.mxu1 %v11518_v62  ;;  %7825 = vmatprep.subr.bf16.mxu0 %v11523_v30 }
 0x36c   : > { %7866 = vmatprep.subr.bf16.mxu1 %v11526_v56  ;;  %v11584_v56 = vld [vmem:[%s15266_s2 + $0x18ac] ss:$16 sps:$4 sm:$0xff]  }
 0x36e   : > { %7826 = vmatpush2.bf16.msra.mxu0 %v11521_v31  ;;  %v11587_v31 = vld [vmem:[%s15266_s2 + $0x1aac] ss:$16 sps:$4 sm:$0xff]  }
 0x36f   : > { %7867 = vmatpush2.bf16.msra.mxu1 %v11524_v32  ;;  %7827 = vmatprep.subr.bf16.mxu0 %v11529_v58 }
 0x370   : > { %7868 = vmatprep.subr.bf16.mxu1 %v11532_v33 }
 0x372   : > { %7828 = vmatpush2.bf16.msra.mxu0 %v11527_v34  ;;  %v11582_v34 = vld [vmem:[%s15266_s2 + $0x18a8] ss:$16 sps:$4 sm:$0xff]  }
 0x373   : > { %7869 = vmatpush2.bf16.msra.mxu1 %v11530_v35  ;;  %7829 = vmatprep.subr.bf16.mxu0 %v11535_v9  ;;  %v11585_v35 = vld [vmem:[%s15266_s2 + $0x1aa8] ss:$16 sps:$4 sm:$0xff]  }
 0x374   : > { %7870 = vmatprep.subr.bf16.mxu1 %v11538_v57 }
 0x376   : > { %7830 = vmatpush2.bf16.msra.mxu0 %v11533_v17  ;;  %v11588_v17 = vld [vmem:[%s15266_s2 + $0x1888] ss:$16 sps:$4 sm:$0xff]  }
 0x377   : > { %7871 = vmatpush2.bf16.msra.mxu1 %v11536_v18  ;;  %7831 = vmatprep.subr.bf16.mxu0 %v11541_v28  ;;  %v11591_v18 = vld [vmem:[%s15266_s2 + $0x1a88] ss:$16 sps:$4 sm:$0xff]   ;;  %v11596_v28 = vld [vmem:[%s15266_s2 + $0x186c] ss:$16 sps:$4 sm:$0xff]  }
 0x378   : > { %7872 = vmatprep.subr.bf16.mxu1 %v11544_v29  ;;  %v11599_v29 = vld [vmem:[%s15266_s2 + $0x1a6c] ss:$16 sps:$4 sm:$0xff]  }
 0x37a   : > { %7832 = vmatpush2.bf16.msra.mxu0 %v11539_v11  ;;  %v11594_v11 = vld [vmem:[%s15266_s2 + $0x1868] ss:$16 sps:$4 sm:$0xff]  }
 0x37b   : > { %7873 = vmatpush2.bf16.msra.mxu1 %v11542_v12  ;;  %7833 = vmatprep.subr.bf16.mxu0 %v11547_v51  ;;  %v11597_v12 = vld [vmem:[%s15266_s2 + $0x1a68] ss:$16 sps:$4 sm:$0xff]   ;;  %v11602_v51 = vld [vmem:[%s15266_s2 + $0x184c] ss:$16 sps:$4 sm:$0xff]  }
 0x37c   : > { %7874 = vmatprep.subr.bf16.mxu1 %v11550_v52  ;;  %v11605_v52 = vld [vmem:[%s15266_s2 + $0x1a4c] ss:$16 sps:$4 sm:$0xff]  }
 0x37e   : > { %7834 = vmatpush2.bf16.msra.mxu0 %v11545_v54  ;;  %v11600_v54 = vld [vmem:[%s15266_s2 + $0x1848] ss:$16 sps:$4 sm:$0xff]  }
 0x37f   : > { %7875 = vmatpush2.bf16.msra.mxu1 %v11548_v19  ;;  %7835 = vmatprep.subr.bf16.mxu0 %v11553_v2  ;;  %v11603_v19 = vld [vmem:[%s15266_s2 + $0x1a48] ss:$16 sps:$4 sm:$0xff]   ;;  %v11608_v2 = vld [vmem:[%s15266_s2 + $0x182c] ss:$16 sps:$4 sm:$0xff]  }
 0x380   : > { %7876 = vmatprep.subr.bf16.mxu1 %v11556_v55  ;;  %v11611_v55 = vld [vmem:[%s15266_s2 + $0x1a2c] ss:$16 sps:$4 sm:$0xff]  }
 0x382   : > { %7836 = vmatpush2.bf16.msra.mxu0 %v11551_v47  ;;  %v11606_v47 = vld [vmem:[%s15266_s2 + $0x1828] ss:$16 sps:$4 sm:$0xff]  }
 0x383   : > { %7877 = vmatpush2.bf16.msra.mxu1 %v11554_v48  ;;  %7837 = vmatprep.subr.bf16.mxu0 %v11559_v59  ;;  %v11609_v48 = vld [vmem:[%s15266_s2 + $0x1a28] ss:$16 sps:$4 sm:$0xff]   ;;  %v11614_v59 = vld [vmem:[%s15266_s2 + $0x180c] ss:$16 sps:$4 sm:$0xff]  }
 0x384   : > { %7878 = vmatprep.subr.bf16.mxu1 %v11562_v3  ;;  %v11617_v3 = vld [vmem:[%s15266_s2 + $0x1a0c] ss:$16 sps:$4 sm:$0xff]  }
 0x386   : > { %7838 = vmatpush2.bf16.msra.mxu0 %v11557_v5  ;;  %v11620_v5 = vld [vmem:[%s15266_s2 + $0x19ec] ss:$16 sps:$4 sm:$0xff]  }
 0x387   : > { %7879 = vmatpush2.bf16.msra.mxu1 %v11560_v6  ;;  %7839 = vmatprep.subr.bf16.mxu0 %v11565_v39  ;;  %v11623_v6 = vld [vmem:[%s15266_s2 + $0x1bec] ss:$16 sps:$4 sm:$0xff]   ;;  %v11618_v39 = vld [vmem:[%s15266_s2 + $0x19e8] ss:$16 sps:$4 sm:$0xff]  }
 0x388   : > { %7880 = vmatprep.subr.bf16.mxu1 %v11568_v24  ;;  %v11621_v24 = vld [vmem:[%s15266_s2 + $0x1be8] ss:$16 sps:$4 sm:$0xff]  }
 0x38a   : > { %7840 = vmatpush2.bf16.msra.mxu0 %v11563_v10  ;;  %v11632_v10 = vld [vmem:[%s15266_s2 + $0x19ac] ss:$16 sps:$4 sm:$0xff]  }
 0x38b   : > { %7881 = vmatpush2.bf16.msra.mxu1 %v11566_v14  ;;  %7891 = vmatprep.subr.bf16.mxu0 %v11572_v25  ;;  %v11635_v14 = vld [vmem:[%s15266_s2 + $0x1bac] ss:$16 sps:$4 sm:$0xff]   ;;  %v11630_v25 = vld [vmem:[%s15266_s2 + $0x19a8] ss:$16 sps:$4 sm:$0xff]  }
 0x38c   : > { %7932 = vmatprep.subr.bf16.mxu1 %v11575_v8  ;;  %v11633_v8 = vld [vmem:[%s15266_s2 + $0x1ba8] ss:$16 sps:$4 sm:$0xff]  }
 0x38d   : > { %v5954_v20 = vpop.f32.mrf.mxu0  ;;  %7842 = vmatmul.mubr.bf16.vlgmr.msra.gmra.mxu0 %v14792_v53 }
 0x38e   : > { %v5995_v21 = vpop.f32.mrf.mxu1  ;;  %7883 = vmatmul.mubr.bf16.vlgmr.msra.gmra.mxu1 %v14794_v1  ;;  %7892 = vmatpush1.bf16.msra.mxu0 %v11570_v27  ;;  %v11638_v27 = vld [vmem:[%s15266_s2 + $0x198c] ss:$16 sps:$4 sm:$0xff]  }
 0x38f   : > { %v14810_v23 = vadd.f32 %v5995_v21, %v5954_v20  ;;  %7933 = vmatpush1.bf16.msra.mxu1 %v11573_v0  ;;  %v5956_v62 = vpop.f32.mrf.mxu0  ;;  %7893 = vmatprep.subr.bf16.mxu0 %v11578_v15  ;;  %v11641_v0 = vld [vmem:[%s15266_s2 + $0x1b8c] ss:$16 sps:$4 sm:$0xff]   ;;  %v11636_v15 = vld [vmem:[%s15266_s2 + $0x1988] ss:$16 sps:$4 sm:$0xff]  }
 0x390   : > { %v5997_v30 = vpop.f32.mrf.mxu1  ;;  %7934 = vmatprep.subr.bf16.mxu1 %v11581_v16  ;;  %7923 = vmatprep.mubr.bf16.mxu0 %v14369_v22  ;;  %v11590_v22 = vld [vmem:[%s15266_s2 + $0x188c] ss:$16 sps:$4 sm:$0xff]   ;;  %v11639_v16 = vld [vmem:[%s15266_s2 + $0x1b88] ss:$16 sps:$4 sm:$0xff]  }
 0x391   : > { %v14824_v32 = vadd.f32 %v5997_v30, %v5956_v62  ;;  %7964 = vmatprep.mubr.bf16.mxu1 %v14371_v60  ;;  %v5958_v58 = vpop.f32.mrf.mxu0  ;;  %v11593_v60 = vld [vmem:[%s15266_s2 + $0x1a8c] ss:$16 sps:$4 sm:$0xff]  }
 0x392   : > { %v5999_v33 = vpop.f32.mrf.mxu1  ;;  %7894 = vmatpush1.bf16.msra.mxu0 %v11576_v26  ;;  %v11644_v20 = vld [vmem:[%s15266_s2 + $0x196c] ss:$16 sps:$4 sm:$0xff]   ;;  %v11642_v26 = vld [vmem:[%s15266_s2 + $0x1968] ss:$16 sps:$4 sm:$0xff]  }
 0x393   : > { %7935 = vmatpush1.bf16.msra.mxu1 %v11579_v61  ;;  %v5959_v9 = vpop.f32.mrf.mxu0  ;;  %7895 = vmatprep.subr.bf16.mxu0 %v11584_v56  ;;  %v11647_v21 = vld [vmem:[%s15266_s2 + $0x1b6c] ss:$16 sps:$4 sm:$0xff]   ;;  %v11645_v61 = vld [vmem:[%s15266_s2 + $0x1b68] ss:$16 sps:$4 sm:$0xff]  }
 0x394   : > { %v6000_v57 = vpop.f32.mrf.mxu1  ;;  %7936 = vmatprep.subr.bf16.mxu1 %v11587_v31  ;;  %v11650_v62 = vld [vmem:[%s15266_s2 + $0x194c] ss:$16 sps:$4 sm:$0xff]   ;;  %v11648_v56 = vld [vmem:[%s15266_s2 + $0x1948] ss:$16 sps:$4 sm:$0xff]  }
 0x395   : > { %v11653_v30 = vld [vmem:[%s15266_s2 + $0x1b4c] ss:$16 sps:$4 sm:$0xff]   ;;  %v11651_v31 = vld [vmem:[%s15266_s2 + $0x1b48] ss:$16 sps:$4 sm:$0xff]  }
 0x396   : > { %7896 = vmatpush1.bf16.msra.mxu0 %v11582_v34  ;;  %v11656_v58 = vld [vmem:[%s15266_s2 + $0x192c] ss:$16 sps:$4 sm:$0xff]   ;;  %v11654_v34 = vld [vmem:[%s15266_s2 + $0x1928] ss:$16 sps:$4 sm:$0xff]  }
 0x397   : > { %7937 = vmatpush1.bf16.msra.mxu1 %v11585_v35  ;;  %7897 = vmatprep.subr.bf16.mxu0 %v11590_v22  ;;  %v11659_v33 = vld [vmem:[%s15266_s2 + $0x1b2c] ss:$16 sps:$4 sm:$0xff]   ;;  %v11657_v35 = vld [vmem:[%s15266_s2 + $0x1b28] ss:$16 sps:$4 sm:$0xff]  }
 0x398   : > { %7938 = vmatprep.subr.bf16.mxu1 %v11593_v60  ;;  %v11662_v9 = vld [vmem:[%s15266_s2 + $0x190c] ss:$16 sps:$4 sm:$0xff]   ;;  %v11660_v22 = vld [vmem:[%s15266_s2 + $0x1908] ss:$16 sps:$4 sm:$0xff]  }
 0x399   : > { %v11665_v57 = vld [vmem:[%s15266_s2 + $0x1b0c] ss:$16 sps:$4 sm:$0xff]   ;;  %v11663_v60 = vld [vmem:[%s15266_s2 + $0x1b08] ss:$16 sps:$4 sm:$0xff]  }
 0x39a   : > { %7898 = vmatpush1.bf16.msra.mxu0 %v11588_v17  ;;  %v11668_v17 = vld [vmem:[%s15266_s2 + $0x1cec] ss:$16 sps:$4 sm:$0xff]  }
 0x39b   : > { %7939 = vmatpush1.bf16.msra.mxu1 %v11591_v18  ;;  %7899 = vmatprep.subr.bf16.mxu0 %v11596_v28  ;;  %v11671_v18 = vld [vmem:[%s15266_s2 + $0x1eec] ss:$16 sps:$4 sm:$0xff]   ;;  %v11666_v28 = vld [vmem:[%s15266_s2 + $0x1ce8] ss:$16 sps:$4 sm:$0xff]  }
 0x39c   : > { %7940 = vmatprep.subr.bf16.mxu1 %v11599_v29  ;;  %v11669_v29 = vld [vmem:[%s15266_s2 + $0x1ee8] ss:$16 sps:$4 sm:$0xff]  }
 0x39e   : > { %7900 = vmatpush1.bf16.msra.mxu0 %v11594_v11  ;;  %v11674_v11 = vld [vmem:[%s15266_s2 + $0x1ccc] ss:$16 sps:$4 sm:$0xff]  }
 0x39f   : > { %7941 = vmatpush1.bf16.msra.mxu1 %v11597_v12  ;;  %7901 = vmatprep.subr.bf16.mxu0 %v11602_v51  ;;  %v11677_v12 = vld [vmem:[%s15266_s2 + $0x1ecc] ss:$16 sps:$4 sm:$0xff]  }
 0x3a0   : > { %7942 = vmatprep.subr.bf16.mxu1 %v11605_v52 }
 0x3a2   : > { %7902 = vmatpush1.bf16.msra.mxu0 %v11600_v54 }
 0x3a3   : > { %7943 = vmatpush1.bf16.msra.mxu1 %v11603_v19  ;;  %7903 = vmatprep.subr.bf16.mxu0 %v11608_v2  ;;  %v11672_v19 = vld [vmem:[%s15266_s2 + $0x1cc8] ss:$16 sps:$4 sm:$0xff]  }
 0x3a4   : > { %7944 = vmatprep.subr.bf16.mxu1 %v11611_v55  ;;  %v11675_v2 = vld [vmem:[%s15266_s2 + $0x1ec8] ss:$16 sps:$4 sm:$0xff]  }
 0x3a6   : > { %7904 = vmatpush1.bf16.msra.mxu0 %v11606_v47 }
 0x3a7   : > { %7945 = vmatpush1.bf16.msra.mxu1 %v11609_v48  ;;  %7905 = vmatprep.subr.bf16.mxu0 %v11614_v59 }
 0x3a8   : > { %7946 = vmatprep.subr.bf16.mxu1 %v11617_v3 }
 0x3aa   : > { %7906 = vmatpush1.bf16.msra.mxu0 %v11612_v4 }
 0x3ab   : > { %7947 = vmatpush1.bf16.msra.mxu1 %v11615_v50  ;;  %7907 = vmatprep.subr.bf16.mxu0 %v11620_v5  ;;  %v11678_v5 = vld [vmem:[%s15266_s2 + $0x1ca8] ss:$16 sps:$4 sm:$0xff]  }
 0x3ac   : > { %7948 = vmatprep.subr.bf16.mxu1 %v11623_v6 }
 0x3ae   : > { %7908 = vmatpush2.bf16.msra.mxu0 %v11618_v39 }
 0x3af   : > { %7949 = vmatpush2.bf16.msra.mxu1 %v11621_v24  ;;  %7909 = vmatprep.subr.bf16.mxu0 %v11626_v41  ;;  %v11684_v24 = vld [vmem:[%s15266_s2 + $0x1c88] ss:$16 sps:$4 sm:$0xff]  }
 0x3b0   : > { %7950 = vmatprep.subr.bf16.mxu1 %v11629_v13  ;;  %v11687_v41 = vld [vmem:[%s15266_s2 + $0x1e88] ss:$16 sps:$4 sm:$0xff]   ;;  %v11692_v13 = vld [vmem:[%s15266_s2 + $0x1c6c] ss:$16 sps:$4 sm:$0xff]  }
 0x3b2   : > { %7910 = vmatpush2.bf16.msra.mxu0 %v11624_v49  ;;  %v11690_v49 = vld [vmem:[%s15266_s2 + $0x1c68] ss:$16 sps:$4 sm:$0xff]  }
 0x3b3   : > { %7951 = vmatpush2.bf16.msra.mxu1 %v11627_v45  ;;  %7911 = vmatprep.subr.bf16.mxu0 %v11632_v10  ;;  %v11693_v45 = vld [vmem:[%s15266_s2 + $0x1e68] ss:$16 sps:$4 sm:$0xff]   ;;  %v11698_v10 = vld [vmem:[%s15266_s2 + $0x1c4c] ss:$16 sps:$4 sm:$0xff]  }
 0x3b4   : > { %7952 = vmatprep.subr.bf16.mxu1 %v11635_v14  ;;  %v11701_v14 = vld [vmem:[%s15266_s2 + $0x1e4c] ss:$16 sps:$4 sm:$0xff]  }
 0x3b6   : > { %7912 = vmatpush2.bf16.msra.mxu0 %v11630_v25  ;;  %v11696_v25 = vld [vmem:[%s15266_s2 + $0x1c48] ss:$16 sps:$4 sm:$0xff]  }
 0x3b7   : > { %7953 = vmatpush2.bf16.msra.mxu1 %v11633_v8  ;;  %7913 = vmatprep.subr.bf16.mxu0 %v11638_v27  ;;  %v11699_v8 = vld [vmem:[%s15266_s2 + $0x1e48] ss:$16 sps:$4 sm:$0xff]   ;;  %v11704_v27 = vld [vmem:[%s15266_s2 + $0x1c2c] ss:$16 sps:$4 sm:$0xff]  }
 0x3b8   : > { %7954 = vmatprep.subr.bf16.mxu1 %v11641_v0  ;;  %v11707_v0 = vld [vmem:[%s15266_s2 + $0x1e2c] ss:$16 sps:$4 sm:$0xff]  }
 0x3ba   : > { %7914 = vmatpush2.bf16.msra.mxu0 %v11636_v15  ;;  %v11702_v15 = vld [vmem:[%s15266_s2 + $0x1c28] ss:$16 sps:$4 sm:$0xff]  }
 0x3bb   : > { %7955 = vmatpush2.bf16.msra.mxu1 %v11639_v16  ;;  %7915 = vmatprep.subr.bf16.mxu0 %v11644_v20  ;;  %v11705_v16 = vld [vmem:[%s15266_s2 + $0x1e28] ss:$16 sps:$4 sm:$0xff]   ;;  %v11710_v20 = vld [vmem:[%s15266_s2 + $0x1c0c] ss:$16 sps:$4 sm:$0xff]  }
 0x3bc   : > { %7956 = vmatprep.subr.bf16.mxu1 %v11647_v21  ;;  %v11713_v21 = vld [vmem:[%s15266_s2 + $0x1e0c] ss:$16 sps:$4 sm:$0xff]  }
 0x3be   : > { %7916 = vmatpush2.bf16.msra.mxu0 %v11642_v26  ;;  %v11708_v26 = vld [vmem:[%s15266_s2 + $0x1c08] ss:$16 sps:$4 sm:$0xff]  }
 0x3bf   : > { %7957 = vmatpush2.bf16.msra.mxu1 %v11645_v61  ;;  %7917 = vmatprep.subr.bf16.mxu0 %v11650_v62  ;;  %v11711_v61 = vld [vmem:[%s15266_s2 + $0x1e08] ss:$16 sps:$4 sm:$0xff]   ;;  %v11716_v62 = vld [vmem:[%s15266_s2 + $0x1dec] ss:$16 sps:$4 sm:$0xff]  }
 0x3c0   : > { %7958 = vmatprep.subr.bf16.mxu1 %v11653_v30  ;;  %v11719_v30 = vld [vmem:[%s15266_s2 + $0x1fec] ss:$16 sps:$4 sm:$0xff]  }
 0x3c2   : > { %7918 = vmatpush2.bf16.msra.mxu0 %v11648_v56  ;;  %v11714_v56 = vld [vmem:[%s15266_s2 + $0x1de8] ss:$16 sps:$4 sm:$0xff]  }
 0x3c3   : > { %7959 = vmatpush2.bf16.msra.mxu1 %v11651_v31  ;;  %7919 = vmatprep.subr.bf16.mxu0 %v11656_v58  ;;  %v11717_v31 = vld [vmem:[%s15266_s2 + $0x1fe8] ss:$16 sps:$4 sm:$0xff]   ;;  %v11722_v58 = vld [vmem:[%s15266_s2 + $0x1dcc] ss:$16 sps:$4 sm:$0xff]  }
 0x3c4   : > { %7960 = vmatprep.subr.bf16.mxu1 %v11659_v33  ;;  %v11725_v33 = vld [vmem:[%s15266_s2 + $0x1fcc] ss:$16 sps:$4 sm:$0xff]  }
 0x3c6   : > { %7920 = vmatpush2.bf16.msra.mxu0 %v11654_v34  ;;  %v11720_v34 = vld [vmem:[%s15266_s2 + $0x1dc8] ss:$16 sps:$4 sm:$0xff]  }
 0x3c7   : > { %7961 = vmatpush2.bf16.msra.mxu1 %v11657_v35  ;;  %7921 = vmatprep.subr.bf16.mxu0 %v11662_v9  ;;  %v11723_v35 = vld [vmem:[%s15266_s2 + $0x1fc8] ss:$16 sps:$4 sm:$0xff]   ;;  %v11728_v9 = vld [vmem:[%s15266_s2 + $0x1dac] ss:$16 sps:$4 sm:$0xff]  }
 0x3c8   : > { %7962 = vmatprep.subr.bf16.mxu1 %v11665_v57  ;;  %v11731_v57 = vld [vmem:[%s15266_s2 + $0x1fac] ss:$16 sps:$4 sm:$0xff]  }
 0x3ca   : > { %7922 = vmatpush2.bf16.msra.mxu0 %v11660_v22  ;;  %v11726_v22 = vld [vmem:[%s15266_s2 + $0x1da8] ss:$16 sps:$4 sm:$0xff]  }
 0x3cb   : > { %7963 = vmatpush2.bf16.msra.mxu1 %v11663_v60  ;;  %7973 = vmatprep.subr.bf16.mxu0 %v11668_v17  ;;  %v11729_v60 = vld [vmem:[%s15266_s2 + $0x1fa8] ss:$16 sps:$4 sm:$0xff]   ;;  %v11734_v17 = vld [vmem:[%s15266_s2 + $0x1d8c] ss:$16 sps:$4 sm:$0xff]  }
 0x3cc   : > { %8014 = vmatprep.subr.bf16.mxu1 %v11671_v18  ;;  %v11737_v18 = vld [vmem:[%s15266_s2 + $0x1f8c] ss:$16 sps:$4 sm:$0xff]  }
 0x3cd   : > { %v6036_v51 = vpop.f32.mrf.mxu0  ;;  %7924 = vmatmul.mubr.bf16.vlgmr.msra.gmra.mxu0 %v14576_v37  ;;  %v11680_v37 = vld [vmem:[%s15266_s2 + $0x1cac] ss:$16 sps:$4 sm:$0xff]  }
 0x3ce   : > { %v6077_v52 = vpop.f32.mrf.mxu1  ;;  %7965 = vmatmul.mubr.bf16.vlgmr.msra.gmra.mxu1 %v14578_v42  ;;  %v6037_v54 = vadd.f32 %v6036_v51, %v14810_v23  ;;  %7974 = vmatpush1.bf16.msra.mxu0 %v11666_v28  ;;  %v11683_v42 = vld [vmem:[%s15266_s2 + $0x1eac] ss:$16 sps:$4 sm:$0xff]   ;;  %v11732_v28 = vld [vmem:[%s15266_s2 + $0x1d88] ss:$16 sps:$4 sm:$0xff]  }
 0x3cf   : > { %8015 = vmatpush1.bf16.msra.mxu1 %v11669_v29  ;;  %v6038_v55 = vpop.f32.mrf.mxu0  ;;  %7975 = vmatprep.subr.bf16.mxu0 %v11674_v11  ;;  %v11735_v29 = vld [vmem:[%s15266_s2 + $0x1f88] ss:$16 sps:$4 sm:$0xff]   ;;  %v11740_v11 = vld [vmem:[%s15266_s2 + $0x1d6c] ss:$16 sps:$4 sm:$0xff]  }
 0x3d0   : > { %v6079_v47 = vpop.f32.mrf.mxu1  ;;  %8016 = vmatprep.subr.bf16.mxu1 %v11677_v12  ;;  %v6078_v23 = vadd.f32 %v6077_v52, %v6037_v54  ;;  %v6039_v48 = vadd.f32 %v6038_v55, %v14824_v32  ;;  %8005 = vmatprep.mubr.bf16.mxu0 %v14592_v44  ;;  %v11681_v32 = vld [vmem:[%s15266_s2 + $0x1ea8] ss:$16 sps:$4 sm:$0xff]   ;;  %v11743_v12 = vld [vmem:[%s15266_s2 + $0x1f6c] ss:$16 sps:$4 sm:$0xff]  }
 0x3d1   : > { %8046 = vmatprep.mubr.bf16.mxu1 %v14594_v46  ;;  %v6040_v59 = vpop.f32.mrf.mxu0  ;;  %v11689_v46 = vld [vmem:[%s15266_s2 + $0x1e8c] ss:$16 sps:$4 sm:$0xff]   ;;  %v11738_v51 = vld [vmem:[%s15266_s2 + $0x1d68] ss:$16 sps:$4 sm:$0xff]  }
 0x3d2   : > { %v6081_v3 = vpop.f32.mrf.mxu1  ;;  %v15027_v4 = vadd.f32 %v6078_v23, %v14171_v7  ;;  %v6080_v50 = vadd.f32 %v6079_v47, %v6039_v48  ;;  %7976 = vmatpush1.bf16.msra.mxu0 %v11672_v19  ;;  %v11686_v7 = vld [vmem:[%s15266_s2 + $0x1c8c] ss:$16 sps:$4 sm:$0xff]   ;;  %v11741_v52 = vld [vmem:[%s15266_s2 + $0x1f68] ss:$16 sps:$4 sm:$0xff]  }
 0x3d3   : > { %8017 = vmatpush1.bf16.msra.mxu1 %v11675_v2  ;;  %v6041_v6 = vpop.f32.mrf.mxu0  ;;  %7977 = vmatprep.subr.bf16.mxu0 %v11680_v37  ;;  %v11746_v54 = vld [vmem:[%s15266_s2 + $0x1d4c] ss:$16 sps:$4 sm:$0xff]   ;;  %v11744_v2 = vld [vmem:[%s15266_s2 + $0x1d48] ss:$16 sps:$4 sm:$0xff]  }
 0x3d4   : > { %v6082_v44 = vpop.f32.mrf.mxu1  ;;  %8018 = vmatprep.subr.bf16.mxu1 %v11683_v42  ;;  %v15042_v39 = vadd.f32 %v6080_v50, %v14176_v36  ;;  %v11695_v36 = vld [vmem:[%s15266_s2 + $0x1e6c] ss:$16 sps:$4 sm:$0xff]   ;;  %v11747_v55 = vld [vmem:[%s15266_s2 + $0x1f48] ss:$16 sps:$4 sm:$0xff]  }
 0x3d5   : > { %v11749_v19 = vld [vmem:[%s15266_s2 + $0x1f4c] ss:$16 sps:$4 sm:$0xff]   ;;  %v11750_v42 = vld [vmem:[%s15266_s2 + $0x1d28] ss:$16 sps:$4 sm:$0xff]  }
 0x3d6   : > { %7978 = vmatpush1.bf16.msra.mxu0 %v11678_v5  ;;  %v11752_v47 = vld [vmem:[%s15266_s2 + $0x1d2c] ss:$16 sps:$4 sm:$0xff]   ;;  %v11753_v23 = vld [vmem:[%s15266_s2 + $0x1f28] ss:$16 sps:$4 sm:$0xff]  }
 0x3d7   : > { %8019 = vmatpush1.bf16.msra.mxu1 %v11681_v32  ;;  %7979 = vmatprep.subr.bf16.mxu0 %v11686_v7  ;;  %v11755_v37 = vld [vmem:[%s15266_s2 + $0x1f2c] ss:$16 sps:$4 sm:$0xff]   ;;  %v11756_v3 = vld [vmem:[%s15266_s2 + $0x1d08] ss:$16 sps:$4 sm:$0xff]  }
 0x3d8   : > { %8020 = vmatprep.subr.bf16.mxu1 %v11689_v46  ;;  %v11758_v48 = vld [vmem:[%s15266_s2 + $0x1d0c] ss:$16 sps:$4 sm:$0xff]   ;;  %v11759_v50 = vld [vmem:[%s15266_s2 + $0x1f08] ss:$16 sps:$4 sm:$0xff]  }
 0x3d9   : > { %v11761_v59 = vld [vmem:[%s15266_s2 + $0x1f0c] ss:$16 sps:$4 sm:$0xff]  }
 0x3da   : > { %7980 = vmatpush1.bf16.msra.mxu0 %v11684_v24 }
 0x3db   : > { %8021 = vmatpush1.bf16.msra.mxu1 %v11687_v41  ;;  %7981 = vmatprep.subr.bf16.mxu0 %v11692_v13 }
 0x3dc   : > { %8022 = vmatprep.subr.bf16.mxu1 %v11695_v36 }
 0x3de   : > { %7982 = vmatpush1.bf16.msra.mxu0 %v11690_v49 }
 0x3df   : > { %8023 = vmatpush1.bf16.msra.mxu1 %v11693_v45  ;;  %7983 = vmatprep.subr.bf16.mxu0 %v11698_v10 }
 0x3e0   : > { %8024 = vmatprep.subr.bf16.mxu1 %v11701_v14 }
 0x3e2   : > { %7984 = vmatpush1.bf16.msra.mxu0 %v11696_v25 }
 0x3e3   : > { %8025 = vmatpush1.bf16.msra.mxu1 %v11699_v8  ;;  %7985 = vmatprep.subr.bf16.mxu0 %v11704_v27 }
 0x3e4   : > { %8026 = vmatprep.subr.bf16.mxu1 %v11707_v0 }
 0x3e6   : > { %7986 = vmatpush1.bf16.msra.mxu0 %v11702_v15 }
 0x3e7   : > { %8027 = vmatpush1.bf16.msra.mxu1 %v11705_v16  ;;  %7987 = vmatprep.subr.bf16.mxu0 %v11710_v20 }
 0x3e8   : > { %8028 = vmatprep.subr.bf16.mxu1 %v11713_v21 }
 0x3ea   : > { %7988 = vmatpush1.bf16.msra.mxu0 %v11708_v26 }
 0x3eb   : > { %8029 = vmatpush1.bf16.msra.mxu1 %v11711_v61  ;;  %7989 = vmatprep.subr.bf16.mxu0 %v11716_v62 }
 0x3ec   : > { %8030 = vmatprep.subr.bf16.mxu1 %v11719_v30 }
 0x3ee   : > { %7990 = vmatpush2.bf16.msra.mxu0 %v11714_v56 }
 0x3ef   : > { %8031 = vmatpush2.bf16.msra.mxu1 %v11717_v31  ;;  %7991 = vmatprep.subr.bf16.mxu0 %v11722_v58 }
 0x3f0   : > { %8032 = vmatprep.subr.bf16.mxu1 %v11725_v33 }
 0x3f2   : > { %7992 = vmatpush2.bf16.msra.mxu0 %v11720_v34 }
 0x3f3   : > { %8033 = vmatpush2.bf16.msra.mxu1 %v11723_v35  ;;  %7993 = vmatprep.subr.bf16.mxu0 %v11728_v9 }
 0x3f4   : > { %8034 = vmatprep.subr.bf16.mxu1 %v11731_v57 }
 0x3f6   : > { %7994 = vmatpush2.bf16.msra.mxu0 %v11726_v22 }
 0x3f7   : > { %8035 = vmatpush2.bf16.msra.mxu1 %v11729_v60  ;;  %7995 = vmatprep.subr.bf16.mxu0 %v11734_v17 }
 0x3f8   : > { %8036 = vmatprep.subr.bf16.mxu1 %v11737_v18 }
 0x3fa   : > { %7996 = vmatpush2.bf16.msra.mxu0 %v11732_v28 }
 0x3fb   : > { %8037 = vmatpush2.bf16.msra.mxu1 %v11735_v29  ;;  %7997 = vmatprep.subr.bf16.mxu0 %v11740_v11 }
 0x3fc   : > { %8038 = vmatprep.subr.bf16.mxu1 %v11743_v12 }
 0x3fe   : > { %7998 = vmatpush2.bf16.msra.mxu0 %v11738_v51 }
 0x3ff   : > { %8039 = vmatpush2.bf16.msra.mxu1 %v11741_v52  ;;  %7999 = vmatprep.subr.bf16.mxu0 %v11746_v54 }
 0x400   : > { %8040 = vmatprep.subr.bf16.mxu1 %v11749_v19 }
 0x402   : > { %8000 = vmatpush2.bf16.msra.mxu0 %v11744_v2 }
 0x403   : > { %8041 = vmatpush2.bf16.msra.mxu1 %v11747_v55  ;;  %8001 = vmatprep.subr.bf16.mxu0 %v11752_v47 }
 0x404   : > { %8042 = vmatprep.subr.bf16.mxu1 %v11755_v37 }
 0x406   : > { %8002 = vmatpush2.bf16.msra.mxu0 %v11750_v42 }
 0x407   : > { %8043 = vmatpush2.bf16.msra.mxu1 %v11753_v23  ;;  %8003 = vmatprep.subr.bf16.mxu0 %v11758_v48 }
 0x408   : > { %8044 = vmatprep.subr.bf16.mxu1 %v11761_v59 }
 0x40a   : > { %8004 = vmatpush2.bf16.msra.mxu0 %v11756_v3 }
 0x40b   : > { %8045 = vmatpush2.bf16.msra.mxu1 %v11759_v50 }
 0x40d   : > { %v7761_v5 = vpop.f32.mrf.mxu0  ;;  %8006 = vmatmul.mubr.bf16.vlgmr.msra.gmra.mxu0 %v14792_v53 }
 0x40e   : > { %v7802_v32 = vpop.f32.mrf.mxu1  ;;  %8047 = vmatmul.mubr.bf16.vlgmr.msra.gmra.mxu1 %v14794_v1 }
 0x40f   : > { %v7803_v6 = vadd.f32 %v7802_v32, %v7761_v5  ;;  %v7763_v44 = vpop.f32.mrf.mxu0 }
 0x410   : > { %v7804_v7 = vpop.f32.mrf.mxu1 }
 0x411   : > { %v7805_v46 = vadd.f32 %v7804_v7, %v7763_v44  ;;  %v7765_v24 = vpop.f32.mrf.mxu0 }
 0x412   : > { %v7806_v41 = vpop.f32.mrf.mxu1  ;;  %v11787_v24 = vmov 1966171168  }
 0x413   : > { %v7766_v13 = vpop.f32.mrf.mxu0  ;;  %v8070_v41 = vunpack.c.l.s4 %v11787_v24 }
 0x414   : > { %v7807_v36 = vpop.f32.mrf.mxu1 }
 0x44d   : > { %v7843_v49 = vpop.f32.mrf.mxu0 }
 0x44e   : > { %v7884_v45 = vpop.f32.mrf.mxu1  ;;  %v7844_v10 = vadd.f32 %v7843_v49, %v7803_v6 }
 0x44f   : > { %v7845_v14 = vpop.f32.mrf.mxu0 }
 0x450   : > { %v7886_v25 = vpop.f32.mrf.mxu1  ;;  %v7885_v8 = vadd.f32 %v7884_v45, %v7844_v10  ;;  %v7846_v27 = vadd.f32 %v7845_v14, %v7805_v46 }
 0x451   : > { %v7847_v0 = vpop.f32.mrf.mxu0 }
 0x452   : > { %v7888_v53 = vpop.f32.mrf.mxu1  ;;  %v15197_v1 = vadd.f32 %v7885_v8, %v14615_v63  ;;  %v7887_v15 = vadd.f32 %v7886_v25, %v7846_v27  ;;  %v8071_v25 = vunpack.c.0.s8 %v8070_v41 }
 0x453   : > { %v7848_v16 = vpop.f32.mrf.mxu0 }
 0x454   : > { %v7889_v20 = vpop.f32.mrf.mxu1  ;;  %v8094_v21 = vsel %vm8093_vm0, %v15197_v1, 0.0  ;;  %v8156_v26 = vmul.f32 %v15197_v1, %v15197_v1  ;;  %v15204_v61 = vadd.f32 %v7887_v15, %v14630_v40 }
 0x455   : > { %v8095_v62 = vrot.slane %v8094_v21, 4 }
 0x456   : > { %v8160_v30 = vsel %vm8093_vm0, %v8156_v26, 0.0  ;;  %v10183_v56 = vpack.c.bf16 %v15204_v61, %v15197_v1  ;;  %v8101_v63 = vsel %vm8093_vm0, %v15204_v61, 0.0  ;;  %v8157_v31 = vmul.f32 %v15204_v61, %v15204_v61 }
 0x457   : > { %v8096_v58 = vadd.f32 %v8095_v62, %v8094_v21  ;;  %v8161_v33 = vrot.slane %v8160_v30, 4  ;;  %v8102_v34 = vrot.slane %v8101_v63, 4  ;;  %v8074_v26 = vsub.s32 %v8071_v25, %v11953_v43 }
 0x458   : > { %v8167_v35 = vsel %vm8093_vm0, %v8157_v31, 0.0 }
 0x459   : > { %v8097_v9 = vrot.slane %v8096_v58, 2  ;;  %v8162_v40 = vadd.f32 %v8161_v33, %v8160_v30  ;;  %v8103_v57 = vadd.f32 %v8102_v34, %v8101_v63  ;;  %v8168_v22 = vrot.slane %v8167_v35, 4 }
 0x45a   : > { %v8075_v43 = vrot.slane %v10183_v56, %v8074_v26 }
 0x45b   : > { %v8098_v60 = vadd.f32 %v8097_v9, %v8096_v58  ;;  %v8163_v17 = vrot.slane %v8162_v40, 2  ;;  %v8104_v18 = vrot.slane %v8103_v57, 2  ;;  %v8169_v28 = vadd.f32 %v8168_v22, %v8167_v35 }
 0x45d   : > { %v8099_v29 = vrot.slane %v8098_v60, 1  ;;  %v8164_v11 = vadd.f32 %v8163_v17, %v8162_v40  ;;  %v8105_v12 = vadd.f32 %v8104_v18, %v8103_v57  ;;  %v8170_v51 = vrot.slane %v8169_v28, 2 }
 0x45f   : > { %v8165_v52 = vrot.slane %v8164_v11, 1  ;;  %v8106_v54 = vrot.slane %v8105_v12, 1  ;;  %v8171_v19 = vadd.f32 %v8170_v51, %v8169_v28  ;;  %v15214_v2 = vadd.f32 %v8099_v29, %v8098_v60 }
 0x461   : > { %v15216_v55 = vadd.f32 %v8106_v54, %v8105_v12  ;;  %v8172_v47 = vrot.slane %v8171_v19, 1  ;;  %v15218_v37 = vadd.f32 %v8165_v52, %v8164_v11 }
 0x463   : > { %v8126_v42 = vcombine.low %v15214_v2, %v15216_v55  ;;  %v15222_v23 = vadd.f32 %v8172_v47, %v8171_v19 }
 0x465   : > { %v8192_v48 = vcombine.low %v15218_v37, %v15222_v23 }
 0x467   : > { %v8200_v24 = vrot.slane %v8192_v48, %v8074_v26 }
 0x48d   : > { %v7925_v59 = vpop.f32.mrf.mxu0 }
 0x48e   : > { %v7966_v3 = vpop.f32.mrf.mxu1 }
 0x48f   : > { %v7967_v50 = vadd.f32 %v7966_v3, %v7925_v59  ;;  %v7927_v5 = vpop.f32.mrf.mxu0 }
 0x490   : > { %v7968_v32 = vpop.f32.mrf.mxu1 }
 0x491   : > { %v7929_v6 = vpop.f32.mrf.mxu0  ;;  %v7969_v49 = vadd.f32 %v7968_v32, %v7927_v5 }
 0x492   : > { %v7970_v44 = vpop.f32.mrf.mxu1 }
 0x493   : > { %v7930_v7 = vpop.f32.mrf.mxu0  ;;  %v8134_v44 = vrot.slane %v8126_v42, %v8074_v26 }
 0x494   : > { %v7971_v46 = vpop.f32.mrf.mxu1 }
 0x4cd   : > { %v8007_v13 = vpop.f32.mrf.mxu0 }
 0x4ce   : > { %v8048_v36 = vpop.f32.mrf.mxu1  ;;  %v8008_v45 = vadd.f32 %v8007_v13, %v7967_v50 }
 0x4cf   : > { %v8009_v10 = vpop.f32.mrf.mxu0 }
 0x4d0   : > { %v8050_v14 = vpop.f32.mrf.mxu1  ;;  %v8049_v8 = vadd.f32 %v8048_v36, %v8008_v45  ;;  %v8010_v27 = vadd.f32 %v8009_v10, %v7969_v49 }
 0x4d1   : > { %v8011_v0 = vpop.f32.mrf.mxu0 }
 0x4d2   : > { %v8052_v53 = vpop.f32.mrf.mxu1  ;;  %v8057_v15 = vadd.f32 %v8049_v8, %v15027_v4  ;;  %v8051_v16 = vadd.f32 %v8050_v14, %v8010_v27 }
 0x4d3   : > { %v8012_v20 = vpop.f32.mrf.mxu0 }
 0x4d4   : > { %v8053_v21 = vpop.f32.mrf.mxu1  ;;  %v8108_v62 = vsel %vm8093_vm0, %v8057_v15, 0.0  ;;  %v8158_v30 = vmul.f32 %v8057_v15, %v8057_v15  ;;  %v8058_v63 = vadd.f32 %v8051_v16, %v15042_v39 }
 0x4d5   : > { %v8109_v31 = vrot.slane %v8108_v62, 4 }
 0x4d6   : > { %v8174_v58 = vsel %vm8093_vm0, %v8158_v30, 0.0  ;;  %v10184_v33 = vpack.c.bf16 %v8058_v63, %v8057_v15  ;;  %v8115_v4 = vsel %vm8093_vm0, %v8058_v63, 0.0  ;;  %v8159_v34 = vmul.f32 %v8058_v63, %v8058_v63 }
 0x4d7   : > { %v8110_v35 = vadd.f32 %v8109_v31, %v8108_v62  ;;  %v8175_v9 = vrot.slane %v8174_v58, 4  ;;  %v8116_v40 = vrot.slane %v8115_v4, 4 }
 0x4d8   : > { %v8082_v57 = vrot.slane %v10184_v33, %v8074_v26  ;;  %v8181_v22 = vsel %vm8093_vm0, %v8159_v34, 0.0 }
 0x4d9   : > { %v8111_v60 = vrot.slane %v8110_v35, 2  ;;  %v8176_v39 = vadd.f32 %v8175_v9, %v8174_v58  ;;  %v8117_v17 = vadd.f32 %v8116_v40, %v8115_v4  ;;  %v8182_v18 = vrot.slane %v8181_v22, 4 }
 0x4da   : > { %v8083_v28 = vcombine.low %v8075_v43, %v8082_v57 }
 0x4db   : > { %v8112_v29 = vadd.f32 %v8111_v60, %v8110_v35  ;;  %v8177_v11 = vrot.slane %v8176_v39, 2  ;;  %v8118_v12 = vrot.slane %v8117_v17, 2  ;;  %v8183_v51 = vadd.f32 %v8182_v18, %v8181_v22 }
 0x4dc   : > { %10185 = vst.sshfl [vmem:[%s286_s22] sm:$0x55 pattern:$0x73625140] %v8083_v28 }
 0x4dd   : > { %v8113_v1 = vrot.slane %v8112_v29, 1  ;;  %v8178_v61 = vadd.f32 %v8177_v11, %v8176_v39  ;;  %v8119_v56 = vadd.f32 %v8118_v12, %v8117_v17  ;;  %v8184_v52 = vrot.slane %v8183_v51, 2 }
 0x4df   : > { %v8179_v54 = vrot.slane %v8178_v61, 1  ;;  %v8120_v19 = vrot.slane %v8119_v56, 1  ;;  %v8185_v47 = vadd.f32 %v8184_v52, %v8183_v51  ;;  %v8114_v59 = vadd.f32 %v8113_v1, %v8112_v29 }
 0x4e1   : > { %v8121_v3 = vadd.f32 %v8120_v19, %v8119_v56  ;;  %v8186_v50 = vrot.slane %v8185_v47, 1  ;;  %v8180_v5 = vadd.f32 %v8179_v54, %v8178_v61 }
 0x4e3   : > { %v8127_v32 = vcombine.low %v8114_v59, %v8121_v3  ;;  %v8187_v6 = vadd.f32 %v8186_v50, %v8185_v47 }
 0x4e5   : > { %v8141_v7 = vrot.slane %v8127_v32, %v8074_v26  ;;  %v8193_v46 = vcombine.low %v8180_v5, %v8187_v6 }
 0x4e7   : > { %v8142_v41 = vcombine.low %v8134_v44, %v8141_v7  ;;  %v8207_v13 = vrot.slane %v8193_v46, %v8074_v26 }
 0x4e9   : > { %v8149_v36 = vrot.slane %v8142_v41, %v8074_v26  ;;  %v8208_v49 = vcombine.low %v8200_v24, %v8207_v13 }
 0x4eb   : > { %8155 = vst.msk [vmem:[%s295_s26] ss:$2 sm:$0xf] %vm8153_vm1, %v8149_v36  ;;  %v8215_v2 = vrot.slane %v8208_v49, %v8074_v26 }
 0x4ed   : > { %10186 = vst.msk [vmem:[%s295_s26 + $0x1] ss:$2 sm:$0xf] %vm8153_vm1, %v8215_v2 }
 0x4ee PF: > { %s15_s17 = sadd.s32 1, %s11784_s17   ;;  %s15269_s15 = smov %s11780_s16 }
 0x4ef   : > { %p12_p7 = scmp.ge.s32.totalorder %s15_s17, 4   ;;  %s15270_s16 = smov %s15272_s18 }
 0x4f1   :  { %14 = sbr.rel (!%p12_p7) target bundleno = 2 (0x2), region = 81 }

</bundles_post_ra>
